<compile_context>
chip_gen: v7x
topology: tpu7x:2x2x1
jax: 0.10.0
libtpu: 0.0.40
codegen_flags: <defaults>
</compile_context>

<pallas_src>
import functools

import jax
import jax.numpy as jnp
from jax import lax
from jax.experimental import pallas as pl
from jax.experimental.pallas import tpu as pltpu


# ---------------------------------------------------------------------------
# helpers
# ---------------------------------------------------------------------------

def _round_up(n, m):
    return ((n + m - 1) // m) * m


def _pad_axis(a, axis, new_size):
    pad = [(0, 0)] * a.ndim
    pad[axis] = (0, new_size - a.shape[axis])
    return jnp.pad(a, pad)


def _pad_gates(w, hidden, hidden_p):
    """Pad the trailing (4*hidden) gate dim to (4*hidden_p), per gate block."""
    lead = w.shape[:-1]
    w = w.reshape(lead + (4, hidden))
    w = _pad_axis(w, w.ndim - 1, hidden_p)
    return w.reshape(lead + (4 * hidden_p,))


def _sigmoid(x):
    # logistic via a single tanh (one EUP op instead of exp + divide)
    return 0.5 * jnp.tanh(0.5 * x) + 0.5


def _cell_from_gates(gates, c_prev, hidden):
    """PyTorch LSTMCell update from the full gate pre-activation (i,f,g,o)."""
    i = _sigmoid(gates[:, 0 * hidden:1 * hidden])
    f = _sigmoid(gates[:, 1 * hidden:2 * hidden])
    g = jnp.tanh(gates[:, 2 * hidden:3 * hidden])
    o = _sigmoid(gates[:, 3 * hidden:4 * hidden])
    c_new = f * c_prev + i * g
    h_new = o * jnp.tanh(c_new)
    return h_new, c_new


def make_condition_lst(condition_num, groundtruth_num, seq_len):
    # get_condition_lst: [1]*groundtruth_num + [0]*condition_num, tiled.
    period = groundtruth_num + condition_num
    pattern = jnp.concatenate([jnp.ones((groundtruth_num,), jnp.int32),
                               jnp.zeros((condition_num,), jnp.int32)])
    reps = seq_len // period + 1
    return jnp.tile(pattern, (reps,))[:seq_len]


def _vmem_capacity_bytes():
    """Per-core VMEM capacity; conservative 64 MiB (v7x) fallback."""
    try:
        info = pltpu.get_tpu_info()
        cap = getattr(info, "vmem_capacity_bytes", None)
        if cap:
            return int(cap)
    except Exception:
        pass
    return 64 << 20


# ---------------------------------------------------------------------------
# kernel
# ---------------------------------------------------------------------------

def _aclstm_kernel(x_ref,
                   w1_ref, w2_ref, w3_ref, wd_ref,
                   b1_ref, b2_ref, b3_ref, bd_ref,
                   out_ref,
                   h0_s, h1_s, h2_s, c0_s, c1_s, c2_s, prev_s,
                   *, gt_steps, ar_steps, hidden_p, batch_tile, frame_p,
                   compute_dtype, unroll):
    t_blk = pl.program_id(1)

    # A new batch tile starts its rollout: zero the recurrent state.
    @pl.when(t_blk == 0)
    def _():
        for r in (h0_s, h1_s, h2_s, c0_s, c1_s, c2_s, prev_s):
            r[...] = jnp.zeros_like(r)

    h4 = 4 * hidden_p
    # Pre-broadcast biases once (JAX does not CSE broadcast_in_dim; adding the
    # (1, N) biases inside the loop would re-materialize broadcasts per step).
    b1 = jnp.broadcast_to(b1_ref[...], (batch_tile, h4))
    b2 = jnp.broadcast_to(b2_ref[...], (batch_tile, h4))
    b3 = jnp.broadcast_to(b3_ref[...], (batch_tile, h4))
    bd = jnp.broadcast_to(bd_ref[...], (batch_tile, frame_p))

    def step(i, hc, in_frame):
        # concat-K: gates_l = [input_l | h_prev_l] @ [W_ih_l ; W_hh_l], so the
        # ih+hh sums accumulate inside the MXU.  lstm2/lstm3 consume the
        # *previous-step* lower-layer hiddens (vec_h[0], vec_h[1]); the decoder
        # consumes the *new* h2 — exactly as the PyTorch module.
        h0, h1, h2, c0, c1, c2 = hc

        x1 = jnp.concatenate([in_frame.astype(compute_dtype),
                              h0.astype(compute_dtype)], axis=1)
        g1 = jnp.dot(x1, w1_ref[...], preferred_element_type=jnp.float32) + b1
        h0n, c0n = _cell_from_gates(g1, c0, hidden_p)

        x2 = jnp.concatenate([h0.astype(compute_dtype),
                              h1.astype(compute_dtype)], axis=1)
        g2 = jnp.dot(x2, w2_ref[...], preferred_element_type=jnp.float32) + b2
        h1n, c1n = _cell_from_gates(g2, c1, hidden_p)

        x3 = jnp.concatenate([h1.astype(compute_dtype),
                              h2.astype(compute_dtype)], axis=1)
        g3 = jnp.dot(x3, w3_ref[...], preferred_element_type=jnp.float32) + b3
        h2n, c2n = _cell_from_gates(g3, c2, hidden_p)

        out = jnp.dot(h2n.astype(compute_dtype), wd_ref[...],
                      preferred_element_type=jnp.float32) + bd
        out_ref[i] = out
        return (h0n, h1n, h2n, c0n, c1n, c2n), out

    # Condition schedule is static per block: first gt_steps read the ground
    # truth, remaining ar_steps feed the previous output back (no SMEM read,
    # no select).
    def gt_body(i, carry):
        new_hc, out = step(i, carry[:6], x_ref[i])
        return new_hc + (out,)

    def ar_body(i, carry):
        new_hc, out = step(i, carry[:6], carry[6])
        return new_hc + (out,)

    carry = (h0_s[...], h1_s[...], h2_s[...],
             c0_s[...], c1_s[...], c2_s[...], prev_s[...])

    loop_kwargs = {} if unroll <= 1 else {"unroll": unroll}
    if gt_steps > 0:
        carry = lax.fori_loop(0, gt_steps, gt_body, carry, **loop_kwargs)
    if ar_steps > 0:
        carry = lax.fori_loop(gt_steps, gt_steps + ar_steps, ar_body, carry,
                              **loop_kwargs)

    h0_s[...], h1_s[...], h2_s[...] = carry[0], carry[1], carry[2]
    c0_s[...], c1_s[...], c2_s[...] = carry[3], carry[4], carry[5]
    prev_s[...] = carry[6]


# ---------------------------------------------------------------------------
# wrapper
# ---------------------------------------------------------------------------

def aclstm_forward(real_seq, params, condition_num=5, groundtruth_num=5,
                   compute_dtype=jnp.bfloat16, batch_tile=None, unroll=1,
                   allow_weight_demotion=True):
    batch, seq_len, in_frame = real_seq.shape
    hidden = params["w_hh1"].shape[0]
    out_frame = params["w_dec"].shape[1]
    assert in_frame == out_frame, "acLSTM feeds its output back as its input"
    period = condition_num + groundtruth_num
    assert period > 0

    hp = _round_up(hidden, 128)          # lane-aligned gate slices
    fp = _round_up(out_frame, 128)       # lane-dense output stores
    bp = _round_up(batch, 8)             # f32 sublane
    if batch_tile is None:
        # Default M<=128 (safe on v5e).  Sweep 256 on v6e/v7x large batches,
        # and use >=2 batch tiles on v7x so both TensorCores are active.
        batch_tile = min(bp, 128)
    batch_tile = _round_up(batch_tile, 8)
    bp = _round_up(bp, batch_tile)
    t_tile = period                       # one (gt + ar) period per grid step
    tp = _round_up(seq_len, t_tile)

    cap = _vmem_capacity_bytes()

    def _weight_bytes(dt):
        itemsize = jnp.dtype(dt).itemsize
        elems = (fp + hp) * 4 * hp + 2 * (2 * hp) * (4 * hp) + hp * fp
        return elems * itemsize + (3 * 4 * hp + fp) * 4      # f32 biases

    io_bytes = 2 * 2 * t_tile * batch_tile * fp * 4           # x + out, 2-deep
    scratch_bytes = (6 * hp + fp) * batch_tile * 4
    budget = cap - (8 << 20)
    if (allow_weight_demotion
            and jnp.dtype(compute_dtype) == jnp.dtype(jnp.float32)
            and _weight_bytes(jnp.float32) + io_bytes + scratch_bytes > budget):
        # f32 weights cannot fit the per-core VMEM budget (e.g. H=1024 on
        # v7x's 64 MiB): demote weights/activations to bf16, keep f32 accum.
        compute_dtype = jnp.bfloat16
    # TODO(synk): optional fp8 recurrent weights on v7x (halves weight VMEM,
    # doubles MXU streaming) once autoregressive accuracy is validated.

    # seq-major padded input: (B, T, F) -> (Tp, Bp, Fp)
    x = jnp.transpose(real_seq, (1, 0, 2)).astype(jnp.float32)
    x = jnp.pad(x, ((0, tp - seq_len), (0, bp - batch), (0, fp - in_frame)))

    # Per-gate zero padding keeps LSTM semantics exact (padded h/c stay 0).
    w_ih1 = _pad_axis(_pad_gates(params["w_ih1"], hidden, hp), 0, fp)
    w_hh1 = _pad_axis(_pad_gates(params["w_hh1"], hidden, hp), 0, hp)
    w_ih2 = _pad_axis(_pad_gates(params["w_ih2"], hidden, hp), 0, hp)
    w_hh2 = _pad_axis(_pad_gates(params["w_hh2"], hidden, hp), 0, hp)
    w_ih3 = _pad_axis(_pad_gates(params["w_ih3"], hidden, hp), 0, hp)
    w_hh3 = _pad_axis(_pad_gates(params["w_hh3"], hidden, hp), 0, hp)
    w_dec = _pad_axis(_pad_axis(params["w_dec"], 0, hp), 1, fp)

    # concat-K stacking: row order matches the kernel's activation concat.
    w1 = jnp.concatenate([w_ih1, w_hh1], axis=0).astype(compute_dtype)  # (fp+hp,4hp)
    w2 = jnp.concatenate([w_ih2, w_hh2], axis=0).astype(compute_dtype)  # (2hp,4hp)
    w3 = jnp.concatenate([w_ih3, w_hh3], axis=0).astype(compute_dtype)  # (2hp,4hp)
    wd = w_dec.astype(compute_dtype)                                    # (hp,fp)

    b1 = _pad_gates(params["b1"], hidden, hp).astype(jnp.float32)
    b2 = _pad_gates(params["b2"], hidden, hp).astype(jnp.float32)
    b3 = _pad_gates(params["b3"], hidden, hp).astype(jnp.float32)
    bd = _pad_axis(params["b_dec"], 1, fp).astype(jnp.float32)

    kernel = functools.partial(
        _aclstm_kernel, gt_steps=groundtruth_num, ar_steps=condition_num,
        hidden_p=hp, batch_tile=batch_tile, frame_p=fp,
        compute_dtype=compute_dtype, unroll=unroll)

    def _build_and_run(single_buffer_weights):
        # Resident weights: constant index_map -> never re-fetched; single
        # buffering halves their VMEM footprint (critical on v7x at H=1024).
        def _resident(shape):
            nd = len(shape)
            kwargs = {}
            if single_buffer_weights:
                kwargs["pipeline_mode"] = pl.Buffered(1)
            return pl.BlockSpec(shape, lambda b, t, _nd=nd: (0,) * _nd,
                                **kwargs)

        wmul = 1 if single_buffer_weights else 2
        need = wmul * _weight_bytes(compute_dtype) + io_bytes + scratch_bytes
        vmem_limit = max(int(1.25 * need) + (2 << 20), 32 << 20)
        vmem_limit = min(vmem_limit, cap - (2 << 20))

        io_spec = pl.BlockSpec((t_tile, batch_tile, fp), lambda b, t: (t, b, 0))

        grid_spec = pltpu.PrefetchScalarGridSpec(
            num_scalar_prefetch=0,
            grid=(bp // batch_tile, tp // t_tile),
            in_specs=[
                io_spec,
                _resident(w1.shape), _resident(w2.shape), _resident(w3.shape),
                _resident(wd.shape),
                _resident(b1.shape), _resident(b2.shape), _resident(b3.shape),
                _resident(bd.shape),
            ],
            out_specs=io_spec,
            scratch_shapes=(
                [pltpu.VMEM((batch_tile, hp), jnp.float32) for _ in range(6)]
                + [pltpu.VMEM((batch_tile, fp), jnp.float32)]),
        )

        return pl.pallas_call(
            kernel,
            out_shape=jax.ShapeDtypeStruct((tp, bp, fp), jnp.float32),
            grid_spec=grid_spec,
            compiler_params=pltpu.CompilerParams(
                dimension_semantics=("parallel", "arbitrary"),
                vmem_limit_bytes=int(vmem_limit)),
        )(x, w1, w2, w3, wd, b1, b2, b3, bd)

    try:
        out = _build_and_run(True)
    except Exception:
        # Fallback: default double-buffered resident blocks.
        out = _build_and_run(False)

    out = out[:seq_len, :batch, :out_frame]
    # torch.cat of per-step frames along dim 1 -> (batch, seq_len * out_frame)
    return jnp.transpose(out, (1, 0, 2)).reshape(batch, seq_len * out_frame)


# ---------------------------------------------------------------------------
# params + pure-JAX reference
# ---------------------------------------------------------------------------

def init_params(key, in_frame_size, hidden_size, out_frame_size):
    """Deterministic init mirroring PyTorch default U(-1/sqrt(H), 1/sqrt(H))."""
    bound = 1.0 / float(hidden_size) ** 0.5
    keys = jax.random.split(key, 17)

    def u(k, shape):
        return jax.random.uniform(k, shape, jnp.float32, -bound, bound)

    def lstm(k0, k1, k2, k3, in_dim):
        # Stored transposed: (in_dim, 4H); bias is b_ih + b_hh, shape (1, 4H).
        return (u(k0, (in_dim, 4 * hidden_size)),
                u(k1, (hidden_size, 4 * hidden_size)),
                u(k2, (1, 4 * hidden_size)) + u(k3, (1, 4 * hidden_size)))

    w_ih1, w_hh1, b1 = lstm(keys[0], keys[1], keys[2], keys[3], in_frame_size)
    w_ih2, w_hh2, b2 = lstm(keys[4], keys[5], keys[6], keys[7], hidden_size)
    w_ih3, w_hh3, b3 = lstm(keys[8], keys[9], keys[10], keys[11], hidden_size)
    w_dec = u(keys[12], (hidden_size, out_frame_size))
    b_dec = u(keys[13], (1, out_frame_size))
    return dict(w_ih1=w_ih1, w_hh1=w_hh1, b1=b1,
                w_ih2=w_ih2, w_hh2=w_hh2, b2=b2,
                w_ih3=w_ih3, w_hh3=w_hh3, b3=b3,
                w_dec=w_dec, b_dec=b_dec)


def aclstm_reference(real_seq, params, condition_num=5, groundtruth_num=5,
                     compute_dtype=jnp.float32):
    """Pure-JAX reference of the PyTorch forward (mirrors the kernel's casts)."""
    batch, seq_len, _ = real_seq.shape
    hidden = params["w_hh1"].shape[0]
    out_frame_size = params["w_dec"].shape[1]
    cond = jax.device_get(
        make_condition_lst(condition_num, groundtruth_num, seq_len))

    def mm(a, w):
        return jnp.dot(a.astype(compute_dtype), w.astype(compute_dtype),
                       preferred_element_type=jnp.float32)

    def cell(x, h, c, w_ih, w_hh, b):
        g = mm(x, w_ih) + mm(h, w_hh) + b
        i = jax.nn.sigmoid(g[:, :hidden])
        f = jax.nn.sigmoid(g[:, hidden:2 * hidden])
        gg = jnp.tanh(g[:, 2 * hidden:3 * hidden])
        o = jax.nn.sigmoid(g[:, 3 * hidden:])
        c_new = f * c + i * gg
        return o * jnp.tanh(c_new), c_new

    h = [jnp.zeros((batch, hidden), jnp.float32) for _ in range(3)]
    c = [jnp.zeros((batch, hidden), jnp.float32) for _ in range(3)]
    out_frame = jnp.zeros((batch, out_frame_size), jnp.float32)
    outs = []
    for t in range(seq_len):
        in_frame = (real_seq[:, t].astype(jnp.float32)
                    if int(cond[t]) == 1 else out_frame)
        h0n, c0n = cell(in_frame, h[0], c[0],
                        params["w_ih1"], params["w_hh1"], params["b1"])
        h1n, c1n = cell(h[0], h[1], c[1],
                        params["w_ih2"], params["w_hh2"], params["b2"])
        h2n, c2n = cell(h[1], h[2], c[2],
                        params["w_ih3"], params["w_hh3"], params["b3"])
        out_frame = mm(h2n, params["w_dec"]) + params["b_dec"]
        h, c = [h0n, h1n, h2n], [c0n, c1n, c2n]
        outs.append(out_frame)
    return jnp.concatenate(outs, axis=1)


# ---------------------------------------------------------------------------
# main
# ---------------------------------------------------------------------------

if __name__ == "__main__":
    # Small, module-consistent shapes (PyTorch defaults are 171/1024/171).
    BATCH, SEQ_LEN = 2, 8
    IN_FRAME = OUT_FRAME = 16
    HIDDEN = 32

    key = jax.random.PRNGKey(0)
    k_par, k_seq = jax.random.split(key)
    params = init_params(k_par, IN_FRAME, HIDDEN, OUT_FRAME)
    real_seq = jax.random.normal(k_seq, (BATCH, SEQ_LEN, IN_FRAME), jnp.float32)

    # (1) f32, period=4 (gt=2, cond=2) -> two time blocks: exercises the
    #     cross-block recurrent state carry in VMEM scratch.
    out = jax.block_until_ready(aclstm_forward(
        real_seq, params, condition_num=2, groundtruth_num=2,
        compute_dtype=jnp.float32))
    assert out.shape == (BATCH, SEQ_LEN * OUT_FRAME)
    ref = aclstm_reference(real_seq, params, condition_num=2, groundtruth_num=2,
                           compute_dtype=jnp.float32)
    err = float(jnp.max(jnp.abs(out - ref)))
    assert err < 5e-3, f"f32 mismatch vs reference: {err}"

    # (2) module defaults (gt=5, cond=5 -> period 10 > seq_len, padded AR
    #     tail), bf16 weights/activations with f32 accumulation.
    out = jax.block_until_ready(aclstm_forward(
        real_seq, params, compute_dtype=jnp.bfloat16))
    ref = aclstm_reference(real_seq, params, compute_dtype=jnp.bfloat16)
    err = float(jnp.max(jnp.abs(out - ref)))
    assert err < 4e-2, f"bf16 mismatch vs reference: {err}"

    # (3) ragged seq_len vs period (period 5, seq 6 -> padded ground-truth and
    #     autoregressive tail steps), f32.
    seq6 = real_seq[:, :6]
    out = jax.block_until_ready(aclstm_forward(
        seq6, params, condition_num=3, groundtruth_num=2,
        compute_dtype=jnp.float32))
    ref = aclstm_reference(seq6, params, condition_num=3, groundtruth_num=2,
                           compute_dtype=jnp.float32)
    err = float(jnp.max(jnp.abs(out - ref)))
    assert err < 5e-3, f"f32 (ragged) mismatch vs reference: {err}"

    print("KERNEL_OK")
</pallas_src>

<mosaic_0001>
module attributes {stable_mosaic.version = 11 : i64} {
  func.func @_aclstm_kernel(%arg0: i32, %arg1: i32, %arg2: memref<4x8x128xf32, #tpu.memory_space<vmem>>, %arg3: memref<256x512xf32, #tpu.memory_space<vmem>>, %arg4: memref<256x512xf32, #tpu.memory_space<vmem>>, %arg5: memref<256x512xf32, #tpu.memory_space<vmem>>, %arg6: memref<128x128xf32, #tpu.memory_space<vmem>>, %arg7: memref<1x512xf32, #tpu.memory_space<vmem>>, %arg8: memref<1x512xf32, #tpu.memory_space<vmem>>, %arg9: memref<1x512xf32, #tpu.memory_space<vmem>>, %arg10: memref<1x128xf32, #tpu.memory_space<vmem>>, %arg11: memref<4x8x128xf32, #tpu.memory_space<vmem>>, %arg12: memref<8x128xf32, #tpu.memory_space<vmem>>, %arg13: memref<8x128xf32, #tpu.memory_space<vmem>>, %arg14: memref<8x128xf32, #tpu.memory_space<vmem>>, %arg15: memref<8x128xf32, #tpu.memory_space<vmem>>, %arg16: memref<8x128xf32, #tpu.memory_space<vmem>>, %arg17: memref<8x128xf32, #tpu.memory_space<vmem>>, %arg18: memref<8x128xf32, #tpu.memory_space<vmem>>) attributes {dimension_semantics = [#tpu.dimension_semantics<parallel>, #tpu.dimension_semantics<arbitrary>], iteration_bounds = array<i64: 1, 2>, scalar_prefetch = 0 : i64, scratch_operands = 7 : i64, tpu.core_type = #tpu.core_type<tc>, window_params = [{transform_indices = @transform_0, window_bounds = array<i64: 4, 8, 128>}, {pipeline_mode = #tpu.pipeline_mode<synchronous>, transform_indices = @transform_1, window_bounds = array<i64: 256, 512>}, {pipeline_mode = #tpu.pipeline_mode<synchronous>, transform_indices = @transform_2, window_bounds = array<i64: 256, 512>}, {pipeline_mode = #tpu.pipeline_mode<synchronous>, transform_indices = @transform_3, window_bounds = array<i64: 256, 512>}, {pipeline_mode = #tpu.pipeline_mode<synchronous>, transform_indices = @transform_4, window_bounds = array<i64: 128, 128>}, {pipeline_mode = #tpu.pipeline_mode<synchronous>, transform_indices = @transform_5, window_bounds = array<i64: 1, 512>}, {pipeline_mode = #tpu.pipeline_mode<synchronous>, transform_indices = @transform_6, window_bounds = array<i64: 1, 512>}, {pipeline_mode = #tpu.pipeline_mode<synchronous>, transform_indices = @transform_7, window_bounds = array<i64: 1, 512>}, {pipeline_mode = #tpu.pipeline_mode<synchronous>, transform_indices = @transform_8, window_bounds = array<i64: 1, 128>}, {transform_indices = @transform_9, window_bounds = array<i64: 4, 8, 128>}]} {
    %c0_i32 = arith.constant 0 : i32
    %0 = arith.cmpi eq, %arg1, %c0_i32 : i32
    %1 = arith.extui %0 : i1 to i32
    %c0_i32_0 = arith.constant 0 : i32
    %2 = arith.cmpi ne, %1, %c0_i32_0 : i32
    scf.if %2 {
      %cst = arith.constant 0.000000e+00 : f32
      %33 = vector.broadcast %cst : f32 to vector<8x128xf32>
      %c0_42 = arith.constant 0 : index
      %c0_43 = arith.constant 0 : index
      %34 = vector.load %arg12[%c0_42, %c0_43] : memref<8x128xf32, #tpu.memory_space<vmem>>, vector<8x128xf32>
      tpu.vector_store %arg12[%c0_42, %c0_43], %33 {strides = array<i32>} : memref<8x128xf32, #tpu.memory_space<vmem>>, vector<8x128xf32>,
      %cst_44 = arith.constant 0.000000e+00 : f32
      %35 = vector.broadcast %cst_44 : f32 to vector<8x128xf32>
      %c0_45 = arith.constant 0 : index
      %c0_46 = arith.constant 0 : index
      %36 = vector.load %arg13[%c0_45, %c0_46] : memref<8x128xf32, #tpu.memory_space<vmem>>, vector<8x128xf32>
      tpu.vector_store %arg13[%c0_45, %c0_46], %35 {strides = array<i32>} : memref<8x128xf32, #tpu.memory_space<vmem>>, vector<8x128xf32>,
      %cst_47 = arith.constant 0.000000e+00 : f32
      %37 = vector.broadcast %cst_47 : f32 to vector<8x128xf32>
      %c0_48 = arith.constant 0 : index
      %c0_49 = arith.constant 0 : index
      %38 = vector.load %arg14[%c0_48, %c0_49] : memref<8x128xf32, #tpu.memory_space<vmem>>, vector<8x128xf32>
      tpu.vector_store %arg14[%c0_48, %c0_49], %37 {strides = array<i32>} : memref<8x128xf32, #tpu.memory_space<vmem>>, vector<8x128xf32>,
      %cst_50 = arith.constant 0.000000e+00 : f32
      %39 = vector.broadcast %cst_50 : f32 to vector<8x128xf32>
      %c0_51 = arith.constant 0 : index
      %c0_52 = arith.constant 0 : index
      %40 = vector.load %arg15[%c0_51, %c0_52] : memref<8x128xf32, #tpu.memory_space<vmem>>, vector<8x128xf32>
      tpu.vector_store %arg15[%c0_51, %c0_52], %39 {strides = array<i32>} : memref<8x128xf32, #tpu.memory_space<vmem>>, vector<8x128xf32>,
      %cst_53 = arith.constant 0.000000e+00 : f32
      %41 = vector.broadcast %cst_53 : f32 to vector<8x128xf32>
      %c0_54 = arith.constant 0 : index
      %c0_55 = arith.constant 0 : index
      %42 = vector.load %arg16[%c0_54, %c0_55] : memref<8x128xf32, #tpu.memory_space<vmem>>, vector<8x128xf32>
      tpu.vector_store %arg16[%c0_54, %c0_55], %41 {strides = array<i32>} : memref<8x128xf32, #tpu.memory_space<vmem>>, vector<8x128xf32>,
      %cst_56 = arith.constant 0.000000e+00 : f32
      %43 = vector.broadcast %cst_56 : f32 to vector<8x128xf32>
      %c0_57 = arith.constant 0 : index
      %c0_58 = arith.constant 0 : index
      %44 = vector.load %arg17[%c0_57, %c0_58] : memref<8x128xf32, #tpu.memory_space<vmem>>, vector<8x128xf32>
      tpu.vector_store %arg17[%c0_57, %c0_58], %43 {strides = array<i32>} : memref<8x128xf32, #tpu.memory_space<vmem>>, vector<8x128xf32>,
      %cst_59 = arith.constant 0.000000e+00 : f32
      %45 = vector.broadcast %cst_59 : f32 to vector<8x128xf32>
      %c0_60 = arith.constant 0 : index
      %c0_61 = arith.constant 0 : index
      %46 = vector.load %arg18[%c0_60, %c0_61] : memref<8x128xf32, #tpu.memory_space<vmem>>, vector<8x128xf32>
      tpu.vector_store %arg18[%c0_60, %c0_61], %45 {strides = array<i32>} : memref<8x128xf32, #tpu.memory_space<vmem>>, vector<8x128xf32>,
    } else {
    }
    %c0 = arith.constant 0 : index
    %c0_1 = arith.constant 0 : index
    %3 = vector.load %arg7[%c0, %c0_1] : memref<1x512xf32, #tpu.memory_space<vmem>>, vector<1x512xf32>
    %4 = vector.shape_cast %3 : vector<1x512xf32> to vector<1x512xf32>
    %5 = vector.broadcast %4 : vector<1x512xf32> to vector<8x512xf32>
    %c0_2 = arith.constant 0 : index
    %c0_3 = arith.constant 0 : index
    %6 = vector.load %arg8[%c0_2, %c0_3] : memref<1x512xf32, #tpu.memory_space<vmem>>, vector<1x512xf32>
    %7 = vector.shape_cast %6 : vector<1x512xf32> to vector<1x512xf32>
    %8 = vector.broadcast %7 : vector<1x512xf32> to vector<8x512xf32>
    %c0_4 = arith.constant 0 : index
    %c0_5 = arith.constant 0 : index
    %9 = vector.load %arg9[%c0_4, %c0_5] : memref<1x512xf32, #tpu.memory_space<vmem>>, vector<1x512xf32>
    %10 = vector.shape_cast %9 : vector<1x512xf32> to vector<1x512xf32>
    %11 = vector.broadcast %10 : vector<1x512xf32> to vector<8x512xf32>
    %c0_6 = arith.constant 0 : index
    %c0_7 = arith.constant 0 : index
    %12 = vector.load %arg10[%c0_6, %c0_7] : memref<1x128xf32, #tpu.memory_space<vmem>>, vector<1x128xf32>
    %13 = vector.shape_cast %12 : vector<1x128xf32> to vector<1x128xf32>
    %14 = vector.broadcast %13 : vector<1x128xf32> to vector<8x128xf32>
    %c0_8 = arith.constant 0 : index
    %c0_9 = arith.constant 0 : index
    %15 = vector.load %arg12[%c0_8, %c0_9] : memref<8x128xf32, #tpu.memory_space<vmem>>, vector<8x128xf32>
    %c0_10 = arith.constant 0 : index
    %c0_11 = arith.constant 0 : index
    %16 = vector.load %arg13[%c0_10, %c0_11] : memref<8x128xf32, #tpu.memory_space<vmem>>, vector<8x128xf32>
    %c0_12 = arith.constant 0 : index
    %c0_13 = arith.constant 0 : index
    %17 = vector.load %arg14[%c0_12, %c0_13] : memref<8x128xf32, #tpu.memory_space<vmem>>, vector<8x128xf32>
    %c0_14 = arith.constant 0 : index
    %c0_15 = arith.constant 0 : index
    %18 = vector.load %arg15[%c0_14, %c0_15] : memref<8x128xf32, #tpu.memory_space<vmem>>, vector<8x128xf32>
    %c0_16 = arith.constant 0 : index
    %c0_17 = arith.constant 0 : index
    %19 = vector.load %arg16[%c0_16, %c0_17] : memref<8x128xf32, #tpu.memory_space<vmem>>, vector<8x128xf32>
    %c0_18 = arith.constant 0 : index
    %c0_19 = arith.constant 0 : index
    %20 = vector.load %arg17[%c0_18, %c0_19] : memref<8x128xf32, #tpu.memory_space<vmem>>, vector<8x128xf32>
    %c0_20 = arith.constant 0 : index
    %c0_21 = arith.constant 0 : index
    %21 = vector.load %arg18[%c0_20, %c0_21] : memref<8x128xf32, #tpu.memory_space<vmem>>, vector<8x128xf32>
    %c0_i32_22 = arith.constant 0 : i32
    %c2_i32 = arith.constant 2 : i32
    %22 = arith.addi %c0_i32_22, %c2_i32 : i32
    %c1_i32 = arith.constant 1 : i32
    %23:7 = scf.for %arg19 = %c0_i32_22 to %22 step %c1_i32 iter_args(%arg20 = %15, %arg21 = %16, %arg22 = %17, %arg23 = %18, %arg24 = %19, %arg25 = %20, %arg26 = %21) -> (vector<8x128xf32>, vector<8x128xf32>, vector<8x128xf32>, vector<8x128xf32>, vector<8x128xf32>, vector<8x128xf32>, vector<8x128xf32>)  : i32 {
      %33 = arith.index_cast %arg19 : i32 to index
      %c0_42 = arith.constant 0 : index
      %c0_43 = arith.constant 0 : index
      %34 = vector.load %arg2[%33, %c0_42, %c0_43] : memref<4x8x128xf32, #tpu.memory_space<vmem>>, vector<1x8x128xf32>
      %35 = vector.shape_cast %34 : vector<1x8x128xf32> to vector<8x128xf32>
      %36 = tpu.concatenate %35, %arg20 in 1 : vector<8x128xf32>, vector<8x128xf32> -> vector<8x256xf32>
      %c0_44 = arith.constant 0 : index
      %c0_45 = arith.constant 0 : index
      %37 = vector.load %arg3[%c0_44, %c0_45] : memref<256x512xf32, #tpu.memory_space<vmem>>, vector<256x512xf32>
      %cst = arith.constant dense<0.000000e+00> : vector<8x512xf32>
      %38 = tpu.matmul %36, %37, %cst {dimension_numbers = #tpu.dot_dimension_numbers<[1], [0], [0], [1], [0, 0, 1, 1], [], []>} : vector<8x256xf32>, vector<256x512xf32>, vector<8x512xf32> -> vector<8x512xf32>
      %39 = arith.addf %38, %5 : vector<8x512xf32>
      %40 = vector.extract_strided_slice %39 {offsets = [0, 0], sizes = [8, 128], strides = [1, 1]} : vector<8x512xf32> to vector<8x128xf32>
      %cst_46 = arith.constant 5.000000e-01 : f32
      %41 = vector.broadcast %cst_46 : f32 to vector<8x128xf32>
      %42 = arith.mulf %41, %40 : vector<8x128xf32>
      %43 = math.tanh %42 : vector<8x128xf32>
      %cst_47 = arith.constant 5.000000e-01 : f32
      %44 = vector.broadcast %cst_47 : f32 to vector<8x128xf32>
      %45 = arith.mulf %44, %43 : vector<8x128xf32>
      %cst_48 = arith.constant 5.000000e-01 : f32
      %46 = vector.broadcast %cst_48 : f32 to vector<8x128xf32>
      %47 = arith.addf %45, %46 : vector<8x128xf32>
      %48 = vector.extract_strided_slice %39 {offsets = [0, 128], sizes = [8, 128], strides = [1, 1]} : vector<8x512xf32> to vector<8x128xf32>
      %cst_49 = arith.constant 5.000000e-01 : f32
      %49 = vector.broadcast %cst_49 : f32 to vector<8x128xf32>
      %50 = arith.mulf %49, %48 : vector<8x128xf32>
      %51 = math.tanh %50 : vector<8x128xf32>
      %cst_50 = arith.constant 5.000000e-01 : f32
      %52 = vector.broadcast %cst_50 : f32 to vector<8x128xf32>
      %53 = arith.mulf %52, %51 : vector<8x128xf32>
      %cst_51 = arith.constant 5.000000e-01 : f32
      %54 = vector.broadcast %cst_51 : f32 to vector<8x128xf32>
      %55 = arith.addf %53, %54 : vector<8x128xf32>
      %56 = vector.extract_strided_slice %39 {offsets = [0, 256], sizes = [8, 128], strides = [1, 1]} : vector<8x512xf32> to vector<8x128xf32>
      %57 = math.tanh %56 : vector<8x128xf32>
      %58 = vector.extract_strided_slice %39 {offsets = [0, 384], sizes = [8, 128], strides = [1, 1]} : vector<8x512xf32> to vector<8x128xf32>
      %cst_52 = arith.constant 5.000000e-01 : f32
      %59 = vector.broadcast %cst_52 : f32 to vector<8x128xf32>
      %60 = arith.mulf %59, %58 : vector<8x128xf32>
      %61 = math.tanh %60 : vector<8x128xf32>
      %cst_53 = arith.constant 5.000000e-01 : f32
      %62 = vector.broadcast %cst_53 : f32 to vector<8x128xf32>
      %63 = arith.mulf %62, %61 : vector<8x128xf32>
      %cst_54 = arith.constant 5.000000e-01 : f32
      %64 = vector.broadcast %cst_54 : f32 to vector<8x128xf32>
      %65 = arith.addf %63, %64 : vector<8x128xf32>
      %66 = arith.mulf %55, %arg23 : vector<8x128xf32>
      %67 = arith.mulf %47, %57 : vector<8x128xf32>
      %68 = arith.addf %66, %67 : vector<8x128xf32>
      %69 = math.tanh %68 : vector<8x128xf32>
      %70 = arith.mulf %65, %69 : vector<8x128xf32>
      %71 = tpu.concatenate %arg20, %arg21 in 1 : vector<8x128xf32>, vector<8x128xf32> -> vector<8x256xf32>
      %c0_55 = arith.constant 0 : index
      %c0_56 = arith.constant 0 : index
      %72 = vector.load %arg4[%c0_55, %c0_56] : memref<256x512xf32, #tpu.memory_space<vmem>>, vector<256x512xf32>
      %cst_57 = arith.constant dense<0.000000e+00> : vector<8x512xf32>
      %73 = tpu.matmul %71, %72, %cst_57 {dimension_numbers = #tpu.dot_dimension_numbers<[1], [0], [0], [1], [0, 0, 1, 1], [], []>} : vector<8x256xf32>, vector<256x512xf32>, vector<8x512xf32> -> vector<8x512xf32>
      %74 = arith.addf %73, %8 : vector<8x512xf32>
      %75 = vector.extract_strided_slice %74 {offsets = [0, 0], sizes = [8, 128], strides = [1, 1]} : vector<8x512xf32> to vector<8x128xf32>
      %cst_58 = arith.constant 5.000000e-01 : f32
      %76 = vector.broadcast %cst_58 : f32 to vector<8x128xf32>
      %77 = arith.mulf %76, %75 : vector<8x128xf32>
      %78 = math.tanh %77 : vector<8x128xf32>
      %cst_59 = arith.constant 5.000000e-01 : f32
      %79 = vector.broadcast %cst_59 : f32 to vector<8x128xf32>
      %80 = arith.mulf %79, %78 : vector<8x128xf32>
      %cst_60 = arith.constant 5.000000e-01 : f32
      %81 = vector.broadcast %cst_60 : f32 to vector<8x128xf32>
      %82 = arith.addf %80, %81 : vector<8x128xf32>
      %83 = vector.extract_strided_slice %74 {offsets = [0, 128], sizes = [8, 128], strides = [1, 1]} : vector<8x512xf32> to vector<8x128xf32>
      %cst_61 = arith.constant 5.000000e-01 : f32
      %84 = vector.broadcast %cst_61 : f32 to vector<8x128xf32>
      %85 = arith.mulf %84, %83 : vector<8x128xf32>
      %86 = math.tanh %85 : vector<8x128xf32>
      %cst_62 = arith.constant 5.000000e-01 : f32
      %87 = vector.broadcast %cst_62 : f32 to vector<8x128xf32>
      %88 = arith.mulf %87, %86 : vector<8x128xf32>
      %cst_63 = arith.constant 5.000000e-01 : f32
      %89 = vector.broadcast %cst_63 : f32 to vector<8x128xf32>
      %90 = arith.addf %88, %89 : vector<8x128xf32>
      %91 = vector.extract_strided_slice %74 {offsets = [0, 256], sizes = [8, 128], strides = [1, 1]} : vector<8x512xf32> to vector<8x128xf32>
      %92 = math.tanh %91 : vector<8x128xf32>
      %93 = vector.extract_strided_slice %74 {offsets = [0, 384], sizes = [8, 128], strides = [1, 1]} : vector<8x512xf32> to vector<8x128xf32>
      %cst_64 = arith.constant 5.000000e-01 : f32
      %94 = vector.broadcast %cst_64 : f32 to vector<8x128xf32>
      %95 = arith.mulf %94, %93 : vector<8x128xf32>
      %96 = math.tanh %95 : vector<8x128xf32>
      %cst_65 = arith.constant 5.000000e-01 : f32
      %97 = vector.broadcast %cst_65 : f32 to vector<8x128xf32>
      %98 = arith.mulf %97, %96 : vector<8x128xf32>
      %cst_66 = arith.constant 5.000000e-01 : f32
      %99 = vector.broadcast %cst_66 : f32 to vector<8x128xf32>
      %100 = arith.addf %98, %99 : vector<8x128xf32>
      %101 = arith.mulf %90, %arg24 : vector<8x128xf32>
      %102 = arith.mulf %82, %92 : vector<8x128xf32>
      %103 = arith.addf %101, %102 : vector<8x128xf32>
      %104 = math.tanh %103 : vector<8x128xf32>
      %105 = arith.mulf %100, %104 : vector<8x128xf32>
      %106 = tpu.concatenate %arg21, %arg22 in 1 : vector<8x128xf32>, vector<8x128xf32> -> vector<8x256xf32>
      %c0_67 = arith.constant 0 : index
      %c0_68 = arith.constant 0 : index
      %107 = vector.load %arg5[%c0_67, %c0_68] : memref<256x512xf32, #tpu.memory_space<vmem>>, vector<256x512xf32>
      %cst_69 = arith.constant dense<0.000000e+00> : vector<8x512xf32>
      %108 = tpu.matmul %106, %107, %cst_69 {dimension_numbers = #tpu.dot_dimension_numbers<[1], [0], [0], [1], [0, 0, 1, 1], [], []>} : vector<8x256xf32>, vector<256x512xf32>, vector<8x512xf32> -> vector<8x512xf32>
      %109 = arith.addf %108, %11 : vector<8x512xf32>
      %110 = vector.extract_strided_slice %109 {offsets = [0, 0], sizes = [8, 128], strides = [1, 1]} : vector<8x512xf32> to vector<8x128xf32>
      %cst_70 = arith.constant 5.000000e-01 : f32
      %111 = vector.broadcast %cst_70 : f32 to vector<8x128xf32>
      %112 = arith.mulf %111, %110 : vector<8x128xf32>
      %113 = math.tanh %112 : vector<8x128xf32>
      %cst_71 = arith.constant 5.000000e-01 : f32
      %114 = vector.broadcast %cst_71 : f32 to vector<8x128xf32>
      %115 = arith.mulf %114, %113 : vector<8x128xf32>
      %cst_72 = arith.constant 5.000000e-01 : f32
      %116 = vector.broadcast %cst_72 : f32 to vector<8x128xf32>
      %117 = arith.addf %115, %116 : vector<8x128xf32>
      %118 = vector.extract_strided_slice %109 {offsets = [0, 128], sizes = [8, 128], strides = [1, 1]} : vector<8x512xf32> to vector<8x128xf32>
      %cst_73 = arith.constant 5.000000e-01 : f32
      %119 = vector.broadcast %cst_73 : f32 to vector<8x128xf32>
      %120 = arith.mulf %119, %118 : vector<8x128xf32>
      %121 = math.tanh %120 : vector<8x128xf32>
      %cst_74 = arith.constant 5.000000e-01 : f32
      %122 = vector.broadcast %cst_74 : f32 to vector<8x128xf32>
      %123 = arith.mulf %122, %121 : vector<8x128xf32>
      %cst_75 = arith.constant 5.000000e-01 : f32
      %124 = vector.broadcast %cst_75 : f32 to vector<8x128xf32>
      %125 = arith.addf %123, %124 : vector<8x128xf32>
      %126 = vector.extract_strided_slice %109 {offsets = [0, 256], sizes = [8, 128], strides = [1, 1]} : vector<8x512xf32> to vector<8x128xf32>
      %127 = math.tanh %126 : vector<8x128xf32>
      %128 = vector.extract_strided_slice %109 {offsets = [0, 384], sizes = [8, 128], strides = [1, 1]} : vector<8x512xf32> to vector<8x128xf32>
      %cst_76 = arith.constant 5.000000e-01 : f32
      %129 = vector.broadcast %cst_76 : f32 to vector<8x128xf32>
      %130 = arith.mulf %129, %128 : vector<8x128xf32>
      %131 = math.tanh %130 : vector<8x128xf32>
      %cst_77 = arith.constant 5.000000e-01 : f32
      %132 = vector.broadcast %cst_77 : f32 to vector<8x128xf32>
      %133 = arith.mulf %132, %131 : vector<8x128xf32>
      %cst_78 = arith.constant 5.000000e-01 : f32
      %134 = vector.broadcast %cst_78 : f32 to vector<8x128xf32>
      %135 = arith.addf %133, %134 : vector<8x128xf32>
      %136 = arith.mulf %125, %arg25 : vector<8x128xf32>
      %137 = arith.mulf %117, %127 : vector<8x128xf32>
      %138 = arith.addf %136, %137 : vector<8x128xf32>
      %139 = math.tanh %138 : vector<8x128xf32>
      %140 = arith.mulf %135, %139 : vector<8x128xf32>
      %c0_79 = arith.constant 0 : index
      %c0_80 = arith.constant 0 : index
      %141 = vector.load %arg6[%c0_79, %c0_80] : memref<128x128xf32, #tpu.memory_space<vmem>>, vector<128x128xf32>
      %cst_81 = arith.constant dense<0.000000e+00> : vector<8x128xf32>
      %142 = tpu.matmul %140, %141, %cst_81 {dimension_numbers = #tpu.dot_dimension_numbers<[1], [0], [0], [1], [0, 0, 1, 1], [], []>} : vector<8x128xf32>, vector<128x128xf32>, vector<8x128xf32> -> vector<8x128xf32>
      %143 = arith.addf %142, %14 : vector<8x128xf32>
      %144 = arith.index_cast %arg19 : i32 to index
      %c0_82 = arith.constant 0 : index
      %c0_83 = arith.constant 0 : index
      %145 = vector.load %arg11[%144, %c0_82, %c0_83] : memref<4x8x128xf32, #tpu.memory_space<vmem>>, vector<1x8x128xf32>
      %146 = vector.shape_cast %145 : vector<1x8x128xf32> to vector<8x128xf32>
      %147 = vector.shape_cast %143 : vector<8x128xf32> to vector<1x8x128xf32>
      tpu.vector_store %arg11[%144, %c0_82, %c0_83], %147 {strides = array<i32>} : memref<4x8x128xf32, #tpu.memory_space<vmem>>, vector<1x8x128xf32>,
      scf.yield %70, %105, %140, %68, %103, %138, %143 : vector<8x128xf32>, vector<8x128xf32>, vector<8x128xf32>, vector<8x128xf32>, vector<8x128xf32>, vector<8x128xf32>, vector<8x128xf32>
    }
    %c2_i32_23 = arith.constant 2 : i32
    %c2_i32_24 = arith.constant 2 : i32
    %c2_i32_25 = arith.constant 2 : i32
    %24 = arith.addi %c2_i32_24, %c2_i32_25 : i32
    %c1_i32_26 = arith.constant 1 : i32
    %25:7 = scf.for %arg19 = %c2_i32_24 to %24 step %c1_i32_26 iter_args(%arg20 = %23#0, %arg21 = %23#1, %arg22 = %23#2, %arg23 = %23#3, %arg24 = %23#4, %arg25 = %23#5, %arg26 = %23#6) -> (vector<8x128xf32>, vector<8x128xf32>, vector<8x128xf32>, vector<8x128xf32>, vector<8x128xf32>, vector<8x128xf32>, vector<8x128xf32>)  : i32 {
      %33 = tpu.concatenate %arg26, %arg20 in 1 : vector<8x128xf32>, vector<8x128xf32> -> vector<8x256xf32>
      %c0_42 = arith.constant 0 : index
      %c0_43 = arith.constant 0 : index
      %34 = vector.load %arg3[%c0_42, %c0_43] : memref<256x512xf32, #tpu.memory_space<vmem>>, vector<256x512xf32>
      %cst = arith.constant dense<0.000000e+00> : vector<8x512xf32>
      %35 = tpu.matmul %33, %34, %cst {dimension_numbers = #tpu.dot_dimension_numbers<[1], [0], [0], [1], [0, 0, 1, 1], [], []>} : vector<8x256xf32>, vector<256x512xf32>, vector<8x512xf32> -> vector<8x512xf32>
      %36 = arith.addf %35, %5 : vector<8x512xf32>
      %37 = vector.extract_strided_slice %36 {offsets = [0, 0], sizes = [8, 128], strides = [1, 1]} : vector<8x512xf32> to vector<8x128xf32>
      %cst_44 = arith.constant 5.000000e-01 : f32
      %38 = vector.broadcast %cst_44 : f32 to vector<8x128xf32>
      %39 = arith.mulf %38, %37 : vector<8x128xf32>
      %40 = math.tanh %39 : vector<8x128xf32>
      %cst_45 = arith.constant 5.000000e-01 : f32
      %41 = vector.broadcast %cst_45 : f32 to vector<8x128xf32>
      %42 = arith.mulf %41, %40 : vector<8x128xf32>
      %cst_46 = arith.constant 5.000000e-01 : f32
      %43 = vector.broadcast %cst_46 : f32 to vector<8x128xf32>
      %44 = arith.addf %42, %43 : vector<8x128xf32>
      %45 = vector.extract_strided_slice %36 {offsets = [0, 128], sizes = [8, 128], strides = [1, 1]} : vector<8x512xf32> to vector<8x128xf32>
      %cst_47 = arith.constant 5.000000e-01 : f32
      %46 = vector.broadcast %cst_47 : f32 to vector<8x128xf32>
      %47 = arith.mulf %46, %45 : vector<8x128xf32>
      %48 = math.tanh %47 : vector<8x128xf32>
      %cst_48 = arith.constant 5.000000e-01 : f32
      %49 = vector.broadcast %cst_48 : f32 to vector<8x128xf32>
      %50 = arith.mulf %49, %48 : vector<8x128xf32>
      %cst_49 = arith.constant 5.000000e-01 : f32
      %51 = vector.broadcast %cst_49 : f32 to vector<8x128xf32>
      %52 = arith.addf %50, %51 : vector<8x128xf32>
      %53 = vector.extract_strided_slice %36 {offsets = [0, 256], sizes = [8, 128], strides = [1, 1]} : vector<8x512xf32> to vector<8x128xf32>
      %54 = math.tanh %53 : vector<8x128xf32>
      %55 = vector.extract_strided_slice %36 {offsets = [0, 384], sizes = [8, 128], strides = [1, 1]} : vector<8x512xf32> to vector<8x128xf32>
      %cst_50 = arith.constant 5.000000e-01 : f32
      %56 = vector.broadcast %cst_50 : f32 to vector<8x128xf32>
      %57 = arith.mulf %56, %55 : vector<8x128xf32>
      %58 = math.tanh %57 : vector<8x128xf32>
      %cst_51 = arith.constant 5.000000e-01 : f32
      %59 = vector.broadcast %cst_51 : f32 to vector<8x128xf32>
      %60 = arith.mulf %59, %58 : vector<8x128xf32>
      %cst_52 = arith.constant 5.000000e-01 : f32
      %61 = vector.broadcast %cst_52 : f32 to vector<8x128xf32>
      %62 = arith.addf %60, %61 : vector<8x128xf32>
      %63 = arith.mulf %52, %arg23 : vector<8x128xf32>
      %64 = arith.mulf %44, %54 : vector<8x128xf32>
      %65 = arith.addf %63, %64 : vector<8x128xf32>
      %66 = math.tanh %65 : vector<8x128xf32>
      %67 = arith.mulf %62, %66 : vector<8x128xf32>
      %68 = tpu.concatenate %arg20, %arg21 in 1 : vector<8x128xf32>, vector<8x128xf32> -> vector<8x256xf32>
      %c0_53 = arith.constant 0 : index
      %c0_54 = arith.constant 0 : index
      %69 = vector.load %arg4[%c0_53, %c0_54] : memref<256x512xf32, #tpu.memory_space<vmem>>, vector<256x512xf32>
      %cst_55 = arith.constant dense<0.000000e+00> : vector<8x512xf32>
      %70 = tpu.matmul %68, %69, %cst_55 {dimension_numbers = #tpu.dot_dimension_numbers<[1], [0], [0], [1], [0, 0, 1, 1], [], []>} : vector<8x256xf32>, vector<256x512xf32>, vector<8x512xf32> -> vector<8x512xf32>
      %71 = arith.addf %70, %8 : vector<8x512xf32>
      %72 = vector.extract_strided_slice %71 {offsets = [0, 0], sizes = [8, 128], strides = [1, 1]} : vector<8x512xf32> to vector<8x128xf32>
      %cst_56 = arith.constant 5.000000e-01 : f32
      %73 = vector.broadcast %cst_56 : f32 to vector<8x128xf32>
      %74 = arith.mulf %73, %72 : vector<8x128xf32>
      %75 = math.tanh %74 : vector<8x128xf32>
      %cst_57 = arith.constant 5.000000e-01 : f32
      %76 = vector.broadcast %cst_57 : f32 to vector<8x128xf32>
      %77 = arith.mulf %76, %75 : vector<8x128xf32>
      %cst_58 = arith.constant 5.000000e-01 : f32
      %78 = vector.broadcast %cst_58 : f32 to vector<8x128xf32>
      %79 = arith.addf %77, %78 : vector<8x128xf32>
      %80 = vector.extract_strided_slice %71 {offsets = [0, 128], sizes = [8, 128], strides = [1, 1]} : vector<8x512xf32> to vector<8x128xf32>
      %cst_59 = arith.constant 5.000000e-01 : f32
      %81 = vector.broadcast %cst_59 : f32 to vector<8x128xf32>
      %82 = arith.mulf %81, %80 : vector<8x128xf32>
      %83 = math.tanh %82 : vector<8x128xf32>
      %cst_60 = arith.constant 5.000000e-01 : f32
      %84 = vector.broadcast %cst_60 : f32 to vector<8x128xf32>
      %85 = arith.mulf %84, %83 : vector<8x128xf32>
      %cst_61 = arith.constant 5.000000e-01 : f32
      %86 = vector.broadcast %cst_61 : f32 to vector<8x128xf32>
      %87 = arith.addf %85, %86 : vector<8x128xf32>
      %88 = vector.extract_strided_slice %71 {offsets = [0, 256], sizes = [8, 128], strides = [1, 1]} : vector<8x512xf32> to vector<8x128xf32>
      %89 = math.tanh %88 : vector<8x128xf32>
      %90 = vector.extract_strided_slice %71 {offsets = [0, 384], sizes = [8, 128], strides = [1, 1]} : vector<8x512xf32> to vector<8x128xf32>
      %cst_62 = arith.constant 5.000000e-01 : f32
      %91 = vector.broadcast %cst_62 : f32 to vector<8x128xf32>
      %92 = arith.mulf %91, %90 : vector<8x128xf32>
      %93 = math.tanh %92 : vector<8x128xf32>
      %cst_63 = arith.constant 5.000000e-01 : f32
      %94 = vector.broadcast %cst_63 : f32 to vector<8x128xf32>
      %95 = arith.mulf %94, %93 : vector<8x128xf32>
      %cst_64 = arith.constant 5.000000e-01 : f32
      %96 = vector.broadcast %cst_64 : f32 to vector<8x128xf32>
      %97 = arith.addf %95, %96 : vector<8x128xf32>
      %98 = arith.mulf %87, %arg24 : vector<8x128xf32>
      %99 = arith.mulf %79, %89 : vector<8x128xf32>
      %100 = arith.addf %98, %99 : vector<8x128xf32>
      %101 = math.tanh %100 : vector<8x128xf32>
      %102 = arith.mulf %97, %101 : vector<8x128xf32>
      %103 = tpu.concatenate %arg21, %arg22 in 1 : vector<8x128xf32>, vector<8x128xf32> -> vector<8x256xf32>
      %c0_65 = arith.constant 0 : index
      %c0_66 = arith.constant 0 : index
      %104 = vector.load %arg5[%c0_65, %c0_66] : memref<256x512xf32, #tpu.memory_space<vmem>>, vector<256x512xf32>
      %cst_67 = arith.constant dense<0.000000e+00> : vector<8x512xf32>
      %105 = tpu.matmul %103, %104, %cst_67 {dimension_numbers = #tpu.dot_dimension_numbers<[1], [0], [0], [1], [0, 0, 1, 1], [], []>} : vector<8x256xf32>, vector<256x512xf32>, vector<8x512xf32> -> vector<8x512xf32>
      %106 = arith.addf %105, %11 : vector<8x512xf32>
      %107 = vector.extract_strided_slice %106 {offsets = [0, 0], sizes = [8, 128], strides = [1, 1]} : vector<8x512xf32> to vector<8x128xf32>
      %cst_68 = arith.constant 5.000000e-01 : f32
      %108 = vector.broadcast %cst_68 : f32 to vector<8x128xf32>
      %109 = arith.mulf %108, %107 : vector<8x128xf32>
      %110 = math.tanh %109 : vector<8x128xf32>
      %cst_69 = arith.constant 5.000000e-01 : f32
      %111 = vector.broadcast %cst_69 : f32 to vector<8x128xf32>
      %112 = arith.mulf %111, %110 : vector<8x128xf32>
      %cst_70 = arith.constant 5.000000e-01 : f32
      %113 = vector.broadcast %cst_70 : f32 to vector<8x128xf32>
      %114 = arith.addf %112, %113 : vector<8x128xf32>
      %115 = vector.extract_strided_slice %106 {offsets = [0, 128], sizes = [8, 128], strides = [1, 1]} : vector<8x512xf32> to vector<8x128xf32>
      %cst_71 = arith.constant 5.000000e-01 : f32
      %116 = vector.broadcast %cst_71 : f32 to vector<8x128xf32>
      %117 = arith.mulf %116, %115 : vector<8x128xf32>
      %118 = math.tanh %117 : vector<8x128xf32>
      %cst_72 = arith.constant 5.000000e-01 : f32
      %119 = vector.broadcast %cst_72 : f32 to vector<8x128xf32>
      %120 = arith.mulf %119, %118 : vector<8x128xf32>
      %cst_73 = arith.constant 5.000000e-01 : f32
      %121 = vector.broadcast %cst_73 : f32 to vector<8x128xf32>
      %122 = arith.addf %120, %121 : vector<8x128xf32>
      %123 = vector.extract_strided_slice %106 {offsets = [0, 256], sizes = [8, 128], strides = [1, 1]} : vector<8x512xf32> to vector<8x128xf32>
      %124 = math.tanh %123 : vector<8x128xf32>
      %125 = vector.extract_strided_slice %106 {offsets = [0, 384], sizes = [8, 128], strides = [1, 1]} : vector<8x512xf32> to vector<8x128xf32>
      %cst_74 = arith.constant 5.000000e-01 : f32
      %126 = vector.broadcast %cst_74 : f32 to vector<8x128xf32>
      %127 = arith.mulf %126, %125 : vector<8x128xf32>
      %128 = math.tanh %127 : vector<8x128xf32>
      %cst_75 = arith.constant 5.000000e-01 : f32
      %129 = vector.broadcast %cst_75 : f32 to vector<8x128xf32>
      %130 = arith.mulf %129, %128 : vector<8x128xf32>
      %cst_76 = arith.constant 5.000000e-01 : f32
      %131 = vector.broadcast %cst_76 : f32 to vector<8x128xf32>
      %132 = arith.addf %130, %131 : vector<8x128xf32>
      %133 = arith.mulf %122, %arg25 : vector<8x128xf32>
      %134 = arith.mulf %114, %124 : vector<8x128xf32>
      %135 = arith.addf %133, %134 : vector<8x128xf32>
      %136 = math.tanh %135 : vector<8x128xf32>
      %137 = arith.mulf %132, %136 : vector<8x128xf32>
      %c0_77 = arith.constant 0 : index
      %c0_78 = arith.constant 0 : index
      %138 = vector.load %arg6[%c0_77, %c0_78] : memref<128x128xf32, #tpu.memory_space<vmem>>, vector<128x128xf32>
      %cst_79 = arith.constant dense<0.000000e+00> : vector<8x128xf32>
      %139 = tpu.matmul %137, %138, %cst_79 {dimension_numbers = #tpu.dot_dimension_numbers<[1], [0], [0], [1], [0, 0, 1, 1], [], []>} : vector<8x128xf32>, vector<128x128xf32>, vector<8x128xf32> -> vector<8x128xf32>
      %140 = arith.addf %139, %14 : vector<8x128xf32>
      %141 = arith.index_cast %arg19 : i32 to index
      %c0_80 = arith.constant 0 : index
      %c0_81 = arith.constant 0 : index
      %142 = vector.load %arg11[%141, %c0_80, %c0_81] : memref<4x8x128xf32, #tpu.memory_space<vmem>>, vector<1x8x128xf32>
      %143 = vector.shape_cast %142 : vector<1x8x128xf32> to vector<8x128xf32>
      %144 = vector.shape_cast %140 : vector<8x128xf32> to vector<1x8x128xf32>
      tpu.vector_store %arg11[%141, %c0_80, %c0_81], %144 {strides = array<i32>} : memref<4x8x128xf32, #tpu.memory_space<vmem>>, vector<1x8x128xf32>,
      scf.yield %67, %102, %137, %65, %100, %135, %140 : vector<8x128xf32>, vector<8x128xf32>, vector<8x128xf32>, vector<8x128xf32>, vector<8x128xf32>, vector<8x128xf32>, vector<8x128xf32>
    }
    %c2_i32_27 = arith.constant 2 : i32
    %c0_28 = arith.constant 0 : index
    %c0_29 = arith.constant 0 : index
    %26 = vector.load %arg12[%c0_28, %c0_29] : memref<8x128xf32, #tpu.memory_space<vmem>>, vector<8x128xf32>
    tpu.vector_store %arg12[%c0_28, %c0_29], %25#0 {strides = array<i32>} : memref<8x128xf32, #tpu.memory_space<vmem>>, vector<8x128xf32>,
    %c0_30 = arith.constant 0 : index
    %c0_31 = arith.constant 0 : index
    %27 = vector.load %arg13[%c0_30, %c0_31] : memref<8x128xf32, #tpu.memory_space<vmem>>, vector<8x128xf32>
    tpu.vector_store %arg13[%c0_30, %c0_31], %25#1 {strides = array<i32>} : memref<8x128xf32, #tpu.memory_space<vmem>>, vector<8x128xf32>,
    %c0_32 = arith.constant 0 : index
    %c0_33 = arith.constant 0 : index
    %28 = vector.load %arg14[%c0_32, %c0_33] : memref<8x128xf32, #tpu.memory_space<vmem>>, vector<8x128xf32>
    tpu.vector_store %arg14[%c0_32, %c0_33], %25#2 {strides = array<i32>} : memref<8x128xf32, #tpu.memory_space<vmem>>, vector<8x128xf32>,
    %c0_34 = arith.constant 0 : index
    %c0_35 = arith.constant 0 : index
    %29 = vector.load %arg15[%c0_34, %c0_35] : memref<8x128xf32, #tpu.memory_space<vmem>>, vector<8x128xf32>
    tpu.vector_store %arg15[%c0_34, %c0_35], %25#3 {strides = array<i32>} : memref<8x128xf32, #tpu.memory_space<vmem>>, vector<8x128xf32>,
    %c0_36 = arith.constant 0 : index
    %c0_37 = arith.constant 0 : index
    %30 = vector.load %arg16[%c0_36, %c0_37] : memref<8x128xf32, #tpu.memory_space<vmem>>, vector<8x128xf32>
    tpu.vector_store %arg16[%c0_36, %c0_37], %25#4 {strides = array<i32>} : memref<8x128xf32, #tpu.memory_space<vmem>>, vector<8x128xf32>,
    %c0_38 = arith.constant 0 : index
    %c0_39 = arith.constant 0 : index
    %31 = vector.load %arg17[%c0_38, %c0_39] : memref<8x128xf32, #tpu.memory_space<vmem>>, vector<8x128xf32>
    tpu.vector_store %arg17[%c0_38, %c0_39], %25#5 {strides = array<i32>} : memref<8x128xf32, #tpu.memory_space<vmem>>, vector<8x128xf32>,
    %c0_40 = arith.constant 0 : index
    %c0_41 = arith.constant 0 : index
    %32 = vector.load %arg18[%c0_40, %c0_41] : memref<8x128xf32, #tpu.memory_space<vmem>>, vector<8x128xf32>
    tpu.vector_store %arg18[%c0_40, %c0_41], %25#6 {strides = array<i32>} : memref<8x128xf32, #tpu.memory_space<vmem>>, vector<8x128xf32>,
    return
  }
  func.func @transform_0(%arg0: i32, %arg1: i32) -> (i32, i32, i32) {
    %c0_i32 = arith.constant 0 : i32
    %c0_i32_0 = arith.constant 0 : i32
    return %arg1, %arg0, %c0_i32 : i32, i32, i32
  }
  func.func @transform_1(%arg0: i32, %arg1: i32) -> (i32, i32) {
    %c0_i32 = arith.constant 0 : i32
    %c0_i32_0 = arith.constant 0 : i32
    %c0_i32_1 = arith.constant 0 : i32
    return %c0_i32, %c0_i32_0 : i32, i32
  }
  func.func @transform_2(%arg0: i32, %arg1: i32) -> (i32, i32) {
    %c0_i32 = arith.constant 0 : i32
    %c0_i32_0 = arith.constant 0 : i32
    %c0_i32_1 = arith.constant 0 : i32
    return %c0_i32, %c0_i32_0 : i32, i32
  }
  func.func @transform_3(%arg0: i32, %arg1: i32) -> (i32, i32) {
    %c0_i32 = arith.constant 0 : i32
    %c0_i32_0 = arith.constant 0 : i32
    %c0_i32_1 = arith.constant 0 : i32
    return %c0_i32, %c0_i32_0 : i32, i32
  }
  func.func @transform_4(%arg0: i32, %arg1: i32) -> (i32, i32) {
    %c0_i32 = arith.constant 0 : i32
    %c0_i32_0 = arith.constant 0 : i32
    %c0_i32_1 = arith.constant 0 : i32
    return %c0_i32, %c0_i32_0 : i32, i32
  }
  func.func @transform_5(%arg0: i32, %arg1: i32) -> (i32, i32) {
    %c0_i32 = arith.constant 0 : i32
    %c0_i32_0 = arith.constant 0 : i32
    %c0_i32_1 = arith.constant 0 : i32
    return %c0_i32, %c0_i32_0 : i32, i32
  }
  func.func @transform_6(%arg0: i32, %arg1: i32) -> (i32, i32) {
    %c0_i32 = arith.constant 0 : i32
    %c0_i32_0 = arith.constant 0 : i32
    %c0_i32_1 = arith.constant 0 : i32
    return %c0_i32, %c0_i32_0 : i32, i32
  }
  func.func @transform_7(%arg0: i32, %arg1: i32) -> (i32, i32) {
    %c0_i32 = arith.constant 0 : i32
    %c0_i32_0 = arith.constant 0 : i32
    %c0_i32_1 = arith.constant 0 : i32
    return %c0_i32, %c0_i32_0 : i32, i32
  }
  func.func @transform_8(%arg0: i32, %arg1: i32) -> (i32, i32) {
    %c0_i32 = arith.constant 0 : i32
    %c0_i32_0 = arith.constant 0 : i32
    %c0_i32_1 = arith.constant 0 : i32
    return %c0_i32, %c0_i32_0 : i32, i32
  }
  func.func @transform_9(%arg0: i32, %arg1: i32) -> (i32, i32, i32) {
    %c0_i32 = arith.constant 0 : i32
    %c0_i32_0 = arith.constant 0 : i32
    return %arg1, %arg0, %c0_i32 : i32, i32, i32
  }
}

module attributes {stable_mosaic.version = 11 : i64} {
  func.func @_aclstm_kernel(%arg0: i32, %arg1: i32, %arg2: memref<4x8x128xf32, #tpu.memory_space<vmem>>, %arg3: memref<256x512xf32, #tpu.memory_space<vmem>>, %arg4: memref<256x512xf32, #tpu.memory_space<vmem>>, %arg5: memref<256x512xf32, #tpu.memory_space<vmem>>, %arg6: memref<128x128xf32, #tpu.memory_space<vmem>>, %arg7: memref<1x512xf32, #tpu.memory_space<vmem>>, %arg8: memref<1x512xf32, #tpu.memory_space<vmem>>, %arg9: memref<1x512xf32, #tpu.memory_space<vmem>>, %arg10: memref<1x128xf32, #tpu.memory_space<vmem>>, %arg11: memref<4x8x128xf32, #tpu.memory_space<vmem>>, %arg12: memref<8x128xf32, #tpu.memory_space<vmem>>, %arg13: memref<8x128xf32, #tpu.memory_space<vmem>>, %arg14: memref<8x128xf32, #tpu.memory_space<vmem>>, %arg15: memref<8x128xf32, #tpu.memory_space<vmem>>, %arg16: memref<8x128xf32, #tpu.memory_space<vmem>>, %arg17: memref<8x128xf32, #tpu.memory_space<vmem>>, %arg18: memref<8x128xf32, #tpu.memory_space<vmem>>) attributes {dimension_semantics = [#tpu.dimension_semantics<parallel>, #tpu.dimension_semantics<arbitrary>], iteration_bounds = array<i64: 1, 2>, scalar_prefetch = 0 : i64, scratch_operands = 7 : i64, tpu.core_type = #tpu.core_type<tc>, window_params = [{transform_indices = @transform_0, window_bounds = array<i64: 4, 8, 128>}, {pipeline_mode = #tpu.pipeline_mode<synchronous>, transform_indices = @transform_1, window_bounds = array<i64: 256, 512>}, {pipeline_mode = #tpu.pipeline_mode<synchronous>, transform_indices = @transform_2, window_bounds = array<i64: 256, 512>}, {pipeline_mode = #tpu.pipeline_mode<synchronous>, transform_indices = @transform_3, window_bounds = array<i64: 256, 512>}, {pipeline_mode = #tpu.pipeline_mode<synchronous>, transform_indices = @transform_4, window_bounds = array<i64: 128, 128>}, {pipeline_mode = #tpu.pipeline_mode<synchronous>, transform_indices = @transform_5, window_bounds = array<i64: 1, 512>}, {pipeline_mode = #tpu.pipeline_mode<synchronous>, transform_indices = @transform_6, window_bounds = array<i64: 1, 512>}, {pipeline_mode = #tpu.pipeline_mode<synchronous>, transform_indices = @transform_7, window_bounds = array<i64: 1, 512>}, {pipeline_mode = #tpu.pipeline_mode<synchronous>, transform_indices = @transform_8, window_bounds = array<i64: 1, 128>}, {transform_indices = @transform_9, window_bounds = array<i64: 4, 8, 128>}]} {
    %c0_i32 = arith.constant 0 : i32
    %0 = arith.cmpi eq, %arg1, %c0_i32 : i32
    %1 = arith.extui %0 : i1 to i32
    %c0_i32_0 = arith.constant 0 : i32
    %2 = arith.cmpi ne, %1, %c0_i32_0 : i32
    scf.if %2 {
      %cst = arith.constant 0.000000e+00 : f32
      %33 = vector.broadcast %cst : f32 to vector<8x128xf32>
      %c0_42 = arith.constant 0 : index
      %c0_43 = arith.constant 0 : index
      %34 = vector.load %arg12[%c0_42, %c0_43] : memref<8x128xf32, #tpu.memory_space<vmem>>, vector<8x128xf32>
      tpu.vector_store %arg12[%c0_42, %c0_43], %33 {strides = array<i32>} : memref<8x128xf32, #tpu.memory_space<vmem>>, vector<8x128xf32>,
      %cst_44 = arith.constant 0.000000e+00 : f32
      %35 = vector.broadcast %cst_44 : f32 to vector<8x128xf32>
      %c0_45 = arith.constant 0 : index
      %c0_46 = arith.constant 0 : index
      %36 = vector.load %arg13[%c0_45, %c0_46] : memref<8x128xf32, #tpu.memory_space<vmem>>, vector<8x128xf32>
      tpu.vector_store %arg13[%c0_45, %c0_46], %35 {strides = array<i32>} : memref<8x128xf32, #tpu.memory_space<vmem>>, vector<8x128xf32>,
      %cst_47 = arith.constant 0.000000e+00 : f32
      %37 = vector.broadcast %cst_47 : f32 to vector<8x128xf32>
      %c0_48 = arith.constant 0 : index
      %c0_49 = arith.constant 0 : index
      %38 = vector.load %arg14[%c0_48, %c0_49] : memref<8x128xf32, #tpu.memory_space<vmem>>, vector<8x128xf32>
      tpu.vector_store %arg14[%c0_48, %c0_49], %37 {strides = array<i32>} : memref<8x128xf32, #tpu.memory_space<vmem>>, vector<8x128xf32>,
      %cst_50 = arith.constant 0.000000e+00 : f32
      %39 = vector.broadcast %cst_50 : f32 to vector<8x128xf32>
      %c0_51 = arith.constant 0 : index
      %c0_52 = arith.constant 0 : index
      %40 = vector.load %arg15[%c0_51, %c0_52] : memref<8x128xf32, #tpu.memory_space<vmem>>, vector<8x128xf32>
      tpu.vector_store %arg15[%c0_51, %c0_52], %39 {strides = array<i32>} : memref<8x128xf32, #tpu.memory_space<vmem>>, vector<8x128xf32>,
      %cst_53 = arith.constant 0.000000e+00 : f32
      %41 = vector.broadcast %cst_53 : f32 to vector<8x128xf32>
      %c0_54 = arith.constant 0 : index
      %c0_55 = arith.constant 0 : index
      %42 = vector.load %arg16[%c0_54, %c0_55] : memref<8x128xf32, #tpu.memory_space<vmem>>, vector<8x128xf32>
      tpu.vector_store %arg16[%c0_54, %c0_55], %41 {strides = array<i32>} : memref<8x128xf32, #tpu.memory_space<vmem>>, vector<8x128xf32>,
      %cst_56 = arith.constant 0.000000e+00 : f32
      %43 = vector.broadcast %cst_56 : f32 to vector<8x128xf32>
      %c0_57 = arith.constant 0 : index
      %c0_58 = arith.constant 0 : index
      %44 = vector.load %arg17[%c0_57, %c0_58] : memref<8x128xf32, #tpu.memory_space<vmem>>, vector<8x128xf32>
      tpu.vector_store %arg17[%c0_57, %c0_58], %43 {strides = array<i32>} : memref<8x128xf32, #tpu.memory_space<vmem>>, vector<8x128xf32>,
      %cst_59 = arith.constant 0.000000e+00 : f32
      %45 = vector.broadcast %cst_59 : f32 to vector<8x128xf32>
      %c0_60 = arith.constant 0 : index
      %c0_61 = arith.constant 0 : index
      %46 = vector.load %arg18[%c0_60, %c0_61] : memref<8x128xf32, #tpu.memory_space<vmem>>, vector<8x128xf32>
      tpu.vector_store %arg18[%c0_60, %c0_61], %45 {strides = array<i32>} : memref<8x128xf32, #tpu.memory_space<vmem>>, vector<8x128xf32>,
    } else {
    }
    %c0 = arith.constant 0 : index
    %c0_1 = arith.constant 0 : index
    %3 = vector.load %arg7[%c0, %c0_1] : memref<1x512xf32, #tpu.memory_space<vmem>>, vector<1x512xf32>
    %4 = vector.shape_cast %3 : vector<1x512xf32> to vector<1x512xf32>
    %5 = vector.broadcast %4 : vector<1x512xf32> to vector<8x512xf32>
    %c0_2 = arith.constant 0 : index
    %c0_3 = arith.constant 0 : index
    %6 = vector.load %arg8[%c0_2, %c0_3] : memref<1x512xf32, #tpu.memory_space<vmem>>, vector<1x512xf32>
    %7 = vector.shape_cast %6 : vector<1x512xf32> to vector<1x512xf32>
    %8 = vector.broadcast %7 : vector<1x512xf32> to vector<8x512xf32>
    %c0_4 = arith.constant 0 : index
    %c0_5 = arith.constant 0 : index
    %9 = vector.load %arg9[%c0_4, %c0_5] : memref<1x512xf32, #tpu.memory_space<vmem>>, vector<1x512xf32>
    %10 = vector.shape_cast %9 : vector<1x512xf32> to vector<1x512xf32>
    %11 = vector.broadcast %10 : vector<1x512xf32> to vector<8x512xf32>
    %c0_6 = arith.constant 0 : index
    %c0_7 = arith.constant 0 : index
    %12 = vector.load %arg10[%c0_6, %c0_7] : memref<1x128xf32, #tpu.memory_space<vmem>>, vector<1x128xf32>
    %13 = vector.shape_cast %12 : vector<1x128xf32> to vector<1x128xf32>
    %14 = vector.broadcast %13 : vector<1x128xf32> to vector<8x128xf32>
    %c0_8 = arith.constant 0 : index
    %c0_9 = arith.constant 0 : index
    %15 = vector.load %arg12[%c0_8, %c0_9] : memref<8x128xf32, #tpu.memory_space<vmem>>, vector<8x128xf32>
    %c0_10 = arith.constant 0 : index
    %c0_11 = arith.constant 0 : index
    %16 = vector.load %arg13[%c0_10, %c0_11] : memref<8x128xf32, #tpu.memory_space<vmem>>, vector<8x128xf32>
    %c0_12 = arith.constant 0 : index
    %c0_13 = arith.constant 0 : index
    %17 = vector.load %arg14[%c0_12, %c0_13] : memref<8x128xf32, #tpu.memory_space<vmem>>, vector<8x128xf32>
    %c0_14 = arith.constant 0 : index
    %c0_15 = arith.constant 0 : index
    %18 = vector.load %arg15[%c0_14, %c0_15] : memref<8x128xf32, #tpu.memory_space<vmem>>, vector<8x128xf32>
    %c0_16 = arith.constant 0 : index
    %c0_17 = arith.constant 0 : index
    %19 = vector.load %arg16[%c0_16, %c0_17] : memref<8x128xf32, #tpu.memory_space<vmem>>, vector<8x128xf32>
    %c0_18 = arith.constant 0 : index
    %c0_19 = arith.constant 0 : index
    %20 = vector.load %arg17[%c0_18, %c0_19] : memref<8x128xf32, #tpu.memory_space<vmem>>, vector<8x128xf32>
    %c0_20 = arith.constant 0 : index
    %c0_21 = arith.constant 0 : index
    %21 = vector.load %arg18[%c0_20, %c0_21] : memref<8x128xf32, #tpu.memory_space<vmem>>, vector<8x128xf32>
    %c0_i32_22 = arith.constant 0 : i32
    %c2_i32 = arith.constant 2 : i32
    %22 = arith.addi %c0_i32_22, %c2_i32 : i32
    %c1_i32 = arith.constant 1 : i32
    %23:7 = scf.for %arg19 = %c0_i32_22 to %22 step %c1_i32 iter_args(%arg20 = %15, %arg21 = %16, %arg22 = %17, %arg23 = %18, %arg24 = %19, %arg25 = %20, %arg26 = %21) -> (vector<8x128xf32>, vector<8x128xf32>, vector<8x128xf32>, vector<8x128xf32>, vector<8x128xf32>, vector<8x128xf32>, vector<8x128xf32>)  : i32 {
      %33 = arith.index_cast %arg19 : i32 to index
      %c0_42 = arith.constant 0 : index
      %c0_43 = arith.constant 0 : index
      %34 = vector.load %arg2[%33, %c0_42, %c0_43] : memref<4x8x128xf32, #tpu.memory_space<vmem>>, vector<1x8x128xf32>
      %35 = vector.shape_cast %34 : vector<1x8x128xf32> to vector<8x128xf32>
      %36 = tpu.concatenate %35, %arg20 in 1 : vector<8x128xf32>, vector<8x128xf32> -> vector<8x256xf32>
      %c0_44 = arith.constant 0 : index
      %c0_45 = arith.constant 0 : index
      %37 = vector.load %arg3[%c0_44, %c0_45] : memref<256x512xf32, #tpu.memory_space<vmem>>, vector<256x512xf32>
      %cst = arith.constant dense<0.000000e+00> : vector<8x512xf32>
      %38 = tpu.matmul %36, %37, %cst {dimension_numbers = #tpu.dot_dimension_numbers<[1], [0], [0], [1], [0, 0, 1, 1], [], []>} : vector<8x256xf32>, vector<256x512xf32>, vector<8x512xf32> -> vector<8x512xf32>
      %39 = arith.addf %38, %5 : vector<8x512xf32>
      %40 = vector.extract_strided_slice %39 {offsets = [0, 0], sizes = [8, 128], strides = [1, 1]} : vector<8x512xf32> to vector<8x128xf32>
      %cst_46 = arith.constant 5.000000e-01 : f32
      %41 = vector.broadcast %cst_46 : f32 to vector<8x128xf32>
      %42 = arith.mulf %41, %40 : vector<8x128xf32>
      %43 = math.tanh %42 : vector<8x128xf32>
      %cst_47 = arith.constant 5.000000e-01 : f32
      %44 = vector.broadcast %cst_47 : f32 to vector<8x128xf32>
      %45 = arith.mulf %44, %43 : vector<8x128xf32>
      %cst_48 = arith.constant 5.000000e-01 : f32
      %46 = vector.broadcast %cst_48 : f32 to vector<8x128xf32>
      %47 = arith.addf %45, %46 : vector<8x128xf32>
      %48 = vector.extract_strided_slice %39 {offsets = [0, 128], sizes = [8, 128], strides = [1, 1]} : vector<8x512xf32> to vector<8x128xf32>
      %cst_49 = arith.constant 5.000000e-01 : f32
      %49 = vector.broadcast %cst_49 : f32 to vector<8x128xf32>
      %50 = arith.mulf %49, %48 : vector<8x128xf32>
      %51 = math.tanh %50 : vector<8x128xf32>
      %cst_50 = arith.constant 5.000000e-01 : f32
      %52 = vector.broadcast %cst_50 : f32 to vector<8x128xf32>
      %53 = arith.mulf %52, %51 : vector<8x128xf32>
      %cst_51 = arith.constant 5.000000e-01 : f32
      %54 = vector.broadcast %cst_51 : f32 to vector<8x128xf32>
      %55 = arith.addf %53, %54 : vector<8x128xf32>
      %56 = vector.extract_strided_slice %39 {offsets = [0, 256], sizes = [8, 128], strides = [1, 1]} : vector<8x512xf32> to vector<8x128xf32>
      %57 = math.tanh %56 : vector<8x128xf32>
      %58 = vector.extract_strided_slice %39 {offsets = [0, 384], sizes = [8, 128], strides = [1, 1]} : vector<8x512xf32> to vector<8x128xf32>
      %cst_52 = arith.constant 5.000000e-01 : f32
      %59 = vector.broadcast %cst_52 : f32 to vector<8x128xf32>
      %60 = arith.mulf %59, %58 : vector<8x128xf32>
      %61 = math.tanh %60 : vector<8x128xf32>
      %cst_53 = arith.constant 5.000000e-01 : f32
      %62 = vector.broadcast %cst_53 : f32 to vector<8x128xf32>
      %63 = arith.mulf %62, %61 : vector<8x128xf32>
      %cst_54 = arith.constant 5.000000e-01 : f32
      %64 = vector.broadcast %cst_54 : f32 to vector<8x128xf32>
      %65 = arith.addf %63, %64 : vector<8x128xf32>
      %66 = arith.mulf %55, %arg23 : vector<8x128xf32>
      %67 = arith.mulf %47, %57 : vector<8x128xf32>
      %68 = arith.addf %66, %67 : vector<8x128xf32>
      %69 = math.tanh %68 : vector<8x128xf32>
      %70 = arith.mulf %65, %69 : vector<8x128xf32>
      %71 = tpu.concatenate %arg20, %arg21 in 1 : vector<8x128xf32>, vector<8x128xf32> -> vector<8x256xf32>
      %c0_55 = arith.constant 0 : index
      %c0_56 = arith.constant 0 : index
      %72 = vector.load %arg4[%c0_55, %c0_56] : memref<256x512xf32, #tpu.memory_space<vmem>>, vector<256x512xf32>
      %cst_57 = arith.constant dense<0.000000e+00> : vector<8x512xf32>
      %73 = tpu.matmul %71, %72, %cst_57 {dimension_numbers = #tpu.dot_dimension_numbers<[1], [0], [0], [1], [0, 0, 1, 1], [], []>} : vector<8x256xf32>, vector<256x512xf32>, vector<8x512xf32> -> vector<8x512xf32>
      %74 = arith.addf %73, %8 : vector<8x512xf32>
      %75 = vector.extract_strided_slice %74 {offsets = [0, 0], sizes = [8, 128], strides = [1, 1]} : vector<8x512xf32> to vector<8x128xf32>
      %cst_58 = arith.constant 5.000000e-01 : f32
      %76 = vector.broadcast %cst_58 : f32 to vector<8x128xf32>
      %77 = arith.mulf %76, %75 : vector<8x128xf32>
      %78 = math.tanh %77 : vector<8x128xf32>
      %cst_59 = arith.constant 5.000000e-01 : f32
      %79 = vector.broadcast %cst_59 : f32 to vector<8x128xf32>
      %80 = arith.mulf %79, %78 : vector<8x128xf32>
      %cst_60 = arith.constant 5.000000e-01 : f32
      %81 = vector.broadcast %cst_60 : f32 to vector<8x128xf32>
      %82 = arith.addf %80, %81 : vector<8x128xf32>
      %83 = vector.extract_strided_slice %74 {offsets = [0, 128], sizes = [8, 128], strides = [1, 1]} : vector<8x512xf32> to vector<8x128xf32>
      %cst_61 = arith.constant 5.000000e-01 : f32
      %84 = vector.broadcast %cst_61 : f32 to vector<8x128xf32>
      %85 = arith.mulf %84, %83 : vector<8x128xf32>
      %86 = math.tanh %85 : vector<8x128xf32>
      %cst_62 = arith.constant 5.000000e-01 : f32
      %87 = vector.broadcast %cst_62 : f32 to vector<8x128xf32>
      %88 = arith.mulf %87, %86 : vector<8x128xf32>
      %cst_63 = arith.constant 5.000000e-01 : f32
      %89 = vector.broadcast %cst_63 : f32 to vector<8x128xf32>
      %90 = arith.addf %88, %89 : vector<8x128xf32>
      %91 = vector.extract_strided_slice %74 {offsets = [0, 256], sizes = [8, 128], strides = [1, 1]} : vector<8x512xf32> to vector<8x128xf32>
      %92 = math.tanh %91 : vector<8x128xf32>
      %93 = vector.extract_strided_slice %74 {offsets = [0, 384], sizes = [8, 128], strides = [1, 1]} : vector<8x512xf32> to vector<8x128xf32>
      %cst_64 = arith.constant 5.000000e-01 : f32
      %94 = vector.broadcast %cst_64 : f32 to vector<8x128xf32>
      %95 = arith.mulf %94, %93 : vector<8x128xf32>
      %96 = math.tanh %95 : vector<8x128xf32>
      %cst_65 = arith.constant 5.000000e-01 : f32
      %97 = vector.broadcast %cst_65 : f32 to vector<8x128xf32>
      %98 = arith.mulf %97, %96 : vector<8x128xf32>
      %cst_66 = arith.constant 5.000000e-01 : f32
      %99 = vector.broadcast %cst_66 : f32 to vector<8x128xf32>
      %100 = arith.addf %98, %99 : vector<8x128xf32>
      %101 = arith.mulf %90, %arg24 : vector<8x128xf32>
      %102 = arith.mulf %82, %92 : vector<8x128xf32>
      %103 = arith.addf %101, %102 : vector<8x128xf32>
      %104 = math.tanh %103 : vector<8x128xf32>
      %105 = arith.mulf %100, %104 : vector<8x128xf32>
      %106 = tpu.concatenate %arg21, %arg22 in 1 : vector<8x128xf32>, vector<8x128xf32> -> vector<8x256xf32>
      %c0_67 = arith.constant 0 : index
      %c0_68 = arith.constant 0 : index
      %107 = vector.load %arg5[%c0_67, %c0_68] : memref<256x512xf32, #tpu.memory_space<vmem>>, vector<256x512xf32>
      %cst_69 = arith.constant dense<0.000000e+00> : vector<8x512xf32>
      %108 = tpu.matmul %106, %107, %cst_69 {dimension_numbers = #tpu.dot_dimension_numbers<[1], [0], [0], [1], [0, 0, 1, 1], [], []>} : vector<8x256xf32>, vector<256x512xf32>, vector<8x512xf32> -> vector<8x512xf32>
      %109 = arith.addf %108, %11 : vector<8x512xf32>
      %110 = vector.extract_strided_slice %109 {offsets = [0, 0], sizes = [8, 128], strides = [1, 1]} : vector<8x512xf32> to vector<8x128xf32>
      %cst_70 = arith.constant 5.000000e-01 : f32
      %111 = vector.broadcast %cst_70 : f32 to vector<8x128xf32>
      %112 = arith.mulf %111, %110 : vector<8x128xf32>
      %113 = math.tanh %112 : vector<8x128xf32>
      %cst_71 = arith.constant 5.000000e-01 : f32
      %114 = vector.broadcast %cst_71 : f32 to vector<8x128xf32>
      %115 = arith.mulf %114, %113 : vector<8x128xf32>
      %cst_72 = arith.constant 5.000000e-01 : f32
      %116 = vector.broadcast %cst_72 : f32 to vector<8x128xf32>
      %117 = arith.addf %115, %116 : vector<8x128xf32>
      %118 = vector.extract_strided_slice %109 {offsets = [0, 128], sizes = [8, 128], strides = [1, 1]} : vector<8x512xf32> to vector<8x128xf32>
      %cst_73 = arith.constant 5.000000e-01 : f32
      %119 = vector.broadcast %cst_73 : f32 to vector<8x128xf32>
      %120 = arith.mulf %119, %118 : vector<8x128xf32>
      %121 = math.tanh %120 : vector<8x128xf32>
      %cst_74 = arith.constant 5.000000e-01 : f32
      %122 = vector.broadcast %cst_74 : f32 to vector<8x128xf32>
      %123 = arith.mulf %122, %121 : vector<8x128xf32>
      %cst_75 = arith.constant 5.000000e-01 : f32
      %124 = vector.broadcast %cst_75 : f32 to vector<8x128xf32>
      %125 = arith.addf %123, %124 : vector<8x128xf32>
      %126 = vector.extract_strided_slice %109 {offsets = [0, 256], sizes = [8, 128], strides = [1, 1]} : vector<8x512xf32> to vector<8x128xf32>
      %127 = math.tanh %126 : vector<8x128xf32>
      %128 = vector.extract_strided_slice %109 {offsets = [0, 384], sizes = [8, 128], strides = [1, 1]} : vector<8x512xf32> to vector<8x128xf32>
      %cst_76 = arith.constant 5.000000e-01 : f32
      %129 = vector.broadcast %cst_76 : f32 to vector<8x128xf32>
      %130 = arith.mulf %129, %128 : vector<8x128xf32>
      %131 = math.tanh %130 : vector<8x128xf32>
      %cst_77 = arith.constant 5.000000e-01 : f32
      %132 = vector.broadcast %cst_77 : f32 to vector<8x128xf32>
      %133 = arith.mulf %132, %131 : vector<8x128xf32>
      %cst_78 = arith.constant 5.000000e-01 : f32
      %134 = vector.broadcast %cst_78 : f32 to vector<8x128xf32>
      %135 = arith.addf %133, %134 : vector<8x128xf32>
      %136 = arith.mulf %125, %arg25 : vector<8x128xf32>
      %137 = arith.mulf %117, %127 : vector<8x128xf32>
      %138 = arith.addf %136, %137 : vector<8x128xf32>
      %139 = math.tanh %138 : vector<8x128xf32>
      %140 = arith.mulf %135, %139 : vector<8x128xf32>
      %c0_79 = arith.constant 0 : index
      %c0_80 = arith.constant 0 : index
      %141 = vector.load %arg6[%c0_79, %c0_80] : memref<128x128xf32, #tpu.memory_space<vmem>>, vector<128x128xf32>
      %cst_81 = arith.constant dense<0.000000e+00> : vector<8x128xf32>
      %142 = tpu.matmul %140, %141, %cst_81 {dimension_numbers = #tpu.dot_dimension_numbers<[1], [0], [0], [1], [0, 0, 1, 1], [], []>} : vector<8x128xf32>, vector<128x128xf32>, vector<8x128xf32> -> vector<8x128xf32>
      %143 = arith.addf %142, %14 : vector<8x128xf32>
      %144 = arith.index_cast %arg19 : i32 to index
      %c0_82 = arith.constant 0 : index
      %c0_83 = arith.constant 0 : index
      %145 = vector.load %arg11[%144, %c0_82, %c0_83] : memref<4x8x128xf32, #tpu.memory_space<vmem>>, vector<1x8x128xf32>
      %146 = vector.shape_cast %145 : vector<1x8x128xf32> to vector<8x128xf32>
      %147 = vector.shape_cast %143 : vector<8x128xf32> to vector<1x8x128xf32>
      tpu.vector_store %arg11[%144, %c0_82, %c0_83], %147 {strides = array<i32>} : memref<4x8x128xf32, #tpu.memory_space<vmem>>, vector<1x8x128xf32>,
      scf.yield %70, %105, %140, %68, %103, %138, %143 : vector<8x128xf32>, vector<8x128xf32>, vector<8x128xf32>, vector<8x128xf32>, vector<8x128xf32>, vector<8x128xf32>, vector<8x128xf32>
    }
    %c2_i32_23 = arith.constant 2 : i32
    %c2_i32_24 = arith.constant 2 : i32
    %c2_i32_25 = arith.constant 2 : i32
    %24 = arith.addi %c2_i32_24, %c2_i32_25 : i32
    %c1_i32_26 = arith.constant 1 : i32
    %25:7 = scf.for %arg19 = %c2_i32_24 to %24 step %c1_i32_26 iter_args(%arg20 = %23#0, %arg21 = %23#1, %arg22 = %23#2, %arg23 = %23#3, %arg24 = %23#4, %arg25 = %23#5, %arg26 = %23#6) -> (vector<8x128xf32>, vector<8x128xf32>, vector<8x128xf32>, vector<8x128xf32>, vector<8x128xf32>, vector<8x128xf32>, vector<8x128xf32>)  : i32 {
      %33 = tpu.concatenate %arg26, %arg20 in 1 : vector<8x128xf32>, vector<8x128xf32> -> vector<8x256xf32>
      %c0_42 = arith.constant 0 : index
      %c0_43 = arith.constant 0 : index
      %34 = vector.load %arg3[%c0_42, %c0_43] : memref<256x512xf32, #tpu.memory_space<vmem>>, vector<256x512xf32>
      %cst = arith.constant dense<0.000000e+00> : vector<8x512xf32>
      %35 = tpu.matmul %33, %34, %cst {dimension_numbers = #tpu.dot_dimension_numbers<[1], [0], [0], [1], [0, 0, 1, 1], [], []>} : vector<8x256xf32>, vector<256x512xf32>, vector<8x512xf32> -> vector<8x512xf32>
      %36 = arith.addf %35, %5 : vector<8x512xf32>
      %37 = vector.extract_strided_slice %36 {offsets = [0, 0], sizes = [8, 128], strides = [1, 1]} : vector<8x512xf32> to vector<8x128xf32>
      %cst_44 = arith.constant 5.000000e-01 : f32
      %38 = vector.broadcast %cst_44 : f32 to vector<8x128xf32>
      %39 = arith.mulf %38, %37 : vector<8x128xf32>
      %40 = math.tanh %39 : vector<8x128xf32>
      %cst_45 = arith.constant 5.000000e-01 : f32
      %41 = vector.broadcast %cst_45 : f32 to vector<8x128xf32>
      %42 = arith.mulf %41, %40 : vector<8x128xf32>
      %cst_46 = arith.constant 5.000000e-01 : f32
      %43 = vector.broadcast %cst_46 : f32 to vector<8x128xf32>
      %44 = arith.addf %42, %43 : vector<8x128xf32>
      %45 = vector.extract_strided_slice %36 {offsets = [0, 128], sizes = [8, 128], strides = [1, 1]} : vector<8x512xf32> to vector<8x128xf32>
      %cst_47 = arith.constant 5.000000e-01 : f32
      %46 = vector.broadcast %cst_47 : f32 to vector<8x128xf32>
      %47 = arith.mulf %46, %45 : vector<8x128xf32>
      %48 = math.tanh %47 : vector<8x128xf32>
      %cst_48 = arith.constant 5.000000e-01 : f32
      %49 = vector.broadcast %cst_48 : f32 to vector<8x128xf32>
      %50 = arith.mulf %49, %48 : vector<8x128xf32>
      %cst_49 = arith.constant 5.000000e-01 : f32
      %51 = vector.broadcast %cst_49 : f32 to vector<8x128xf32>
      %52 = arith.addf %50, %51 : vector<8x128xf32>
      %53 = vector.extract_strided_slice %36 {offsets = [0, 256], sizes = [8, 128], strides = [1, 1]} : vector<8x512xf32> to vector<8x128xf32>
      %54 = math.tanh %53 : vector<8x128xf32>
      %55 = vector.extract_strided_slice %36 {offsets = [0, 384], sizes = [8, 128], strides = [1, 1]} : vector<8x512xf32> to vector<8x128xf32>
      %cst_50 = arith.constant 5.000000e-01 : f32
      %56 = vector.broadcast %cst_50 : f32 to vector<8x128xf32>
      %57 = arith.mulf %56, %55 : vector<8x128xf32>
      %58 = math.tanh %57 : vector<8x128xf32>
      %cst_51 = arith.constant 5.000000e-01 : f32
      %59 = vector.broadcast %cst_51 : f32 to vector<8x128xf32>
      %60 = arith.mulf %59, %58 : vector<8x128xf32>
      %cst_52 = arith.constant 5.000000e-01 : f32
      %61 = vector.broadcast %cst_52 : f32 to vector<8x128xf32>
      %62 = arith.addf %60, %61 : vector<8x128xf32>
      %63 = arith.mulf %52, %arg23 : vector<8x128xf32>
      %64 = arith.mulf %44, %54 : vector<8x128xf32>
      %65 = arith.addf %63, %64 : vector<8x128xf32>
      %66 = math.tanh %65 : vector<8x128xf32>
      %67 = arith.mulf %62, %66 : vector<8x128xf32>
      %68 = tpu.concatenate %arg20, %arg21 in 1 : vector<8x128xf32>, vector<8x128xf32> -> vector<8x256xf32>
      %c0_53 = arith.constant 0 : index
      %c0_54 = arith.constant 0 : index
      %69 = vector.load %arg4[%c0_53, %c0_54] : memref<256x512xf32, #tpu.memory_space<vmem>>, vector<256x512xf32>
      %cst_55 = arith.constant dense<0.000000e+00> : vector<8x512xf32>
      %70 = tpu.matmul %68, %69, %cst_55 {dimension_numbers = #tpu.dot_dimension_numbers<[1], [0], [0], [1], [0, 0, 1, 1], [], []>} : vector<8x256xf32>, vector<256x512xf32>, vector<8x512xf32> -> vector<8x512xf32>
      %71 = arith.addf %70, %8 : vector<8x512xf32>
      %72 = vector.extract_strided_slice %71 {offsets = [0, 0], sizes = [8, 128], strides = [1, 1]} : vector<8x512xf32> to vector<8x128xf32>
      %cst_56 = arith.constant 5.000000e-01 : f32
      %73 = vector.broadcast %cst_56 : f32 to vector<8x128xf32>
      %74 = arith.mulf %73, %72 : vector<8x128xf32>
      %75 = math.tanh %74 : vector<8x128xf32>
      %cst_57 = arith.constant 5.000000e-01 : f32
      %76 = vector.broadcast %cst_57 : f32 to vector<8x128xf32>
      %77 = arith.mulf %76, %75 : vector<8x128xf32>
      %cst_58 = arith.constant 5.000000e-01 : f32
      %78 = vector.broadcast %cst_58 : f32 to vector<8x128xf32>
      %79 = arith.addf %77, %78 : vector<8x128xf32>
      %80 = vector.extract_strided_slice %71 {offsets = [0, 128], sizes = [8, 128], strides = [1, 1]} : vector<8x512xf32> to vector<8x128xf32>
      %cst_59 = arith.constant 5.000000e-01 : f32
      %81 = vector.broadcast %cst_59 : f32 to vector<8x128xf32>
      %82 = arith.mulf %81, %80 : vector<8x128xf32>
      %83 = math.tanh %82 : vector<8x128xf32>
      %cst_60 = arith.constant 5.000000e-01 : f32
      %84 = vector.broadcast %cst_60 : f32 to vector<8x128xf32>
      %85 = arith.mulf %84, %83 : vector<8x128xf32>
      %cst_61 = arith.constant 5.000000e-01 : f32
      %86 = vector.broadcast %cst_61 : f32 to vector<8x128xf32>
      %87 = arith.addf %85, %86 : vector<8x128xf32>
      %88 = vector.extract_strided_slice %71 {offsets = [0, 256], sizes = [8, 128], strides = [1, 1]} : vector<8x512xf32> to vector<8x128xf32>
      %89 = math.tanh %88 : vector<8x128xf32>
      %90 = vector.extract_strided_slice %71 {offsets = [0, 384], sizes = [8, 128], strides = [1, 1]} : vector<8x512xf32> to vector<8x128xf32>
      %cst_62 = arith.constant 5.000000e-01 : f32
      %91 = vector.broadcast %cst_62 : f32 to vector<8x128xf32>
      %92 = arith.mulf %91, %90 : vector<8x128xf32>
      %93 = math.tanh %92 : vector<8x128xf32>
      %cst_63 = arith.constant 5.000000e-01 : f32
      %94 = vector.broadcast %cst_63 : f32 to vector<8x128xf32>
      %95 = arith.mulf %94, %93 : vector<8x128xf32>
      %cst_64 = arith.constant 5.000000e-01 : f32
      %96 = vector.broadcast %cst_64 : f32 to vector<8x128xf32>
      %97 = arith.addf %95, %96 : vector<8x128xf32>
      %98 = arith.mulf %87, %arg24 : vector<8x128xf32>
      %99 = arith.mulf %79, %89 : vector<8x128xf32>
      %100 = arith.addf %98, %99 : vector<8x128xf32>
      %101 = math.tanh %100 : vector<8x128xf32>
      %102 = arith.mulf %97, %101 : vector<8x128xf32>
      %103 = tpu.concatenate %arg21, %arg22 in 1 : vector<8x128xf32>, vector<8x128xf32> -> vector<8x256xf32>
      %c0_65 = arith.constant 0 : index
      %c0_66 = arith.constant 0 : index
      %104 = vector.load %arg5[%c0_65, %c0_66] : memref<256x512xf32, #tpu.memory_space<vmem>>, vector<256x512xf32>
      %cst_67 = arith.constant dense<0.000000e+00> : vector<8x512xf32>
      %105 = tpu.matmul %103, %104, %cst_67 {dimension_numbers = #tpu.dot_dimension_numbers<[1], [0], [0], [1], [0, 0, 1, 1], [], []>} : vector<8x256xf32>, vector<256x512xf32>, vector<8x512xf32> -> vector<8x512xf32>
      %106 = arith.addf %105, %11 : vector<8x512xf32>
      %107 = vector.extract_strided_slice %106 {offsets = [0, 0], sizes = [8, 128], strides = [1, 1]} : vector<8x512xf32> to vector<8x128xf32>
      %cst_68 = arith.constant 5.000000e-01 : f32
      %108 = vector.broadcast %cst_68 : f32 to vector<8x128xf32>
      %109 = arith.mulf %108, %107 : vector<8x128xf32>
      %110 = math.tanh %109 : vector<8x128xf32>
      %cst_69 = arith.constant 5.000000e-01 : f32
      %111 = vector.broadcast %cst_69 : f32 to vector<8x128xf32>
      %112 = arith.mulf %111, %110 : vector<8x128xf32>
      %cst_70 = arith.constant 5.000000e-01 : f32
      %113 = vector.broadcast %cst_70 : f32 to vector<8x128xf32>
      %114 = arith.addf %112, %113 : vector<8x128xf32>
      %115 = vector.extract_strided_slice %106 {offsets = [0, 128], sizes = [8, 128], strides = [1, 1]} : vector<8x512xf32> to vector<8x128xf32>
      %cst_71 = arith.constant 5.000000e-01 : f32
      %116 = vector.broadcast %cst_71 : f32 to vector<8x128xf32>
      %117 = arith.mulf %116, %115 : vector<8x128xf32>
      %118 = math.tanh %117 : vector<8x128xf32>
      %cst_72 = arith.constant 5.000000e-01 : f32
      %119 = vector.broadcast %cst_72 : f32 to vector<8x128xf32>
      %120 = arith.mulf %119, %118 : vector<8x128xf32>
      %cst_73 = arith.constant 5.000000e-01 : f32
      %121 = vector.broadcast %cst_73 : f32 to vector<8x128xf32>
      %122 = arith.addf %120, %121 : vector<8x128xf32>
      %123 = vector.extract_strided_slice %106 {offsets = [0, 256], sizes = [8, 128], strides = [1, 1]} : vector<8x512xf32> to vector<8x128xf32>
      %124 = math.tanh %123 : vector<8x128xf32>
      %125 = vector.extract_strided_slice %106 {offsets = [0, 384], sizes = [8, 128], strides = [1, 1]} : vector<8x512xf32> to vector<8x128xf32>
      %cst_74 = arith.constant 5.000000e-01 : f32
      %126 = vector.broadcast %cst_74 : f32 to vector<8x128xf32>
      %127 = arith.mulf %126, %125 : vector<8x128xf32>
      %128 = math.tanh %127 : vector<8x128xf32>
      %cst_75 = arith.constant 5.000000e-01 : f32
      %129 = vector.broadcast %cst_75 : f32 to vector<8x128xf32>
      %130 = arith.mulf %129, %128 : vector<8x128xf32>
      %cst_76 = arith.constant 5.000000e-01 : f32
      %131 = vector.broadcast %cst_76 : f32 to vector<8x128xf32>
      %132 = arith.addf %130, %131 : vector<8x128xf32>
      %133 = arith.mulf %122, %arg25 : vector<8x128xf32>
      %134 = arith.mulf %114, %124 : vector<8x128xf32>
      %135 = arith.addf %133, %134 : vector<8x128xf32>
      %136 = math.tanh %135 : vector<8x128xf32>
      %137 = arith.mulf %132, %136 : vector<8x128xf32>
      %c0_77 = arith.constant 0 : index
      %c0_78 = arith.constant 0 : index
      %138 = vector.load %arg6[%c0_77, %c0_78] : memref<128x128xf32, #tpu.memory_space<vmem>>, vector<128x128xf32>
      %cst_79 = arith.constant dense<0.000000e+00> : vector<8x128xf32>
      %139 = tpu.matmul %137, %138, %cst_79 {dimension_numbers = #tpu.dot_dimension_numbers<[1], [0], [0], [1], [0, 0, 1, 1], [], []>} : vector<8x128xf32>, vector<128x128xf32>, vector<8x128xf32> -> vector<8x128xf32>
      %140 = arith.addf %139, %14 : vector<8x128xf32>
      %141 = arith.index_cast %arg19 : i32 to index
      %c0_80 = arith.constant 0 : index
      %c0_81 = arith.constant 0 : index
      %142 = vector.load %arg11[%141, %c0_80, %c0_81] : memref<4x8x128xf32, #tpu.memory_space<vmem>>, vector<1x8x128xf32>
      %143 = vector.shape_cast %142 : vector<1x8x128xf32> to vector<8x128xf32>
      %144 = vector.shape_cast %140 : vector<8x128xf32> to vector<1x8x128xf32>
      tpu.vector_store %arg11[%141, %c0_80, %c0_81], %144 {strides = array<i32>} : memref<4x8x128xf32, #tpu.memory_space<vmem>>, vector<1x8x128xf32>,
      scf.yield %67, %102, %137, %65, %100, %135, %140 : vector<8x128xf32>, vector<8x128xf32>, vector<8x128xf32>, vector<8x128xf32>, vector<8x128xf32>, vector<8x128xf32>, vector<8x128xf32>
    }
    %c2_i32_27 = arith.constant 2 : i32
    %c0_28 = arith.constant 0 : index
    %c0_29 = arith.constant 0 : index
    %26 = vector.load %arg12[%c0_28, %c0_29] : memref<8x128xf32, #tpu.memory_space<vmem>>, vector<8x128xf32>
    tpu.vector_store %arg12[%c0_28, %c0_29], %25#0 {strides = array<i32>} : memref<8x128xf32, #tpu.memory_space<vmem>>, vector<8x128xf32>,
    %c0_30 = arith.constant 0 : index
    %c0_31 = arith.constant 0 : index
    %27 = vector.load %arg13[%c0_30, %c0_31] : memref<8x128xf32, #tpu.memory_space<vmem>>, vector<8x128xf32>
    tpu.vector_store %arg13[%c0_30, %c0_31], %25#1 {strides = array<i32>} : memref<8x128xf32, #tpu.memory_space<vmem>>, vector<8x128xf32>,
    %c0_32 = arith.constant 0 : index
    %c0_33 = arith.constant 0 : index
    %28 = vector.load %arg14[%c0_32, %c0_33] : memref<8x128xf32, #tpu.memory_space<vmem>>, vector<8x128xf32>
    tpu.vector_store %arg14[%c0_32, %c0_33], %25#2 {strides = array<i32>} : memref<8x128xf32, #tpu.memory_space<vmem>>, vector<8x128xf32>,
    %c0_34 = arith.constant 0 : index
    %c0_35 = arith.constant 0 : index
    %29 = vector.load %arg15[%c0_34, %c0_35] : memref<8x128xf32, #tpu.memory_space<vmem>>, vector<8x128xf32>
    tpu.vector_store %arg15[%c0_34, %c0_35], %25#3 {strides = array<i32>} : memref<8x128xf32, #tpu.memory_space<vmem>>, vector<8x128xf32>,
    %c0_36 = arith.constant 0 : index
    %c0_37 = arith.constant 0 : index
    %30 = vector.load %arg16[%c0_36, %c0_37] : memref<8x128xf32, #tpu.memory_space<vmem>>, vector<8x128xf32>
    tpu.vector_store %arg16[%c0_36, %c0_37], %25#4 {strides = array<i32>} : memref<8x128xf32, #tpu.memory_space<vmem>>, vector<8x128xf32>,
    %c0_38 = arith.constant 0 : index
    %c0_39 = arith.constant 0 : index
    %31 = vector.load %arg17[%c0_38, %c0_39] : memref<8x128xf32, #tpu.memory_space<vmem>>, vector<8x128xf32>
    tpu.vector_store %arg17[%c0_38, %c0_39], %25#5 {strides = array<i32>} : memref<8x128xf32, #tpu.memory_space<vmem>>, vector<8x128xf32>,
    %c0_40 = arith.constant 0 : index
    %c0_41 = arith.constant 0 : index
    %32 = vector.load %arg18[%c0_40, %c0_41] : memref<8x128xf32, #tpu.memory_space<vmem>>, vector<8x128xf32>
    tpu.vector_store %arg18[%c0_40, %c0_41], %25#6 {strides = array<i32>} : memref<8x128xf32, #tpu.memory_space<vmem>>, vector<8x128xf32>,
    return
  }
  func.func @transform_0(%arg0: i32, %arg1: i32) -> (i32, i32, i32) {
    %c0_i32 = arith.constant 0 : i32
    %c0_i32_0 = arith.constant 0 : i32
    return %arg1, %arg0, %c0_i32 : i32, i32, i32
  }
  func.func @transform_1(%arg0: i32, %arg1: i32) -> (i32, i32) {
    %c0_i32 = arith.constant 0 : i32
    %c0_i32_0 = arith.constant 0 : i32
    %c0_i32_1 = arith.constant 0 : i32
    return %c0_i32, %c0_i32_0 : i32, i32
  }
  func.func @transform_2(%arg0: i32, %arg1: i32) -> (i32, i32) {
    %c0_i32 = arith.constant 0 : i32
    %c0_i32_0 = arith.constant 0 : i32
    %c0_i32_1 = arith.constant 0 : i32
    return %c0_i32, %c0_i32_0 : i32, i32
  }
  func.func @transform_3(%arg0: i32, %arg1: i32) -> (i32, i32) {
    %c0_i32 = arith.constant 0 : i32
    %c0_i32_0 = arith.constant 0 : i32
    %c0_i32_1 = arith.constant 0 : i32
    return %c0_i32, %c0_i32_0 : i32, i32
  }
  func.func @transform_4(%arg0: i32, %arg1: i32) -> (i32, i32) {
    %c0_i32 = arith.constant 0 : i32
    %c0_i32_0 = arith.constant 0 : i32
    %c0_i32_1 = arith.constant 0 : i32
    return %c0_i32, %c0_i32_0 : i32, i32
  }
  func.func @transform_5(%arg0: i32, %arg1: i32) -> (i32, i32) {
    %c0_i32 = arith.constant 0 : i32
    %c0_i32_0 = arith.constant 0 : i32
    %c0_i32_1 = arith.constant 0 : i32
    return %c0_i32, %c0_i32_0 : i32, i32
  }
  func.func @transform_6(%arg0: i32, %arg1: i32) -> (i32, i32) {
    %c0_i32 = arith.constant 0 : i32
    %c0_i32_0 = arith.constant 0 : i32
    %c0_i32_1 = arith.constant 0 : i32
    return %c0_i32, %c0_i32_0 : i32, i32
  }
  func.func @transform_7(%arg0: i32, %arg1: i32) -> (i32, i32) {
    %c0_i32 = arith.constant 0 : i32
    %c0_i32_0 = arith.constant 0 : i32
    %c0_i32_1 = arith.constant 0 : i32
    return %c0_i32, %c0_i32_0 : i32, i32
  }
  func.func @transform_8(%arg0: i32, %arg1: i32) -> (i32, i32) {
    %c0_i32 = arith.constant 0 : i32
    %c0_i32_0 = arith.constant 0 : i32
    %c0_i32_1 = arith.constant 0 : i32
    return %c0_i32, %c0_i32_0 : i32, i32
  }
  func.func @transform_9(%arg0: i32, %arg1: i32) -> (i32, i32, i32) {
    %c0_i32 = arith.constant 0 : i32
    %c0_i32_0 = arith.constant 0 : i32
    return %arg1, %arg0, %c0_i32 : i32, i32, i32
  }
}

</mosaic_0001>

<bundles_post_ra>
// kernel: tpu_custom_call.1
= control target key start
LH: loop header
LB: loop body
LE: loop exit
PB: predicated region body
PF: predicated region fallthrough
CT: control target
= control target key end

     0   :  { %s4869_s0 = inlined_call_operand.hbm [shape: f32[8,8,128], index: 0, kind: input, shape index: {}]   ;;  %s4870_s1 = inlined_call_operand.hbm [shape: f32[256,512], index: 1, kind: input, shape index: {}]   ;;  %s4871_s2 = inlined_call_operand.hbm [shape: f32[256,512], index: 2, kind: input, shape index: {}]   ;;  %s4872_s3 = inlined_call_operand.hbm [shape: f32[256,512], index: 3, kind: input, shape index: {}]   ;;  %s4873_s4 = inlined_call_operand.hbm [shape: f32[128,128], index: 4, kind: input, shape index: {}]   ;;  %s4874_s5 = inlined_call_operand.vmem [shape: f32[1,512], index: 5, kind: input, shape index: {}]   ;;  %s4875_s6 = inlined_call_operand.vmem [shape: f32[1,512], index: 6, kind: input, shape index: {}]   ;;  %s4876_s7 = inlined_call_operand.vmem [shape: f32[1,512], index: 7, kind: input, shape index: {}]   ;;  %s4877_s8 = inlined_call_operand.vmem [shape: f32[1,128], index: 8, kind: input, shape index: {}]   ;;  %s4878_s9 = inlined_call_operand.hbm [shape: f32[8,8,128], index: 9, kind: output, shape index: {}]  }
   0x1   :  { %4886 = sst [smem:[#allocation25_spill]] %s4874_s5 }
   0x2   :  { %4887 = sst [smem:[#allocation26_spill]] %s4875_s6 }
   0x3   :  { %4888 = sst [smem:[#allocation27_spill]] %s4876_s7 }
   0x4   :  { %4889 = sst [smem:[#allocation28_spill]] %s4878_s9 }
   0x5   :  { %14 = vsyncpa [#allocation10], 0 }
   0x6   :  { %16 = vsyncpa [#allocation10 + $0x1], 0 }
   0x7   :  { %17 = vsyncpa [#allocation13], 0 }
   0x8   :  { %18 = vsyncpa [#allocation16], 0 }
   0x9   :  { %19 = vsyncpa [#allocation11], 0 }
   0xa   :  { %21 = vsyncpa [#allocation11 + $0x1], 0  ;;  %s4324_s30 = smov 0   ;;  %s4326_s10 = smov 0  }
   0xb   :  { %s4328_s11 = smov 0   ;;  %s4330_s12 = smov 0  }
   0xc   :  { %s4332_s13 = smov 0   ;;  %s4334_s14 = smov 0  }
   0xd LB: > { %4890 = sst [smem:[#allocation23_spill]] %s4173_s30  ;;  %s2656_s15 = sadd.s32 4294967295, %s4193_s14   ;;  %s4193_s14 = sphi %s4334_s14, %s27_s14   ;;  %s4189_s13 = sphi %s4332_s13, %s4933_s13   ;;  %s4185_s12 = sphi %s4330_s12, %s4932_s12   ;;  %s4181_s11 = sphi %s4328_s11, %s4931_s11   ;;  %s4177_s10 = sphi %s4326_s10, %s4930_s10   ;;  %s4173_s30 = sphi %s4324_s30, %s4929_s30  }
   0xe   : > { %s2657_s16 = sadd.s32 4294967294, %s4193_s14   ;;  %p61_p0 = scmp.ne.s32.totalorder %s4177_s10, %s4173_s30 }
   0xf   : > { %p4358_p1 = scmp.eq.s32.totalorder %s2656_s15, 0  ;;  %p4362_p2 = scmp.eq.s32.totalorder %s2656_s15, 1 }
  0x10   : > { %p261_p3 = scmp.eq.s32.totalorder %s2657_s16, 1  ;;  %p2658_p5 = scmp.ge.s32.totalorder %s4193_s14, 1 }
  0x11   : > { %s4891_s17 = scalar_select %p4358_p1, 1, 0 }
  0x12   : > { %s4892_s18 = scalar_select %p4362_p2, 1, 0 }
  0x13   : > { %p4368_p4 = por %p4358_p1, %p61_p0  ;;  %p4373_p6 = por %p261_p3, %p61_p0 }
  0x14   : > { %p268_p7 = scmp.lt.s32.totalorder %s4193_s14, 3  ;;  %s4255_s22 = smov [#allocation12]  }
  0x15   : > { %s4893_s19 = scalar_select %p4368_p4, 1, 0 }
  0x16   : > { %s4894_s20 = scalar_select %p4373_p6, 1, 0 }
  0x17   : > { %p4378_p8 = pnand %p2658_p5, %p268_p7  ;;  %s280_s23 = sshll.u32 %s4255_s22, 4  ;;  %s4382_s23 = int_to_ptr.vmem [resolvable:$true] %s280_s23 }
  0x18   : > { %4895 = sst [smem:[#allocation24_spill]] %s4894_s20  ;;  %s4256_s25 = smov [#allocation15]  }
  0x19   : > { %s4896_s21 = scalar_select %p4378_p8, 1, 0 }
  0x1a   : > { %p3625_p9 = pneg %p4378_p8  ;;  %s306_s26 = sshll.u32 %s4256_s25, 4  ;;  %s4393_s26 = int_to_ptr.vmem [resolvable:$true] %s306_s26 }
  0x1b   : > { %s4257_s27 = smov [#allocation14]   ;;  %s3901_s16 = scalar_lea.hbm %s4870_s1, 16384 }
  0x1c   : > { %p4389_p11 = pnand %p3625_p9, %p4358_p1  ;;  %s4395_s28 = sshll.u32 %s4257_s27, 4  ;;  %s294_s28 = int_to_ptr.vmem [resolvable:$true] %s4395_s28 }
  0x1d   : > { %p3902_p12 = scmp.ne.s32.totalorder %s4870_s1, %s3901_s16  ;;  %p3908_p5 = scmp.lt.u32.totalorder %s3901_s16, %s4870_s1 }
  0x1e   : > { %p4405_p13 = pneg %p4389_p11 }
  0x20   : > { %p3904_p0 = pnand %p4405_p13, %p3902_p12 }
  0x22   : > { %p3905_p3 = pneg %p3904_p0 }
  0x24   : > { %p3910_p7 = pnand %p3908_p5, %p3905_p3 }
  0x26   : > { %3913 = shalt.err (!%p3910_p7)
}
  0x27   : > { %s3914_s20 = scalar_lea.vmem %s4382_s23, 16384  ;;  %p3922_p1 = scmp.lt.s32.totalorder %s4382_s23, %s4382_s23 }
  0x28   : > { %p3915_p9 = scmp.ne.s32.totalorder %s4382_s23, %s3914_s20  ;;  %p3923_p4 = scmp.lt.s32.totalorder %s3914_s20, %s3914_s20 }
  0x2a   : > { %p3917_p10 = pnand %p3915_p9, %p4405_p13  ;;  %p3924_p12 = por %p3923_p4, %p3922_p1 }
  0x2c   : > { %p3918_p6 = pneg %p3917_p10 }
  0x2e   : > { %p3925_p0 = pnand %p3924_p12, %p3918_p6 }
  0x30   : > { %3928 = shalt.err (!%p3925_p0)
}
  0x31   : > { %s4258_s29 = smov 512   ;;  %s4259_s15 = smov 32  }
  0x32   : > { %3628 = dma.hbm_to_vmem [thread:$0]  (!%p4389_p11), %s4870_s1, 16384, %s4382_s23, [#allocation13], %s4258_s29, %s4258_s29, %s4259_s15  }
  0x33   : > { %s3929_s20 = scalar_lea.hbm %s4872_s3, 16384 }
  0x34   : > { %p3930_p1 = scmp.ne.s32.totalorder %s4872_s3, %s3929_s20  ;;  %p3936_p10 = scmp.lt.u32.totalorder %s3929_s20, %s4872_s3 }
  0x36   : > { %p3932_p4 = pnand %p3930_p1, %p4405_p13 }
  0x38   : > { %p3933_p6 = pneg %p3932_p4 }
  0x3a   : > { %p3938_p3 = pnand %p3936_p10, %p3933_p6 }
  0x3c   : > { %3941 = shalt.err (!%p3938_p3)
}
  0x3d   : > { %s3942_s23 = scalar_lea.vmem %s4393_s26, 16384  ;;  %p3950_p12 = scmp.lt.s32.totalorder %s4393_s26, %s4393_s26 }
  0x3e   : > { %p3943_p5 = scmp.ne.s32.totalorder %s4393_s26, %s3942_s23  ;;  %p3951_p0 = scmp.lt.s32.totalorder %s3942_s23, %s3942_s23 }
  0x40   : > { %p3945_p7 = pnand %p3943_p5, %p4405_p13  ;;  %p3952_p1 = por %p3951_p0, %p3950_p12 }
  0x42   : > { %p3946_p9 = pneg %p3945_p7 }
  0x44   : > { %p3953_p4 = pnand %p3952_p1, %p3946_p9 }
  0x46   : > { %3956 = shalt.err (!%p3953_p4)
}
  0x47   : > { %3634 = dma.hbm_to_vmem [thread:$0]  (!%p4389_p11), %s4872_s3, 16384, %s4393_s26, [#allocation16], %s4258_s29, %s4258_s29, %s4259_s15  }
  0x48   : > { %s3957_s16 = scalar_lea.hbm %s4871_s2, 16384 }
  0x49   : > { %p3958_p6 = scmp.ne.s32.totalorder %s4871_s2, %s3957_s16  ;;  %p3964_p5 = scmp.lt.u32.totalorder %s3957_s16, %s4871_s2 }
  0x4b   : > { %p3960_p10 = pnand %p3958_p6, %p4405_p13 }
  0x4d   : > { %p3961_p3 = pneg %p3960_p10 }
  0x4f   : > { %p3966_p7 = pnand %p3964_p5, %p3961_p3 }
  0x51   : > { %3969 = shalt.err (!%p3966_p7)
}
  0x52   : > { %s3970_s23 = scalar_lea.vmem %s294_s28, 16384  ;;  %p3978_p1 = scmp.lt.s32.totalorder %s294_s28, %s294_s28 }
  0x53   : > { %p3971_p9 = scmp.ne.s32.totalorder %s294_s28, %s3970_s23  ;;  %p3979_p4 = scmp.lt.s32.totalorder %s3970_s23, %s3970_s23 }
  0x55   : > { %p3973_p12 = pnand %p3971_p9, %p4405_p13  ;;  %p3980_p8 = por %p3979_p4, %p3978_p1 }
  0x57   : > { %p3974_p0 = pneg %p3973_p12 }
  0x59   : > { %p3981_p2 = pnand %p3980_p8, %p3974_p0 }
  0x5b   : > { %3984 = shalt.err (!%p3981_p2)
}
  0x5c   : > { %3631 = dma.hbm_to_vmem [thread:$0]  (!%p4389_p11), %s4871_s2, 16384, %s294_s28, [#allocation13], %s4258_s29, %s4258_s29, %s4259_s15  }
  0x5d   : > { %s4260_s6 = smov [#allocation17]   ;;  %s3985_s22 = scalar_lea.hbm %s4873_s4, 2048 }
  0x5e   : > { %s319_s7 = sshll.u32 %s4260_s6, 4  ;;  %p3986_p2 = scmp.ne.s32.totalorder %s4873_s4, %s3985_s22  ;;  %s320_s7 = int_to_ptr.vmem [resolvable:$true] %s319_s7 }
  0x5f   : > { %p3992_p10 = scmp.lt.u32.totalorder %s3985_s22, %s4873_s4 }
  0x60   : > { %p3988_p8 = pnand %p3986_p2, %p4405_p13 }
  0x62   : > { %p3989_p6 = pneg %p3988_p8 }
  0x64   : > { %p3994_p3 = pnand %p3992_p10, %p3989_p6 }
  0x66   : > { %3997 = shalt.err (!%p3994_p3)
}
  0x67   : > { %s3998_s28 = scalar_lea.vmem %s320_s7, 2048  ;;  %p4006_p12 = scmp.lt.s32.totalorder %s320_s7, %s320_s7 }
  0x68   : > { %p3999_p5 = scmp.ne.s32.totalorder %s320_s7, %s3998_s28  ;;  %p4007_p0 = scmp.lt.s32.totalorder %s3998_s28, %s3998_s28 }
  0x6a   : > { %p4001_p7 = pnand %p3999_p5, %p4405_p13  ;;  %p4008_p1 = por %p4007_p0, %p4006_p12 }
  0x6c   : > { %p4002_p9 = pneg %p4001_p7 }
  0x6e   : > { %p4009_p4 = pnand %p4008_p1, %p4002_p9 }
  0x70   : > { %4012 = shalt.err (!%p4009_p4)
}
  0x71   : > { %s4261_s29 = smov 128   ;;  %s4262_s30 = smov 8  }
  0x72   : > { %3637 = dma.hbm_to_vmem [thread:$0]  (!%p4389_p11), %s4873_s4, 2048, %s320_s7, [#allocation16], %s4261_s29, %s4261_s29, %s4262_s30  }
  0x73   : > { %s36_s5 = sadd.s32 1, %s4189_s13  ;;  %s48_s6 = sadd.s32 1, %s4181_s11 }
  0x74   : > { %p37_p13 = scmp.ge.s32.totalorder %s36_s5, 2  ;;  %p55_p2 = scmp.ne.s32.totalorder %s4181_s11, %s4177_s10 }
  0x75   : > { %p56_p8 = scmp.eq.s32.totalorder %s4193_s14, 0  ;;  %p3650_p6 = scmp.lt.s32.totalorder %s4193_s14, 2 }
  0x76   : > { %s4935_s5 = smov (%p37_p13, %s36_s5), 0  ;;  %p4899_p3 = scmp.ne.s32.totalorder %s4892_s18, 0 }
  0x77   : > { %p57_p10 = por %p56_p8, %p55_p2  ;;  %s43_s9 = ssub.s32 %s4189_s13, %s4935_s5 }
  0x78   : > { %p4508_p5 = por %p4899_p3, %p55_p2  ;;  %s345_s16 = sand.u32 1, %s4181_s11  }
  0x79   : > { %p46_p7 = scmp.eq.s32.totalorder %s43_s9, 0  ;;  %s2664_s7 = sshll.u32 %s345_s16, 5 }
  0x7a   : > { %s2683_s22 = sshll.u32 %s4189_s13, 9  ;;  %s349_s18 = scalar_lea.vmem [#allocation9], %s2664_s7 }
  0x7b   : > { %s4517_s25 = scalar_select %p46_p7, %s4181_s11, %s48_s6  }
  0x7c   : > { %s4522_s23 = scalar_lea.hbm %s4869_s0, %s2683_s22  ;;  %s357_s28 = sshll.u32 %s349_s18, 4  ;;  %s4530_s28 = int_to_ptr.vmem [resolvable:$true] %s357_s28 }
  0x7d   : > { %p4526_p11 = pnand %p3650_p6, %p57_p10  ;;  %s4532_s26 = scalar_lea.sflag [#allocation10], %s345_s16 }
  0x7e   : > { %s4013_s6 = scalar_lea.hbm %s4522_s23, 512  ;;  %s4018_s22 = scalar_lea.hbm %s4869_s0, 1024 }
  0x7f   : > { %p4014_p9 = scmp.ne.s32.totalorder %s4522_s23, %s4013_s6  ;;  %p4015_p12 = pneg %p4526_p11 }
  0x80   : > { %p4019_p4 = scmp.lt.u32.totalorder %s4522_s23, %s4869_s0  ;;  %p4020_p13 = scmp.lt.u32.totalorder %s4018_s22, %s4013_s6 }
  0x81   : > { %p4016_p0 = pnand %p4015_p12, %p4014_p9  ;;  %p4022_p8 = scmp.lt.u32.totalorder %s4013_s6, %s4522_s23 }
  0x82   : > { %p4021_p2 = por %p4020_p13, %p4019_p4 }
  0x83   : > { %p4017_p1 = pneg %p4016_p0 }
  0x84   : > { %p4023_p6 = por %p4022_p8, %p4021_p2 }
  0x86   : > { %p4024_p10 = pnand %p4023_p6, %p4017_p1 }
  0x88   : > { %4027 = shalt.err (!%p4024_p10)
}
  0x89   : > { %s4028_s16 = scalar_lea.vmem %s4530_s28, 512  ;;  %s4263_s18 = smov [#allocation9]  }
  0x8a   : > { %p4029_p3 = scmp.ne.s32.totalorder %s4530_s28, %s4028_s16  ;;  %s4033_s9 = sshll.u32 %s4263_s18, 4  ;;  %s4034_s9 = int_to_ptr.vmem [resolvable:$false] %s4033_s9 }
  0x8b   : > { %s4035_s7 = scalar_lea.vmem %s4034_s9, 1024  ;;  %p4036_p0 = scmp.lt.s32.totalorder %s4530_s28, %s4034_s9 }
  0x8c   : > { %p4031_p7 = pnand %p4029_p3, %p4015_p12  ;;  %p4037_p4 = scmp.lt.s32.totalorder %s4035_s7, %s4028_s16 }
  0x8e   : > { %p4032_p9 = pneg %p4031_p7  ;;  %p4038_p13 = por %p4037_p4, %p4036_p0 }
  0x90   : > { %p4039_p2 = pnand %p4038_p13, %p4032_p9 }
  0x92   : > { %4042 = shalt.err (!%p4039_p2)
}
  0x93   : > { %3641 = dma.hbm_to_vmem [thread:$0]  (!%p4526_p11), %s4522_s23, 512, %s4530_s28, %s4532_s26, %s4261_s29, %s4261_s29, %s4262_s30  }
  0x94   : > { %p4902_p12 = scmp.ne.s32.totalorder %s4896_s21, 0 }
  0x95   : > { %s4566_s6 = sand.u32 (!%p4902_p12), 1, %s4177_s10   ;;  %p4903_p1 = scmp.ne.s32.totalorder (!%p4902_p12), %s4893_s19, 0 }
  0x96   : > { %369 = sbr.rel (%p4902_p12) target bundleno = 1516 (0x5ec), region = 56  ;;  %s2668_s22 = sshll.u32 (!%p4902_p12), %s4566_s6, 5 }
  0x97   : > { %s372_s27 = scalar_lea.sflag (!%p4902_p12), [#allocation10], %s4566_s6  ;;  %s4570_s20 = scalar_lea.vmem (!%p4902_p12), [#allocation9], %s2668_s22 }
  0x9d   : > { %4156 = dma.done.wait (%p4903_p1), %s372_s27, 512  }
  0x9e   : > { %4158 = vsyncadd (%p4903_p1), %s372_s27, 4294966784  ;;  %p4904_p11 = scmp.ne.s32.totalorder %s4891_s17, 0 }
  0xa0   : > { %4160 = dma.done.wait (%p4904_p11), [#allocation13], 32768  }
  0xa1   : > { %4162 = vsyncadd (%p4904_p11), [#allocation13], 4294934528 }
  0xa2   : > { %4164 = dma.done.wait (%p4904_p11), [#allocation16], 18432  }
  0xa3   : > { %4166 = vsyncadd (%p4904_p11), [#allocation16], 4294948864  ;;  %s4584_s21 = scalar_lea.vmem [#allocation18], %s2668_s22  ;;  %p2674_p8 = scmp.ne.s32.totalorder %s4185_s12, 0 }
  0xa4   : > { %v4264_v0 = vmov (!%p2674_p8), 0.0  }
  0xa5   : > { %431 = sbr.rel (%p2674_p8) target bundleno = 172 (0xac), region = 80  ;;  %432 = vst [vmem:[#allocation2] sm:$0xff] (!%p2674_p8), %v4264_v0  ;;  %433 = vst [vmem:[#allocation3] sm:$0xff] (!%p2674_p8), %v4264_v0 }
  0xa6   : > { %434 = vst [vmem:[#allocation4] sm:$0xff] (!%p2674_p8), %v4264_v0  ;;  %435 = vst [vmem:[#allocation5] sm:$0xff] (!%p2674_p8), %v4264_v0 }
  0xa7   : > { %436 = vst [vmem:[#allocation6] sm:$0xff] (!%p2674_p8), %v4264_v0  ;;  %437 = vst [vmem:[#allocation7] sm:$0xff] (!%p2674_p8), %v4264_v0 }
  0xac PF: > { %v441_v1 = vlaneseq  ;;  %v4590_v2 = vld [vmem:[%s4877_s8] ss:$0 sm:$0xff]  ;;  %v513_v4 = vld [vmem:[#allocation3] sm:$0xff]   ;;  %s4905_s23 = sld [smem:[#allocation25_spill]]  ;;  %s4906_s26 = sld [smem:[#allocation26_spill]] }
  0xad   : > { %v512_v3 = vld [vmem:[#allocation2] sm:$0xff]   ;;  %v514_v6 = vld [vmem:[#allocation4] sm:$0xff]   ;;  %v515_v7 = vld [vmem:[#allocation5] sm:$0xff]   ;;  %s4907_s9 = sld [smem:[#allocation27_spill]]  ;;  %s4637_s7 = smov 0  }
  0xae   : > { %v442_v5 = vshrl.u32 %v441_v1, 7  ;;  %v516_v8 = vld [vmem:[#allocation6] sm:$0xff]   ;;  %v517_v10 = vld [vmem:[#allocation7] sm:$0xff]  }
  0xb0   : > { %v443_v11 = vsub.s32 0, %v442_v5  ;;  %v447_v12 = vsub.s32 1, %v442_v5  ;;  %v451_v13 = vsub.s32 2, %v442_v5  ;;  %v455_v14 = vsub.s32 3, %v442_v5 }
  0xb2   : > { %v439_v9 = vld [vmem:[%s4905_s23] sm:$0xf] }
  0xb3   : > { %v461_v15 = vld [vmem:[%s4906_s26] sm:$0xf]  ;;  %v4601_v17 = vrot.slane %v439_v9, %v443_v11  ;;  %v4603_v18 = vrot.slane %v439_v9, %v447_v12  ;;  %v4605_v19 = vrot.slane %v439_v9, %v451_v13  ;;  %v4607_v20 = vrot.slane %v439_v9, %v455_v14 }
  0xb4   : > { %v483_v16 = vld [vmem:[%s4907_s9] sm:$0xf]  ;;  %v4609_v21 = vrot.slane %v461_v15, %v443_v11  ;;  %v4611_v22 = vrot.slane %v461_v15, %v447_v12  ;;  %v4613_v23 = vrot.slane %v461_v15, %v451_v13  ;;  %v4615_v24 = vrot.slane %v461_v15, %v455_v14 }
  0xb5   : > { %v4617_v25 = vrot.slane %v483_v16, %v443_v11  ;;  %v4619_v26 = vrot.slane %v483_v16, %v447_v12  ;;  %v4621_v27 = vrot.slane %v483_v16, %v451_v13  ;;  %v4623_v28 = vrot.slane %v483_v16, %v455_v14 }
  0xb6 LB: >> { %v536_v29 = vld [vmem:[#allocation12 + $0x8] sm:$0xff]  ;;  %v535_v31 = vld [vmem:[#allocation12] sm:$0xff]  ;;  %v538_v40 = vld [vmem:[#allocation12 + $0x18] sm:$0xff]  ;;  %727 = vmatprep.mubr.f32.mxu0 %v4217_v3  ;;  %798 = vmatprep.mubr.f32.mxu1 %v4217_v3  ;;  %s2676_s22 = sshll.u32 %s4221_s7, 3  ;;  %vm4266_vm0 = vmmov 0   ;;  %s524_s7 = sadd.s32 1, %s4221_s7   ;;  %s4221_s7 = sphi %s4637_s7, %s524_s7   ;;  %v4217_v3 = vphi %v512_v3, %v4915_v3   ;;  %v4213_v4 = vphi %v513_v4, %v4914_v4   ;;  %v4209_v6 = vphi %v514_v6, %v4913_v6   ;;  %v4205_v7 = vphi %v515_v7, %v4912_v7   ;;  %v4201_v8 = vphi %v516_v8, %v4911_v8   ;;  %v4197_v10 = vphi %v517_v10, %v4910_v10  }
  0xb7   : >> { %v540_v30 = vld [vmem:[#allocation12 + $0x28] sm:$0xff]  ;;  %v539_v33 = vld [vmem:[#allocation12 + $0x20] sm:$0xff]  ;;  %v542_v41 = vld [vmem:[#allocation12 + $0x38] sm:$0xff]  ;;  %s533_s27 = scalar_lea.vmem %s4570_s20, %s2676_s22 [#allocation9]  ;;  %s1485_s19 = scalar_lea.vmem %s4584_s21, %s2676_s22 [#allocation18] }
  0xb8   : >> { %v2789_v32 = vpack.c.bf16 %v540_v30, %v536_v29  ;;  %v544_v34 = vld [vmem:[#allocation12 + $0x48] sm:$0xff]  ;;  %v2791_v36 = vpack.c.bf16 %v539_v33, %v535_v31  ;;  %v543_v38 = vld [vmem:[#allocation12 + $0x40] sm:$0xff]  ;;  %v537_v42 = vld [vmem:[#allocation12 + $0x10] sm:$0xff]  ;;  %v2853_v45 = vpack.c.bf16 %v542_v41, %v538_v40  ;;  %p521_p6 = scmp.ge.s32.totalorder %s524_s7, 2  }
  0xb9   : >> { %v548_v35 = vld [vmem:[#allocation12 + $0x68] sm:$0xff]  ;;  %v547_v39 = vld [vmem:[#allocation12 + $0x60] sm:$0xff]  ;;  %v541_v43 = vld [vmem:[#allocation12 + $0x30] sm:$0xff]  ;;  %s4731_s29 = smov (%p521_p6), 2  }
  0xba   : >> { %v2793_v37 = vpack.c.bf16 %v548_v35, %v544_v34  ;;  %2790 = vmatprep.subr.bf16.mxu0 %v2789_v32  ;;  %v2795_v44 = vpack.c.bf16 %v547_v39, %v543_v38  ;;  %v2855_v46 = vpack.c.bf16 %v541_v43, %v537_v42  ;;  %v552_v47 = vld [vmem:[#allocation12 + $0x88] sm:$0xff]  ;;  %v551_v49 = vld [vmem:[#allocation12 + $0x80] sm:$0xff]  ;;  %v546_v52 = vld [vmem:[#allocation12 + $0x58] sm:$0xff]  ;;  %2854 = vmatprep.subr.bf16.mxu1 %v2853_v45 }
  0xbb   : >> { %2792 = vmatpush1.bf16.msra.mxu0 %v2791_v36  ;;  %v556_v48 = vld [vmem:[#allocation12 + $0xa8] sm:$0xff]  ;;  %v555_v51 = vld [vmem:[#allocation12 + $0xa0] sm:$0xff]  ;;  %v550_v53 = vld [vmem:[#allocation12 + $0x78] sm:$0xff] }
  0xbc   : >> { %2794 = vmatprep.subr.bf16.mxu0 %v2793_v37  ;;  %v2797_v50 = vpack.c.bf16 %v556_v48, %v552_v47  ;;  %v2857_v54 = vpack.c.bf16 %v550_v53, %v546_v52  ;;  %v545_v55 = vld [vmem:[#allocation12 + $0x50] sm:$0xff]  ;;  %v560_v57 = vld [vmem:[#allocation12 + $0xc8] sm:$0xff]  ;;  %2856 = vmatpush1.bf16.msra.mxu1 %v2855_v46  ;;  %v2799_v60 = vpack.c.bf16 %v555_v51, %v551_v49  ;;  %v554_v61 = vld [vmem:[#allocation12 + $0x98] sm:$0xff] }
  0xbd   : >> { %v549_v56 = vld [vmem:[#allocation12 + $0x70] sm:$0xff]  ;;  %v564_v59 = vld [vmem:[#allocation12 + $0xe8] sm:$0xff]  ;;  %v558_v62 = vld [vmem:[#allocation12 + $0xb8] sm:$0xff] }
  0xbe   : >> { %v2859_v58 = vpack.c.bf16 %v549_v56, %v545_v55  ;;  %2858 = vmatprep.subr.bf16.mxu1 %v2857_v54  ;;  %v553_v63 = vld [vmem:[#allocation12 + $0x90] sm:$0xff]  ;;  %v2801_v0 = vpack.c.bf16 %v564_v59, %v560_v57  ;;  %v559_v1 = vld [vmem:[#allocation12 + $0xc0] sm:$0xff]  ;;  %v2861_v9 = vpack.c.bf16 %v558_v62, %v554_v61  ;;  %v568_v12 = vld [vmem:[#allocation12 + $0x108] sm:$0xff] }
  0xbf   : >> { %2796 = vmatpush1.bf16.msra.mxu0 %v2795_v44  ;;  %v563_v5 = vld [vmem:[#allocation12 + $0xe0] sm:$0xff]  ;;  %v557_v11 = vld [vmem:[#allocation12 + $0xb0] sm:$0xff]  ;;  %v572_v13 = vld [vmem:[#allocation12 + $0x128] sm:$0xff] }
  0xc0   : >> { %2798 = vmatprep.subr.bf16.mxu0 %v2797_v50  ;;  %v562_v14 = vld [vmem:[#allocation12 + $0xd8] sm:$0xff]  ;;  %2860 = vmatpush1.bf16.msra.mxu1 %v2859_v58  ;;  %v2863_v15 = vpack.c.bf16 %v557_v11, %v553_v63  ;;  %v2803_v29 = vpack.c.bf16 %v563_v5, %v559_v1  ;;  %v567_v30 = vld [vmem:[#allocation12 + $0x100] sm:$0xff]  ;;  %v561_v32 = vld [vmem:[#allocation12 + $0xd0] sm:$0xff]  ;;  %v2805_v34 = vpack.c.bf16 %v572_v13, %v568_v12 }
  0xc1   : >> { %v566_v16 = vld [vmem:[#allocation12 + $0xf8] sm:$0xff]  ;;  %2862 = vmatprep.subr.bf16.mxu1 %v2861_v9  ;;  %v565_v33 = vld [vmem:[#allocation12 + $0xf0] sm:$0xff]  ;;  %v571_v35 = vld [vmem:[#allocation12 + $0x120] sm:$0xff] }
  0xc2   : >> { %v2865_v31 = vpack.c.bf16 %v566_v16, %v562_v14  ;;  %v570_v36 = vld [vmem:[#allocation12 + $0x118] sm:$0xff]  ;;  %v576_v38 = vld [vmem:[#allocation12 + $0x148] sm:$0xff]  ;;  %v2867_v40 = vpack.c.bf16 %v565_v33, %v561_v32  ;;  %v2807_v41 = vpack.c.bf16 %v571_v35, %v567_v30  ;;  %v575_v42 = vld [vmem:[#allocation12 + $0x140] sm:$0xff] }
  0xc3   : >> { %2800 = vmatpush1.bf16.msra.mxu0 %v2799_v60  ;;  %v574_v37 = vld [vmem:[#allocation12 + $0x138] sm:$0xff]  ;;  %v580_v39 = vld [vmem:[#allocation12 + $0x168] sm:$0xff]  ;;  %v569_v44 = vld [vmem:[#allocation12 + $0x110] sm:$0xff] }
  0xc4   : >> { %2802 = vmatprep.subr.bf16.mxu0 %v2801_v0  ;;  %2864 = vmatpush1.bf16.msra.mxu1 %v2863_v15  ;;  %v2869_v43 = vpack.c.bf16 %v574_v37, %v570_v36  ;;  %v573_v45 = vld [vmem:[#allocation12 + $0x130] sm:$0xff]  ;;  %v2809_v46 = vpack.c.bf16 %v580_v39, %v576_v38  ;;  %v579_v47 = vld [vmem:[#allocation12 + $0x160] sm:$0xff]  ;;  %v578_v48 = vld [vmem:[#allocation12 + $0x158] sm:$0xff] }
  0xc5   : >> { %2866 = vmatprep.subr.bf16.mxu1 %v2865_v31  ;;  %v582_v49 = vld [vmem:[#allocation12 + $0x178] sm:$0xff]  ;;  %v584_v50 = vld [vmem:[#allocation12 + $0x188] sm:$0xff]  ;;  %v2871_v52 = vpack.c.bf16 %v573_v45, %v569_v44  ;;  %v2811_v53 = vpack.c.bf16 %v579_v47, %v575_v42  ;;  %v583_v54 = vld [vmem:[#allocation12 + $0x180] sm:$0xff] }
  0xc6   : >> { %v588_v51 = vld [vmem:[#allocation12 + $0x1a8] sm:$0xff]  ;;  %v2873_v55 = vpack.c.bf16 %v582_v49, %v578_v48  ;;  %v577_v56 = vld [vmem:[#allocation12 + $0x150] sm:$0xff]  ;;  %v587_v59 = vld [vmem:[#allocation12 + $0x1a0] sm:$0xff] }
  0xc7   : >> { %2804 = vmatpush1.bf16.msra.mxu0 %v2803_v29  ;;  %v581_v57 = vld [vmem:[#allocation12 + $0x170] sm:$0xff]  ;;  %v2813_v58 = vpack.c.bf16 %v588_v51, %v584_v50  ;;  %v586_v60 = vld [vmem:[#allocation12 + $0x198] sm:$0xff]  ;;  %v592_v62 = vld [vmem:[#allocation12 + $0x1c8] sm:$0xff]  ;;  %v2815_v1 = vpack.c.bf16 %v587_v59, %v583_v54 }
  0xc8   : >> { %2806 = vmatprep.subr.bf16.mxu0 %v2805_v34  ;;  %2868 = vmatpush1.bf16.msra.mxu1 %v2867_v40  ;;  %v590_v61 = vld [vmem:[#allocation12 + $0x1b8] sm:$0xff]  ;;  %v596_v63 = vld [vmem:[#allocation12 + $0x1e8] sm:$0xff]  ;;  %v2875_v0 = vpack.c.bf16 %v581_v57, %v577_v56  ;;  %v591_v5 = vld [vmem:[#allocation12 + $0x1c0] sm:$0xff] }
  0xc9   : >> { %2870 = vmatprep.subr.bf16.mxu1 %v2869_v43  ;;  %v2877_v9 = vpack.c.bf16 %v590_v61, %v586_v60  ;;  %v585_v11 = vld [vmem:[#allocation12 + $0x190] sm:$0xff]  ;;  %v2817_v13 = vpack.c.bf16 %v596_v63, %v592_v62  ;;  %v595_v14 = vld [vmem:[#allocation12 + $0x1e0] sm:$0xff]  ;;  %v594_v15 = vld [vmem:[#allocation12 + $0x1d8] sm:$0xff] }
  0xca   : >> { %v589_v12 = vld [vmem:[#allocation12 + $0x1b0] sm:$0xff]  ;;  %v598_v16 = vld [vmem:[#allocation12 + $0x1f8] sm:$0xff]  ;;  %v600_v29 = vld [vmem:[#allocation12 + $0x208] sm:$0xff]  ;;  %v2819_v32 = vpack.c.bf16 %v595_v14, %v591_v5 }
  0xcb   : >> { %2808 = vmatpush1.bf16.msra.mxu0 %v2807_v41  ;;  %v604_v30 = vld [vmem:[#allocation12 + $0x228] sm:$0xff]  ;;  %v2879_v31 = vpack.c.bf16 %v589_v12, %v585_v11  ;;  %v599_v33 = vld [vmem:[#allocation12 + $0x200] sm:$0xff]  ;;  %v2881_v34 = vpack.c.bf16 %v598_v16, %v594_v15  ;;  %v593_v35 = vld [vmem:[#allocation12 + $0x1d0] sm:$0xff] }
  0xcc   : >> { %2810 = vmatprep.subr.bf16.mxu0 %v2809_v46  ;;  %2872 = vmatpush1.bf16.msra.mxu1 %v2871_v52  ;;  %v597_v36 = vld [vmem:[#allocation12 + $0x1f0] sm:$0xff]  ;;  %v2821_v37 = vpack.c.bf16 %v604_v30, %v600_v29  ;;  %v603_v38 = vld [vmem:[#allocation12 + $0x220] sm:$0xff]  ;;  %v602_v39 = vld [vmem:[#allocation12 + $0x218] sm:$0xff] }
  0xcd   : >> { %2874 = vmatprep.subr.bf16.mxu1 %v2873_v55  ;;  %v606_v40 = vld [vmem:[#allocation12 + $0x238] sm:$0xff]  ;;  %v608_v41 = vld [vmem:[#allocation12 + $0x248] sm:$0xff]  ;;  %v2883_v43 = vpack.c.bf16 %v597_v36, %v593_v35  ;;  %v2823_v44 = vpack.c.bf16 %v603_v38, %v599_v33  ;;  %v607_v45 = vld [vmem:[#allocation12 + $0x240] sm:$0xff] }
  0xce   : >> { %v612_v42 = vld [vmem:[#allocation12 + $0x268] sm:$0xff]  ;;  %v2885_v46 = vpack.c.bf16 %v606_v40, %v602_v39  ;;  %v601_v47 = vld [vmem:[#allocation12 + $0x210] sm:$0xff]  ;;  %v611_v50 = vld [vmem:[#allocation12 + $0x260] sm:$0xff] }
  0xcf   : >> { %2812 = vmatpush1.bf16.msra.mxu0 %v2811_v53  ;;  %v605_v48 = vld [vmem:[#allocation12 + $0x230] sm:$0xff]  ;;  %v2825_v49 = vpack.c.bf16 %v612_v42, %v608_v41  ;;  %v610_v51 = vld [vmem:[#allocation12 + $0x258] sm:$0xff]  ;;  %v616_v53 = vld [vmem:[#allocation12 + $0x288] sm:$0xff]  ;;  %v2827_v56 = vpack.c.bf16 %v611_v50, %v607_v45 }
  0xd0   : >> { %2814 = vmatprep.subr.bf16.mxu0 %v2813_v58  ;;  %2876 = vmatpush1.bf16.msra.mxu1 %v2875_v0  ;;  %v614_v52 = vld [vmem:[#allocation12 + $0x278] sm:$0xff]  ;;  %v620_v54 = vld [vmem:[#allocation12 + $0x2a8] sm:$0xff]  ;;  %v2887_v55 = vpack.c.bf16 %v605_v48, %v601_v47  ;;  %v615_v57 = vld [vmem:[#allocation12 + $0x280] sm:$0xff] }
  0xd1   : >> { %2878 = vmatprep.subr.bf16.mxu1 %v2877_v9  ;;  %v2889_v58 = vpack.c.bf16 %v614_v52, %v610_v51  ;;  %v609_v59 = vld [vmem:[#allocation12 + $0x250] sm:$0xff]  ;;  %v2829_v61 = vpack.c.bf16 %v620_v54, %v616_v53  ;;  %v619_v62 = vld [vmem:[#allocation12 + $0x2a0] sm:$0xff]  ;;  %v618_v63 = vld [vmem:[#allocation12 + $0x298] sm:$0xff] }
  0xd2   : >> { %v613_v60 = vld [vmem:[#allocation12 + $0x270] sm:$0xff]  ;;  %v622_v0 = vld [vmem:[#allocation12 + $0x2b8] sm:$0xff]  ;;  %v628_v5 = vld [vmem:[#allocation12 + $0x2e8] sm:$0xff]  ;;  %v2831_v11 = vpack.c.bf16 %v619_v62, %v615_v57 }
  0xd3   : >> { %2816 = vmatpush1.bf16.msra.mxu0 %v2815_v1  ;;  %v624_v1 = vld [vmem:[#allocation12 + $0x2c8] sm:$0xff]  ;;  %v2891_v9 = vpack.c.bf16 %v613_v60, %v609_v59  ;;  %v623_v12 = vld [vmem:[#allocation12 + $0x2c0] sm:$0xff]  ;;  %v617_v14 = vld [vmem:[#allocation12 + $0x290] sm:$0xff] }
  0xd4   : >> { %2818 = vmatprep.subr.bf16.mxu0 %v2817_v13  ;;  %2880 = vmatpush1.bf16.msra.mxu1 %v2879_v31  ;;  %v2893_v13 = vpack.c.bf16 %v622_v0, %v618_v63  ;;  %v621_v15 = vld [vmem:[#allocation12 + $0x2b0] sm:$0xff]  ;;  %v2833_v16 = vpack.c.bf16 %v628_v5, %v624_v1  ;;  %v627_v29 = vld [vmem:[#allocation12 + $0x2e0] sm:$0xff]  ;;  %v626_v30 = vld [vmem:[#allocation12 + $0x2d8] sm:$0xff] }
  0xd5   : >> { %2882 = vmatprep.subr.bf16.mxu1 %v2881_v34  ;;  %v630_v31 = vld [vmem:[#allocation12 + $0x2f8] sm:$0xff]  ;;  %v636_v33 = vld [vmem:[#allocation12 + $0x328] sm:$0xff]  ;;  %v2895_v34 = vpack.c.bf16 %v621_v15, %v617_v14  ;;  %v2835_v35 = vpack.c.bf16 %v627_v29, %v623_v12  ;;  %v631_v36 = vld [vmem:[#allocation12 + $0x300] sm:$0xff] }
  0xd6   : >> { %v625_v38 = vld [vmem:[#allocation12 + $0x2d0] sm:$0xff]  ;;  %v635_v41 = vld [vmem:[#allocation12 + $0x320] sm:$0xff]  ;;  %v634_v42 = vld [vmem:[#allocation12 + $0x318] sm:$0xff] }
  0xd7   : >> { %2820 = vmatpush1.bf16.msra.mxu0 %v2819_v32  ;;  %v632_v32 = vld [vmem:[#allocation12 + $0x308] sm:$0xff]  ;;  %v629_v39 = vld [vmem:[#allocation12 + $0x2f0] sm:$0xff]  ;;  %v2839_v47 = vpack.c.bf16 %v635_v41, %v631_v36  ;;  %v639_v48 = vld [vmem:[#allocation12 + $0x340] sm:$0xff] }
  0xd8   : >> { %2822 = vmatprep.subr.bf16.mxu0 %v2821_v37  ;;  %2884 = vmatpush1.bf16.msra.mxu1 %v2883_v43  ;;  %v2897_v37 = vpack.c.bf16 %v630_v31, %v626_v30  ;;  %v2837_v40 = vpack.c.bf16 %v636_v33, %v632_v32  ;;  %v638_v43 = vld [vmem:[#allocation12 + $0x338] sm:$0xff]  ;;  %v644_v45 = vld [vmem:[#allocation12 + $0x368] sm:$0xff]  ;;  %v633_v50 = vld [vmem:[#allocation12 + $0x310] sm:$0xff] }
  0xd9   : >> { %2886 = vmatprep.subr.bf16.mxu1 %v2885_v46  ;;  %v2899_v46 = vpack.c.bf16 %v629_v39, %v625_v38  ;;  %v637_v51 = vld [vmem:[#allocation12 + $0x330] sm:$0xff]  ;;  %v643_v53 = vld [vmem:[#allocation12 + $0x360] sm:$0xff]  ;;  %v642_v54 = vld [vmem:[#allocation12 + $0x358] sm:$0xff] }
  0xda   : >> { %v652_v57 = vld [vmem:[#allocation12 + $0x3a8] sm:$0xff]  ;;  %v2843_v59 = vpack.c.bf16 %v643_v53, %v639_v48  ;;  %v647_v60 = vld [vmem:[#allocation12 + $0x380] sm:$0xff]  ;;  %v641_v62 = vld [vmem:[#allocation12 + $0x350] sm:$0xff] }
  0xdb   : >> { %2824 = vmatpush1.bf16.msra.mxu0 %v2823_v44  ;;  %v640_v44 = vld [vmem:[#allocation12 + $0x348] sm:$0xff]  ;;  %v645_v63 = vld [vmem:[#allocation12 + $0x370] sm:$0xff]  ;;  %v651_v1 = vld [vmem:[#allocation12 + $0x3a0] sm:$0xff] }
  0xdc   : >> { %2826 = vmatprep.subr.bf16.mxu0 %v2825_v49  ;;  %2888 = vmatpush1.bf16.msra.mxu1 %v2887_v55  ;;  %v2901_v49 = vpack.c.bf16 %v638_v43, %v634_v42  ;;  %v2841_v52 = vpack.c.bf16 %v644_v45, %v640_v44  ;;  %v646_v55 = vld [vmem:[#allocation12 + $0x378] sm:$0xff]  ;;  %v660_v12 = vld [vmem:[#allocation12 + $0x3e8] sm:$0xff]  ;;  %v2847_v14 = vpack.c.bf16 %v651_v1, %v647_v60  ;;  %v655_v15 = vld [vmem:[#allocation12 + $0x3c0] sm:$0xff] }
  0xdd   : >> { %2890 = vmatprep.subr.bf16.mxu1 %v2889_v58  ;;  %v2903_v58 = vpack.c.bf16 %v637_v51, %v633_v50  ;;  %v650_v5 = vld [vmem:[#allocation12 + $0x398] sm:$0xff]  ;;  %v649_v29 = vld [vmem:[#allocation12 + $0x390] sm:$0xff]  ;;  %v659_v32 = vld [vmem:[#allocation12 + $0x3e0] sm:$0xff] }
  0xde   : >> { %v653_v30 = vld [vmem:[#allocation12 + $0x3b0] sm:$0xff]  ;;  %v658_v33 = vld [vmem:[#allocation12 + $0x3d8] sm:$0xff]  ;;  %v828_v36 = vld [vmem:[#allocation14 + $0x28] sm:$0xff]  ;;  %v2851_v38 = vpack.c.bf16 %v659_v32, %v655_v15 }
  0xdf   : >> { %2828 = vmatpush1.bf16.msra.mxu0 %v2827_v56  ;;  %v648_v56 = vld [vmem:[#allocation12 + $0x388] sm:$0xff]  ;;  %v823_v39 = vld [vmem:[#allocation14] sm:$0xff]  ;;  %v657_v41 = vld [vmem:[#allocation12 + $0x3d0] sm:$0xff] }
  0xe0   : >> { %2830 = vmatprep.subr.bf16.mxu0 %v2829_v61  ;;  %2892 = vmatpush1.bf16.msra.mxu1 %v2891_v9  ;;  %v2905_v61 = vpack.c.bf16 %v646_v55, %v642_v54  ;;  %v2845_v0 = vpack.c.bf16 %v652_v57, %v648_v56  ;;  %v654_v9 = vld [vmem:[#allocation12 + $0x3b8] sm:$0xff]  ;;  %v661_v42 = vld [vmem:[#allocation12 + $0x3f0] sm:$0xff]  ;;  %v827_v44 = vld [vmem:[#allocation14 + $0x20] sm:$0xff] }
  0xe1   : >> { %2894 = vmatprep.subr.bf16.mxu1 %v2893_v13  ;;  %v2907_v13 = vpack.c.bf16 %v645_v63, %v641_v62  ;;  %v826_v45 = vld [vmem:[#allocation14 + $0x18] sm:$0xff]  ;;  %v836_v48 = vld [vmem:[#allocation14 + $0x68] sm:$0xff]  ;;  %v2915_v50 = vpack.c.bf16 %v661_v42, %v657_v41  ;;  %v2919_v51 = vpack.c.bf16 %v827_v44, %v823_v39  ;;  %v825_v54 = vld [vmem:[#allocation14 + $0x10] sm:$0xff] }
  0xe2   : >> { %v829_v55 = vld [vmem:[#allocation14 + $0x30] sm:$0xff]  ;;  %v835_v57 = vld [vmem:[#allocation14 + $0x60] sm:$0xff]  ;;  %v840_v60 = vld [vmem:[#allocation14 + $0x88] sm:$0xff] }
  0xe3   : >> { %2832 = vmatpush1.bf16.msra.mxu0 %v2831_v11  ;;  %v656_v11 = vld [vmem:[#allocation12 + $0x3c8] sm:$0xff]  ;;  %v2983_v62 = vpack.c.bf16 %v829_v55, %v825_v54  ;;  %v863_v55 = vld [vmem:[#allocation14 + $0x140] sm:$0xff] }
  0xe4   : >> { %2834 = vmatprep.subr.bf16.mxu0 %v2833_v16  ;;  %2896 = vmatpush1.bf16.msra.mxu1 %v2895_v34  ;;  %v2909_v16 = vpack.c.bf16 %v654_v9, %v650_v5  ;;  %v2849_v31 = vpack.c.bf16 %v660_v12, %v656_v11  ;;  %v662_v34 = vld [vmem:[#allocation12 + $0x3f8] sm:$0xff]  ;;  %v833_v5 = vld [vmem:[#allocation14 + $0x50] sm:$0xff]  ;;  %v843_v12 = vld [vmem:[#allocation14 + $0xa0] sm:$0xff] }
  0xe5   : >> { %2898 = vmatprep.subr.bf16.mxu1 %v2897_v37  ;;  %v2911_v37 = vpack.c.bf16 %v653_v30, %v649_v29  ;;  %v837_v9 = vld [vmem:[#allocation14 + $0x70] sm:$0xff]  ;;  %v848_v15 = vld [vmem:[#allocation14 + $0xc8] sm:$0xff] }
  0xe6   : >> { %v2987_v29 = vpack.c.bf16 %v837_v9, %v833_v5  ;;  %v856_v39 = vld [vmem:[#allocation14 + $0x108] sm:$0xff]  ;;  %v871_v9 = vld [vmem:[#allocation14 + $0x180] sm:$0xff] }
  0xe7   : >> { %2836 = vmatpush1.bf16.msra.mxu0 %v2835_v35  ;;  %v824_v35 = vld [vmem:[#allocation14 + $0x8] sm:$0xff] }
  0xe8   : >> { %2838 = vmatprep.subr.bf16.mxu0 %v2837_v40  ;;  %2900 = vmatpush1.bf16.msra.mxu1 %v2899_v46  ;;  %v2913_v40 = vpack.c.bf16 %v662_v34, %v658_v33  ;;  %v2917_v43 = vpack.c.bf16 %v828_v36, %v824_v35  ;;  %v830_v46 = vld [vmem:[#allocation14 + $0x38] sm:$0xff]  ;;  %v841_v33 = vld [vmem:[#allocation14 + $0x90] sm:$0xff]  ;;  %v851_v36 = vld [vmem:[#allocation14 + $0xe0] sm:$0xff] }
  0xe9   : >> { %2902 = vmatprep.subr.bf16.mxu1 %v2901_v49  ;;  %v534_v49 = vld [vmem:[%s533_s27] sm:$0xff]  ;;  %v2981_v53 = vpack.c.bf16 %v830_v46, %v826_v45 }
  0xea   : >> { %v845_v34 = vld [vmem:[#allocation14 + $0xb0] sm:$0xff] }
  0xeb   : >> { %2840 = vmatpush1.bf16.msra.mxu0 %v2839_v47  ;;  %v832_v47 = vld [vmem:[#allocation14 + $0x48] sm:$0xff]  ;;  %v2991_v41 = vpack.c.bf16 %v845_v34, %v841_v33  ;;  %v849_v45 = vld [vmem:[#allocation14 + $0xd0] sm:$0xff]  ;;  %v879_v34 = vld [vmem:[#allocation14 + $0x1c0] sm:$0xff] }
  0xec   : >> { %2842 = vmatprep.subr.bf16.mxu0 %v2841_v52  ;;  %2904 = vmatpush1.bf16.msra.mxu1 %v2903_v58  ;;  %v831_v52 = vld [vmem:[#allocation14 + $0x40] sm:$0xff]  ;;  %v2921_v56 = vpack.c.bf16 %v836_v48, %v832_v47  ;;  %v834_v58 = vld [vmem:[#allocation14 + $0x58] sm:$0xff]  ;;  %v853_v46 = vld [vmem:[#allocation14 + $0xf0] sm:$0xff] }
  0xed   : >> { %2906 = vmatprep.subr.bf16.mxu1 %v2905_v61  ;;  %v844_v61 = vld [vmem:[#allocation14 + $0xa8] sm:$0xff]  ;;  %v2923_v63 = vpack.c.bf16 %v835_v57, %v831_v52  ;;  %v859_v48 = vld [vmem:[#allocation14 + $0x120] sm:$0xff]  ;;  %v857_v57 = vld [vmem:[#allocation14 + $0x110] sm:$0xff] }
  0xee   : >> { %v2925_v11 = vpack.c.bf16 %v844_v61, %v840_v60  ;;  %v868_v52 = vld [vmem:[#allocation14 + $0x168] sm:$0xff]  ;;  %v867_v60 = vld [vmem:[#allocation14 + $0x160] sm:$0xff]  ;;  %v866_v61 = vld [vmem:[#allocation14 + $0x158] sm:$0xff] }
  0xef   : >> { %2844 = vmatpush1.bf16.msra.mxu0 %v2843_v59  ;;  %v838_v59 = vld [vmem:[#allocation14 + $0x78] sm:$0xff]  ;;  %v2939_v5 = vpack.c.bf16 %v867_v60, %v863_v55  ;;  %v900_v55 = vld [vmem:[#allocation14 + $0x268] sm:$0xff]  ;;  %v889_v60 = vld [vmem:[#allocation14 + $0x210] sm:$0xff] }
  0xf0   : >> { %2846 = vmatprep.subr.bf16.mxu0 %v2845_v0  ;;  %2908 = vmatpush1.bf16.msra.mxu1 %v2907_v13  ;;  %v839_v0 = vld [vmem:[#allocation14 + $0x80] sm:$0xff]  ;;  %v2985_v1 = vpack.c.bf16 %v838_v59, %v834_v58  ;;  %v842_v13 = vld [vmem:[#allocation14 + $0x98] sm:$0xff]  ;;  %v861_v58 = vld [vmem:[#allocation14 + $0x130] sm:$0xff] }
  0xf1   : >> { %2910 = vmatprep.subr.bf16.mxu1 %v2909_v16  ;;  %v852_v16 = vld [vmem:[#allocation14 + $0xe8] sm:$0xff]  ;;  %v2927_v30 = vpack.c.bf16 %v843_v12, %v839_v0  ;;  %v865_v12 = vld [vmem:[#allocation14 + $0x150] sm:$0xff] }
  0xf2   : >> { %v2929_v35 = vpack.c.bf16 %v852_v16, %v848_v15  ;;  %v876_v0 = vld [vmem:[#allocation14 + $0x1a8] sm:$0xff]  ;;  %v875_v15 = vld [vmem:[#allocation14 + $0x1a0] sm:$0xff]  ;;  %v874_v16 = vld [vmem:[#allocation14 + $0x198] sm:$0xff] }
  0xf3   : >> { %2848 = vmatpush1.bf16.msra.mxu0 %v2847_v14  ;;  %v846_v14 = vld [vmem:[#allocation14 + $0xb8] sm:$0xff]  ;;  %v2943_v33 = vpack.c.bf16 %v875_v15, %v871_v9  ;;  %v908_v9 = vld [vmem:[#allocation14 + $0x2a8] sm:$0xff]  ;;  %v897_v15 = vld [vmem:[#allocation14 + $0x250] sm:$0xff] }
  0xf4   : >> { %2850 = vmatprep.subr.bf16.mxu0 %v2849_v31  ;;  %2912 = vmatpush1.bf16.msra.mxu1 %v2911_v37  ;;  %v847_v31 = vld [vmem:[#allocation14 + $0xc0] sm:$0xff]  ;;  %v2989_v32 = vpack.c.bf16 %v846_v14, %v842_v13  ;;  %v850_v37 = vld [vmem:[#allocation14 + $0xd8] sm:$0xff]  ;;  %v869_v13 = vld [vmem:[#allocation14 + $0x170] sm:$0xff] }
  0xf5   : >> { %2914 = vmatprep.subr.bf16.mxu1 %v2913_v40  ;;  %v860_v40 = vld [vmem:[#allocation14 + $0x128] sm:$0xff]  ;;  %v2931_v42 = vpack.c.bf16 %v851_v36, %v847_v31  ;;  %v873_v36 = vld [vmem:[#allocation14 + $0x190] sm:$0xff] }
  0xf6   : >> { %v2933_v47 = vpack.c.bf16 %v860_v40, %v856_v39  ;;  %v884_v31 = vld [vmem:[#allocation14 + $0x1e8] sm:$0xff]  ;;  %v883_v39 = vld [vmem:[#allocation14 + $0x1e0] sm:$0xff]  ;;  %v882_v40 = vld [vmem:[#allocation14 + $0x1d8] sm:$0xff] }
  0xf7   : >> { %2852 = vmatpush1.bf16.msra.mxu0 %v2851_v38  ;;  %v854_v38 = vld [vmem:[#allocation14 + $0xf8] sm:$0xff] }
  0xf8   : >> { %2918 = vmatprep.subr.bf16.mxu0 %v2917_v43  ;;  %2916 = vmatpush1.bf16.msra.mxu1 %v2915_v50  ;;  %v855_v43 = vld [vmem:[#allocation14 + $0x100] sm:$0xff]  ;;  %v2993_v44 = vpack.c.bf16 %v854_v38, %v850_v37  ;;  %v862_v50 = vld [vmem:[#allocation14 + $0x138] sm:$0xff]  ;;  %v877_v37 = vld [vmem:[#allocation14 + $0x1b0] sm:$0xff] }
  0xf9   : >> { %2982 = vmatprep.subr.bf16.mxu1 %v2981_v53  ;;  %v2995_v53 = vpack.c.bf16 %v853_v46, %v849_v45  ;;  %v2935_v54 = vpack.c.bf16 %v859_v48, %v855_v43  ;;  %v892_v43 = vld [vmem:[#allocation14 + $0x228] sm:$0xff]  ;;  %v2947_v45 = vpack.c.bf16 %v883_v39, %v879_v34  ;;  %v887_v46 = vld [vmem:[#allocation14 + $0x200] sm:$0xff]  ;;  %v881_v48 = vld [vmem:[#allocation14 + $0x1d0] sm:$0xff] }
  0xfa   : >> { %728 = vmatmul.mubr.f32.vlgmr.msra.gmra.mrb[0].mxu0 %v534_v49  ;;  %v916_v34 = vld [vmem:[#allocation14 + $0x2e8] sm:$0xff]  ;;  %v905_v39 = vld [vmem:[#allocation14 + $0x290] sm:$0xff] }
  0xfb   : >> { %2920 = vmatpush1.bf16.msra.mxu0 %v2919_v51  ;;  %1015 = vmatprep.mubr.f32.mxu0 %v4213_v4  ;;  %v864_v51 = vld [vmem:[#allocation14 + $0x148] sm:$0xff] }
  0xfc   : >> { %2922 = vmatprep.subr.bf16.mxu0 %v2921_v56  ;;  %799 = vmatmul.mubr.f32.vlgmr.msra.gmra.mrb[0].mxu1 %v534_v49  ;;  %v858_v49 = vld [vmem:[#allocation14 + $0x118] sm:$0xff]  ;;  %v2937_v59 = vpack.c.bf16 %v868_v52, %v864_v51  ;;  %v891_v51 = vld [vmem:[#allocation14 + $0x220] sm:$0xff] }
  0xfd   : >> { %2984 = vmatpush1.bf16.msra.mxu1 %v2983_v62  ;;  %1086 = vmatprep.mubr.f32.mxu1 %v4213_v4  ;;  %v2997_v56 = vpack.c.bf16 %v862_v50, %v858_v49  ;;  %v870_v62 = vld [vmem:[#allocation14 + $0x178] sm:$0xff]  ;;  %v885_v49 = vld [vmem:[#allocation14 + $0x1f0] sm:$0xff] }
  0xfe   : >> { %2986 = vmatprep.subr.bf16.mxu1 %v2985_v1  ;;  %v2999_v1 = vpack.c.bf16 %v861_v58, %v857_v57  ;;  %v890_v52 = vld [vmem:[#allocation14 + $0x218] sm:$0xff]  ;;  %v2951_v57 = vpack.c.bf16 %v891_v51, %v887_v46  ;;  %v895_v58 = vld [vmem:[#allocation14 + $0x240] sm:$0xff]  ;;  %v924_v46 = vld [vmem:[#allocation14 + $0x328] sm:$0xff] }
  0xff   : >> { %2924 = vmatpush1.bf16.msra.mxu0 %v2923_v63  ;;  %v872_v63 = vld [vmem:[#allocation14 + $0x188] sm:$0xff]  ;;  %v913_v51 = vld [vmem:[#allocation14 + $0x2d0] sm:$0xff] }
 0x100   : >> { %2926 = vmatprep.subr.bf16.mxu0 %v2925_v11  ;;  %v3001_v11 = vpack.c.bf16 %v870_v62, %v866_v61  ;;  %v2941_v14 = vpack.c.bf16 %v876_v0, %v872_v63  ;;  %v893_v61 = vld [vmem:[#allocation14 + $0x230] sm:$0xff]  ;;  %v899_v63 = vld [vmem:[#allocation14 + $0x260] sm:$0xff]  ;;  %v898_v0 = vld [vmem:[#allocation14 + $0x258] sm:$0xff] }
 0x101   : >> { %2988 = vmatpush1.bf16.msra.mxu1 %v2987_v29  ;;  %v878_v29 = vld [vmem:[#allocation14 + $0x1b8] sm:$0xff] }
 0x102   : >> { %2990 = vmatprep.subr.bf16.mxu1 %v2989_v32  ;;  %v3003_v32 = vpack.c.bf16 %v869_v13, %v865_v12  ;;  %v2955_v12 = vpack.c.bf16 %v899_v63, %v895_v58  ;;  %v903_v13 = vld [vmem:[#allocation14 + $0x280] sm:$0xff]  ;;  %v932_v58 = vld [vmem:[#allocation14 + $0x368] sm:$0xff]  ;;  %v921_v63 = vld [vmem:[#allocation14 + $0x310] sm:$0xff] }
 0x103   : >> { %2928 = vmatpush1.bf16.msra.mxu0 %v2927_v30  ;;  %v880_v30 = vld [vmem:[#allocation14 + $0x1c8] sm:$0xff] }
 0x104   : >> { %2930 = vmatprep.subr.bf16.mxu0 %v2929_v35  ;;  %v3005_v35 = vpack.c.bf16 %v878_v29, %v874_v16  ;;  %v2945_v38 = vpack.c.bf16 %v884_v31, %v880_v30  ;;  %v901_v16 = vld [vmem:[#allocation14 + $0x270] sm:$0xff]  ;;  %v907_v30 = vld [vmem:[#allocation14 + $0x2a0] sm:$0xff]  ;;  %v906_v31 = vld [vmem:[#allocation14 + $0x298] sm:$0xff] }
 0x105   : >> { %2992 = vmatpush1.bf16.msra.mxu1 %v2991_v41  ;;  %v886_v41 = vld [vmem:[#allocation14 + $0x1f8] sm:$0xff] }
 0x106   : >> { %2994 = vmatprep.subr.bf16.mxu1 %v2993_v44  ;;  %v3007_v44 = vpack.c.bf16 %v877_v37, %v873_v36  ;;  %v2959_v36 = vpack.c.bf16 %v907_v30, %v903_v13  ;;  %v911_v37 = vld [vmem:[#allocation14 + $0x2c0] sm:$0xff]  ;;  %v940_v13 = vld [vmem:[#allocation14 + $0x3a8] sm:$0xff]  ;;  %v929_v30 = vld [vmem:[#allocation14 + $0x350] sm:$0xff] }
 0x107   : >> { %2932 = vmatpush1.bf16.msra.mxu0 %v2931_v42  ;;  %v888_v42 = vld [vmem:[#allocation14 + $0x208] sm:$0xff] }
 0x108   : >> { %2934 = vmatprep.subr.bf16.mxu0 %v2933_v47  ;;  %v3009_v47 = vpack.c.bf16 %v886_v41, %v882_v40  ;;  %v2949_v50 = vpack.c.bf16 %v892_v43, %v888_v42  ;;  %v909_v40 = vld [vmem:[#allocation14 + $0x2b0] sm:$0xff]  ;;  %v915_v42 = vld [vmem:[#allocation14 + $0x2e0] sm:$0xff]  ;;  %v914_v43 = vld [vmem:[#allocation14 + $0x2d8] sm:$0xff] }
 0x109   : >> { %2996 = vmatpush1.bf16.msra.mxu1 %v2995_v53  ;;  %v894_v53 = vld [vmem:[#allocation14 + $0x238] sm:$0xff] }
 0x10a   : >> { %2998 = vmatprep.subr.bf16.mxu1 %v2997_v56  ;;  %v3011_v56 = vpack.c.bf16 %v885_v49, %v881_v48  ;;  %v2963_v48 = vpack.c.bf16 %v915_v42, %v911_v37  ;;  %v919_v49 = vld [vmem:[#allocation14 + $0x300] sm:$0xff]  ;;  %v948_v37 = vld [vmem:[#allocation14 + $0x3e8] sm:$0xff]  ;;  %v937_v42 = vld [vmem:[#allocation14 + $0x390] sm:$0xff] }
 0x10b   : >> { %2936 = vmatpush1.bf16.msra.mxu0 %v2935_v54  ;;  %v896_v54 = vld [vmem:[#allocation14 + $0x248] sm:$0xff] }
 0x10c   : >> { %2938 = vmatprep.subr.bf16.mxu0 %v2937_v59  ;;  %v3013_v59 = vpack.c.bf16 %v894_v53, %v890_v52  ;;  %v2953_v62 = vpack.c.bf16 %v900_v55, %v896_v54  ;;  %v917_v52 = vld [vmem:[#allocation14 + $0x2f0] sm:$0xff]  ;;  %v923_v54 = vld [vmem:[#allocation14 + $0x320] sm:$0xff]  ;;  %v922_v55 = vld [vmem:[#allocation14 + $0x318] sm:$0xff] }
 0x10d   : >> { %3000 = vmatpush1.bf16.msra.mxu1 %v2999_v1  ;;  %v902_v1 = vld [vmem:[#allocation14 + $0x278] sm:$0xff] }
 0x10e   : >> { %3002 = vmatprep.subr.bf16.mxu1 %v3001_v11  ;;  %v3015_v11 = vpack.c.bf16 %v893_v61, %v889_v60  ;;  %v2967_v60 = vpack.c.bf16 %v923_v54, %v919_v49  ;;  %v927_v61 = vld [vmem:[#allocation14 + $0x340] sm:$0xff]  ;;  %v1116_v49 = vld [vmem:[#allocation15 + $0x28] sm:$0xff]  ;;  %v945_v54 = vld [vmem:[#allocation14 + $0x3d0] sm:$0xff] }
 0x10f   : >> { %2940 = vmatpush1.bf16.msra.mxu0 %v2939_v5  ;;  %v904_v5 = vld [vmem:[#allocation14 + $0x288] sm:$0xff] }
 0x110   : >> { %2942 = vmatprep.subr.bf16.mxu0 %v2941_v14  ;;  %v3017_v14 = vpack.c.bf16 %v902_v1, %v898_v0  ;;  %v2957_v29 = vpack.c.bf16 %v908_v9, %v904_v5  ;;  %v925_v0 = vld [vmem:[#allocation14 + $0x330] sm:$0xff]  ;;  %v931_v5 = vld [vmem:[#allocation14 + $0x360] sm:$0xff]  ;;  %v930_v9 = vld [vmem:[#allocation14 + $0x358] sm:$0xff] }
 0x111   : >> { %3004 = vmatpush1.bf16.msra.mxu1 %v3003_v32  ;;  %v910_v32 = vld [vmem:[#allocation14 + $0x2b8] sm:$0xff] }
 0x112   : >> { %3006 = vmatprep.subr.bf16.mxu1 %v3005_v35  ;;  %v3019_v35 = vpack.c.bf16 %v901_v16, %v897_v15  ;;  %v2971_v15 = vpack.c.bf16 %v931_v5, %v927_v61  ;;  %v935_v16 = vld [vmem:[#allocation14 + $0x380] sm:$0xff]  ;;  %v1124_v61 = vld [vmem:[#allocation15 + $0x68] sm:$0xff]  ;;  %v1113_v5 = vld [vmem:[#allocation15 + $0x10] sm:$0xff] }
 0x113   : >> { %2944 = vmatpush1.bf16.msra.mxu0 %v2943_v33  ;;  %v912_v33 = vld [vmem:[#allocation14 + $0x2c8] sm:$0xff] }
 0x114   : >> { %2946 = vmatprep.subr.bf16.mxu0 %v2945_v38  ;;  %v3021_v38 = vpack.c.bf16 %v910_v32, %v906_v31  ;;  %v2961_v41 = vpack.c.bf16 %v916_v34, %v912_v33  ;;  %v933_v31 = vld [vmem:[#allocation14 + $0x370] sm:$0xff]  ;;  %v939_v33 = vld [vmem:[#allocation14 + $0x3a0] sm:$0xff]  ;;  %v938_v34 = vld [vmem:[#allocation14 + $0x398] sm:$0xff] }
 0x115   : >> { %3008 = vmatpush1.bf16.msra.mxu1 %v3007_v44  ;;  %v918_v44 = vld [vmem:[#allocation14 + $0x2f8] sm:$0xff] }
 0x116   : >> { %3010 = vmatprep.subr.bf16.mxu1 %v3009_v47  ;;  %v3023_v47 = vpack.c.bf16 %v909_v40, %v905_v39  ;;  %v2975_v39 = vpack.c.bf16 %v939_v33, %v935_v16  ;;  %v943_v40 = vld [vmem:[#allocation14 + $0x3c0] sm:$0xff]  ;;  %v1132_v16 = vld [vmem:[#allocation15 + $0xa8] sm:$0xff]  ;;  %v1121_v33 = vld [vmem:[#allocation15 + $0x50] sm:$0xff] }
 0x117   : >> { %2948 = vmatpush1.bf16.msra.mxu0 %v2947_v45  ;;  %v920_v45 = vld [vmem:[#allocation14 + $0x308] sm:$0xff] }
 0x118   : >> { %2950 = vmatprep.subr.bf16.mxu0 %v2949_v50  ;;  %v3025_v50 = vpack.c.bf16 %v918_v44, %v914_v43  ;;  %v2965_v53 = vpack.c.bf16 %v924_v46, %v920_v45  ;;  %v941_v43 = vld [vmem:[#allocation14 + $0x3b0] sm:$0xff]  ;;  %v947_v45 = vld [vmem:[#allocation14 + $0x3e0] sm:$0xff]  ;;  %v946_v46 = vld [vmem:[#allocation14 + $0x3d8] sm:$0xff] }
 0x119   : >> { %3012 = vmatpush1.bf16.msra.mxu1 %v3011_v56  ;;  %v926_v56 = vld [vmem:[#allocation14 + $0x338] sm:$0xff] }
 0x11a   : >> { %3014 = vmatprep.subr.bf16.mxu1 %v3013_v59  ;;  %v3027_v59 = vpack.c.bf16 %v917_v52, %v913_v51  ;;  %v2979_v51 = vpack.c.bf16 %v947_v45, %v943_v40  ;;  %v1111_v52 = vld [vmem:[#allocation15] sm:$0xff]  ;;  %v1140_v40 = vld [vmem:[#allocation15 + $0xe8] sm:$0xff]  ;;  %v1129_v45 = vld [vmem:[#allocation15 + $0x90] sm:$0xff] }
 0x11b   : >> { %2952 = vmatpush1.bf16.msra.mxu0 %v2951_v57  ;;  %v928_v57 = vld [vmem:[#allocation14 + $0x348] sm:$0xff] }
 0x11c   : >> { %2954 = vmatprep.subr.bf16.mxu0 %v2953_v62  ;;  %v3029_v62 = vpack.c.bf16 %v926_v56, %v922_v55  ;;  %v2969_v1 = vpack.c.bf16 %v932_v58, %v928_v57  ;;  %v949_v55 = vld [vmem:[#allocation14 + $0x3f0] sm:$0xff]  ;;  %v1115_v57 = vld [vmem:[#allocation15 + $0x20] sm:$0xff]  ;;  %v1114_v58 = vld [vmem:[#allocation15 + $0x18] sm:$0xff] }
 0x11d   : >> { %3016 = vmatpush1.bf16.msra.mxu1 %v3015_v11  ;;  %v934_v11 = vld [vmem:[#allocation14 + $0x378] sm:$0xff] }
 0x11e   : >> { %3018 = vmatprep.subr.bf16.mxu1 %v3017_v14  ;;  %v3031_v14 = vpack.c.bf16 %v925_v0, %v921_v63  ;;  %v3047_v63 = vpack.c.bf16 %v1115_v57, %v1111_v52  ;;  %v1119_v0 = vld [vmem:[#allocation15 + $0x40] sm:$0xff] }
 0x11f   : >> { %2956 = vmatpush1.bf16.msra.mxu0 %v2955_v12  ;;  %v936_v12 = vld [vmem:[#allocation14 + $0x388] sm:$0xff] }
 0x120   : >> { %2958 = vmatprep.subr.bf16.mxu0 %v2957_v29  ;;  %v3033_v29 = vpack.c.bf16 %v934_v11, %v930_v9  ;;  %v2973_v32 = vpack.c.bf16 %v940_v13, %v936_v12  ;;  %v1117_v9 = vld [vmem:[#allocation15 + $0x30] sm:$0xff]  ;;  %v1123_v12 = vld [vmem:[#allocation15 + $0x60] sm:$0xff]  ;;  %v1122_v13 = vld [vmem:[#allocation15 + $0x58] sm:$0xff] }
 0x121   : >> { %3020 = vmatpush1.bf16.msra.mxu1 %v3019_v35  ;;  %v942_v35 = vld [vmem:[#allocation14 + $0x3b8] sm:$0xff] }
 0x122   : >> { %3022 = vmatprep.subr.bf16.mxu1 %v3021_v38  ;;  %v3035_v38 = vpack.c.bf16 %v933_v31, %v929_v30  ;;  %v3051_v30 = vpack.c.bf16 %v1123_v12, %v1119_v0  ;;  %v1127_v31 = vld [vmem:[#allocation15 + $0x80] sm:$0xff] }
 0x123   : >> { %2960 = vmatpush1.bf16.msra.mxu0 %v2959_v36  ;;  %v944_v36 = vld [vmem:[#allocation14 + $0x3c8] sm:$0xff] }
 0x124   : >> { %2962 = vmatprep.subr.bf16.mxu0 %v2961_v41  ;;  %v3037_v41 = vpack.c.bf16 %v942_v35, %v938_v34  ;;  %v2977_v44 = vpack.c.bf16 %v948_v37, %v944_v36  ;;  %v1125_v34 = vld [vmem:[#allocation15 + $0x70] sm:$0xff]  ;;  %v1131_v36 = vld [vmem:[#allocation15 + $0xa0] sm:$0xff]  ;;  %v1130_v37 = vld [vmem:[#allocation15 + $0x98] sm:$0xff] }
 0x125   : >> { %3024 = vmatpush1.bf16.msra.mxu1 %v3023_v47  ;;  %v950_v47 = vld [vmem:[#allocation14 + $0x3f8] sm:$0xff] }
 0x126   : >> { %3026 = vmatprep.subr.bf16.mxu1 %v3025_v50  ;;  %v3039_v50 = vpack.c.bf16 %v941_v43, %v937_v42  ;;  %v3055_v42 = vpack.c.bf16 %v1131_v36, %v1127_v31  ;;  %v1135_v43 = vld [vmem:[#allocation15 + $0xc0] sm:$0xff] }
 0x127   : >> { %2964 = vmatpush1.bf16.msra.mxu0 %v2963_v48  ;;  %v1112_v48 = vld [vmem:[#allocation15 + $0x8] sm:$0xff] }
 0x128   : >> { %2966 = vmatprep.subr.bf16.mxu0 %v2965_v53  ;;  %v3041_v53 = vpack.c.bf16 %v950_v47, %v946_v46  ;;  %v3045_v56 = vpack.c.bf16 %v1116_v49, %v1112_v48  ;;  %v1133_v46 = vld [vmem:[#allocation15 + $0xb0] sm:$0xff]  ;;  %v1139_v48 = vld [vmem:[#allocation15 + $0xe0] sm:$0xff]  ;;  %v1138_v49 = vld [vmem:[#allocation15 + $0xd8] sm:$0xff] }
 0x129   : >> { %3028 = vmatpush1.bf16.msra.mxu1 %v3027_v59  ;;  %v1118_v59 = vld [vmem:[#allocation15 + $0x38] sm:$0xff]  ;;  %v3119_v52 = vpack.c.bf16 %v1133_v46, %v1129_v45  ;;  %v1161_v46 = vld [vmem:[#allocation15 + $0x190] sm:$0xff] }
 0x12a   : >> { %3030 = vmatprep.subr.bf16.mxu1 %v3029_v62  ;;  %v3043_v62 = vpack.c.bf16 %v949_v55, %v945_v54  ;;  %v1137_v55 = vld [vmem:[#allocation15 + $0xd0] sm:$0xff] }
 0x12b   : >> { %2968 = vmatpush1.bf16.msra.mxu0 %v2967_v60  ;;  %v1120_v60 = vld [vmem:[#allocation15 + $0x48] sm:$0xff] }
 0x12c   : >> { %2970 = vmatprep.subr.bf16.mxu0 %v2969_v1  ;;  %v3109_v1 = vpack.c.bf16 %v1118_v59, %v1114_v58  ;;  %v3049_v11 = vpack.c.bf16 %v1124_v61, %v1120_v60  ;;  %v1147_v58 = vld [vmem:[#allocation15 + $0x120] sm:$0xff]  ;;  %v1146_v59 = vld [vmem:[#allocation15 + $0x118] sm:$0xff]  ;;  %v1152_v61 = vld [vmem:[#allocation15 + $0x148] sm:$0xff] }
 0x12d   : >> { %3032 = vmatpush1.bf16.msra.mxu1 %v3031_v14  ;;  %v1126_v14 = vld [vmem:[#allocation15 + $0x78] sm:$0xff] }
 0x12e   : >> { %3034 = vmatprep.subr.bf16.mxu1 %v3033_v29  ;;  %v3111_v29 = vpack.c.bf16 %v1117_v9, %v1113_v5  ;;  %v1150_v60 = vld [vmem:[#allocation15 + $0x138] sm:$0xff]  ;;  %v1145_v9 = vld [vmem:[#allocation15 + $0x110] sm:$0xff] }
 0x12f   : >> { %2972 = vmatpush1.bf16.msra.mxu0 %v2971_v15  ;;  %v1128_v15 = vld [vmem:[#allocation15 + $0x88] sm:$0xff]  ;;  %v3125_v5 = vpack.c.bf16 %v1150_v60, %v1146_v59  ;;  %v1179_v59 = vld [vmem:[#allocation15 + $0x220] sm:$0xff]  ;;  %v1178_v60 = vld [vmem:[#allocation15 + $0x218] sm:$0xff] }
 0x130   : >> { %2974 = vmatprep.subr.bf16.mxu0 %v2973_v32  ;;  %v3113_v32 = vpack.c.bf16 %v1126_v14, %v1122_v13  ;;  %v3053_v35 = vpack.c.bf16 %v1132_v16, %v1128_v15  ;;  %v1155_v13 = vld [vmem:[#allocation15 + $0x160] sm:$0xff]  ;;  %v1154_v14 = vld [vmem:[#allocation15 + $0x158] sm:$0xff]  ;;  %v1160_v16 = vld [vmem:[#allocation15 + $0x188] sm:$0xff] }
 0x131   : >> { %3036 = vmatpush1.bf16.msra.mxu1 %v3035_v38  ;;  %v1134_v38 = vld [vmem:[#allocation15 + $0xb8] sm:$0xff] }
 0x132   : >> { %3038 = vmatprep.subr.bf16.mxu1 %v3037_v41  ;;  %v3115_v41 = vpack.c.bf16 %v1125_v34, %v1121_v33  ;;  %v1158_v15 = vld [vmem:[#allocation15 + $0x178] sm:$0xff]  ;;  %v1153_v34 = vld [vmem:[#allocation15 + $0x150] sm:$0xff] }
 0x133   : >> { %2976 = vmatpush1.bf16.msra.mxu0 %v2975_v39  ;;  %v1136_v39 = vld [vmem:[#allocation15 + $0xc8] sm:$0xff]  ;;  %v3129_v33 = vpack.c.bf16 %v1158_v15, %v1154_v14  ;;  %v1187_v14 = vld [vmem:[#allocation15 + $0x260] sm:$0xff]  ;;  %v1186_v15 = vld [vmem:[#allocation15 + $0x258] sm:$0xff] }
 0x134   : >> { %2978 = vmatprep.subr.bf16.mxu0 %v2977_v44  ;;  %v3117_v44 = vpack.c.bf16 %v1134_v38, %v1130_v37  ;;  %v3057_v47 = vpack.c.bf16 %v1140_v40, %v1136_v39  ;;  %v1163_v37 = vld [vmem:[#allocation15 + $0x1a0] sm:$0xff]  ;;  %v1162_v38 = vld [vmem:[#allocation15 + $0x198] sm:$0xff]  ;;  %v1168_v40 = vld [vmem:[#allocation15 + $0x1c8] sm:$0xff] }
 0x135   : >> { %3040 = vmatpush1.bf16.msra.mxu1 %v3039_v50  ;;  %v1142_v50 = vld [vmem:[#allocation15 + $0xf8] sm:$0xff] }
 0x136   : >> { %3042 = vmatprep.subr.bf16.mxu1 %v3041_v53  ;;  %v3059_v53 = vpack.c.bf16 %v1139_v48, %v1135_v43  ;;  %v3121_v54 = vpack.c.bf16 %v1142_v50, %v1138_v49  ;;  %v1166_v39 = vld [vmem:[#allocation15 + $0x1b8] sm:$0xff]  ;;  %v1171_v49 = vld [vmem:[#allocation15 + $0x1e0] sm:$0xff] }
 0x137   : >> { %2980 = vmatpush1.bf16.msra.mxu0 %v2979_v51  ;;  %v1144_v51 = vld [vmem:[#allocation15 + $0x108] sm:$0xff]  ;;  %v3133_v45 = vpack.c.bf16 %v1166_v39, %v1162_v38  ;;  %v1170_v50 = vld [vmem:[#allocation15 + $0x1d8] sm:$0xff]  ;;  %v1195_v38 = vld [vmem:[#allocation15 + $0x2a0] sm:$0xff] }
 0x138   : >> { %3046 = vmatprep.subr.bf16.mxu0 %v3045_v56  ;;  %v1141_v56 = vld [vmem:[#allocation15 + $0xf0] sm:$0xff]  ;;  %v1194_v39 = vld [vmem:[#allocation15 + $0x298] sm:$0xff] }
 0x139   : >> { %3044 = vmatpush1.bf16.msra.mxu1 %v3043_v62  ;;  %v1156_v62 = vld [vmem:[#allocation15 + $0x168] sm:$0xff] }
 0x13a   : >> { %1016 = vmatmul.mubr.f32.vlgmr.msra.gmra.mrb[2].mxu0 %v4217_v3  ;;  %3110 = vmatprep.subr.bf16.mxu1 %v3109_v1  ;;  %v1151_v1 = vld [vmem:[#allocation15 + $0x140] sm:$0xff]  ;;  %v3065_v12 = vpack.c.bf16 %v1156_v62, %v1152_v61  ;;  %v1182_v61 = vld [vmem:[#allocation15 + $0x238] sm:$0xff]  ;;  %v1184_v62 = vld [vmem:[#allocation15 + $0x248] sm:$0xff] }
 0x13b   : >> { %3048 = vmatpush1.bf16.msra.mxu0 %v3047_v63  ;;  %1303 = vmatprep.mubr.f32.mxu0 %v4209_v6  ;;  %v3123_v63 = vpack.c.bf16 %v1141_v56, %v1137_v55  ;;  %v3067_v31 = vpack.c.bf16 %v1155_v13, %v1151_v1  ;;  %v1169_v56 = vld [vmem:[#allocation15 + $0x1d0] sm:$0xff] }
 0x13c   : >> { %3050 = vmatprep.subr.bf16.mxu0 %v3049_v11  ;;  %1087 = vmatmul.mubr.f32.vlgmr.msra.gmra.mrb[2].mxu1 %v4217_v3  ;;  %v1148_v3 = vld [vmem:[#allocation15 + $0x128] sm:$0xff]  ;;  %v1149_v11 = vld [vmem:[#allocation15 + $0x130] sm:$0xff] }
 0x13d   : >> { %3112 = vmatpush1.bf16.msra.mxu1 %v3111_v29  ;;  %1374 = vmatprep.mubr.f32.mxu1 %v4209_v6  ;;  %v1143_v6 = vld [vmem:[#allocation15 + $0x100] sm:$0xff]  ;;  %v3061_v57 = vpack.c.bf16 %v1148_v3, %v1144_v51  ;;  %v1164_v29 = vld [vmem:[#allocation15 + $0x1a8] sm:$0xff]  ;;  %v1174_v51 = vld [vmem:[#allocation15 + $0x1f8] sm:$0xff] }
 0x13e   : >> { %3114 = vmatprep.subr.bf16.mxu1 %v3113_v32  ;;  %v3063_v0 = vpack.c.bf16 %v1147_v58, %v1143_v6  ;;  %v1159_v32 = vld [vmem:[#allocation15 + $0x180] sm:$0xff]  ;;  %v3069_v36 = vpack.c.bf16 %v1164_v29, %v1160_v16  ;;  %v1176_v3 = vld [vmem:[#allocation15 + $0x208] sm:$0xff]  ;;  %v3137_v55 = vpack.c.bf16 %v1174_v51, %v1170_v50  ;;  %v1190_v16 = vld [vmem:[#allocation15 + $0x278] sm:$0xff] }
 0x13f   : >> { %3052 = vmatpush1.bf16.msra.mxu0 %v3051_v30  ;;  %v3127_v30 = vpack.c.bf16 %v1149_v11, %v1145_v9  ;;  %v3071_v43 = vpack.c.bf16 %v1163_v37, %v1159_v32  ;;  %v3141_v9 = vpack.c.bf16 %v1182_v61, %v1178_v60  ;;  %v1177_v11 = vld [vmem:[#allocation15 + $0x210] sm:$0xff]  ;;  %v1192_v29 = vld [vmem:[#allocation15 + $0x288] sm:$0xff]  ;;  %v1203_v50 = vld [vmem:[#allocation15 + $0x2e0] sm:$0xff] }
 0x140   : >> { %3054 = vmatprep.subr.bf16.mxu0 %v3053_v35  ;;  %v1157_v35 = vld [vmem:[#allocation15 + $0x170] sm:$0xff]  ;;  %v1202_v51 = vld [vmem:[#allocation15 + $0x2d8] sm:$0xff]  ;;  %v1211_v60 = vld [vmem:[#allocation15 + $0x320] sm:$0xff] }
 0x141   : >> { %3116 = vmatpush1.bf16.msra.mxu1 %v3115_v41  ;;  %v1172_v41 = vld [vmem:[#allocation15 + $0x1e8] sm:$0xff]  ;;  %v1210_v61 = vld [vmem:[#allocation15 + $0x318] sm:$0xff] }
 0x142   : >> { %3118 = vmatprep.subr.bf16.mxu1 %v3117_v44  ;;  %v1167_v44 = vld [vmem:[#allocation15 + $0x1c0] sm:$0xff]  ;;  %v3073_v48 = vpack.c.bf16 %v1172_v41, %v1168_v40  ;;  %v1198_v40 = vld [vmem:[#allocation15 + $0x2b8] sm:$0xff]  ;;  %v1200_v41 = vld [vmem:[#allocation15 + $0x2c8] sm:$0xff] }
 0x143   : >> { %3056 = vmatpush1.bf16.msra.mxu0 %v3055_v42  ;;  %v3131_v42 = vpack.c.bf16 %v1157_v35, %v1153_v34  ;;  %v3075_v6 = vpack.c.bf16 %v1171_v49, %v1167_v44  ;;  %v3145_v34 = vpack.c.bf16 %v1190_v16, %v1186_v15  ;;  %v1185_v35 = vld [vmem:[#allocation15 + $0x250] sm:$0xff]  ;;  %v1219_v15 = vld [vmem:[#allocation15 + $0x360] sm:$0xff]  ;;  %v1218_v16 = vld [vmem:[#allocation15 + $0x358] sm:$0xff] }
 0x144   : >> { %3058 = vmatprep.subr.bf16.mxu0 %v3057_v47  ;;  %v1165_v47 = vld [vmem:[#allocation15 + $0x1b0] sm:$0xff] }
 0x145   : >> { %3120 = vmatpush1.bf16.msra.mxu1 %v3119_v52  ;;  %v1180_v52 = vld [vmem:[#allocation15 + $0x228] sm:$0xff] }
 0x146   : >> { %3122 = vmatprep.subr.bf16.mxu1 %v3121_v54  ;;  %v1175_v54 = vld [vmem:[#allocation15 + $0x200] sm:$0xff]  ;;  %v3077_v58 = vpack.c.bf16 %v1180_v52, %v1176_v3  ;;  %v1206_v3 = vld [vmem:[#allocation15 + $0x2f8] sm:$0xff]  ;;  %v1208_v52 = vld [vmem:[#allocation15 + $0x308] sm:$0xff] }
 0x147   : >> { %3060 = vmatpush1.bf16.msra.mxu0 %v3059_v53  ;;  %v3135_v53 = vpack.c.bf16 %v1165_v47, %v1161_v46  ;;  %v3079_v1 = vpack.c.bf16 %v1179_v59, %v1175_v54  ;;  %v3149_v46 = vpack.c.bf16 %v1198_v40, %v1194_v39  ;;  %v1193_v47 = vld [vmem:[#allocation15 + $0x290] sm:$0xff]  ;;  %v1227_v39 = vld [vmem:[#allocation15 + $0x3a0] sm:$0xff]  ;;  %v1226_v40 = vld [vmem:[#allocation15 + $0x398] sm:$0xff] }
 0x148   : >> { %3062 = vmatprep.subr.bf16.mxu0 %v3061_v57  ;;  %v1173_v57 = vld [vmem:[#allocation15 + $0x1f0] sm:$0xff] }
 0x149   : >> { %3124 = vmatpush1.bf16.msra.mxu1 %v3123_v63  ;;  %v1188_v63 = vld [vmem:[#allocation15 + $0x268] sm:$0xff] }
 0x14a   : >> { %3126 = vmatprep.subr.bf16.mxu1 %v3125_v5  ;;  %v1183_v5 = vld [vmem:[#allocation15 + $0x240] sm:$0xff]  ;;  %v3081_v13 = vpack.c.bf16 %v1188_v63, %v1184_v62  ;;  %v1214_v62 = vld [vmem:[#allocation15 + $0x338] sm:$0xff]  ;;  %v1216_v63 = vld [vmem:[#allocation15 + $0x348] sm:$0xff] }
 0x14b   : >> { %3064 = vmatpush1.bf16.msra.mxu0 %v3063_v0  ;;  %v3139_v0 = vpack.c.bf16 %v1173_v57, %v1169_v56  ;;  %v3083_v32 = vpack.c.bf16 %v1187_v14, %v1183_v5  ;;  %v3153_v56 = vpack.c.bf16 %v1206_v3, %v1202_v51  ;;  %v1201_v57 = vld [vmem:[#allocation15 + $0x2d0] sm:$0xff]  ;;  %v1235_v51 = vld [vmem:[#allocation15 + $0x3e0] sm:$0xff]  ;;  %v1234_v3 = vld [vmem:[#allocation15 + $0x3d8] sm:$0xff] }
 0x14c   : >> { %3066 = vmatprep.subr.bf16.mxu0 %v3065_v12  ;;  %v1181_v12 = vld [vmem:[#allocation15 + $0x230] sm:$0xff] }
 0x14d   : >> { %3128 = vmatpush1.bf16.msra.mxu1 %v3127_v30  ;;  %v1196_v30 = vld [vmem:[#allocation15 + $0x2a8] sm:$0xff] }
 0x14e   : >> { %3130 = vmatprep.subr.bf16.mxu1 %v3129_v33  ;;  %v1191_v33 = vld [vmem:[#allocation15 + $0x280] sm:$0xff]  ;;  %v3085_v37 = vpack.c.bf16 %v1196_v30, %v1192_v29  ;;  %v1222_v29 = vld [vmem:[#allocation15 + $0x378] sm:$0xff]  ;;  %v1224_v30 = vld [vmem:[#allocation15 + $0x388] sm:$0xff] }
 0x14f   : >> { %3068 = vmatpush1.bf16.msra.mxu0 %v3067_v31  ;;  %v3143_v31 = vpack.c.bf16 %v1181_v12, %v1177_v11  ;;  %v3087_v44 = vpack.c.bf16 %v1195_v38, %v1191_v33  ;;  %v3157_v11 = vpack.c.bf16 %v1214_v62, %v1210_v61  ;;  %v1209_v12 = vld [vmem:[#allocation15 + $0x310] sm:$0xff] }
 0x150   : >> { %3070 = vmatprep.subr.bf16.mxu0 %v3069_v36  ;;  %v1189_v36 = vld [vmem:[#allocation15 + $0x270] sm:$0xff] }
 0x151   : >> { %3132 = vmatpush1.bf16.msra.mxu1 %v3131_v42  ;;  %v1204_v42 = vld [vmem:[#allocation15 + $0x2e8] sm:$0xff] }
 0x152   : >> { %3134 = vmatprep.subr.bf16.mxu1 %v3133_v45  ;;  %v1199_v45 = vld [vmem:[#allocation15 + $0x2c0] sm:$0xff]  ;;  %v3089_v49 = vpack.c.bf16 %v1204_v42, %v1200_v41  ;;  %v1230_v41 = vld [vmem:[#allocation15 + $0x3b8] sm:$0xff]  ;;  %v1232_v42 = vld [vmem:[#allocation15 + $0x3c8] sm:$0xff] }
 0x153   : >> { %3072 = vmatpush1.bf16.msra.mxu0 %v3071_v43  ;;  %v3147_v43 = vpack.c.bf16 %v1189_v36, %v1185_v35  ;;  %v3091_v54 = vpack.c.bf16 %v1203_v50, %v1199_v45  ;;  %v3161_v35 = vpack.c.bf16 %v1222_v29, %v1218_v16  ;;  %v1217_v36 = vld [vmem:[#allocation15 + $0x350] sm:$0xff]  ;;  %v1403_v29 = vld [vmem:[#allocation17 + $0x20] sm:$0xff] }
 0x154   : >> { %3074 = vmatprep.subr.bf16.mxu0 %v3073_v48  ;;  %v1197_v48 = vld [vmem:[#allocation15 + $0x2b0] sm:$0xff] }
 0x155   : >> { %3136 = vmatpush1.bf16.msra.mxu1 %v3135_v53  ;;  %v1212_v53 = vld [vmem:[#allocation15 + $0x328] sm:$0xff] }
 0x156   : >> { %3138 = vmatprep.subr.bf16.mxu1 %v3137_v55  ;;  %v1207_v55 = vld [vmem:[#allocation15 + $0x300] sm:$0xff]  ;;  %v3093_v59 = vpack.c.bf16 %v1212_v53, %v1208_v52  ;;  %v1238_v52 = vld [vmem:[#allocation15 + $0x3f8] sm:$0xff] }
 0x157   : >> { %3076 = vmatpush1.bf16.msra.mxu0 %v3075_v6  ;;  %v3151_v6 = vpack.c.bf16 %v1197_v48, %v1193_v47  ;;  %v3095_v5 = vpack.c.bf16 %v1211_v60, %v1207_v55  ;;  %v3165_v47 = vpack.c.bf16 %v1230_v41, %v1226_v40  ;;  %v1225_v48 = vld [vmem:[#allocation15 + $0x390] sm:$0xff] }
 0x158   : >> { %3078 = vmatprep.subr.bf16.mxu0 %v3077_v58  ;;  %v1205_v58 = vld [vmem:[#allocation15 + $0x2f0] sm:$0xff] }
 0x159   : >> { %3140 = vmatpush1.bf16.msra.mxu1 %v3139_v0  ;;  %v1220_v0 = vld [vmem:[#allocation15 + $0x368] sm:$0xff]  ;;  %v1233_v55 = vld [vmem:[#allocation15 + $0x3d0] sm:$0xff] }
 0x15a   : >> { %3142 = vmatprep.subr.bf16.mxu1 %v3141_v9  ;;  %v1215_v9 = vld [vmem:[#allocation15 + $0x340] sm:$0xff]  ;;  %v3097_v14 = vpack.c.bf16 %v1220_v0, %v1216_v63 }
 0x15b   : >> { %3080 = vmatpush1.bf16.msra.mxu0 %v3079_v1  ;;  %v3155_v1 = vpack.c.bf16 %v1205_v58, %v1201_v57  ;;  %v3099_v33 = vpack.c.bf16 %v1219_v15, %v1215_v9  ;;  %v1399_v9 = vld [vmem:[#allocation17] sm:$0xff] }
 0x15c   : >> { %3082 = vmatprep.subr.bf16.mxu0 %v3081_v13  ;;  %v1213_v13 = vld [vmem:[#allocation15 + $0x330] sm:$0xff] }
 0x15d   : >> { %3144 = vmatpush1.bf16.msra.mxu1 %v3143_v31  ;;  %v1228_v31 = vld [vmem:[#allocation15 + $0x3a8] sm:$0xff] }
 0x15e   : >> { %3146 = vmatprep.subr.bf16.mxu1 %v3145_v34  ;;  %v1223_v34 = vld [vmem:[#allocation15 + $0x380] sm:$0xff]  ;;  %v3101_v38 = vpack.c.bf16 %v1228_v31, %v1224_v30  ;;  %v1404_v30 = vld [vmem:[#allocation17 + $0x28] sm:$0xff] }
 0x15f   : >> { %3084 = vmatpush1.bf16.msra.mxu0 %v3083_v32  ;;  %v3159_v32 = vpack.c.bf16 %v1213_v13, %v1209_v12  ;;  %v3103_v45 = vpack.c.bf16 %v1227_v39, %v1223_v34  ;;  %v4265_v13 = vmov 0.0|0.0  }
 0x160   : >> { %3086 = vmatprep.subr.bf16.mxu0 %v3085_v37  ;;  %v1221_v37 = vld [vmem:[#allocation15 + $0x370] sm:$0xff] }
 0x161   : >> { %3148 = vmatpush1.bf16.msra.mxu1 %v3147_v43  ;;  %v1236_v43 = vld [vmem:[#allocation15 + $0x3e8] sm:$0xff] }
 0x162   : >> { %3150 = vmatprep.subr.bf16.mxu1 %v3149_v46  ;;  %v1231_v46 = vld [vmem:[#allocation15 + $0x3c0] sm:$0xff]  ;;  %v3105_v50 = vpack.c.bf16 %v1236_v43, %v1232_v42 }
 0x163   : >> { %3088 = vmatpush1.bf16.msra.mxu0 %v3087_v44  ;;  %v3163_v44 = vpack.c.bf16 %v1221_v37, %v1217_v36  ;;  %v1405_v36 = vld [vmem:[#allocation17 + $0x30] sm:$0xff]  ;;  %v1406_v37 = vld [vmem:[#allocation17 + $0x38] sm:$0xff] }
 0x164   : >> { %3090 = vmatprep.subr.bf16.mxu0 %v3089_v49  ;;  %v1229_v49 = vld [vmem:[#allocation15 + $0x3b0] sm:$0xff]  ;;  %v3183_v40 = vpack.c.bf16 %v1406_v37, %v1405_v36 }
 0x165   : >> { %3152 = vmatpush1.bf16.msra.mxu1 %v3151_v6  ;;  %v3167_v53 = vpack.c.bf16 %v1229_v49, %v1225_v48  ;;  %v3107_v6 = vpack.c.bf16 %v1235_v51, %v1231_v46  ;;  %v1409_v49 = vld [vmem:[#allocation17 + $0x50] sm:$0xff] }
 0x166   : >> { %3154 = vmatprep.subr.bf16.mxu1 %v3153_v56  ;;  %v1237_v56 = vld [vmem:[#allocation15 + $0x3f0] sm:$0xff] }
 0x167   : >> { %3092 = vmatpush1.bf16.msra.mxu0 %v3091_v54  ;;  %v3169_v54 = vpack.c.bf16 %v1238_v52, %v1234_v3  ;;  %v3171_v57 = vpack.c.bf16 %v1237_v56, %v1233_v55  ;;  %v1411_v52 = vld [vmem:[#allocation17 + $0x60] sm:$0xff]  ;;  %v1413_v55 = vld [vmem:[#allocation17 + $0x70] sm:$0xff]  ;;  %v1414_v56 = vld [vmem:[#allocation17 + $0x78] sm:$0xff] }
 0x168   : >> { %3094 = vmatprep.subr.bf16.mxu0 %v3093_v59 }
 0x169   : >> { %3156 = vmatpush1.bf16.msra.mxu1 %v3155_v1 }
 0x16a   : >> { %3158 = vmatprep.subr.bf16.mxu1 %v3157_v11  ;;  %v1400_v11 = vld [vmem:[#allocation17 + $0x8] sm:$0xff] }
 0x16b   : >> { %3096 = vmatpush1.bf16.msra.mxu0 %v3095_v5  ;;  %v3174_v12 = vpack.c.bf16 %v1400_v11, %v1399_v9 }
 0x16c   : >> { %3098 = vmatprep.subr.bf16.mxu0 %v3097_v14  ;;  %v1402_v14 = vld [vmem:[#allocation17 + $0x18] sm:$0xff] }
 0x16d   : >> { %3160 = vmatpush1.bf16.msra.mxu1 %v3159_v32  ;;  %v3180_v32 = vpack.c.bf16 %v1404_v30, %v1403_v29 }
 0x16e   : >> { %3162 = vmatprep.subr.bf16.mxu1 %v3161_v35 }
 0x16f   : >> { %3100 = vmatpush1.bf16.msra.mxu0 %v3099_v33 }
 0x170   : >> { %3102 = vmatprep.subr.bf16.mxu0 %v3101_v38 }
 0x171   : >> { %3164 = vmatpush1.bf16.msra.mxu1 %v3163_v44  ;;  %v1407_v44 = vld [vmem:[#allocation17 + $0x40] sm:$0xff] }
 0x172   : >> { %3166 = vmatprep.subr.bf16.mxu1 %v3165_v47 }
 0x173   : >> { %3104 = vmatpush1.bf16.msra.mxu0 %v3103_v45  ;;  %v1408_v45 = vld [vmem:[#allocation17 + $0x48] sm:$0xff] }
 0x174   : >> { %3106 = vmatprep.subr.bf16.mxu0 %v3105_v50  ;;  %v3186_v47 = vpack.c.bf16 %v1408_v45, %v1407_v44  ;;  %v1410_v50 = vld [vmem:[#allocation17 + $0x58] sm:$0xff] }
 0x175   : >> { %3168 = vmatpush1.bf16.msra.mxu1 %v3167_v53  ;;  %v3189_v51 = vpack.c.bf16 %v1410_v50, %v1409_v49  ;;  %v1412_v53 = vld [vmem:[#allocation17 + $0x68] sm:$0xff] }
 0x176   : >> { %3170 = vmatprep.subr.bf16.mxu1 %v3169_v54 }
 0x177   : >> { %3108 = vmatpush1.bf16.msra.mxu0 %v3107_v6  ;;  %v3192_v6 = vpack.c.bf16 %v1412_v53, %v1411_v52 }
 0x178   : >> { %3173 = vmatprep.subr.bf16.mxu0 %v4265_v13 }
 0x179   : >> { %3172 = vmatpush1.bf16.msra.mxu1 %v3171_v57  ;;  %v3195_v57 = vpack.c.bf16 %v1414_v56, %v1413_v55 }
 0x17a   : >> { %1304 = vmatmul.mubr.f32.vlgmr.msra.gmra.mrb[4].mxu0 %v4213_v4 }
 0x17b   : >> { %3175 = vmatpush3.bf16.msra.mxu0 %v3174_v12 }
 0x17c   : >> { %1375 = vmatmul.mubr.f32.vlgmr.msra.gmra.mrb[4].mxu1 %v4213_v4  ;;  %3176 = vmatprep.subr.bf16.mxu0 %v4265_v13  ;;  %v1401_v4 = vld [vmem:[#allocation17 + $0x10] sm:$0xff] }
 0x17d   : >> { %v3177_v16 = vpack.c.bf16 %v1402_v14, %v1401_v4 }
 0x17f   : >> { %3178 = vmatpush3.bf16.msra.mxu0 %v3177_v16 }
 0x180   : >> { %3179 = vmatprep.subr.bf16.mxu0 %v4265_v13 }
 0x183   : >> { %3181 = vmatpush3.bf16.msra.mxu0 %v3180_v32 }
 0x184   : >> { %3182 = vmatprep.subr.bf16.mxu0 %v4265_v13 }
 0x187   : >> { %3184 = vmatpush3.bf16.msra.mxu0 %v3183_v40 }
 0x188   : >> { %3185 = vmatprep.subr.bf16.mxu0 %v4265_v13 }
 0x18b   : >> { %3187 = vmatpush3.bf16.msra.mxu0 %v3186_v47 }
 0x18c   : >> { %3188 = vmatprep.subr.bf16.mxu0 %v4265_v13 }
 0x18f   : >> { %3190 = vmatpush3.bf16.msra.mxu0 %v3189_v51 }
 0x190   : >> { %3191 = vmatprep.subr.bf16.mxu0 %v4265_v13 }
 0x193   : >> { %3193 = vmatpush3.bf16.msra.mxu0 %v3192_v6 }
 0x194   : >> { %3194 = vmatprep.subr.bf16.mxu0 %v4265_v13 }
 0x197   : >> { %3196 = vmatpush3.bf16.msra.mxu0 %v3195_v57 }
 0x1cd   : >> { %v729_v58 = vpop.f32.mrb[0].mxu0 }
 0x1ce   : >> { %v730_v59 = vadd.f32 %v729_v58, %v4601_v17  ;;  %v731_v60 = vpop.f32.mrb[1].mxu0 }
 0x1cf   : >> { %v732_v61 = vadd.f32 %v731_v60, %v4603_v18  ;;  %v800_v63 = vpop.f32.mrb[0].mxu1  ;;  %v4267_v60 = vmov 0.0  }
 0x1d0   : >> { %v805_v62 = vmul.f32 0.5, %v730_v59  ;;  %v801_v1 = vadd.f32 %v800_v63, %v4605_v19  ;;  %v802_v5 = vpop.f32.mrb[1].mxu1  ;;  %2751 = vmatprep.mubr.msk.f32.mxu0 %vm4266_vm0, %v4267_v60 }
 0x1d1   : >> { %v809_v0 = vmul.f32 0.5, %v732_v61  ;;  %v803_v15 = vadd.f32 %v802_v5, %v4607_v20 }
 0x1d2   : >> { %3841 = vtanh.f32 %v805_v62 }
 0x1d3   : >> { %3843 = vtanh.f32 %v809_v0  ;;  %v814_v31 = vmul.f32 0.5, %v803_v15 }
 0x1d4   : >> { %3845 = vtanh.f32 %v801_v1 }
 0x1d5   : >> { %3847 = vtanh.f32 %v814_v31 }
 0x1dc   : >> { %v3842_v33 = vpop.eup %3841 }
 0x1dd   : >> { %v3844_v34 = vpop.eup %3843  ;;  %v807_v35 = vmul.f32 0.5, %v3842_v33 }
 0x1de   : >> { %v3846_v38 = vpop.eup %3845  ;;  %v811_v39 = vmul.f32 0.5, %v3844_v34 }
 0x1df   : >> { %v808_v41 = vadd.f32 0.5, %v807_v35  ;;  %v3848_v3 = vpop.eup %3847 }
 0x1e0   : >> { %v812_v42 = vadd.f32 0.5, %v811_v39  ;;  %v816_v54 = vmul.f32 0.5, %v3848_v3 }
 0x1e1   : >> { %v819_v43 = vmul.f32 %v3846_v38, %v808_v41 }
 0x1e2   : >> { %v818_v46 = vmul.f32 %v4205_v7, %v812_v42 }
 0x1e4   : >> { %v4679_v7 = vadd.f32 %v819_v43, %v818_v46  }
 0x1e6   : >> { %v4908_v48 = vmov %v4679_v7  ;;  %v817_v7 = vadd.f32 0.5, %v816_v54 }
 0x1e7   : >> { %3849 = vtanh.f32 %v4908_v48 }
 0x1f1   : >> { %v3850_v58 = vpop.eup %3849 }
 0x1f2   : >> { %v4682_v3 = vmul.f32 %v3850_v58, %v817_v7  }
 0x1f4   : >> { %v4909_v59 = vmov %v4682_v3 }
 0x20d   : >> { %v1017_v61 = vpop.f32.mrb[2].mxu0 }
 0x20e   : >> { %v1018_v62 = vadd.f32 %v1017_v61, %v4609_v21  ;;  %v1019_v63 = vpop.f32.mrb[3].mxu0 }
 0x20f   : >> { %v1020_v0 = vadd.f32 %v1019_v63, %v4611_v22  ;;  %v1088_v5 = vpop.f32.mrb[2].mxu1 }
 0x210   : >> { %v1093_v1 = vmul.f32 0.5, %v1018_v62  ;;  %v1089_v11 = vadd.f32 %v1088_v5, %v4613_v23  ;;  %v1090_v12 = vpop.f32.mrb[3].mxu1 }
 0x211   : >> { %v1097_v9 = vmul.f32 0.5, %v1020_v0  ;;  %v1091_v13 = vadd.f32 %v1090_v12, %v4615_v24 }
 0x212   : >> { %3851 = vtanh.f32 %v1093_v1 }
 0x213   : >> { %3853 = vtanh.f32 %v1097_v9  ;;  %v1102_v4 = vmul.f32 0.5, %v1091_v13 }
 0x214   : >> { %3855 = vtanh.f32 %v1089_v11 }
 0x215   : >> { %3857 = vtanh.f32 %v1102_v4 }
 0x21c   : >> { %v3852_v14 = vpop.eup %3851 }
 0x21d   : >> { %v3854_v15 = vpop.eup %3853  ;;  %v1095_v16 = vmul.f32 0.5, %v3852_v14 }
 0x21e   : >> { %v3856_v29 = vpop.eup %3855  ;;  %v1099_v30 = vmul.f32 0.5, %v3854_v15 }
 0x21f   : >> { %v1096_v31 = vadd.f32 0.5, %v1095_v16  ;;  %v3858_v36 = vpop.eup %3857 }
 0x220   : >> { %v1100_v32 = vadd.f32 0.5, %v1099_v30  ;;  %v1104_v37 = vmul.f32 0.5, %v3858_v36 }
 0x221   : >> { %v1107_v33 = vmul.f32 %v3856_v29, %v1096_v31 }
 0x222   : >> { %v1106_v34 = vmul.f32 %v4201_v8, %v1100_v32  ;;  %v1105_v38 = vadd.f32 0.5, %v1104_v37 }
 0x224   : >> { %v1108_v35 = vadd.f32 %v1107_v33, %v1106_v34  }
 0x226   : >> { %3859 = vtanh.f32 %v1108_v35 }
 0x230   : >> { %v3860_v39 = vpop.eup %3859 }
 0x231   : >> { %v1110_v40 = vmul.f32 %v3860_v39, %v1105_v38  }
 0x233   : >> { %v4914_v4 = vmov %v1110_v40 }
 0x24d   : >> { %v1305_v41 = vpop.f32.mrb[4].mxu0 }
 0x24e   : >> { %v1306_v42 = vadd.f32 %v1305_v41, %v4617_v25  ;;  %v1307_v43 = vpop.f32.mrb[5].mxu0 }
 0x24f   : >> { %v1308_v44 = vadd.f32 %v1307_v43, %v4619_v26  ;;  %v1376_v46 = vpop.f32.mrb[4].mxu1 }
 0x250   : >> { %v1381_v45 = vmul.f32 0.5, %v1306_v42  ;;  %v1377_v49 = vadd.f32 %v1376_v46, %v4621_v27  ;;  %v1378_v50 = vpop.f32.mrb[5].mxu1 }
 0x251   : >> { %v1385_v47 = vmul.f32 0.5, %v1308_v44  ;;  %v1379_v8 = vadd.f32 %v1378_v50, %v4623_v28 }
 0x252   : >> { %3861 = vtanh.f32 %v1381_v45 }
 0x253   : >> { %3863 = vtanh.f32 %v1385_v47  ;;  %v1390_v51 = vmul.f32 0.5, %v1379_v8  ;;  %v4911_v8 = vmov %v1108_v35 }
 0x254   : >> { %3865 = vtanh.f32 %v1377_v49 }
 0x255   : >> { %3867 = vtanh.f32 %v1390_v51 }
 0x25c   : >> { %v3862_v3 = vpop.eup %3861 }
 0x25d   : >> { %v3864_v52 = vpop.eup %3863  ;;  %v1383_v53 = vmul.f32 0.5, %v3862_v3  ;;  %v4915_v3 = vmov %v4909_v59 }
 0x25e   : >> { %v3866_v6 = vpop.eup %3865  ;;  %v1387_v54 = vmul.f32 0.5, %v3864_v52 }
 0x25f   : >> { %v1384_v55 = vadd.f32 0.5, %v1383_v53  ;;  %v3868_v60 = vpop.eup %3867 }
 0x260   : >> { %v1388_v56 = vadd.f32 0.5, %v1387_v54  ;;  %v1392_v61 = vmul.f32 0.5, %v3868_v60 }
 0x261   : >> { %v1395_v57 = vmul.f32 %v3866_v6, %v1384_v55 }
 0x262   : >> { %v1394_v7 = vmul.f32 %v4197_v10, %v1388_v56  ;;  %v1393_v62 = vadd.f32 0.5, %v1392_v61 }
 0x264   : >> { %v1396_v58 = vadd.f32 %v1395_v57, %v1394_v7   ;;  %v4912_v7 = vmov %v4908_v48 }
 0x266   : >> { %3869 = vtanh.f32 %v1396_v58  ;;  %v4910_v10 = vmov %v1396_v58 }
 0x270   : >> { %v3870_v63 = vpop.eup %3869 }
 0x271   : >> { %v1398_v0 = vmul.f32 %v3870_v63, %v1393_v62  }
 0x273   : >> { %2752 = vmatmul.mubr.f32.vlgmr.msra.gmra.mrb[6].mxu0 %v1398_v0  ;;  %v4913_v6 = vmov %v1398_v0 }
 0x343   : > { %523 = sbr.rel (!%p521_p6) target bundleno = 182 (0xb6), region = 138 }
 0x346   : >> { %v1481_v1 = vpop.f32.mrb[6].mxu0 }
 0x347   : >> { %v1482_v5 = vadd.f32 %v4590_v2, %v1481_v1   ;;  %v2753_v9 = vpop.f32.mrb[7].mxu0 }
 0x349   : >> { %1486 = vst [vmem:[%s1485_s19] sm:$0xff] %v1482_v5 }
 0x34a LB: >> { %v1501_v10 = vld [vmem:[#allocation12 + $0x8] sm:$0xff]  ;;  %v1500_v12 = vld [vmem:[#allocation12] sm:$0xff]  ;;  %v1503_v32 = vld [vmem:[#allocation12 + $0x18] sm:$0xff]  ;;  %1692 = vmatprep.mubr.f32.mxu0 %v4249_v59  ;;  %1763 = vmatprep.mubr.f32.mxu1 %v4249_v59  ;;  %vm4269_vm1 = vmmov 0   ;;  %s2677_s20 = sshll.u32 %s4253_s29, 3  ;;  %s1492_s29 = sadd.s32 1, %s4253_s29   ;;  %s4253_s29 = sphi %s4731_s29, %s1492_s29   ;;  %v4249_v59 = vphi %v4909_v59, %v4923_v59   ;;  %v4245_v40 = vphi %v1110_v40, %v4922_v40   ;;  %v4241_v0 = vphi %v1398_v0, %v4921_v0   ;;  %v4237_v48 = vphi %v4908_v48, %v4920_v48   ;;  %v4233_v35 = vphi %v1108_v35, %v4919_v35   ;;  %v4229_v58 = vphi %v1396_v58, %v4918_v58   ;;  %v4225_v5 = vphi %v1482_v5, %v2447_v5  }
 0x34b   : >> { %v1505_v11 = vld [vmem:[#allocation12 + $0x28] sm:$0xff]  ;;  %v1504_v4 = vld [vmem:[#allocation12 + $0x20] sm:$0xff]  ;;  %v1507_v33 = vld [vmem:[#allocation12 + $0x38] sm:$0xff]  ;;  %s2451_s17 = scalar_lea.vmem %s4584_s21, %s2677_s20 [#allocation18]  ;;  %p1489_p10 = scmp.ge.s32.totalorder %s1492_s29, 4  }
 0x34c   : >> { %v3197_v13 = vpack.c.bf16 %v1505_v11, %v1501_v10  ;;  %v1509_v14 = vld [vmem:[#allocation12 + $0x48] sm:$0xff]  ;;  %v3199_v16 = vpack.c.bf16 %v1504_v4, %v1500_v12  ;;  %v1508_v30 = vld [vmem:[#allocation12 + $0x40] sm:$0xff]  ;;  %v1502_v34 = vld [vmem:[#allocation12 + $0x10] sm:$0xff]  ;;  %v3261_v38 = vpack.c.bf16 %v1507_v33, %v1503_v32  ;;  %s2684_s30 = sshll.u32 (%p1489_p10), %s4185_s12, 9  ;;  %s4924_s15 = sld [smem:[#allocation28_spill]] (%p1489_p10) }
 0x34d   : >> { %v1513_v15 = vld [vmem:[#allocation12 + $0x68] sm:$0xff]  ;;  %v1512_v31 = vld [vmem:[#allocation12 + $0x60] sm:$0xff]  ;;  %v1506_v36 = vld [vmem:[#allocation12 + $0x30] sm:$0xff]  ;;  %s2475_s16 = sshll.u32 (%p1489_p10), %s4584_s21, 4  ;;  %s2461_s18 = scalar_lea.sflag (%p1489_p10), [#allocation11], %s4566_s6  ;;  %s4820_s16 = int_to_ptr.vmem [resolvable:$true] %s2475_s16 }
 0x34e   : >> { %v3201_v29 = vpack.c.bf16 %v1513_v15, %v1509_v14  ;;  %3198 = vmatprep.subr.bf16.mxu0 %v3197_v13  ;;  %v3203_v37 = vpack.c.bf16 %v1512_v31, %v1508_v30  ;;  %v3263_v39 = vpack.c.bf16 %v1506_v36, %v1502_v34  ;;  %v1517_v41 = vld [vmem:[#allocation12 + $0x88] sm:$0xff]  ;;  %v1516_v43 = vld [vmem:[#allocation12 + $0x80] sm:$0xff]  ;;  %v1511_v46 = vld [vmem:[#allocation12 + $0x58] sm:$0xff]  ;;  %3262 = vmatprep.subr.bf16.mxu1 %v3261_v38  ;;  %s4043_s9 = scalar_lea.vmem (%p1489_p10), %s4820_s16, 512  ;;  %s4271_s7 = smov (%p1489_p10), [#allocation18]  }
 0x34f   : >> { %3200 = vmatpush1.bf16.msra.mxu0 %v3199_v16  ;;  %v1521_v42 = vld [vmem:[#allocation12 + $0xa8] sm:$0xff]  ;;  %v1520_v45 = vld [vmem:[#allocation12 + $0xa0] sm:$0xff]  ;;  %v1515_v47 = vld [vmem:[#allocation12 + $0x78] sm:$0xff]  ;;  %p4044_p3 = scmp.ne.s32.totalorder (%p1489_p10), %s4820_s16, %s4043_s9  ;;  %s4047_s22 = sshll.u32 (%p1489_p10), %s4271_s7, 4  ;;  %s4048_s22 = int_to_ptr.vmem [resolvable:$false] %s4047_s22 }
 0x350   : >> { %3202 = vmatprep.subr.bf16.mxu0 %v3201_v29  ;;  %v3205_v44 = vpack.c.bf16 %v1521_v42, %v1517_v41  ;;  %v3265_v49 = vpack.c.bf16 %v1515_v47, %v1511_v46  ;;  %v1510_v50 = vld [vmem:[#allocation12 + $0x50] sm:$0xff]  ;;  %v1525_v51 = vld [vmem:[#allocation12 + $0xc8] sm:$0xff]  ;;  %3264 = vmatpush1.bf16.msra.mxu1 %v3263_v39  ;;  %v3207_v53 = vpack.c.bf16 %v1520_v45, %v1516_v43  ;;  %v1519_v6 = vld [vmem:[#allocation12 + $0x98] sm:$0xff]  ;;  %s4049_s12 = scalar_lea.vmem (%p1489_p10), %s4048_s22, 1024  ;;  %p4050_p0 = scmp.lt.s32.totalorder (%p1489_p10), %s4820_s16, %s4048_s22 }
 0x351   : >> { %v1514_v8 = vld [vmem:[#allocation12 + $0x70] sm:$0xff]  ;;  %v1529_v52 = vld [vmem:[#allocation12 + $0xe8] sm:$0xff]  ;;  %v1523_v54 = vld [vmem:[#allocation12 + $0xb8] sm:$0xff]  ;;  %p4045_p7 = pnand (%p1489_p10), %p4044_p3, %p4508_p5  ;;  %p4051_p4 = scmp.lt.s32.totalorder (%p1489_p10), %s4049_s12, %s4043_s9 }
 0x352   : >> { %v3267_v3 = vpack.c.bf16 %v1514_v8, %v1510_v50  ;;  %3266 = vmatprep.subr.bf16.mxu1 %v3265_v49  ;;  %v1518_v55 = vld [vmem:[#allocation12 + $0x90] sm:$0xff]  ;;  %v3209_v56 = vpack.c.bf16 %v1529_v52, %v1525_v51  ;;  %v1524_v57 = vld [vmem:[#allocation12 + $0xc0] sm:$0xff]  ;;  %v3269_v60 = vpack.c.bf16 %v1523_v54, %v1519_v6  ;;  %v1533_v62 = vld [vmem:[#allocation12 + $0x108] sm:$0xff]  ;;  %s4817_s26 = scalar_lea.hbm (%p1489_p10), %s4924_s15, %s2684_s30 }
 0x353   : >> { %3204 = vmatpush1.bf16.msra.mxu0 %v3203_v37  ;;  %v1528_v7 = vld [vmem:[#allocation12 + $0xe0] sm:$0xff]  ;;  %v1522_v61 = vld [vmem:[#allocation12 + $0xb0] sm:$0xff]  ;;  %v1537_v63 = vld [vmem:[#allocation12 + $0x128] sm:$0xff]  ;;  %p4046_p9 = pneg (%p1489_p10), %p4045_p7  ;;  %p4052_p13 = por (%p1489_p10), %p4051_p4, %p4050_p0 }
 0x354   : >> { %3206 = vmatprep.subr.bf16.mxu0 %v3205_v44  ;;  %v1527_v1 = vld [vmem:[#allocation12 + $0xd8] sm:$0xff]  ;;  %3268 = vmatpush1.bf16.msra.mxu1 %v3267_v3  ;;  %v3271_v9 = vpack.c.bf16 %v1522_v61, %v1518_v55  ;;  %v3211_v11 = vpack.c.bf16 %v1528_v7, %v1524_v57  ;;  %v1532_v12 = vld [vmem:[#allocation12 + $0x100] sm:$0xff]  ;;  %v1526_v4 = vld [vmem:[#allocation12 + $0xd0] sm:$0xff]  ;;  %v3213_v15 = vpack.c.bf16 %v1537_v63, %v1533_v62 }
 0x355   : >> { %v1531_v10 = vld [vmem:[#allocation12 + $0xf8] sm:$0xff]  ;;  %3270 = vmatprep.subr.bf16.mxu1 %v3269_v60  ;;  %v1530_v14 = vld [vmem:[#allocation12 + $0xf0] sm:$0xff]  ;;  %v1536_v16 = vld [vmem:[#allocation12 + $0x120] sm:$0xff]  ;;  %p4053_p2 = pnand (%p1489_p10), %p4052_p13, %p4046_p9 }
 0x356   : >> { %v3273_v13 = vpack.c.bf16 %v1531_v10, %v1527_v1  ;;  %v1535_v29 = vld [vmem:[#allocation12 + $0x118] sm:$0xff]  ;;  %v1541_v31 = vld [vmem:[#allocation12 + $0x148] sm:$0xff]  ;;  %v3275_v33 = vpack.c.bf16 %v1530_v14, %v1526_v4  ;;  %v3215_v34 = vpack.c.bf16 %v1536_v16, %v1532_v12  ;;  %v1540_v36 = vld [vmem:[#allocation12 + $0x140] sm:$0xff] }
 0x357   : >> { %3208 = vmatpush1.bf16.msra.mxu0 %v3207_v53  ;;  %v1539_v30 = vld [vmem:[#allocation12 + $0x138] sm:$0xff]  ;;  %v1545_v32 = vld [vmem:[#allocation12 + $0x168] sm:$0xff]  ;;  %v1534_v38 = vld [vmem:[#allocation12 + $0x110] sm:$0xff] }
 0x358   : >> { %3210 = vmatprep.subr.bf16.mxu0 %v3209_v56  ;;  %3272 = vmatpush1.bf16.msra.mxu1 %v3271_v9  ;;  %v3277_v37 = vpack.c.bf16 %v1539_v30, %v1535_v29  ;;  %v1538_v39 = vld [vmem:[#allocation12 + $0x130] sm:$0xff]  ;;  %v3217_v41 = vpack.c.bf16 %v1545_v32, %v1541_v31  ;;  %v1544_v42 = vld [vmem:[#allocation12 + $0x160] sm:$0xff]  ;;  %v1543_v43 = vld [vmem:[#allocation12 + $0x158] sm:$0xff] }
 0x359   : >> { %3274 = vmatprep.subr.bf16.mxu1 %v3273_v13  ;;  %v1547_v44 = vld [vmem:[#allocation12 + $0x178] sm:$0xff]  ;;  %v1549_v45 = vld [vmem:[#allocation12 + $0x188] sm:$0xff]  ;;  %v3279_v47 = vpack.c.bf16 %v1538_v39, %v1534_v38  ;;  %v3219_v49 = vpack.c.bf16 %v1544_v42, %v1540_v36  ;;  %v1548_v50 = vld [vmem:[#allocation12 + $0x180] sm:$0xff] }
 0x35a   : >> { %v1553_v46 = vld [vmem:[#allocation12 + $0x1a8] sm:$0xff]  ;;  %v3281_v8 = vpack.c.bf16 %v1547_v44, %v1543_v43  ;;  %v1542_v51 = vld [vmem:[#allocation12 + $0x150] sm:$0xff]  ;;  %v1552_v53 = vld [vmem:[#allocation12 + $0x1a0] sm:$0xff] }
 0x35b   : >> { %3212 = vmatpush1.bf16.msra.mxu0 %v3211_v11  ;;  %v1546_v3 = vld [vmem:[#allocation12 + $0x170] sm:$0xff]  ;;  %v3221_v52 = vpack.c.bf16 %v1553_v46, %v1549_v45  ;;  %v1551_v6 = vld [vmem:[#allocation12 + $0x198] sm:$0xff]  ;;  %v1557_v55 = vld [vmem:[#allocation12 + $0x1c8] sm:$0xff]  ;;  %v3223_v7 = vpack.c.bf16 %v1552_v53, %v1548_v50 }
 0x35c   : >> { %3214 = vmatprep.subr.bf16.mxu0 %v3213_v15  ;;  %3276 = vmatpush1.bf16.msra.mxu1 %v3275_v33  ;;  %v1555_v54 = vld [vmem:[#allocation12 + $0x1b8] sm:$0xff]  ;;  %v1561_v56 = vld [vmem:[#allocation12 + $0x1e8] sm:$0xff]  ;;  %v3283_v57 = vpack.c.bf16 %v1546_v3, %v1542_v51  ;;  %v1556_v60 = vld [vmem:[#allocation12 + $0x1c0] sm:$0xff] }
 0x35d   : >> { %3278 = vmatprep.subr.bf16.mxu1 %v3277_v37  ;;  %v3285_v61 = vpack.c.bf16 %v1555_v54, %v1551_v6  ;;  %v1550_v62 = vld [vmem:[#allocation12 + $0x190] sm:$0xff]  ;;  %v3225_v1 = vpack.c.bf16 %v1561_v56, %v1557_v55  ;;  %v1560_v9 = vld [vmem:[#allocation12 + $0x1e0] sm:$0xff]  ;;  %v1559_v10 = vld [vmem:[#allocation12 + $0x1d8] sm:$0xff] }
 0x35e   : >> { %v1554_v63 = vld [vmem:[#allocation12 + $0x1b0] sm:$0xff]  ;;  %v1563_v11 = vld [vmem:[#allocation12 + $0x1f8] sm:$0xff]  ;;  %v1565_v12 = vld [vmem:[#allocation12 + $0x208] sm:$0xff]  ;;  %v3227_v14 = vpack.c.bf16 %v1560_v9, %v1556_v60 }
 0x35f   : >> { %3216 = vmatpush1.bf16.msra.mxu0 %v3215_v34  ;;  %v1569_v13 = vld [vmem:[#allocation12 + $0x228] sm:$0xff]  ;;  %v3287_v4 = vpack.c.bf16 %v1554_v63, %v1550_v62  ;;  %v1564_v15 = vld [vmem:[#allocation12 + $0x200] sm:$0xff]  ;;  %v3289_v16 = vpack.c.bf16 %v1563_v11, %v1559_v10  ;;  %v1558_v29 = vld [vmem:[#allocation12 + $0x1d0] sm:$0xff] }
 0x360   : >> { %3218 = vmatprep.subr.bf16.mxu0 %v3217_v41  ;;  %3280 = vmatpush1.bf16.msra.mxu1 %v3279_v47  ;;  %v1562_v30 = vld [vmem:[#allocation12 + $0x1f0] sm:$0xff]  ;;  %v3229_v31 = vpack.c.bf16 %v1569_v13, %v1565_v12  ;;  %v1568_v32 = vld [vmem:[#allocation12 + $0x220] sm:$0xff]  ;;  %v1567_v33 = vld [vmem:[#allocation12 + $0x218] sm:$0xff] }
 0x361   : >> { %3282 = vmatprep.subr.bf16.mxu1 %v3281_v8  ;;  %v1571_v34 = vld [vmem:[#allocation12 + $0x238] sm:$0xff]  ;;  %v1573_v36 = vld [vmem:[#allocation12 + $0x248] sm:$0xff]  ;;  %v3291_v38 = vpack.c.bf16 %v1562_v30, %v1558_v29  ;;  %v3231_v39 = vpack.c.bf16 %v1568_v32, %v1564_v15  ;;  %v1572_v41 = vld [vmem:[#allocation12 + $0x240] sm:$0xff] }
 0x362   : >> { %v1577_v37 = vld [vmem:[#allocation12 + $0x268] sm:$0xff]  ;;  %v3293_v42 = vpack.c.bf16 %v1571_v34, %v1567_v33  ;;  %v1566_v43 = vld [vmem:[#allocation12 + $0x210] sm:$0xff]  ;;  %v1576_v46 = vld [vmem:[#allocation12 + $0x260] sm:$0xff] }
 0x363   : >> { %3220 = vmatpush1.bf16.msra.mxu0 %v3219_v49  ;;  %v1570_v44 = vld [vmem:[#allocation12 + $0x230] sm:$0xff]  ;;  %v3233_v45 = vpack.c.bf16 %v1577_v37, %v1573_v36  ;;  %v1575_v47 = vld [vmem:[#allocation12 + $0x258] sm:$0xff]  ;;  %v1581_v50 = vld [vmem:[#allocation12 + $0x288] sm:$0xff]  ;;  %v3235_v3 = vpack.c.bf16 %v1576_v46, %v1572_v41 }
 0x364   : >> { %3222 = vmatprep.subr.bf16.mxu0 %v3221_v52  ;;  %3284 = vmatpush1.bf16.msra.mxu1 %v3283_v57  ;;  %v1579_v49 = vld [vmem:[#allocation12 + $0x278] sm:$0xff]  ;;  %v1585_v8 = vld [vmem:[#allocation12 + $0x2a8] sm:$0xff]  ;;  %v3295_v51 = vpack.c.bf16 %v1570_v44, %v1566_v43  ;;  %v1580_v52 = vld [vmem:[#allocation12 + $0x280] sm:$0xff] }
 0x365   : >> { %3286 = vmatprep.subr.bf16.mxu1 %v3285_v61  ;;  %v3297_v53 = vpack.c.bf16 %v1579_v49, %v1575_v47  ;;  %v1574_v6 = vld [vmem:[#allocation12 + $0x250] sm:$0xff]  ;;  %v3237_v55 = vpack.c.bf16 %v1585_v8, %v1581_v50  ;;  %v1584_v56 = vld [vmem:[#allocation12 + $0x2a0] sm:$0xff]  ;;  %v1583_v57 = vld [vmem:[#allocation12 + $0x298] sm:$0xff] }
 0x366   : >> { %v1578_v54 = vld [vmem:[#allocation12 + $0x270] sm:$0xff]  ;;  %v1589_v60 = vld [vmem:[#allocation12 + $0x2c8] sm:$0xff]  ;;  %v3239_v63 = vpack.c.bf16 %v1584_v56, %v1580_v52  ;;  %v1592_v13 = vld [vmem:[#allocation12 + $0x2e0] sm:$0xff] }
 0x367   : >> { %3224 = vmatpush1.bf16.msra.mxu0 %v3223_v7  ;;  %v1587_v7 = vld [vmem:[#allocation12 + $0x2b8] sm:$0xff]  ;;  %v1593_v61 = vld [vmem:[#allocation12 + $0x2e8] sm:$0xff]  ;;  %v3299_v62 = vpack.c.bf16 %v1578_v54, %v1574_v6  ;;  %v1582_v10 = vld [vmem:[#allocation12 + $0x290] sm:$0xff] }
 0x368   : >> { %3226 = vmatprep.subr.bf16.mxu0 %v3225_v1  ;;  %3288 = vmatpush1.bf16.msra.mxu1 %v3287_v4  ;;  %v1588_v1 = vld [vmem:[#allocation12 + $0x2c0] sm:$0xff]  ;;  %v3301_v9 = vpack.c.bf16 %v1587_v7, %v1583_v57  ;;  %v1586_v11 = vld [vmem:[#allocation12 + $0x2b0] sm:$0xff]  ;;  %v3241_v12 = vpack.c.bf16 %v1593_v61, %v1589_v60  ;;  %v1591_v4 = vld [vmem:[#allocation12 + $0x2d8] sm:$0xff] }
 0x369   : >> { %3290 = vmatprep.subr.bf16.mxu1 %v3289_v16  ;;  %v1597_v15 = vld [vmem:[#allocation12 + $0x308] sm:$0xff]  ;;  %v3303_v29 = vpack.c.bf16 %v1586_v11, %v1582_v10  ;;  %v3243_v30 = vpack.c.bf16 %v1592_v13, %v1588_v1  ;;  %v1590_v33 = vld [vmem:[#allocation12 + $0x2d0] sm:$0xff]  ;;  %v1600_v37 = vld [vmem:[#allocation12 + $0x320] sm:$0xff] }
 0x36a   : >> { %v1601_v16 = vld [vmem:[#allocation12 + $0x328] sm:$0xff]  ;;  %v1594_v34 = vld [vmem:[#allocation12 + $0x2f0] sm:$0xff]  ;;  %v1608_v8 = vld [vmem:[#allocation12 + $0x360] sm:$0xff] }
 0x36b   : >> { %3228 = vmatpush1.bf16.msra.mxu0 %v3227_v14  ;;  %v1595_v14 = vld [vmem:[#allocation12 + $0x2f8] sm:$0xff]  ;;  %v3245_v36 = vpack.c.bf16 %v1601_v16, %v1597_v15  ;;  %v1605_v41 = vld [vmem:[#allocation12 + $0x348] sm:$0xff]  ;;  %v3307_v43 = vpack.c.bf16 %v1594_v34, %v1590_v33  ;;  %v1598_v47 = vld [vmem:[#allocation12 + $0x310] sm:$0xff] }
 0x36c   : >> { %3230 = vmatprep.subr.bf16.mxu0 %v3229_v31  ;;  %3292 = vmatpush1.bf16.msra.mxu1 %v3291_v38  ;;  %v1596_v31 = vld [vmem:[#allocation12 + $0x300] sm:$0xff]  ;;  %v3305_v32 = vpack.c.bf16 %v1595_v14, %v1591_v4  ;;  %v1599_v38 = vld [vmem:[#allocation12 + $0x318] sm:$0xff]  ;;  %v1602_v49 = vld [vmem:[#allocation12 + $0x330] sm:$0xff] }
 0x36d   : >> { %3294 = vmatprep.subr.bf16.mxu1 %v3293_v42  ;;  %v1609_v42 = vld [vmem:[#allocation12 + $0x368] sm:$0xff]  ;;  %v3247_v44 = vpack.c.bf16 %v1600_v37, %v1596_v31  ;;  %v3311_v6 = vpack.c.bf16 %v1602_v49, %v1598_v47  ;;  %v1606_v57 = vld [vmem:[#allocation12 + $0x350] sm:$0xff]  ;;  %v1616_v61 = vld [vmem:[#allocation12 + $0x3a0] sm:$0xff] }
 0x36e   : >> { %v3249_v50 = vpack.c.bf16 %v1609_v42, %v1605_v41  ;;  %v1613_v52 = vld [vmem:[#allocation12 + $0x388] sm:$0xff]  ;;  %v1610_v7 = vld [vmem:[#allocation12 + $0x370] sm:$0xff]  ;;  %v1624_v16 = vld [vmem:[#allocation12 + $0x3e0] sm:$0xff] }
 0x36f   : >> { %3232 = vmatpush1.bf16.msra.mxu0 %v3231_v39  ;;  %v1603_v39 = vld [vmem:[#allocation12 + $0x338] sm:$0xff]  ;;  %v1621_v1 = vld [vmem:[#allocation12 + $0x3c8] sm:$0xff]  ;;  %v3315_v10 = vpack.c.bf16 %v1610_v7, %v1606_v57  ;;  %v1614_v4 = vld [vmem:[#allocation12 + $0x390] sm:$0xff] }
 0x370   : >> { %3234 = vmatprep.subr.bf16.mxu0 %v3233_v45  ;;  %3296 = vmatpush1.bf16.msra.mxu1 %v3295_v51  ;;  %v1604_v45 = vld [vmem:[#allocation12 + $0x340] sm:$0xff]  ;;  %v3309_v46 = vpack.c.bf16 %v1603_v39, %v1599_v38  ;;  %v1607_v51 = vld [vmem:[#allocation12 + $0x358] sm:$0xff]  ;;  %v1618_v14 = vld [vmem:[#allocation12 + $0x3b0] sm:$0xff] }
 0x371   : >> { %3298 = vmatprep.subr.bf16.mxu1 %v3297_v53  ;;  %v1617_v53 = vld [vmem:[#allocation12 + $0x3a8] sm:$0xff]  ;;  %v3251_v54 = vpack.c.bf16 %v1608_v8, %v1604_v45  ;;  %v3319_v33 = vpack.c.bf16 %v1618_v14, %v1614_v4  ;;  %v1622_v38 = vld [vmem:[#allocation12 + $0x3d0] sm:$0xff]  ;;  %v1792_v42 = vld [vmem:[#allocation14 + $0x20] sm:$0xff] }
 0x372   : >> { %v3253_v60 = vpack.c.bf16 %v1617_v53, %v1613_v52  ;;  %v1789_v31 = vld [vmem:[#allocation14 + $0x8] sm:$0xff]  ;;  %v1626_v39 = vld [vmem:[#allocation12 + $0x3f0] sm:$0xff]  ;;  %v1800_v53 = vld [vmem:[#allocation14 + $0x60] sm:$0xff] }
 0x373   : >> { %3236 = vmatpush1.bf16.msra.mxu0 %v3235_v3  ;;  %v1611_v3 = vld [vmem:[#allocation12 + $0x378] sm:$0xff]  ;;  %v1797_v45 = vld [vmem:[#allocation14 + $0x48] sm:$0xff]  ;;  %v3323_v47 = vpack.c.bf16 %v1626_v39, %v1622_v38  ;;  %v1820_v39 = vld [vmem:[#allocation14 + $0x100] sm:$0xff] }
 0x374   : >> { %3238 = vmatprep.subr.bf16.mxu0 %v3237_v55  ;;  %3300 = vmatpush1.bf16.msra.mxu1 %v3299_v62  ;;  %v1612_v55 = vld [vmem:[#allocation12 + $0x380] sm:$0xff]  ;;  %v3313_v56 = vpack.c.bf16 %v1611_v3, %v1607_v51  ;;  %v1615_v62 = vld [vmem:[#allocation12 + $0x398] sm:$0xff]  ;;  %v1790_v51 = vld [vmem:[#allocation14 + $0x10] sm:$0xff] }
 0x375   : >> { %3302 = vmatprep.subr.bf16.mxu1 %v3301_v9  ;;  %v1625_v9 = vld [vmem:[#allocation12 + $0x3e8] sm:$0xff]  ;;  %v3255_v11 = vpack.c.bf16 %v1616_v61, %v1612_v55  ;;  %v1794_v3 = vld [vmem:[#allocation14 + $0x30] sm:$0xff] }
 0x376   : >> { %v3257_v15 = vpack.c.bf16 %v1625_v9, %v1621_v1  ;;  %v1805_v55 = vld [vmem:[#allocation14 + $0x88] sm:$0xff]  ;;  %v3391_v57 = vpack.c.bf16 %v1794_v3, %v1790_v51  ;;  %v1808_v9 = vld [vmem:[#allocation14 + $0xa0] sm:$0xff] }
 0x377   : >> { %3240 = vmatpush1.bf16.msra.mxu0 %v3239_v63  ;;  %v1619_v63 = vld [vmem:[#allocation12 + $0x3b8] sm:$0xff]  ;;  %v1828_v3 = vld [vmem:[#allocation14 + $0x140] sm:$0xff] }
 0x378   : >> { %3242 = vmatprep.subr.bf16.mxu0 %v3241_v12  ;;  %3304 = vmatpush1.bf16.msra.mxu1 %v3303_v29  ;;  %v1620_v12 = vld [vmem:[#allocation12 + $0x3c0] sm:$0xff]  ;;  %v3317_v13 = vpack.c.bf16 %v1619_v63, %v1615_v62  ;;  %v1623_v29 = vld [vmem:[#allocation12 + $0x3d8] sm:$0xff]  ;;  %v1798_v62 = vld [vmem:[#allocation14 + $0x50] sm:$0xff] }
 0x379   : >> { %3306 = vmatprep.subr.bf16.mxu1 %v3305_v32  ;;  %v1793_v32 = vld [vmem:[#allocation14 + $0x28] sm:$0xff]  ;;  %v3259_v34 = vpack.c.bf16 %v1624_v16, %v1620_v12  ;;  %v1802_v63 = vld [vmem:[#allocation14 + $0x70] sm:$0xff] }
 0x37a   : >> { %v3325_v41 = vpack.c.bf16 %v1793_v32, %v1789_v31  ;;  %v1813_v12 = vld [vmem:[#allocation14 + $0xc8] sm:$0xff]  ;;  %v3395_v4 = vpack.c.bf16 %v1802_v63, %v1798_v62  ;;  %v1816_v32 = vld [vmem:[#allocation14 + $0xe0] sm:$0xff] }
 0x37b   : >> { %3244 = vmatpush1.bf16.msra.mxu0 %v3243_v30  ;;  %v1627_v30 = vld [vmem:[#allocation12 + $0x3f8] sm:$0xff]  ;;  %v1836_v63 = vld [vmem:[#allocation14 + $0x180] sm:$0xff] }
 0x37c   : >> { %3246 = vmatprep.subr.bf16.mxu0 %v3245_v36  ;;  %3308 = vmatpush1.bf16.msra.mxu1 %v3307_v43  ;;  %v1788_v36 = vld [vmem:[#allocation14] sm:$0xff]  ;;  %v3321_v37 = vpack.c.bf16 %v1627_v30, %v1623_v29  ;;  %v1791_v43 = vld [vmem:[#allocation14 + $0x18] sm:$0xff]  ;;  %v1806_v29 = vld [vmem:[#allocation14 + $0x90] sm:$0xff] }
 0x37d   : >> { %3310 = vmatprep.subr.bf16.mxu1 %v3309_v46  ;;  %v1801_v46 = vld [vmem:[#allocation14 + $0x68] sm:$0xff]  ;;  %v3327_v49 = vpack.c.bf16 %v1792_v42, %v1788_v36  ;;  %v1810_v30 = vld [vmem:[#allocation14 + $0xb0] sm:$0xff] }
 0x37e   : >> { %v3329_v52 = vpack.c.bf16 %v1801_v46, %v1797_v45  ;;  %v1821_v36 = vld [vmem:[#allocation14 + $0x108] sm:$0xff]  ;;  %v1814_v42 = vld [vmem:[#allocation14 + $0xd0] sm:$0xff]  ;;  %v1824_v45 = vld [vmem:[#allocation14 + $0x120] sm:$0xff] }
 0x37f   : >> { %3248 = vmatpush1.bf16.msra.mxu0 %v3247_v44  ;;  %v1795_v44 = vld [vmem:[#allocation14 + $0x38] sm:$0xff]  ;;  %v3343_v51 = vpack.c.bf16 %v1824_v45, %v1820_v39  ;;  %v1857_v39 = vld [vmem:[#allocation14 + $0x228] sm:$0xff]  ;;  %v1846_v45 = vld [vmem:[#allocation14 + $0x1d0] sm:$0xff] }
 0x380   : >> { %3250 = vmatprep.subr.bf16.mxu0 %v3249_v50  ;;  %3312 = vmatpush1.bf16.msra.mxu1 %v3311_v6  ;;  %v1796_v50 = vld [vmem:[#allocation14 + $0x40] sm:$0xff]  ;;  %v3389_v8 = vpack.c.bf16 %v1795_v44, %v1791_v43  ;;  %v1799_v6 = vld [vmem:[#allocation14 + $0x58] sm:$0xff]  ;;  %v1818_v43 = vld [vmem:[#allocation14 + $0xf0] sm:$0xff] }
 0x381   : >> { %3314 = vmatprep.subr.bf16.mxu1 %v3313_v56  ;;  %v1809_v56 = vld [vmem:[#allocation14 + $0xa8] sm:$0xff]  ;;  %v3331_v7 = vpack.c.bf16 %v1800_v53, %v1796_v50  ;;  %v1823_v46 = vld [vmem:[#allocation14 + $0x118] sm:$0xff]  ;;  %v1822_v53 = vld [vmem:[#allocation14 + $0x110] sm:$0xff] }
 0x382   : >> { %v3333_v1 = vpack.c.bf16 %v1809_v56, %v1805_v55  ;;  %v1833_v50 = vld [vmem:[#allocation14 + $0x168] sm:$0xff]  ;;  %v1832_v55 = vld [vmem:[#allocation14 + $0x160] sm:$0xff]  ;;  %v1831_v56 = vld [vmem:[#allocation14 + $0x158] sm:$0xff] }
 0x383   : >> { %3252 = vmatpush1.bf16.msra.mxu0 %v3251_v54  ;;  %v1803_v54 = vld [vmem:[#allocation14 + $0x78] sm:$0xff]  ;;  %v3347_v62 = vpack.c.bf16 %v1832_v55, %v1828_v3  ;;  %v1865_v3 = vld [vmem:[#allocation14 + $0x268] sm:$0xff]  ;;  %v1854_v55 = vld [vmem:[#allocation14 + $0x210] sm:$0xff] }
 0x384   : >> { %3254 = vmatprep.subr.bf16.mxu0 %v3253_v60  ;;  %3316 = vmatpush1.bf16.msra.mxu1 %v3315_v10  ;;  %v1804_v60 = vld [vmem:[#allocation14 + $0x80] sm:$0xff]  ;;  %v3393_v61 = vpack.c.bf16 %v1803_v54, %v1799_v6  ;;  %v1807_v10 = vld [vmem:[#allocation14 + $0x98] sm:$0xff]  ;;  %v1826_v6 = vld [vmem:[#allocation14 + $0x130] sm:$0xff] }
 0x385   : >> { %3318 = vmatprep.subr.bf16.mxu1 %v3317_v13  ;;  %v1817_v13 = vld [vmem:[#allocation14 + $0xe8] sm:$0xff]  ;;  %v3335_v14 = vpack.c.bf16 %v1808_v9, %v1804_v60  ;;  %v1830_v9 = vld [vmem:[#allocation14 + $0x150] sm:$0xff] }
 0x386   : >> { %v3337_v31 = vpack.c.bf16 %v1817_v13, %v1813_v12  ;;  %v1841_v60 = vld [vmem:[#allocation14 + $0x1a8] sm:$0xff]  ;;  %v1840_v12 = vld [vmem:[#allocation14 + $0x1a0] sm:$0xff]  ;;  %v1839_v13 = vld [vmem:[#allocation14 + $0x198] sm:$0xff] }
 0x387   : >> { %3256 = vmatpush1.bf16.msra.mxu0 %v3255_v11  ;;  %v1811_v11 = vld [vmem:[#allocation14 + $0xb8] sm:$0xff] }
 0x388   : >> { %3258 = vmatprep.subr.bf16.mxu0 %v3257_v15  ;;  %3320 = vmatpush1.bf16.msra.mxu1 %v3319_v33  ;;  %v1812_v15 = vld [vmem:[#allocation14 + $0xc0] sm:$0xff]  ;;  %v3397_v16 = vpack.c.bf16 %v1811_v11, %v1807_v10  ;;  %v1815_v33 = vld [vmem:[#allocation14 + $0xd8] sm:$0xff]  ;;  %v1834_v10 = vld [vmem:[#allocation14 + $0x170] sm:$0xff] }
 0x389   : >> { %3322 = vmatprep.subr.bf16.mxu1 %v3321_v37  ;;  %v3399_v37 = vpack.c.bf16 %v1810_v30, %v1806_v29  ;;  %v3339_v38 = vpack.c.bf16 %v1816_v32, %v1812_v15  ;;  %v1849_v15 = vld [vmem:[#allocation14 + $0x1e8] sm:$0xff]  ;;  %v3351_v29 = vpack.c.bf16 %v1840_v12, %v1836_v63  ;;  %v1844_v30 = vld [vmem:[#allocation14 + $0x1c0] sm:$0xff]  ;;  %v1838_v32 = vld [vmem:[#allocation14 + $0x190] sm:$0xff] }
 0x38a   : >> { %v1873_v63 = vld [vmem:[#allocation14 + $0x2a8] sm:$0xff]  ;;  %v1862_v12 = vld [vmem:[#allocation14 + $0x250] sm:$0xff] }
 0x38b   : >> { %3260 = vmatpush1.bf16.msra.mxu0 %v3259_v34  ;;  %v1819_v34 = vld [vmem:[#allocation14 + $0xf8] sm:$0xff] }
 0x38c   : >> { %3326 = vmatprep.subr.bf16.mxu0 %v3325_v41  ;;  %3324 = vmatpush1.bf16.msra.mxu1 %v3323_v47  ;;  %v3401_v41 = vpack.c.bf16 %v1819_v34, %v1815_v33  ;;  %v1827_v47 = vld [vmem:[#allocation14 + $0x138] sm:$0xff]  ;;  %v1842_v33 = vld [vmem:[#allocation14 + $0x1b0] sm:$0xff] }
 0x38d   : >> { %3390 = vmatprep.subr.bf16.mxu1 %v3389_v8  ;;  %v3403_v8 = vpack.c.bf16 %v1818_v43, %v1814_v42  ;;  %v1852_v43 = vld [vmem:[#allocation14 + $0x200] sm:$0xff] }
 0x38e   : >> { %1693 = vmatmul.mubr.f32.vlgmr.msra.gmra.mrb[0].mxu0 %v4225_v5 }
 0x38f   : >> { %3328 = vmatpush1.bf16.msra.mxu0 %v3327_v49  ;;  %1980 = vmatprep.mubr.f32.mxu0 %v4245_v40  ;;  %v1829_v49 = vld [vmem:[#allocation14 + $0x148] sm:$0xff] }
 0x390   : >> { %3330 = vmatprep.subr.bf16.mxu0 %v3329_v52  ;;  %1764 = vmatmul.mubr.f32.vlgmr.msra.gmra.mrb[0].mxu1 %v4225_v5  ;;  %v1825_v5 = vld [vmem:[#allocation14 + $0x128] sm:$0xff]  ;;  %v3405_v52 = vpack.c.bf16 %v1827_v47, %v1823_v46  ;;  %v3345_v54 = vpack.c.bf16 %v1833_v50, %v1829_v49  ;;  %v1850_v46 = vld [vmem:[#allocation14 + $0x1f0] sm:$0xff]  ;;  %v1856_v49 = vld [vmem:[#allocation14 + $0x220] sm:$0xff] }
 0x391   : >> { %3392 = vmatpush1.bf16.msra.mxu1 %v3391_v57  ;;  %2051 = vmatprep.mubr.f32.mxu1 %v4245_v40  ;;  %v3341_v44 = vpack.c.bf16 %v1825_v5, %v1821_v36  ;;  %v1835_v57 = vld [vmem:[#allocation14 + $0x178] sm:$0xff]  ;;  %v1848_v36 = vld [vmem:[#allocation14 + $0x1e0] sm:$0xff] }
 0x392   : >> { %3394 = vmatprep.subr.bf16.mxu1 %v3393_v61  ;;  %v3407_v61 = vpack.c.bf16 %v1826_v6, %v1822_v53  ;;  %v1847_v5 = vld [vmem:[#allocation14 + $0x1d8] sm:$0xff]  ;;  %v3355_v42 = vpack.c.bf16 %v1848_v36, %v1844_v30  ;;  %v3359_v53 = vpack.c.bf16 %v1856_v49, %v1852_v43  ;;  %v1860_v6 = vld [vmem:[#allocation14 + $0x240] sm:$0xff]  ;;  %v1881_v30 = vld [vmem:[#allocation14 + $0x2e8] sm:$0xff] }
 0x393   : >> { %3332 = vmatpush1.bf16.msra.mxu0 %v3331_v7  ;;  %v1837_v7 = vld [vmem:[#allocation14 + $0x188] sm:$0xff]  ;;  %v1855_v50 = vld [vmem:[#allocation14 + $0x218] sm:$0xff]  ;;  %v1870_v36 = vld [vmem:[#allocation14 + $0x290] sm:$0xff] }
 0x394   : >> { %3334 = vmatprep.subr.bf16.mxu0 %v3333_v1  ;;  %v3409_v1 = vpack.c.bf16 %v1835_v57, %v1831_v56  ;;  %v3349_v11 = vpack.c.bf16 %v1841_v60, %v1837_v7  ;;  %v1858_v56 = vld [vmem:[#allocation14 + $0x230] sm:$0xff]  ;;  %v1864_v7 = vld [vmem:[#allocation14 + $0x260] sm:$0xff]  ;;  %v1863_v60 = vld [vmem:[#allocation14 + $0x258] sm:$0xff] }
 0x395   : >> { %3396 = vmatpush1.bf16.msra.mxu1 %v3395_v4  ;;  %v1843_v4 = vld [vmem:[#allocation14 + $0x1b8] sm:$0xff]  ;;  %v1889_v43 = vld [vmem:[#allocation14 + $0x328] sm:$0xff]  ;;  %v1878_v49 = vld [vmem:[#allocation14 + $0x2d0] sm:$0xff] }
 0x396   : >> { %3398 = vmatprep.subr.bf16.mxu1 %v3397_v16  ;;  %v3411_v16 = vpack.c.bf16 %v1834_v10, %v1830_v9  ;;  %v3363_v9 = vpack.c.bf16 %v1864_v7, %v1860_v6  ;;  %v1868_v10 = vld [vmem:[#allocation14 + $0x280] sm:$0xff]  ;;  %v1897_v6 = vld [vmem:[#allocation14 + $0x368] sm:$0xff]  ;;  %v1886_v7 = vld [vmem:[#allocation14 + $0x310] sm:$0xff] }
 0x397   : >> { %3336 = vmatpush1.bf16.msra.mxu0 %v3335_v14  ;;  %v1845_v14 = vld [vmem:[#allocation14 + $0x1c8] sm:$0xff] }
 0x398   : >> { %3338 = vmatprep.subr.bf16.mxu0 %v3337_v31  ;;  %v3413_v31 = vpack.c.bf16 %v1843_v4, %v1839_v13  ;;  %v3353_v34 = vpack.c.bf16 %v1849_v15, %v1845_v14  ;;  %v1866_v13 = vld [vmem:[#allocation14 + $0x270] sm:$0xff]  ;;  %v1872_v14 = vld [vmem:[#allocation14 + $0x2a0] sm:$0xff]  ;;  %v1871_v15 = vld [vmem:[#allocation14 + $0x298] sm:$0xff] }
 0x399   : >> { %3400 = vmatpush1.bf16.msra.mxu1 %v3399_v37  ;;  %v1851_v37 = vld [vmem:[#allocation14 + $0x1f8] sm:$0xff] }
 0x39a   : >> { %3402 = vmatprep.subr.bf16.mxu1 %v3401_v41  ;;  %v3415_v41 = vpack.c.bf16 %v1842_v33, %v1838_v32  ;;  %v3367_v32 = vpack.c.bf16 %v1872_v14, %v1868_v10  ;;  %v1876_v33 = vld [vmem:[#allocation14 + $0x2c0] sm:$0xff]  ;;  %v1905_v10 = vld [vmem:[#allocation14 + $0x3a8] sm:$0xff]  ;;  %v1894_v14 = vld [vmem:[#allocation14 + $0x350] sm:$0xff] }
 0x39b   : >> { %3340 = vmatpush1.bf16.msra.mxu0 %v3339_v38  ;;  %v1853_v38 = vld [vmem:[#allocation14 + $0x208] sm:$0xff] }
 0x39c   : >> { %3342 = vmatprep.subr.bf16.mxu0 %v3341_v44  ;;  %v3417_v44 = vpack.c.bf16 %v1851_v37, %v1847_v5  ;;  %v3357_v47 = vpack.c.bf16 %v1857_v39, %v1853_v38  ;;  %v1874_v5 = vld [vmem:[#allocation14 + $0x2b0] sm:$0xff]  ;;  %v1880_v38 = vld [vmem:[#allocation14 + $0x2e0] sm:$0xff]  ;;  %v1879_v39 = vld [vmem:[#allocation14 + $0x2d8] sm:$0xff] }
 0x39d   : >> { %3404 = vmatpush1.bf16.msra.mxu1 %v3403_v8  ;;  %v1859_v8 = vld [vmem:[#allocation14 + $0x238] sm:$0xff] }
 0x39e   : >> { %3406 = vmatprep.subr.bf16.mxu1 %v3405_v52  ;;  %v3419_v52 = vpack.c.bf16 %v1850_v46, %v1846_v45  ;;  %v3371_v45 = vpack.c.bf16 %v1880_v38, %v1876_v33  ;;  %v1884_v46 = vld [vmem:[#allocation14 + $0x300] sm:$0xff]  ;;  %v1913_v33 = vld [vmem:[#allocation14 + $0x3e8] sm:$0xff]  ;;  %v1902_v38 = vld [vmem:[#allocation14 + $0x390] sm:$0xff] }
 0x39f   : >> { %3344 = vmatpush1.bf16.msra.mxu0 %v3343_v51  ;;  %v1861_v51 = vld [vmem:[#allocation14 + $0x248] sm:$0xff] }
 0x3a0   : >> { %3346 = vmatprep.subr.bf16.mxu0 %v3345_v54  ;;  %v3421_v54 = vpack.c.bf16 %v1859_v8, %v1855_v50  ;;  %v3361_v57 = vpack.c.bf16 %v1865_v3, %v1861_v51  ;;  %v1882_v50 = vld [vmem:[#allocation14 + $0x2f0] sm:$0xff]  ;;  %v1888_v51 = vld [vmem:[#allocation14 + $0x320] sm:$0xff]  ;;  %v1887_v3 = vld [vmem:[#allocation14 + $0x318] sm:$0xff] }
 0x3a1   : >> { %3408 = vmatpush1.bf16.msra.mxu1 %v3407_v61  ;;  %v1867_v61 = vld [vmem:[#allocation14 + $0x278] sm:$0xff] }
 0x3a2   : >> { %3410 = vmatprep.subr.bf16.mxu1 %v3409_v1  ;;  %v3423_v1 = vpack.c.bf16 %v1858_v56, %v1854_v55  ;;  %v3375_v55 = vpack.c.bf16 %v1888_v51, %v1884_v46  ;;  %v1892_v56 = vld [vmem:[#allocation14 + $0x340] sm:$0xff]  ;;  %v2081_v46 = vld [vmem:[#allocation15 + $0x28] sm:$0xff]  ;;  %v1910_v51 = vld [vmem:[#allocation14 + $0x3d0] sm:$0xff] }
 0x3a3   : >> { %3348 = vmatpush1.bf16.msra.mxu0 %v3347_v62  ;;  %v1869_v62 = vld [vmem:[#allocation14 + $0x288] sm:$0xff] }
 0x3a4   : >> { %3350 = vmatprep.subr.bf16.mxu0 %v3349_v11  ;;  %v3425_v11 = vpack.c.bf16 %v1867_v61, %v1863_v60  ;;  %v3365_v4 = vpack.c.bf16 %v1873_v63, %v1869_v62  ;;  %v1890_v60 = vld [vmem:[#allocation14 + $0x330] sm:$0xff]  ;;  %v1896_v62 = vld [vmem:[#allocation14 + $0x360] sm:$0xff]  ;;  %v1895_v63 = vld [vmem:[#allocation14 + $0x358] sm:$0xff] }
 0x3a5   : >> { %3412 = vmatpush1.bf16.msra.mxu1 %v3411_v16  ;;  %v1875_v16 = vld [vmem:[#allocation14 + $0x2b8] sm:$0xff] }
 0x3a6   : >> { %3414 = vmatprep.subr.bf16.mxu1 %v3413_v31  ;;  %v3427_v31 = vpack.c.bf16 %v1866_v13, %v1862_v12  ;;  %v3379_v12 = vpack.c.bf16 %v1896_v62, %v1892_v56  ;;  %v1900_v13 = vld [vmem:[#allocation14 + $0x380] sm:$0xff]  ;;  %v2089_v56 = vld [vmem:[#allocation15 + $0x68] sm:$0xff]  ;;  %v2078_v62 = vld [vmem:[#allocation15 + $0x10] sm:$0xff] }
 0x3a7   : >> { %3352 = vmatpush1.bf16.msra.mxu0 %v3351_v29  ;;  %v1877_v29 = vld [vmem:[#allocation14 + $0x2c8] sm:$0xff] }
 0x3a8   : >> { %3354 = vmatprep.subr.bf16.mxu0 %v3353_v34  ;;  %v3429_v34 = vpack.c.bf16 %v1875_v16, %v1871_v15  ;;  %v3369_v37 = vpack.c.bf16 %v1881_v30, %v1877_v29  ;;  %v1898_v15 = vld [vmem:[#allocation14 + $0x370] sm:$0xff]  ;;  %v1904_v29 = vld [vmem:[#allocation14 + $0x3a0] sm:$0xff]  ;;  %v1903_v30 = vld [vmem:[#allocation14 + $0x398] sm:$0xff] }
 0x3a9   : >> { %3416 = vmatpush1.bf16.msra.mxu1 %v3415_v41  ;;  %v1883_v41 = vld [vmem:[#allocation14 + $0x2f8] sm:$0xff] }
 0x3aa   : >> { %3418 = vmatprep.subr.bf16.mxu1 %v3417_v44  ;;  %v3431_v44 = vpack.c.bf16 %v1874_v5, %v1870_v36  ;;  %v3383_v36 = vpack.c.bf16 %v1904_v29, %v1900_v13  ;;  %v1908_v5 = vld [vmem:[#allocation14 + $0x3c0] sm:$0xff]  ;;  %v2097_v13 = vld [vmem:[#allocation15 + $0xa8] sm:$0xff]  ;;  %v2086_v29 = vld [vmem:[#allocation15 + $0x50] sm:$0xff] }
 0x3ab   : >> { %3356 = vmatpush1.bf16.msra.mxu0 %v3355_v42  ;;  %v1885_v42 = vld [vmem:[#allocation14 + $0x308] sm:$0xff] }
 0x3ac   : >> { %3358 = vmatprep.subr.bf16.mxu0 %v3357_v47  ;;  %v3433_v47 = vpack.c.bf16 %v1883_v41, %v1879_v39  ;;  %v3373_v8 = vpack.c.bf16 %v1889_v43, %v1885_v42  ;;  %v1906_v39 = vld [vmem:[#allocation14 + $0x3b0] sm:$0xff]  ;;  %v1912_v42 = vld [vmem:[#allocation14 + $0x3e0] sm:$0xff]  ;;  %v1911_v43 = vld [vmem:[#allocation14 + $0x3d8] sm:$0xff] }
 0x3ad   : >> { %3420 = vmatpush1.bf16.msra.mxu1 %v3419_v52  ;;  %v1891_v52 = vld [vmem:[#allocation14 + $0x338] sm:$0xff] }
 0x3ae   : >> { %3422 = vmatprep.subr.bf16.mxu1 %v3421_v54  ;;  %v3435_v54 = vpack.c.bf16 %v1882_v50, %v1878_v49  ;;  %v3387_v49 = vpack.c.bf16 %v1912_v42, %v1908_v5  ;;  %v2076_v50 = vld [vmem:[#allocation15] sm:$0xff]  ;;  %v2105_v5 = vld [vmem:[#allocation15 + $0xe8] sm:$0xff]  ;;  %v2094_v42 = vld [vmem:[#allocation15 + $0x90] sm:$0xff] }
 0x3af   : >> { %3360 = vmatpush1.bf16.msra.mxu0 %v3359_v53  ;;  %v1893_v53 = vld [vmem:[#allocation14 + $0x348] sm:$0xff] }
 0x3b0   : >> { %3362 = vmatprep.subr.bf16.mxu0 %v3361_v57  ;;  %v3437_v57 = vpack.c.bf16 %v1891_v52, %v1887_v3  ;;  %v3377_v61 = vpack.c.bf16 %v1897_v6, %v1893_v53  ;;  %v1914_v3 = vld [vmem:[#allocation14 + $0x3f0] sm:$0xff]  ;;  %v2080_v53 = vld [vmem:[#allocation15 + $0x20] sm:$0xff]  ;;  %v2079_v6 = vld [vmem:[#allocation15 + $0x18] sm:$0xff] }
 0x3b1   : >> { %3424 = vmatpush1.bf16.msra.mxu1 %v3423_v1  ;;  %v1899_v1 = vld [vmem:[#allocation14 + $0x378] sm:$0xff] }
 0x3b2   : >> { %3426 = vmatprep.subr.bf16.mxu1 %v3425_v11  ;;  %v3439_v11 = vpack.c.bf16 %v1890_v60, %v1886_v7  ;;  %v3455_v7 = vpack.c.bf16 %v2080_v53, %v2076_v50  ;;  %v2084_v60 = vld [vmem:[#allocation15 + $0x40] sm:$0xff] }
 0x3b3   : >> { %3364 = vmatpush1.bf16.msra.mxu0 %v3363_v9  ;;  %v1901_v9 = vld [vmem:[#allocation14 + $0x388] sm:$0xff] }
 0x3b4   : >> { %3366 = vmatprep.subr.bf16.mxu0 %v3365_v4  ;;  %v3441_v4 = vpack.c.bf16 %v1899_v1, %v1895_v63  ;;  %v3381_v16 = vpack.c.bf16 %v1905_v10, %v1901_v9  ;;  %v2082_v63 = vld [vmem:[#allocation15 + $0x30] sm:$0xff]  ;;  %v2088_v9 = vld [vmem:[#allocation15 + $0x60] sm:$0xff]  ;;  %v2087_v10 = vld [vmem:[#allocation15 + $0x58] sm:$0xff] }
 0x3b5   : >> { %3428 = vmatpush1.bf16.msra.mxu1 %v3427_v31  ;;  %v1907_v31 = vld [vmem:[#allocation14 + $0x3b8] sm:$0xff] }
 0x3b6   : >> { %3430 = vmatprep.subr.bf16.mxu1 %v3429_v34  ;;  %v3443_v34 = vpack.c.bf16 %v1898_v15, %v1894_v14  ;;  %v3459_v14 = vpack.c.bf16 %v2088_v9, %v2084_v60  ;;  %v2092_v15 = vld [vmem:[#allocation15 + $0x80] sm:$0xff] }
 0x3b7   : >> { %3368 = vmatpush1.bf16.msra.mxu0 %v3367_v32  ;;  %v1909_v32 = vld [vmem:[#allocation14 + $0x3c8] sm:$0xff] }
 0x3b8   : >> { %3370 = vmatprep.subr.bf16.mxu0 %v3369_v37  ;;  %v3445_v37 = vpack.c.bf16 %v1907_v31, %v1903_v30  ;;  %v3385_v41 = vpack.c.bf16 %v1913_v33, %v1909_v32  ;;  %v2090_v30 = vld [vmem:[#allocation15 + $0x70] sm:$0xff]  ;;  %v2096_v32 = vld [vmem:[#allocation15 + $0xa0] sm:$0xff]  ;;  %v2095_v33 = vld [vmem:[#allocation15 + $0x98] sm:$0xff] }
 0x3b9   : >> { %3432 = vmatpush1.bf16.msra.mxu1 %v3431_v44  ;;  %v1915_v44 = vld [vmem:[#allocation14 + $0x3f8] sm:$0xff] }
 0x3ba   : >> { %3434 = vmatprep.subr.bf16.mxu1 %v3433_v47  ;;  %v3447_v47 = vpack.c.bf16 %v1906_v39, %v1902_v38  ;;  %v3463_v38 = vpack.c.bf16 %v2096_v32, %v2092_v15  ;;  %v2100_v39 = vld [vmem:[#allocation15 + $0xc0] sm:$0xff] }
 0x3bb   : >> { %3372 = vmatpush1.bf16.msra.mxu0 %v3371_v45  ;;  %v2077_v45 = vld [vmem:[#allocation15 + $0x8] sm:$0xff] }
 0x3bc   : >> { %3374 = vmatprep.subr.bf16.mxu0 %v3373_v8  ;;  %v3449_v8 = vpack.c.bf16 %v1915_v44, %v1911_v43  ;;  %v3453_v52 = vpack.c.bf16 %v2081_v46, %v2077_v45  ;;  %v2098_v43 = vld [vmem:[#allocation15 + $0xb0] sm:$0xff]  ;;  %v2104_v45 = vld [vmem:[#allocation15 + $0xe0] sm:$0xff]  ;;  %v2103_v46 = vld [vmem:[#allocation15 + $0xd8] sm:$0xff] }
 0x3bd   : >> { %3436 = vmatpush1.bf16.msra.mxu1 %v3435_v54  ;;  %v2083_v54 = vld [vmem:[#allocation15 + $0x38] sm:$0xff]  ;;  %v3527_v50 = vpack.c.bf16 %v2098_v43, %v2094_v42  ;;  %v2126_v43 = vld [vmem:[#allocation15 + $0x190] sm:$0xff] }
 0x3be   : >> { %3438 = vmatprep.subr.bf16.mxu1 %v3437_v57  ;;  %v3451_v57 = vpack.c.bf16 %v1914_v3, %v1910_v51  ;;  %v2102_v3 = vld [vmem:[#allocation15 + $0xd0] sm:$0xff] }
 0x3bf   : >> { %3376 = vmatpush1.bf16.msra.mxu0 %v3375_v55  ;;  %v2085_v55 = vld [vmem:[#allocation15 + $0x48] sm:$0xff] }
 0x3c0   : >> { %3378 = vmatprep.subr.bf16.mxu0 %v3377_v61  ;;  %v3517_v61 = vpack.c.bf16 %v2083_v54, %v2079_v6  ;;  %v3457_v1 = vpack.c.bf16 %v2089_v56, %v2085_v55  ;;  %v2112_v6 = vld [vmem:[#allocation15 + $0x120] sm:$0xff]  ;;  %v2111_v54 = vld [vmem:[#allocation15 + $0x118] sm:$0xff]  ;;  %v2117_v56 = vld [vmem:[#allocation15 + $0x148] sm:$0xff] }
 0x3c1   : >> { %3440 = vmatpush1.bf16.msra.mxu1 %v3439_v11  ;;  %v2091_v11 = vld [vmem:[#allocation15 + $0x78] sm:$0xff] }
 0x3c2   : >> { %3442 = vmatprep.subr.bf16.mxu1 %v3441_v4  ;;  %v3519_v4 = vpack.c.bf16 %v2082_v63, %v2078_v62  ;;  %v2115_v55 = vld [vmem:[#allocation15 + $0x138] sm:$0xff]  ;;  %v2110_v63 = vld [vmem:[#allocation15 + $0x110] sm:$0xff] }
 0x3c3   : >> { %3380 = vmatpush1.bf16.msra.mxu0 %v3379_v12  ;;  %v2093_v12 = vld [vmem:[#allocation15 + $0x88] sm:$0xff]  ;;  %v3533_v62 = vpack.c.bf16 %v2115_v55, %v2111_v54  ;;  %v2144_v54 = vld [vmem:[#allocation15 + $0x220] sm:$0xff]  ;;  %v2143_v55 = vld [vmem:[#allocation15 + $0x218] sm:$0xff] }
 0x3c4   : >> { %3382 = vmatprep.subr.bf16.mxu0 %v3381_v16  ;;  %v3521_v16 = vpack.c.bf16 %v2091_v11, %v2087_v10  ;;  %v3461_v31 = vpack.c.bf16 %v2097_v13, %v2093_v12  ;;  %v2120_v10 = vld [vmem:[#allocation15 + $0x160] sm:$0xff]  ;;  %v2119_v11 = vld [vmem:[#allocation15 + $0x158] sm:$0xff]  ;;  %v2125_v13 = vld [vmem:[#allocation15 + $0x188] sm:$0xff] }
 0x3c5   : >> { %3444 = vmatpush1.bf16.msra.mxu1 %v3443_v34  ;;  %v2099_v34 = vld [vmem:[#allocation15 + $0xb8] sm:$0xff] }
 0x3c6   : >> { %3446 = vmatprep.subr.bf16.mxu1 %v3445_v37  ;;  %v3523_v37 = vpack.c.bf16 %v2090_v30, %v2086_v29  ;;  %v2123_v12 = vld [vmem:[#allocation15 + $0x178] sm:$0xff]  ;;  %v2118_v30 = vld [vmem:[#allocation15 + $0x150] sm:$0xff] }
 0x3c7   : >> { %3384 = vmatpush1.bf16.msra.mxu0 %v3383_v36  ;;  %v2101_v36 = vld [vmem:[#allocation15 + $0xc8] sm:$0xff]  ;;  %v3537_v29 = vpack.c.bf16 %v2123_v12, %v2119_v11  ;;  %v2152_v11 = vld [vmem:[#allocation15 + $0x260] sm:$0xff]  ;;  %v2151_v12 = vld [vmem:[#allocation15 + $0x258] sm:$0xff] }
 0x3c8   : >> { %3386 = vmatprep.subr.bf16.mxu0 %v3385_v41  ;;  %v3525_v41 = vpack.c.bf16 %v2099_v34, %v2095_v33  ;;  %v3465_v44 = vpack.c.bf16 %v2105_v5, %v2101_v36  ;;  %v2128_v33 = vld [vmem:[#allocation15 + $0x1a0] sm:$0xff]  ;;  %v2127_v34 = vld [vmem:[#allocation15 + $0x198] sm:$0xff]  ;;  %v2133_v5 = vld [vmem:[#allocation15 + $0x1c8] sm:$0xff] }
 0x3c9   : >> { %3448 = vmatpush1.bf16.msra.mxu1 %v3447_v47  ;;  %v2107_v47 = vld [vmem:[#allocation15 + $0xf8] sm:$0xff] }
 0x3ca   : >> { %3450 = vmatprep.subr.bf16.mxu1 %v3449_v8  ;;  %v3467_v8 = vpack.c.bf16 %v2104_v45, %v2100_v39  ;;  %v3529_v51 = vpack.c.bf16 %v2107_v47, %v2103_v46  ;;  %v2131_v36 = vld [vmem:[#allocation15 + $0x1b8] sm:$0xff]  ;;  %v2136_v46 = vld [vmem:[#allocation15 + $0x1e0] sm:$0xff] }
 0x3cb   : >> { %3388 = vmatpush1.bf16.msra.mxu0 %v3387_v49  ;;  %v2109_v49 = vld [vmem:[#allocation15 + $0x108] sm:$0xff]  ;;  %v3541_v42 = vpack.c.bf16 %v2131_v36, %v2127_v34  ;;  %v2135_v47 = vld [vmem:[#allocation15 + $0x1d8] sm:$0xff]  ;;  %v2160_v34 = vld [vmem:[#allocation15 + $0x2a0] sm:$0xff] }
 0x3cc   : >> { %3454 = vmatprep.subr.bf16.mxu0 %v3453_v52  ;;  %v2106_v52 = vld [vmem:[#allocation15 + $0xf0] sm:$0xff]  ;;  %v2159_v36 = vld [vmem:[#allocation15 + $0x298] sm:$0xff] }
 0x3cd   : >> { %3452 = vmatpush1.bf16.msra.mxu1 %v3451_v57  ;;  %v2121_v57 = vld [vmem:[#allocation15 + $0x168] sm:$0xff] }
 0x3ce   : >> { %1981 = vmatmul.mubr.f32.vlgmr.msra.gmra.mrb[2].mxu0 %v4249_v59  ;;  %3518 = vmatprep.subr.bf16.mxu1 %v3517_v61  ;;  %v2116_v61 = vld [vmem:[#allocation15 + $0x140] sm:$0xff]  ;;  %v3473_v9 = vpack.c.bf16 %v2121_v57, %v2117_v56  ;;  %v2147_v56 = vld [vmem:[#allocation15 + $0x238] sm:$0xff]  ;;  %v2149_v57 = vld [vmem:[#allocation15 + $0x248] sm:$0xff] }
 0x3cf   : >> { %3456 = vmatpush1.bf16.msra.mxu0 %v3455_v7  ;;  %2268 = vmatprep.mubr.f32.mxu0 %v4241_v0  ;;  %v3531_v7 = vpack.c.bf16 %v2106_v52, %v2102_v3  ;;  %v3475_v15 = vpack.c.bf16 %v2120_v10, %v2116_v61  ;;  %v2134_v52 = vld [vmem:[#allocation15 + $0x1d0] sm:$0xff] }
 0x3d0   : >> { %3458 = vmatprep.subr.bf16.mxu0 %v3457_v1  ;;  %2052 = vmatmul.mubr.f32.vlgmr.msra.gmra.mrb[2].mxu1 %v4249_v59  ;;  %v2113_v59 = vld [vmem:[#allocation15 + $0x128] sm:$0xff]  ;;  %v2114_v1 = vld [vmem:[#allocation15 + $0x130] sm:$0xff] }
 0x3d1   : >> { %3520 = vmatpush1.bf16.msra.mxu1 %v3519_v4  ;;  %2339 = vmatprep.mubr.f32.mxu1 %v4241_v0  ;;  %v2108_v0 = vld [vmem:[#allocation15 + $0x100] sm:$0xff]  ;;  %v3469_v53 = vpack.c.bf16 %v2113_v59, %v2109_v49  ;;  %v2129_v4 = vld [vmem:[#allocation15 + $0x1a8] sm:$0xff]  ;;  %v2139_v49 = vld [vmem:[#allocation15 + $0x1f8] sm:$0xff] }
 0x3d2   : >> { %3522 = vmatprep.subr.bf16.mxu1 %v3521_v16  ;;  %v3471_v60 = vpack.c.bf16 %v2112_v6, %v2108_v0  ;;  %v2124_v16 = vld [vmem:[#allocation15 + $0x180] sm:$0xff]  ;;  %v3477_v32 = vpack.c.bf16 %v2129_v4, %v2125_v13  ;;  %v2141_v59 = vld [vmem:[#allocation15 + $0x208] sm:$0xff]  ;;  %v3545_v3 = vpack.c.bf16 %v2139_v49, %v2135_v47  ;;  %v2155_v13 = vld [vmem:[#allocation15 + $0x278] sm:$0xff] }
 0x3d3   : >> { %3460 = vmatpush1.bf16.msra.mxu0 %v3459_v14  ;;  %v3535_v14 = vpack.c.bf16 %v2114_v1, %v2110_v63  ;;  %v3479_v39 = vpack.c.bf16 %v2128_v33, %v2124_v16  ;;  %v3549_v63 = vpack.c.bf16 %v2147_v56, %v2143_v55  ;;  %v2142_v1 = vld [vmem:[#allocation15 + $0x210] sm:$0xff]  ;;  %v2157_v4 = vld [vmem:[#allocation15 + $0x288] sm:$0xff]  ;;  %v2168_v47 = vld [vmem:[#allocation15 + $0x2e0] sm:$0xff] }
 0x3d4   : >> { %3462 = vmatprep.subr.bf16.mxu0 %v3461_v31  ;;  %v2122_v31 = vld [vmem:[#allocation15 + $0x170] sm:$0xff]  ;;  %v2167_v49 = vld [vmem:[#allocation15 + $0x2d8] sm:$0xff]  ;;  %v2176_v55 = vld [vmem:[#allocation15 + $0x320] sm:$0xff] }
 0x3d5   : >> { %3524 = vmatpush1.bf16.msra.mxu1 %v3523_v37  ;;  %v2137_v37 = vld [vmem:[#allocation15 + $0x1e8] sm:$0xff]  ;;  %v2175_v56 = vld [vmem:[#allocation15 + $0x318] sm:$0xff] }
 0x3d6   : >> { %3526 = vmatprep.subr.bf16.mxu1 %v3525_v41  ;;  %v2132_v41 = vld [vmem:[#allocation15 + $0x1c0] sm:$0xff]  ;;  %v3481_v45 = vpack.c.bf16 %v2137_v37, %v2133_v5  ;;  %v2163_v5 = vld [vmem:[#allocation15 + $0x2b8] sm:$0xff]  ;;  %v2165_v37 = vld [vmem:[#allocation15 + $0x2c8] sm:$0xff] }
 0x3d7   : >> { %3464 = vmatpush1.bf16.msra.mxu0 %v3463_v38  ;;  %v3539_v38 = vpack.c.bf16 %v2122_v31, %v2118_v30  ;;  %v3483_v0 = vpack.c.bf16 %v2136_v46, %v2132_v41  ;;  %v3553_v30 = vpack.c.bf16 %v2155_v13, %v2151_v12  ;;  %v2150_v31 = vld [vmem:[#allocation15 + $0x250] sm:$0xff]  ;;  %v2184_v12 = vld [vmem:[#allocation15 + $0x360] sm:$0xff]  ;;  %v2183_v13 = vld [vmem:[#allocation15 + $0x358] sm:$0xff] }
 0x3d8   : >> { %3466 = vmatprep.subr.bf16.mxu0 %v3465_v44  ;;  %v2130_v44 = vld [vmem:[#allocation15 + $0x1b0] sm:$0xff] }
 0x3d9   : >> { %3528 = vmatpush1.bf16.msra.mxu1 %v3527_v50  ;;  %v2145_v50 = vld [vmem:[#allocation15 + $0x228] sm:$0xff] }
 0x3da   : >> { %3530 = vmatprep.subr.bf16.mxu1 %v3529_v51  ;;  %v2140_v51 = vld [vmem:[#allocation15 + $0x200] sm:$0xff]  ;;  %v3485_v6 = vpack.c.bf16 %v2145_v50, %v2141_v59  ;;  %v2171_v59 = vld [vmem:[#allocation15 + $0x2f8] sm:$0xff]  ;;  %v2173_v50 = vld [vmem:[#allocation15 + $0x308] sm:$0xff] }
 0x3db   : >> { %3468 = vmatpush1.bf16.msra.mxu0 %v3467_v8  ;;  %v3543_v8 = vpack.c.bf16 %v2130_v44, %v2126_v43  ;;  %v3487_v61 = vpack.c.bf16 %v2144_v54, %v2140_v51  ;;  %v3557_v43 = vpack.c.bf16 %v2163_v5, %v2159_v36  ;;  %v2158_v44 = vld [vmem:[#allocation15 + $0x290] sm:$0xff]  ;;  %v2192_v36 = vld [vmem:[#allocation15 + $0x3a0] sm:$0xff]  ;;  %v2191_v5 = vld [vmem:[#allocation15 + $0x398] sm:$0xff] }
 0x3dc   : >> { %3470 = vmatprep.subr.bf16.mxu0 %v3469_v53  ;;  %v2138_v53 = vld [vmem:[#allocation15 + $0x1f0] sm:$0xff] }
 0x3dd   : >> { %3532 = vmatpush1.bf16.msra.mxu1 %v3531_v7  ;;  %v2153_v7 = vld [vmem:[#allocation15 + $0x268] sm:$0xff] }
 0x3de   : >> { %3534 = vmatprep.subr.bf16.mxu1 %v3533_v62  ;;  %v2148_v62 = vld [vmem:[#allocation15 + $0x240] sm:$0xff]  ;;  %v3489_v10 = vpack.c.bf16 %v2153_v7, %v2149_v57  ;;  %v2179_v57 = vld [vmem:[#allocation15 + $0x338] sm:$0xff]  ;;  %v2181_v7 = vld [vmem:[#allocation15 + $0x348] sm:$0xff] }
 0x3df   : >> { %3472 = vmatpush1.bf16.msra.mxu0 %v3471_v60  ;;  %v3547_v60 = vpack.c.bf16 %v2138_v53, %v2134_v52  ;;  %v3491_v16 = vpack.c.bf16 %v2152_v11, %v2148_v62  ;;  %v3561_v52 = vpack.c.bf16 %v2171_v59, %v2167_v49  ;;  %v2166_v53 = vld [vmem:[#allocation15 + $0x2d0] sm:$0xff]  ;;  %v2200_v49 = vld [vmem:[#allocation15 + $0x3e0] sm:$0xff]  ;;  %v2199_v59 = vld [vmem:[#allocation15 + $0x3d8] sm:$0xff] }
 0x3e0   : >> { %3474 = vmatprep.subr.bf16.mxu0 %v3473_v9  ;;  %v2146_v9 = vld [vmem:[#allocation15 + $0x230] sm:$0xff] }
 0x3e1   : >> { %3536 = vmatpush1.bf16.msra.mxu1 %v3535_v14  ;;  %v2161_v14 = vld [vmem:[#allocation15 + $0x2a8] sm:$0xff] }
 0x3e2   : >> { %3538 = vmatprep.subr.bf16.mxu1 %v3537_v29  ;;  %v2156_v29 = vld [vmem:[#allocation15 + $0x280] sm:$0xff]  ;;  %v3493_v33 = vpack.c.bf16 %v2161_v14, %v2157_v4  ;;  %v2187_v4 = vld [vmem:[#allocation15 + $0x378] sm:$0xff]  ;;  %v2189_v14 = vld [vmem:[#allocation15 + $0x388] sm:$0xff] }
 0x3e3   : >> { %3476 = vmatpush1.bf16.msra.mxu0 %v3475_v15  ;;  %v3551_v15 = vpack.c.bf16 %v2146_v9, %v2142_v1  ;;  %v3495_v41 = vpack.c.bf16 %v2160_v34, %v2156_v29  ;;  %v3565_v1 = vpack.c.bf16 %v2179_v57, %v2175_v56  ;;  %v2174_v9 = vld [vmem:[#allocation15 + $0x310] sm:$0xff] }
 0x3e4   : >> { %3478 = vmatprep.subr.bf16.mxu0 %v3477_v32  ;;  %v2154_v32 = vld [vmem:[#allocation15 + $0x270] sm:$0xff] }
 0x3e5   : >> { %3540 = vmatpush1.bf16.msra.mxu1 %v3539_v38  ;;  %v2169_v38 = vld [vmem:[#allocation15 + $0x2e8] sm:$0xff] }
 0x3e6   : >> { %3542 = vmatprep.subr.bf16.mxu1 %v3541_v42  ;;  %v2164_v42 = vld [vmem:[#allocation15 + $0x2c0] sm:$0xff]  ;;  %v3497_v46 = vpack.c.bf16 %v2169_v38, %v2165_v37  ;;  %v2195_v37 = vld [vmem:[#allocation15 + $0x3b8] sm:$0xff]  ;;  %v2197_v38 = vld [vmem:[#allocation15 + $0x3c8] sm:$0xff] }
 0x3e7   : >> { %3480 = vmatpush1.bf16.msra.mxu0 %v3479_v39  ;;  %v3555_v39 = vpack.c.bf16 %v2154_v32, %v2150_v31  ;;  %v3499_v51 = vpack.c.bf16 %v2168_v47, %v2164_v42  ;;  %v3569_v31 = vpack.c.bf16 %v2187_v4, %v2183_v13  ;;  %v2182_v32 = vld [vmem:[#allocation15 + $0x350] sm:$0xff]  ;;  %v2368_v4 = vld [vmem:[#allocation17 + $0x20] sm:$0xff] }
 0x3e8   : >> { %3482 = vmatprep.subr.bf16.mxu0 %v3481_v45  ;;  %v2162_v45 = vld [vmem:[#allocation15 + $0x2b0] sm:$0xff] }
 0x3e9   : >> { %3544 = vmatpush1.bf16.msra.mxu1 %v3543_v8  ;;  %v2177_v8 = vld [vmem:[#allocation15 + $0x328] sm:$0xff] }
 0x3ea   : >> { %3546 = vmatprep.subr.bf16.mxu1 %v3545_v3  ;;  %v2172_v3 = vld [vmem:[#allocation15 + $0x300] sm:$0xff]  ;;  %v3501_v54 = vpack.c.bf16 %v2177_v8, %v2173_v50  ;;  %v2203_v50 = vld [vmem:[#allocation15 + $0x3f8] sm:$0xff] }
 0x3eb   : >> { %3484 = vmatpush1.bf16.msra.mxu0 %v3483_v0  ;;  %v3559_v0 = vpack.c.bf16 %v2162_v45, %v2158_v44  ;;  %v3503_v62 = vpack.c.bf16 %v2176_v55, %v2172_v3  ;;  %v3573_v44 = vpack.c.bf16 %v2195_v37, %v2191_v5  ;;  %v2190_v45 = vld [vmem:[#allocation15 + $0x390] sm:$0xff] }
 0x3ec   : >> { %3486 = vmatprep.subr.bf16.mxu0 %v3485_v6  ;;  %v2170_v6 = vld [vmem:[#allocation15 + $0x2f0] sm:$0xff] }
 0x3ed   : >> { %3548 = vmatpush1.bf16.msra.mxu1 %v3547_v60  ;;  %v2185_v60 = vld [vmem:[#allocation15 + $0x368] sm:$0xff]  ;;  %v2198_v3 = vld [vmem:[#allocation15 + $0x3d0] sm:$0xff] }
 0x3ee   : >> { %3550 = vmatprep.subr.bf16.mxu1 %v3549_v63  ;;  %v2180_v63 = vld [vmem:[#allocation15 + $0x340] sm:$0xff]  ;;  %v3505_v11 = vpack.c.bf16 %v2185_v60, %v2181_v7 }
 0x3ef   : >> { %3488 = vmatpush1.bf16.msra.mxu0 %v3487_v61  ;;  %v3563_v61 = vpack.c.bf16 %v2170_v6, %v2166_v53  ;;  %v3507_v29 = vpack.c.bf16 %v2184_v12, %v2180_v63  ;;  %v2364_v63 = vld [vmem:[#allocation17] sm:$0xff] }
 0x3f0   : >> { %3490 = vmatprep.subr.bf16.mxu0 %v3489_v10  ;;  %v2178_v10 = vld [vmem:[#allocation15 + $0x330] sm:$0xff] }
 0x3f1   : >> { %3552 = vmatpush1.bf16.msra.mxu1 %v3551_v15  ;;  %v2193_v15 = vld [vmem:[#allocation15 + $0x3a8] sm:$0xff] }
 0x3f2   : >> { %3554 = vmatprep.subr.bf16.mxu1 %v3553_v30  ;;  %v2188_v30 = vld [vmem:[#allocation15 + $0x380] sm:$0xff]  ;;  %v3509_v34 = vpack.c.bf16 %v2193_v15, %v2189_v14  ;;  %v2369_v14 = vld [vmem:[#allocation17 + $0x28] sm:$0xff] }
 0x3f3   : >> { %3492 = vmatpush1.bf16.msra.mxu0 %v3491_v16  ;;  %v3567_v16 = vpack.c.bf16 %v2178_v10, %v2174_v9  ;;  %v3511_v42 = vpack.c.bf16 %v2192_v36, %v2188_v30  ;;  %v4268_v10 = vmov 0.0|0.0  }
 0x3f4   : >> { %3494 = vmatprep.subr.bf16.mxu0 %v3493_v33  ;;  %v2186_v33 = vld [vmem:[#allocation15 + $0x370] sm:$0xff] }
 0x3f5   : >> { %3556 = vmatpush1.bf16.msra.mxu1 %v3555_v39  ;;  %v2201_v39 = vld [vmem:[#allocation15 + $0x3e8] sm:$0xff] }
 0x3f6   : >> { %3558 = vmatprep.subr.bf16.mxu1 %v3557_v43  ;;  %v2196_v43 = vld [vmem:[#allocation15 + $0x3c0] sm:$0xff]  ;;  %v3513_v47 = vpack.c.bf16 %v2201_v39, %v2197_v38 }
 0x3f7   : >> { %3496 = vmatpush1.bf16.msra.mxu0 %v3495_v41  ;;  %v3571_v41 = vpack.c.bf16 %v2186_v33, %v2182_v32  ;;  %v2370_v32 = vld [vmem:[#allocation17 + $0x30] sm:$0xff]  ;;  %v2371_v33 = vld [vmem:[#allocation17 + $0x38] sm:$0xff] }
 0x3f8   : >> { %3498 = vmatprep.subr.bf16.mxu0 %v3497_v46  ;;  %v2194_v46 = vld [vmem:[#allocation15 + $0x3b0] sm:$0xff]  ;;  %v3591_v5 = vpack.c.bf16 %v2371_v33, %v2370_v32 }
 0x3f9   : >> { %3560 = vmatpush1.bf16.msra.mxu1 %v3559_v0  ;;  %v3575_v8 = vpack.c.bf16 %v2194_v46, %v2190_v45  ;;  %v3515_v0 = vpack.c.bf16 %v2200_v49, %v2196_v43  ;;  %v2374_v46 = vld [vmem:[#allocation17 + $0x50] sm:$0xff] }
 0x3fa   : >> { %3562 = vmatprep.subr.bf16.mxu1 %v3561_v52  ;;  %v2202_v52 = vld [vmem:[#allocation15 + $0x3f0] sm:$0xff] }
 0x3fb   : >> { %3500 = vmatpush1.bf16.msra.mxu0 %v3499_v51  ;;  %v3577_v51 = vpack.c.bf16 %v2203_v50, %v2199_v59  ;;  %v3579_v53 = vpack.c.bf16 %v2202_v52, %v2198_v3  ;;  %v2376_v50 = vld [vmem:[#allocation17 + $0x60] sm:$0xff]  ;;  %v2378_v3 = vld [vmem:[#allocation17 + $0x70] sm:$0xff]  ;;  %v2379_v52 = vld [vmem:[#allocation17 + $0x78] sm:$0xff] }
 0x3fc   : >> { %3502 = vmatprep.subr.bf16.mxu0 %v3501_v54 }
 0x3fd   : >> { %3564 = vmatpush1.bf16.msra.mxu1 %v3563_v61 }
 0x3fe   : >> { %3566 = vmatprep.subr.bf16.mxu1 %v3565_v1  ;;  %v2365_v1 = vld [vmem:[#allocation17 + $0x8] sm:$0xff] }
 0x3ff   : >> { %3504 = vmatpush1.bf16.msra.mxu0 %v3503_v62  ;;  %v3582_v9 = vpack.c.bf16 %v2365_v1, %v2364_v63 }
 0x400   : >> { %3506 = vmatprep.subr.bf16.mxu0 %v3505_v11  ;;  %v2367_v11 = vld [vmem:[#allocation17 + $0x18] sm:$0xff] }
 0x401   : >> { %3568 = vmatpush1.bf16.msra.mxu1 %v3567_v16  ;;  %v3588_v16 = vpack.c.bf16 %v2369_v14, %v2368_v4 }
 0x402   : >> { %3570 = vmatprep.subr.bf16.mxu1 %v3569_v31 }
 0x403   : >> { %3508 = vmatpush1.bf16.msra.mxu0 %v3507_v29 }
 0x404   : >> { %3510 = vmatprep.subr.bf16.mxu0 %v3509_v34 }
 0x405   : >> { %3572 = vmatpush1.bf16.msra.mxu1 %v3571_v41  ;;  %v2372_v41 = vld [vmem:[#allocation17 + $0x40] sm:$0xff] }
 0x406   : >> { %3574 = vmatprep.subr.bf16.mxu1 %v3573_v44 }
 0x407   : >> { %3512 = vmatpush1.bf16.msra.mxu0 %v3511_v42  ;;  %v2373_v42 = vld [vmem:[#allocation17 + $0x48] sm:$0xff] }
 0x408   : >> { %3514 = vmatprep.subr.bf16.mxu0 %v3513_v47  ;;  %v3594_v44 = vpack.c.bf16 %v2373_v42, %v2372_v41  ;;  %v2375_v47 = vld [vmem:[#allocation17 + $0x58] sm:$0xff] }
 0x409   : >> { %3576 = vmatpush1.bf16.msra.mxu1 %v3575_v8  ;;  %v3597_v49 = vpack.c.bf16 %v2375_v47, %v2374_v46  ;;  %v2377_v8 = vld [vmem:[#allocation17 + $0x68] sm:$0xff] }
 0x40a   : >> { %3578 = vmatprep.subr.bf16.mxu1 %v3577_v51 }
 0x40b   : >> { %3516 = vmatpush1.bf16.msra.mxu0 %v3515_v0  ;;  %v3600_v0 = vpack.c.bf16 %v2377_v8, %v2376_v50 }
 0x40c   : >> { %3581 = vmatprep.subr.bf16.mxu0 %v4268_v10 }
 0x40d   : >> { %3580 = vmatpush1.bf16.msra.mxu1 %v3579_v53  ;;  %v3603_v53 = vpack.c.bf16 %v2379_v52, %v2378_v3 }
 0x40e   : >> { %2269 = vmatmul.mubr.f32.vlgmr.msra.gmra.mrb[4].mxu0 %v4245_v40 }
 0x40f   : >> { %3583 = vmatpush3.bf16.msra.mxu0 %v3582_v9 }
 0x410   : >> { %2340 = vmatmul.mubr.f32.vlgmr.msra.gmra.mrb[4].mxu1 %v4245_v40  ;;  %3584 = vmatprep.subr.bf16.mxu0 %v4268_v10  ;;  %v2366_v40 = vld [vmem:[#allocation17 + $0x10] sm:$0xff] }
 0x411   : >> { %v3585_v13 = vpack.c.bf16 %v2367_v11, %v2366_v40 }
 0x413   : >> { %3586 = vmatpush3.bf16.msra.mxu0 %v3585_v13 }
 0x414   : >> { %3587 = vmatprep.subr.bf16.mxu0 %v4268_v10 }
 0x417   : >> { %3589 = vmatpush3.bf16.msra.mxu0 %v3588_v16 }
 0x418   : >> { %3590 = vmatprep.subr.bf16.mxu0 %v4268_v10 }
 0x41b   : >> { %3592 = vmatpush3.bf16.msra.mxu0 %v3591_v5 }
 0x41c   : >> { %3593 = vmatprep.subr.bf16.mxu0 %v4268_v10 }
 0x41f   : >> { %3595 = vmatpush3.bf16.msra.mxu0 %v3594_v44 }
 0x420   : >> { %3596 = vmatprep.subr.bf16.mxu0 %v4268_v10 }
 0x423   : >> { %3598 = vmatpush3.bf16.msra.mxu0 %v3597_v49 }
 0x424   : >> { %3599 = vmatprep.subr.bf16.mxu0 %v4268_v10 }
 0x427   : >> { %3601 = vmatpush3.bf16.msra.mxu0 %v3600_v0 }
 0x428   : >> { %3602 = vmatprep.subr.bf16.mxu0 %v4268_v10 }
 0x42b   : >> { %3604 = vmatpush3.bf16.msra.mxu0 %v3603_v53 }
 0x461   : >> { %v1694_v6 = vpop.f32.mrb[0].mxu0 }
 0x462   : >> { %v1695_v54 = vadd.f32 %v1694_v6, %v4601_v17  ;;  %v1696_v55 = vpop.f32.mrb[1].mxu0 }
 0x463   : >> { %v1697_v56 = vadd.f32 %v1696_v55, %v4603_v18  ;;  %v1765_v7 = vpop.f32.mrb[0].mxu1  ;;  %v4270_v55 = vmov 0.0  }
 0x464   : >> { %v1770_v57 = vmul.f32 0.5, %v1695_v54  ;;  %v1766_v61 = vadd.f32 %v1765_v7, %v4605_v19  ;;  %v1767_v62 = vpop.f32.mrb[1].mxu1  ;;  %2786 = vmatprep.mubr.msk.f32.mxu0 %vm4269_vm1, %v4270_v55 }
 0x465   : >> { %v1774_v60 = vmul.f32 0.5, %v1697_v56  ;;  %v1768_v12 = vadd.f32 %v1767_v62, %v4607_v20 }
 0x466   : >> { %3871 = vtanh.f32 %v1770_v57 }
 0x467   : >> { %3873 = vtanh.f32 %v1774_v60  ;;  %v1779_v15 = vmul.f32 0.5, %v1768_v12 }
 0x468   : >> { %3875 = vtanh.f32 %v1766_v61 }
 0x469   : >> { %3877 = vtanh.f32 %v1779_v15 }
 0x470   : >> { %v3872_v29 = vpop.eup %3871 }
 0x471   : >> { %v3874_v30 = vpop.eup %3873  ;;  %v1772_v31 = vmul.f32 0.5, %v3872_v29 }
 0x472   : >> { %v3876_v34 = vpop.eup %3875  ;;  %v1776_v36 = vmul.f32 0.5, %v3874_v30 }
 0x473   : >> { %v1773_v37 = vadd.f32 0.5, %v1772_v31  ;;  %v3878_v59 = vpop.eup %3877 }
 0x474   : >> { %v1777_v38 = vadd.f32 0.5, %v1776_v36  ;;  %v1781_v51 = vmul.f32 0.5, %v3878_v59 }
 0x475   : >> { %v1784_v39 = vmul.f32 %v3876_v34, %v1773_v37 }
 0x476   : >> { %v1783_v43 = vmul.f32 %v4237_v48, %v1777_v38 }
 0x478   : >> { %v4774_v48 = vadd.f32 %v1784_v39, %v1783_v43  }
 0x47a   : >> { %v4916_v45 = vmov %v4774_v48  ;;  %v1782_v48 = vadd.f32 0.5, %v1781_v51 }
 0x47b   : >> { %3879 = vtanh.f32 %v4916_v45  ;;  %2456 = vst [vmem:[#allocation5] sm:$0xff] (%p1489_p10), %v4916_v45 }
 0x485   : >> { %v3880_v6 = vpop.eup %3879 }
 0x486   : >> { %v4777_v59 = vmul.f32 %v3880_v6, %v1782_v48  }
 0x488   : >> { %v4917_v54 = vmov %v4777_v59 }
 0x489   : > { %2453 = vst [vmem:[#allocation2] sm:$0xff] (%p1489_p10), %v4917_v54 }
 0x4a1   : >> { %v1982_v56 = vpop.f32.mrb[2].mxu0 }
 0x4a2   : >> { %v1983_v57 = vadd.f32 %v1982_v56, %v4609_v21  ;;  %v1984_v7 = vpop.f32.mrb[3].mxu0 }
 0x4a3   : >> { %v1985_v60 = vadd.f32 %v1984_v7, %v4611_v22  ;;  %v2053_v62 = vpop.f32.mrb[2].mxu1 }
 0x4a4   : >> { %v2058_v61 = vmul.f32 0.5, %v1983_v57  ;;  %v2054_v1 = vadd.f32 %v2053_v62, %v4613_v23  ;;  %v2055_v9 = vpop.f32.mrb[3].mxu1 }
 0x4a5   : >> { %v2062_v63 = vmul.f32 0.5, %v1985_v60  ;;  %v2056_v10 = vadd.f32 %v2055_v9, %v4615_v24 }
 0x4a6   : >> { %3881 = vtanh.f32 %v2058_v61 }
 0x4a7   : >> { %3883 = vtanh.f32 %v2062_v63  ;;  %v2067_v40 = vmul.f32 0.5, %v2056_v10 }
 0x4a8   : >> { %3885 = vtanh.f32 %v2054_v1 }
 0x4a9   : >> { %3887 = vtanh.f32 %v2067_v40 }
 0x4b0   : >> { %v3882_v11 = vpop.eup %3881 }
 0x4b1   : >> { %v3884_v12 = vpop.eup %3883  ;;  %v2060_v13 = vmul.f32 0.5, %v3882_v11 }
 0x4b2   : >> { %v3886_v4 = vpop.eup %3885  ;;  %v2064_v14 = vmul.f32 0.5, %v3884_v12 }
 0x4b3   : >> { %v2061_v15 = vadd.f32 0.5, %v2060_v13  ;;  %v3888_v32 = vpop.eup %3887 }
 0x4b4   : >> { %v2065_v16 = vadd.f32 0.5, %v2064_v14  ;;  %v2069_v33 = vmul.f32 0.5, %v3888_v32 }
 0x4b5   : >> { %v2072_v29 = vmul.f32 %v3886_v4, %v2061_v15 }
 0x4b6   : >> { %v2071_v30 = vmul.f32 %v4233_v35, %v2065_v16  ;;  %v2070_v34 = vadd.f32 0.5, %v2069_v33 }
 0x4b8   : >> { %v2073_v31 = vadd.f32 %v2072_v29, %v2071_v30  }
 0x4ba   : >> { %3889 = vtanh.f32 %v2073_v31  ;;  %2457 = vst [vmem:[#allocation6] sm:$0xff] (%p1489_p10), %v2073_v31 }
 0x4c4   : >> { %v3890_v36 = vpop.eup %3889 }
 0x4c5   : >> { %v2075_v37 = vmul.f32 %v3890_v36, %v2070_v34  }
 0x4c7   : >> { %v4922_v40 = vmov %v2075_v37  ;;  %2454 = vst [vmem:[#allocation3] sm:$0xff] (%p1489_p10), %v2075_v37 }
 0x4e1   : >> { %v2270_v5 = vpop.f32.mrb[4].mxu0 }
 0x4e2   : >> { %v2271_v38 = vadd.f32 %v2270_v5, %v4617_v25  ;;  %v2272_v39 = vpop.f32.mrb[5].mxu0 }
 0x4e3   : >> { %v2273_v41 = vadd.f32 %v2272_v39, %v4619_v26  ;;  %v2341_v43 = vpop.f32.mrb[4].mxu1 }
 0x4e4   : >> { %v2346_v42 = vmul.f32 0.5, %v2271_v38  ;;  %v2342_v46 = vadd.f32 %v2341_v43, %v4621_v27  ;;  %v2343_v47 = vpop.f32.mrb[5].mxu1 }
 0x4e5   : >> { %v2350_v44 = vmul.f32 0.5, %v2273_v41  ;;  %v2344_v35 = vadd.f32 %v2343_v47, %v4623_v28 }
 0x4e6   : >> { %3891 = vtanh.f32 %v2346_v42 }
 0x4e7   : >> { %3893 = vtanh.f32 %v2350_v44  ;;  %v2355_v49 = vmul.f32 0.5, %v2344_v35  ;;  %v4919_v35 = vmov %v2073_v31 }
 0x4e8   : >> { %3895 = vtanh.f32 %v2342_v46 }
 0x4e9   : >> { %3897 = vtanh.f32 %v2355_v49 }
 0x4f0   : >> { %v3892_v59 = vpop.eup %3891 }
 0x4f1   : >> { %v3894_v50 = vpop.eup %3893  ;;  %v2348_v8 = vmul.f32 0.5, %v3892_v59  ;;  %v4923_v59 = vmov %v4917_v54 }
 0x4f2   : >> { %v3896_v0 = vpop.eup %3895  ;;  %v2352_v51 = vmul.f32 0.5, %v3894_v50 }
 0x4f3   : >> { %v2349_v3 = vadd.f32 0.5, %v2348_v8  ;;  %v3898_v55 = vpop.eup %3897 }
 0x4f4   : >> { %v2353_v52 = vadd.f32 0.5, %v2352_v51  ;;  %v2357_v56 = vmul.f32 0.5, %v3898_v55 }
 0x4f5   : >> { %v2360_v53 = vmul.f32 %v3896_v0, %v2349_v3 }
 0x4f6   : >> { %v2359_v48 = vmul.f32 %v4229_v58, %v2353_v52  ;;  %v2358_v57 = vadd.f32 0.5, %v2357_v56 }
 0x4f8   : >> { %v2361_v6 = vadd.f32 %v2360_v53, %v2359_v48   ;;  %v4920_v48 = vmov %v4916_v45 }
 0x4fa   : >> { %3899 = vtanh.f32 %v2361_v6  ;;  %v4918_v58 = vmov %v2361_v6  ;;  %2458 = vst [vmem:[#allocation7] sm:$0xff] (%p1489_p10), %v2361_v6 }
 0x504   : >> { %v3900_v7 = vpop.eup %3899 }
 0x505   : >> { %v2363_v60 = vmul.f32 %v3900_v7, %v2358_v57  }
 0x507   : >> { %2787 = vmatmul.mubr.f32.vlgmr.msra.gmra.mrb[6].mxu0 %v2363_v60  ;;  %v4921_v0 = vmov %v2363_v60  ;;  %2455 = vst [vmem:[#allocation4] sm:$0xff] (%p1489_p10), %v2363_v60 }
 0x5d7   : > { %1491 = sbr.rel (!%p1489_p10) target bundleno = 842 (0x34a), region = 149 }
 0x5da   : >> { %v2446_v61 = vpop.f32.mrb[6].mxu0 }
 0x5db   : >> { %v2447_v5 = vadd.f32 %v4590_v2, %v2446_v61   ;;  %v2788_v62 = vpop.f32.mrb[7].mxu0 }
 0x5dd   : >> { %2452 = vst [vmem:[%s2451_s17] sm:$0xff] %v2447_v5 }
 0x5de   : > { %4056 = shalt.err (!%p4053_p2)
}
 0x5df   : > { %s4057_s21 = scalar_lea.hbm %s4817_s26, 512  ;;  %s4061_s29 = scalar_lea.hbm %s4924_s15, 1024 }
 0x5e0   : > { %p4058_p12 = scmp.ne.s32.totalorder %s4817_s26, %s4057_s21  ;;  %p4062_p8 = scmp.lt.u32.totalorder %s4817_s26, %s4924_s15 }
 0x5e1   : > { %p4063_p6 = scmp.lt.u32.totalorder %s4061_s29, %s4057_s21  ;;  %p4065_p3 = scmp.lt.u32.totalorder %s4057_s21, %s4817_s26 }
 0x5e2   : > { %p4059_p1 = pnand %p4058_p12, %p4508_p5 }
 0x5e3   : > { %p4064_p10 = por %p4063_p6, %p4062_p8 }
 0x5e4   : > { %p4060_p11 = pneg %p4059_p1 }
 0x5e5   : > { %p4066_p7 = por %p4065_p3, %p4064_p10 }
 0x5e7   : > { %p4067_p9 = pnand %p4066_p7, %p4060_p11 }
 0x5e9   : > { %4070 = shalt.err (!%p4067_p9)
}
 0x5ea   : > { %s4272_s30 = smov 128   ;;  %s4273_s23 = smov 8  }
 0x5eb   : > { %3623 = dma.vmem_to_hbm [thread:$0]  (%p4508_p5), %s4820_s16, 512, %s4817_s26, %s2461_s18, %s4272_s30, %s4272_s30, %s4273_s23  }
 0x5ec PF: > { %s4925_s28 = sld [smem:[#allocation23_spill]]  ;;  %s4926_s9 = sld [smem:[#allocation24_spill]] }
 0x5ed   : > { %p4928_p4 = scmp.ge.s32.totalorder %s4193_s14, 2 }
 0x5f2   : > { %s2490_s7 = sand.u32 1, %s4925_s28   ;;  %p4927_p0 = scmp.ne.s32.totalorder %s4926_s9, 0 }
 0x5f3   : > { %s2491_s22 = scalar_lea.sflag [#allocation11], %s2490_s7 }
 0x5f4   : > { %p3643_p13 = pnand %p4928_p4, %p4927_p0 }
 0x5f6   : > { %4168 = dma.done.wait (!%p3643_p13), %s2491_s22, 512  }
 0x5f7   : > { %4170 = vsyncadd (!%p3643_p13), %s2491_s22, 4294966784  ;;  %s27_s14 = sadd.s32 1, %s4193_s14   ;;  %s4929_s30 = smov %s4177_s10 }
 0x5f8   : > { %p24_p2 = scmp.ge.s32.totalorder %s27_s14, 4   ;;  %s4930_s10 = smov %s4181_s11 }
 0x5f9   : > { %s4931_s11 = smov %s4517_s25  ;;  %s4932_s12 = smov %s4189_s13 }
 0x5fa   : > { %s4933_s13 = smov %s4935_s5  ;;  %26 = sbr.rel (!%p24_p2) target bundleno = 13 (0xd), region = 160 }
 0x601   :  { %2496 = vsyncpa [#allocation10], 1 }
 0x602   :  { %2498 = vsyncpa [#allocation10 + $0x1], 1 }
 0x603   :  { %2499 = vsyncpa [#allocation13], 1 }
 0x604   :  { %2500 = vsyncpa [#allocation16], 1 }
 0x605   :  { %2501 = vsyncpa [#allocation11], 1 }
 0x606   :  { %2503 = vsyncpa [#allocation11 + $0x1], 1 }

// kernel: tpu_custom_call.1
= control target key start
LH: loop header
LB: loop body
LE: loop exit
PB: predicated region body
PF: predicated region fallthrough
CT: control target
= control target key end

     0   :  { %s4869_s0 = inlined_call_operand.hbm [shape: f32[8,8,128], index: 0, kind: input, shape index: {}]   ;;  %s4870_s1 = inlined_call_operand.hbm [shape: f32[256,512], index: 1, kind: input, shape index: {}]   ;;  %s4871_s2 = inlined_call_operand.hbm [shape: f32[256,512], index: 2, kind: input, shape index: {}]   ;;  %s4872_s3 = inlined_call_operand.hbm [shape: f32[256,512], index: 3, kind: input, shape index: {}]   ;;  %s4873_s4 = inlined_call_operand.hbm [shape: f32[128,128], index: 4, kind: input, shape index: {}]   ;;  %s4874_s5 = inlined_call_operand.vmem [shape: f32[1,512], index: 5, kind: input, shape index: {}]   ;;  %s4875_s6 = inlined_call_operand.vmem [shape: f32[1,512], index: 6, kind: input, shape index: {}]   ;;  %s4876_s7 = inlined_call_operand.vmem [shape: f32[1,512], index: 7, kind: input, shape index: {}]   ;;  %s4877_s8 = inlined_call_operand.vmem [shape: f32[1,128], index: 8, kind: input, shape index: {}]   ;;  %s4878_s9 = inlined_call_operand.hbm [shape: f32[8,8,128], index: 9, kind: output, shape index: {}]  }
   0x1   :  { %4886 = sst [smem:[#allocation25_spill]] %s4874_s5 }
   0x2   :  { %4887 = sst [smem:[#allocation26_spill]] %s4875_s6 }
   0x3   :  { %4888 = sst [smem:[#allocation27_spill]] %s4876_s7 }
   0x4   :  { %4889 = sst [smem:[#allocation28_spill]] %s4878_s9 }
   0x5   :  { %14 = vsyncpa [#allocation10], 0 }
   0x6   :  { %16 = vsyncpa [#allocation10 + $0x1], 0 }
   0x7   :  { %17 = vsyncpa [#allocation13], 0 }
   0x8   :  { %18 = vsyncpa [#allocation16], 0 }
   0x9   :  { %19 = vsyncpa [#allocation11], 0 }
   0xa   :  { %21 = vsyncpa [#allocation11 + $0x1], 0  ;;  %s4324_s30 = smov 0   ;;  %s4326_s10 = smov 0  }
   0xb   :  { %s4328_s11 = smov 0   ;;  %s4330_s12 = smov 0  }
   0xc   :  { %s4332_s13 = smov 0   ;;  %s4334_s14 = smov 0  }
   0xd LB: > { %4890 = sst [smem:[#allocation23_spill]] %s4173_s30  ;;  %s2656_s15 = sadd.s32 4294967295, %s4193_s14   ;;  %s4193_s14 = sphi %s4334_s14, %s27_s14   ;;  %s4189_s13 = sphi %s4332_s13, %s4933_s13   ;;  %s4185_s12 = sphi %s4330_s12, %s4932_s12   ;;  %s4181_s11 = sphi %s4328_s11, %s4931_s11   ;;  %s4177_s10 = sphi %s4326_s10, %s4930_s10   ;;  %s4173_s30 = sphi %s4324_s30, %s4929_s30  }
   0xe   : > { %s2657_s16 = sadd.s32 4294967294, %s4193_s14   ;;  %p61_p0 = scmp.ne.s32.totalorder %s4177_s10, %s4173_s30 }
   0xf   : > { %p4358_p1 = scmp.eq.s32.totalorder %s2656_s15, 0  ;;  %p4362_p2 = scmp.eq.s32.totalorder %s2656_s15, 1 }
  0x10   : > { %p261_p3 = scmp.eq.s32.totalorder %s2657_s16, 1  ;;  %p2658_p5 = scmp.ge.s32.totalorder %s4193_s14, 1 }
  0x11   : > { %s4891_s17 = scalar_select %p4358_p1, 1, 0 }
  0x12   : > { %s4892_s18 = scalar_select %p4362_p2, 1, 0 }
  0x13   : > { %p4368_p4 = por %p4358_p1, %p61_p0  ;;  %p4373_p6 = por %p261_p3, %p61_p0 }
  0x14   : > { %p268_p7 = scmp.lt.s32.totalorder %s4193_s14, 3  ;;  %s4255_s22 = smov [#allocation12]  }
  0x15   : > { %s4893_s19 = scalar_select %p4368_p4, 1, 0 }
  0x16   : > { %s4894_s20 = scalar_select %p4373_p6, 1, 0 }
  0x17   : > { %p4378_p8 = pnand %p2658_p5, %p268_p7  ;;  %s280_s23 = sshll.u32 %s4255_s22, 4  ;;  %s4382_s23 = int_to_ptr.vmem [resolvable:$true] %s280_s23 }
  0x18   : > { %4895 = sst [smem:[#allocation24_spill]] %s4894_s20  ;;  %s4256_s25 = smov [#allocation15]  }
  0x19   : > { %s4896_s21 = scalar_select %p4378_p8, 1, 0 }
  0x1a   : > { %p3625_p9 = pneg %p4378_p8  ;;  %s306_s26 = sshll.u32 %s4256_s25, 4  ;;  %s4393_s26 = int_to_ptr.vmem [resolvable:$true] %s306_s26 }
  0x1b   : > { %s4257_s27 = smov [#allocation14]   ;;  %s3901_s16 = scalar_lea.hbm %s4870_s1, 16384 }
  0x1c   : > { %p4389_p11 = pnand %p3625_p9, %p4358_p1  ;;  %s4395_s28 = sshll.u32 %s4257_s27, 4  ;;  %s294_s28 = int_to_ptr.vmem [resolvable:$true] %s4395_s28 }
  0x1d   : > { %p3902_p12 = scmp.ne.s32.totalorder %s4870_s1, %s3901_s16  ;;  %p3908_p5 = scmp.lt.u32.totalorder %s3901_s16, %s4870_s1 }
  0x1e   : > { %p4405_p13 = pneg %p4389_p11 }
  0x20   : > { %p3904_p0 = pnand %p4405_p13, %p3902_p12 }
  0x22   : > { %p3905_p3 = pneg %p3904_p0 }
  0x24   : > { %p3910_p7 = pnand %p3908_p5, %p3905_p3 }
  0x26   : > { %3913 = shalt.err (!%p3910_p7)
}
  0x27   : > { %s3914_s20 = scalar_lea.vmem %s4382_s23, 16384  ;;  %p3922_p1 = scmp.lt.s32.totalorder %s4382_s23, %s4382_s23 }
  0x28   : > { %p3915_p9 = scmp.ne.s32.totalorder %s4382_s23, %s3914_s20  ;;  %p3923_p4 = scmp.lt.s32.totalorder %s3914_s20, %s3914_s20 }
  0x2a   : > { %p3917_p10 = pnand %p3915_p9, %p4405_p13  ;;  %p3924_p12 = por %p3923_p4, %p3922_p1 }
  0x2c   : > { %p3918_p6 = pneg %p3917_p10 }
  0x2e   : > { %p3925_p0 = pnand %p3924_p12, %p3918_p6 }
  0x30   : > { %3928 = shalt.err (!%p3925_p0)
}
  0x31   : > { %s4258_s29 = smov 512   ;;  %s4259_s15 = smov 32  }
  0x32   : > { %3628 = dma.hbm_to_vmem [thread:$0]  (!%p4389_p11), %s4870_s1, 16384, %s4382_s23, [#allocation13], %s4258_s29, %s4258_s29, %s4259_s15  }
  0x33   : > { %s3929_s20 = scalar_lea.hbm %s4872_s3, 16384 }
  0x34   : > { %p3930_p1 = scmp.ne.s32.totalorder %s4872_s3, %s3929_s20  ;;  %p3936_p10 = scmp.lt.u32.totalorder %s3929_s20, %s4872_s3 }
  0x36   : > { %p3932_p4 = pnand %p3930_p1, %p4405_p13 }
  0x38   : > { %p3933_p6 = pneg %p3932_p4 }
  0x3a   : > { %p3938_p3 = pnand %p3936_p10, %p3933_p6 }
  0x3c   : > { %3941 = shalt.err (!%p3938_p3)
}
  0x3d   : > { %s3942_s23 = scalar_lea.vmem %s4393_s26, 16384  ;;  %p3950_p12 = scmp.lt.s32.totalorder %s4393_s26, %s4393_s26 }
  0x3e   : > { %p3943_p5 = scmp.ne.s32.totalorder %s4393_s26, %s3942_s23  ;;  %p3951_p0 = scmp.lt.s32.totalorder %s3942_s23, %s3942_s23 }
  0x40   : > { %p3945_p7 = pnand %p3943_p5, %p4405_p13  ;;  %p3952_p1 = por %p3951_p0, %p3950_p12 }
  0x42   : > { %p3946_p9 = pneg %p3945_p7 }
  0x44   : > { %p3953_p4 = pnand %p3952_p1, %p3946_p9 }
  0x46   : > { %3956 = shalt.err (!%p3953_p4)
}
  0x47   : > { %3634 = dma.hbm_to_vmem [thread:$0]  (!%p4389_p11), %s4872_s3, 16384, %s4393_s26, [#allocation16], %s4258_s29, %s4258_s29, %s4259_s15  }
  0x48   : > { %s3957_s16 = scalar_lea.hbm %s4871_s2, 16384 }
  0x49   : > { %p3958_p6 = scmp.ne.s32.totalorder %s4871_s2, %s3957_s16  ;;  %p3964_p5 = scmp.lt.u32.totalorder %s3957_s16, %s4871_s2 }
  0x4b   : > { %p3960_p10 = pnand %p3958_p6, %p4405_p13 }
  0x4d   : > { %p3961_p3 = pneg %p3960_p10 }
  0x4f   : > { %p3966_p7 = pnand %p3964_p5, %p3961_p3 }
  0x51   : > { %3969 = shalt.err (!%p3966_p7)
}
  0x52   : > { %s3970_s23 = scalar_lea.vmem %s294_s28, 16384  ;;  %p3978_p1 = scmp.lt.s32.totalorder %s294_s28, %s294_s28 }
  0x53   : > { %p3971_p9 = scmp.ne.s32.totalorder %s294_s28, %s3970_s23  ;;  %p3979_p4 = scmp.lt.s32.totalorder %s3970_s23, %s3970_s23 }
  0x55   : > { %p3973_p12 = pnand %p3971_p9, %p4405_p13  ;;  %p3980_p8 = por %p3979_p4, %p3978_p1 }
  0x57   : > { %p3974_p0 = pneg %p3973_p12 }
  0x59   : > { %p3981_p2 = pnand %p3980_p8, %p3974_p0 }
  0x5b   : > { %3984 = shalt.err (!%p3981_p2)
}
  0x5c   : > { %3631 = dma.hbm_to_vmem [thread:$0]  (!%p4389_p11), %s4871_s2, 16384, %s294_s28, [#allocation13], %s4258_s29, %s4258_s29, %s4259_s15  }
  0x5d   : > { %s4260_s6 = smov [#allocation17]   ;;  %s3985_s22 = scalar_lea.hbm %s4873_s4, 2048 }
  0x5e   : > { %s319_s7 = sshll.u32 %s4260_s6, 4  ;;  %p3986_p2 = scmp.ne.s32.totalorder %s4873_s4, %s3985_s22  ;;  %s320_s7 = int_to_ptr.vmem [resolvable:$true] %s319_s7 }
  0x5f   : > { %p3992_p10 = scmp.lt.u32.totalorder %s3985_s22, %s4873_s4 }
  0x60   : > { %p3988_p8 = pnand %p3986_p2, %p4405_p13 }
  0x62   : > { %p3989_p6 = pneg %p3988_p8 }
  0x64   : > { %p3994_p3 = pnand %p3992_p10, %p3989_p6 }
  0x66   : > { %3997 = shalt.err (!%p3994_p3)
}
  0x67   : > { %s3998_s28 = scalar_lea.vmem %s320_s7, 2048  ;;  %p4006_p12 = scmp.lt.s32.totalorder %s320_s7, %s320_s7 }
  0x68   : > { %p3999_p5 = scmp.ne.s32.totalorder %s320_s7, %s3998_s28  ;;  %p4007_p0 = scmp.lt.s32.totalorder %s3998_s28, %s3998_s28 }
  0x6a   : > { %p4001_p7 = pnand %p3999_p5, %p4405_p13  ;;  %p4008_p1 = por %p4007_p0, %p4006_p12 }
  0x6c   : > { %p4002_p9 = pneg %p4001_p7 }
  0x6e   : > { %p4009_p4 = pnand %p4008_p1, %p4002_p9 }
  0x70   : > { %4012 = shalt.err (!%p4009_p4)
}
  0x71   : > { %s4261_s29 = smov 128   ;;  %s4262_s30 = smov 8  }
  0x72   : > { %3637 = dma.hbm_to_vmem [thread:$0]  (!%p4389_p11), %s4873_s4, 2048, %s320_s7, [#allocation16], %s4261_s29, %s4261_s29, %s4262_s30  }
  0x73   : > { %s36_s5 = sadd.s32 1, %s4189_s13  ;;  %s48_s6 = sadd.s32 1, %s4181_s11 }
  0x74   : > { %p37_p13 = scmp.ge.s32.totalorder %s36_s5, 2  ;;  %p55_p2 = scmp.ne.s32.totalorder %s4181_s11, %s4177_s10 }
  0x75   : > { %p56_p8 = scmp.eq.s32.totalorder %s4193_s14, 0  ;;  %p3650_p6 = scmp.lt.s32.totalorder %s4193_s14, 2 }
  0x76   : > { %s4935_s5 = smov (%p37_p13, %s36_s5), 0  ;;  %p4899_p3 = scmp.ne.s32.totalorder %s4892_s18, 0 }
  0x77   : > { %p57_p10 = por %p56_p8, %p55_p2  ;;  %s43_s9 = ssub.s32 %s4189_s13, %s4935_s5 }
  0x78   : > { %p4508_p5 = por %p4899_p3, %p55_p2  ;;  %s345_s16 = sand.u32 1, %s4181_s11  }
  0x79   : > { %p46_p7 = scmp.eq.s32.totalorder %s43_s9, 0  ;;  %s2664_s7 = sshll.u32 %s345_s16, 5 }
  0x7a   : > { %s2683_s22 = sshll.u32 %s4189_s13, 9  ;;  %s349_s18 = scalar_lea.vmem [#allocation9], %s2664_s7 }
  0x7b   : > { %s4517_s25 = scalar_select %p46_p7, %s4181_s11, %s48_s6  }
  0x7c   : > { %s4522_s23 = scalar_lea.hbm %s4869_s0, %s2683_s22  ;;  %s357_s28 = sshll.u32 %s349_s18, 4  ;;  %s4530_s28 = int_to_ptr.vmem [resolvable:$true] %s357_s28 }
  0x7d   : > { %p4526_p11 = pnand %p3650_p6, %p57_p10  ;;  %s4532_s26 = scalar_lea.sflag [#allocation10], %s345_s16 }
  0x7e   : > { %s4013_s6 = scalar_lea.hbm %s4522_s23, 512  ;;  %s4018_s22 = scalar_lea.hbm %s4869_s0, 1024 }
  0x7f   : > { %p4014_p9 = scmp.ne.s32.totalorder %s4522_s23, %s4013_s6  ;;  %p4015_p12 = pneg %p4526_p11 }
  0x80   : > { %p4019_p4 = scmp.lt.u32.totalorder %s4522_s23, %s4869_s0  ;;  %p4020_p13 = scmp.lt.u32.totalorder %s4018_s22, %s4013_s6 }
  0x81   : > { %p4016_p0 = pnand %p4015_p12, %p4014_p9  ;;  %p4022_p8 = scmp.lt.u32.totalorder %s4013_s6, %s4522_s23 }
  0x82   : > { %p4021_p2 = por %p4020_p13, %p4019_p4 }
  0x83   : > { %p4017_p1 = pneg %p4016_p0 }
  0x84   : > { %p4023_p6 = por %p4022_p8, %p4021_p2 }
  0x86   : > { %p4024_p10 = pnand %p4023_p6, %p4017_p1 }
  0x88   : > { %4027 = shalt.err (!%p4024_p10)
}
  0x89   : > { %s4028_s16 = scalar_lea.vmem %s4530_s28, 512  ;;  %s4263_s18 = smov [#allocation9]  }
  0x8a   : > { %p4029_p3 = scmp.ne.s32.totalorder %s4530_s28, %s4028_s16  ;;  %s4033_s9 = sshll.u32 %s4263_s18, 4  ;;  %s4034_s9 = int_to_ptr.vmem [resolvable:$false] %s4033_s9 }
  0x8b   : > { %s4035_s7 = scalar_lea.vmem %s4034_s9, 1024  ;;  %p4036_p0 = scmp.lt.s32.totalorder %s4530_s28, %s4034_s9 }
  0x8c   : > { %p4031_p7 = pnand %p4029_p3, %p4015_p12  ;;  %p4037_p4 = scmp.lt.s32.totalorder %s4035_s7, %s4028_s16 }
  0x8e   : > { %p4032_p9 = pneg %p4031_p7  ;;  %p4038_p13 = por %p4037_p4, %p4036_p0 }
  0x90   : > { %p4039_p2 = pnand %p4038_p13, %p4032_p9 }
  0x92   : > { %4042 = shalt.err (!%p4039_p2)
}
  0x93   : > { %3641 = dma.hbm_to_vmem [thread:$0]  (!%p4526_p11), %s4522_s23, 512, %s4530_s28, %s4532_s26, %s4261_s29, %s4261_s29, %s4262_s30  }
  0x94   : > { %p4902_p12 = scmp.ne.s32.totalorder %s4896_s21, 0 }
  0x95   : > { %s4566_s6 = sand.u32 (!%p4902_p12), 1, %s4177_s10   ;;  %p4903_p1 = scmp.ne.s32.totalorder (!%p4902_p12), %s4893_s19, 0 }
  0x96   : > { %369 = sbr.rel (%p4902_p12) target bundleno = 1516 (0x5ec), region = 56  ;;  %s2668_s22 = sshll.u32 (!%p4902_p12), %s4566_s6, 5 }
  0x97   : > { %s372_s27 = scalar_lea.sflag (!%p4902_p12), [#allocation10], %s4566_s6  ;;  %s4570_s20 = scalar_lea.vmem (!%p4902_p12), [#allocation9], %s2668_s22 }
  0x9d   : > { %4156 = dma.done.wait (%p4903_p1), %s372_s27, 512  }
  0x9e   : > { %4158 = vsyncadd (%p4903_p1), %s372_s27, 4294966784  ;;  %p4904_p11 = scmp.ne.s32.totalorder %s4891_s17, 0 }
  0xa0   : > { %4160 = dma.done.wait (%p4904_p11), [#allocation13], 32768  }
  0xa1   : > { %4162 = vsyncadd (%p4904_p11), [#allocation13], 4294934528 }
  0xa2   : > { %4164 = dma.done.wait (%p4904_p11), [#allocation16], 18432  }
  0xa3   : > { %4166 = vsyncadd (%p4904_p11), [#allocation16], 4294948864  ;;  %s4584_s21 = scalar_lea.vmem [#allocation18], %s2668_s22  ;;  %p2674_p8 = scmp.ne.s32.totalorder %s4185_s12, 0 }
  0xa4   : > { %v4264_v0 = vmov (!%p2674_p8), 0.0  }
  0xa5   : > { %431 = sbr.rel (%p2674_p8) target bundleno = 172 (0xac), region = 80  ;;  %432 = vst [vmem:[#allocation2] sm:$0xff] (!%p2674_p8), %v4264_v0  ;;  %433 = vst [vmem:[#allocation3] sm:$0xff] (!%p2674_p8), %v4264_v0 }
  0xa6   : > { %434 = vst [vmem:[#allocation4] sm:$0xff] (!%p2674_p8), %v4264_v0  ;;  %435 = vst [vmem:[#allocation5] sm:$0xff] (!%p2674_p8), %v4264_v0 }
  0xa7   : > { %436 = vst [vmem:[#allocation6] sm:$0xff] (!%p2674_p8), %v4264_v0  ;;  %437 = vst [vmem:[#allocation7] sm:$0xff] (!%p2674_p8), %v4264_v0 }
  0xac PF: > { %v441_v1 = vlaneseq  ;;  %v4590_v2 = vld [vmem:[%s4877_s8] ss:$0 sm:$0xff]  ;;  %v513_v4 = vld [vmem:[#allocation3] sm:$0xff]   ;;  %s4905_s23 = sld [smem:[#allocation25_spill]]  ;;  %s4906_s26 = sld [smem:[#allocation26_spill]] }
  0xad   : > { %v512_v3 = vld [vmem:[#allocation2] sm:$0xff]   ;;  %v514_v6 = vld [vmem:[#allocation4] sm:$0xff]   ;;  %v515_v7 = vld [vmem:[#allocation5] sm:$0xff]   ;;  %s4907_s9 = sld [smem:[#allocation27_spill]]  ;;  %s4637_s7 = smov 0  }
  0xae   : > { %v442_v5 = vshrl.u32 %v441_v1, 7  ;;  %v516_v8 = vld [vmem:[#allocation6] sm:$0xff]   ;;  %v517_v10 = vld [vmem:[#allocation7] sm:$0xff]  }
  0xb0   : > { %v443_v11 = vsub.s32 0, %v442_v5  ;;  %v447_v12 = vsub.s32 1, %v442_v5  ;;  %v451_v13 = vsub.s32 2, %v442_v5  ;;  %v455_v14 = vsub.s32 3, %v442_v5 }
  0xb2   : > { %v439_v9 = vld [vmem:[%s4905_s23] sm:$0xf] }
  0xb3   : > { %v461_v15 = vld [vmem:[%s4906_s26] sm:$0xf]  ;;  %v4601_v17 = vrot.slane %v439_v9, %v443_v11  ;;  %v4603_v18 = vrot.slane %v439_v9, %v447_v12  ;;  %v4605_v19 = vrot.slane %v439_v9, %v451_v13  ;;  %v4607_v20 = vrot.slane %v439_v9, %v455_v14 }
  0xb4   : > { %v483_v16 = vld [vmem:[%s4907_s9] sm:$0xf]  ;;  %v4609_v21 = vrot.slane %v461_v15, %v443_v11  ;;  %v4611_v22 = vrot.slane %v461_v15, %v447_v12  ;;  %v4613_v23 = vrot.slane %v461_v15, %v451_v13  ;;  %v4615_v24 = vrot.slane %v461_v15, %v455_v14 }
  0xb5   : > { %v4617_v25 = vrot.slane %v483_v16, %v443_v11  ;;  %v4619_v26 = vrot.slane %v483_v16, %v447_v12  ;;  %v4621_v27 = vrot.slane %v483_v16, %v451_v13  ;;  %v4623_v28 = vrot.slane %v483_v16, %v455_v14 }
  0xb6 LB: >> { %v536_v29 = vld [vmem:[#allocation12 + $0x8] sm:$0xff]  ;;  %v535_v31 = vld [vmem:[#allocation12] sm:$0xff]  ;;  %v538_v40 = vld [vmem:[#allocation12 + $0x18] sm:$0xff]  ;;  %727 = vmatprep.mubr.f32.mxu0 %v4217_v3  ;;  %798 = vmatprep.mubr.f32.mxu1 %v4217_v3  ;;  %s2676_s22 = sshll.u32 %s4221_s7, 3  ;;  %vm4266_vm0 = vmmov 0   ;;  %s524_s7 = sadd.s32 1, %s4221_s7   ;;  %s4221_s7 = sphi %s4637_s7, %s524_s7   ;;  %v4217_v3 = vphi %v512_v3, %v4915_v3   ;;  %v4213_v4 = vphi %v513_v4, %v4914_v4   ;;  %v4209_v6 = vphi %v514_v6, %v4913_v6   ;;  %v4205_v7 = vphi %v515_v7, %v4912_v7   ;;  %v4201_v8 = vphi %v516_v8, %v4911_v8   ;;  %v4197_v10 = vphi %v517_v10, %v4910_v10  }
  0xb7   : >> { %v540_v30 = vld [vmem:[#allocation12 + $0x28] sm:$0xff]  ;;  %v539_v33 = vld [vmem:[#allocation12 + $0x20] sm:$0xff]  ;;  %v542_v41 = vld [vmem:[#allocation12 + $0x38] sm:$0xff]  ;;  %s533_s27 = scalar_lea.vmem %s4570_s20, %s2676_s22 [#allocation9]  ;;  %s1485_s19 = scalar_lea.vmem %s4584_s21, %s2676_s22 [#allocation18] }
  0xb8   : >> { %v2789_v32 = vpack.c.bf16 %v540_v30, %v536_v29  ;;  %v544_v34 = vld [vmem:[#allocation12 + $0x48] sm:$0xff]  ;;  %v2791_v36 = vpack.c.bf16 %v539_v33, %v535_v31  ;;  %v543_v38 = vld [vmem:[#allocation12 + $0x40] sm:$0xff]  ;;  %v537_v42 = vld [vmem:[#allocation12 + $0x10] sm:$0xff]  ;;  %v2853_v45 = vpack.c.bf16 %v542_v41, %v538_v40  ;;  %p521_p6 = scmp.ge.s32.totalorder %s524_s7, 2  }
  0xb9   : >> { %v548_v35 = vld [vmem:[#allocation12 + $0x68] sm:$0xff]  ;;  %v547_v39 = vld [vmem:[#allocation12 + $0x60] sm:$0xff]  ;;  %v541_v43 = vld [vmem:[#allocation12 + $0x30] sm:$0xff]  ;;  %s4731_s29 = smov (%p521_p6), 2  }
  0xba   : >> { %v2793_v37 = vpack.c.bf16 %v548_v35, %v544_v34  ;;  %2790 = vmatprep.subr.bf16.mxu0 %v2789_v32  ;;  %v2795_v44 = vpack.c.bf16 %v547_v39, %v543_v38  ;;  %v2855_v46 = vpack.c.bf16 %v541_v43, %v537_v42  ;;  %v552_v47 = vld [vmem:[#allocation12 + $0x88] sm:$0xff]  ;;  %v551_v49 = vld [vmem:[#allocation12 + $0x80] sm:$0xff]  ;;  %v546_v52 = vld [vmem:[#allocation12 + $0x58] sm:$0xff]  ;;  %2854 = vmatprep.subr.bf16.mxu1 %v2853_v45 }
  0xbb   : >> { %2792 = vmatpush1.bf16.msra.mxu0 %v2791_v36  ;;  %v556_v48 = vld [vmem:[#allocation12 + $0xa8] sm:$0xff]  ;;  %v555_v51 = vld [vmem:[#allocation12 + $0xa0] sm:$0xff]  ;;  %v550_v53 = vld [vmem:[#allocation12 + $0x78] sm:$0xff] }
  0xbc   : >> { %2794 = vmatprep.subr.bf16.mxu0 %v2793_v37  ;;  %v2797_v50 = vpack.c.bf16 %v556_v48, %v552_v47  ;;  %v2857_v54 = vpack.c.bf16 %v550_v53, %v546_v52  ;;  %v545_v55 = vld [vmem:[#allocation12 + $0x50] sm:$0xff]  ;;  %v560_v57 = vld [vmem:[#allocation12 + $0xc8] sm:$0xff]  ;;  %2856 = vmatpush1.bf16.msra.mxu1 %v2855_v46  ;;  %v2799_v60 = vpack.c.bf16 %v555_v51, %v551_v49  ;;  %v554_v61 = vld [vmem:[#allocation12 + $0x98] sm:$0xff] }
  0xbd   : >> { %v549_v56 = vld [vmem:[#allocation12 + $0x70] sm:$0xff]  ;;  %v564_v59 = vld [vmem:[#allocation12 + $0xe8] sm:$0xff]  ;;  %v558_v62 = vld [vmem:[#allocation12 + $0xb8] sm:$0xff] }
  0xbe   : >> { %v2859_v58 = vpack.c.bf16 %v549_v56, %v545_v55  ;;  %2858 = vmatprep.subr.bf16.mxu1 %v2857_v54  ;;  %v553_v63 = vld [vmem:[#allocation12 + $0x90] sm:$0xff]  ;;  %v2801_v0 = vpack.c.bf16 %v564_v59, %v560_v57  ;;  %v559_v1 = vld [vmem:[#allocation12 + $0xc0] sm:$0xff]  ;;  %v2861_v9 = vpack.c.bf16 %v558_v62, %v554_v61  ;;  %v568_v12 = vld [vmem:[#allocation12 + $0x108] sm:$0xff] }
  0xbf   : >> { %2796 = vmatpush1.bf16.msra.mxu0 %v2795_v44  ;;  %v563_v5 = vld [vmem:[#allocation12 + $0xe0] sm:$0xff]  ;;  %v557_v11 = vld [vmem:[#allocation12 + $0xb0] sm:$0xff]  ;;  %v572_v13 = vld [vmem:[#allocation12 + $0x128] sm:$0xff] }
  0xc0   : >> { %2798 = vmatprep.subr.bf16.mxu0 %v2797_v50  ;;  %v562_v14 = vld [vmem:[#allocation12 + $0xd8] sm:$0xff]  ;;  %2860 = vmatpush1.bf16.msra.mxu1 %v2859_v58  ;;  %v2863_v15 = vpack.c.bf16 %v557_v11, %v553_v63  ;;  %v2803_v29 = vpack.c.bf16 %v563_v5, %v559_v1  ;;  %v567_v30 = vld [vmem:[#allocation12 + $0x100] sm:$0xff]  ;;  %v561_v32 = vld [vmem:[#allocation12 + $0xd0] sm:$0xff]  ;;  %v2805_v34 = vpack.c.bf16 %v572_v13, %v568_v12 }
  0xc1   : >> { %v566_v16 = vld [vmem:[#allocation12 + $0xf8] sm:$0xff]  ;;  %2862 = vmatprep.subr.bf16.mxu1 %v2861_v9  ;;  %v565_v33 = vld [vmem:[#allocation12 + $0xf0] sm:$0xff]  ;;  %v571_v35 = vld [vmem:[#allocation12 + $0x120] sm:$0xff] }
  0xc2   : >> { %v2865_v31 = vpack.c.bf16 %v566_v16, %v562_v14  ;;  %v570_v36 = vld [vmem:[#allocation12 + $0x118] sm:$0xff]  ;;  %v576_v38 = vld [vmem:[#allocation12 + $0x148] sm:$0xff]  ;;  %v2867_v40 = vpack.c.bf16 %v565_v33, %v561_v32  ;;  %v2807_v41 = vpack.c.bf16 %v571_v35, %v567_v30  ;;  %v575_v42 = vld [vmem:[#allocation12 + $0x140] sm:$0xff] }
  0xc3   : >> { %2800 = vmatpush1.bf16.msra.mxu0 %v2799_v60  ;;  %v574_v37 = vld [vmem:[#allocation12 + $0x138] sm:$0xff]  ;;  %v580_v39 = vld [vmem:[#allocation12 + $0x168] sm:$0xff]  ;;  %v569_v44 = vld [vmem:[#allocation12 + $0x110] sm:$0xff] }
  0xc4   : >> { %2802 = vmatprep.subr.bf16.mxu0 %v2801_v0  ;;  %2864 = vmatpush1.bf16.msra.mxu1 %v2863_v15  ;;  %v2869_v43 = vpack.c.bf16 %v574_v37, %v570_v36  ;;  %v573_v45 = vld [vmem:[#allocation12 + $0x130] sm:$0xff]  ;;  %v2809_v46 = vpack.c.bf16 %v580_v39, %v576_v38  ;;  %v579_v47 = vld [vmem:[#allocation12 + $0x160] sm:$0xff]  ;;  %v578_v48 = vld [vmem:[#allocation12 + $0x158] sm:$0xff] }
  0xc5   : >> { %2866 = vmatprep.subr.bf16.mxu1 %v2865_v31  ;;  %v582_v49 = vld [vmem:[#allocation12 + $0x178] sm:$0xff]  ;;  %v584_v50 = vld [vmem:[#allocation12 + $0x188] sm:$0xff]  ;;  %v2871_v52 = vpack.c.bf16 %v573_v45, %v569_v44  ;;  %v2811_v53 = vpack.c.bf16 %v579_v47, %v575_v42  ;;  %v583_v54 = vld [vmem:[#allocation12 + $0x180] sm:$0xff] }
  0xc6   : >> { %v588_v51 = vld [vmem:[#allocation12 + $0x1a8] sm:$0xff]  ;;  %v2873_v55 = vpack.c.bf16 %v582_v49, %v578_v48  ;;  %v577_v56 = vld [vmem:[#allocation12 + $0x150] sm:$0xff]  ;;  %v587_v59 = vld [vmem:[#allocation12 + $0x1a0] sm:$0xff] }
  0xc7   : >> { %2804 = vmatpush1.bf16.msra.mxu0 %v2803_v29  ;;  %v581_v57 = vld [vmem:[#allocation12 + $0x170] sm:$0xff]  ;;  %v2813_v58 = vpack.c.bf16 %v588_v51, %v584_v50  ;;  %v586_v60 = vld [vmem:[#allocation12 + $0x198] sm:$0xff]  ;;  %v592_v62 = vld [vmem:[#allocation12 + $0x1c8] sm:$0xff]  ;;  %v2815_v1 = vpack.c.bf16 %v587_v59, %v583_v54 }
  0xc8   : >> { %2806 = vmatprep.subr.bf16.mxu0 %v2805_v34  ;;  %2868 = vmatpush1.bf16.msra.mxu1 %v2867_v40  ;;  %v590_v61 = vld [vmem:[#allocation12 + $0x1b8] sm:$0xff]  ;;  %v596_v63 = vld [vmem:[#allocation12 + $0x1e8] sm:$0xff]  ;;  %v2875_v0 = vpack.c.bf16 %v581_v57, %v577_v56  ;;  %v591_v5 = vld [vmem:[#allocation12 + $0x1c0] sm:$0xff] }
  0xc9   : >> { %2870 = vmatprep.subr.bf16.mxu1 %v2869_v43  ;;  %v2877_v9 = vpack.c.bf16 %v590_v61, %v586_v60  ;;  %v585_v11 = vld [vmem:[#allocation12 + $0x190] sm:$0xff]  ;;  %v2817_v13 = vpack.c.bf16 %v596_v63, %v592_v62  ;;  %v595_v14 = vld [vmem:[#allocation12 + $0x1e0] sm:$0xff]  ;;  %v594_v15 = vld [vmem:[#allocation12 + $0x1d8] sm:$0xff] }
  0xca   : >> { %v589_v12 = vld [vmem:[#allocation12 + $0x1b0] sm:$0xff]  ;;  %v598_v16 = vld [vmem:[#allocation12 + $0x1f8] sm:$0xff]  ;;  %v600_v29 = vld [vmem:[#allocation12 + $0x208] sm:$0xff]  ;;  %v2819_v32 = vpack.c.bf16 %v595_v14, %v591_v5 }
  0xcb   : >> { %2808 = vmatpush1.bf16.msra.mxu0 %v2807_v41  ;;  %v604_v30 = vld [vmem:[#allocation12 + $0x228] sm:$0xff]  ;;  %v2879_v31 = vpack.c.bf16 %v589_v12, %v585_v11  ;;  %v599_v33 = vld [vmem:[#allocation12 + $0x200] sm:$0xff]  ;;  %v2881_v34 = vpack.c.bf16 %v598_v16, %v594_v15  ;;  %v593_v35 = vld [vmem:[#allocation12 + $0x1d0] sm:$0xff] }
  0xcc   : >> { %2810 = vmatprep.subr.bf16.mxu0 %v2809_v46  ;;  %2872 = vmatpush1.bf16.msra.mxu1 %v2871_v52  ;;  %v597_v36 = vld [vmem:[#allocation12 + $0x1f0] sm:$0xff]  ;;  %v2821_v37 = vpack.c.bf16 %v604_v30, %v600_v29  ;;  %v603_v38 = vld [vmem:[#allocation12 + $0x220] sm:$0xff]  ;;  %v602_v39 = vld [vmem:[#allocation12 + $0x218] sm:$0xff] }
  0xcd   : >> { %2874 = vmatprep.subr.bf16.mxu1 %v2873_v55  ;;  %v606_v40 = vld [vmem:[#allocation12 + $0x238] sm:$0xff]  ;;  %v608_v41 = vld [vmem:[#allocation12 + $0x248] sm:$0xff]  ;;  %v2883_v43 = vpack.c.bf16 %v597_v36, %v593_v35  ;;  %v2823_v44 = vpack.c.bf16 %v603_v38, %v599_v33  ;;  %v607_v45 = vld [vmem:[#allocation12 + $0x240] sm:$0xff] }
  0xce   : >> { %v612_v42 = vld [vmem:[#allocation12 + $0x268] sm:$0xff]  ;;  %v2885_v46 = vpack.c.bf16 %v606_v40, %v602_v39  ;;  %v601_v47 = vld [vmem:[#allocation12 + $0x210] sm:$0xff]  ;;  %v611_v50 = vld [vmem:[#allocation12 + $0x260] sm:$0xff] }
  0xcf   : >> { %2812 = vmatpush1.bf16.msra.mxu0 %v2811_v53  ;;  %v605_v48 = vld [vmem:[#allocation12 + $0x230] sm:$0xff]  ;;  %v2825_v49 = vpack.c.bf16 %v612_v42, %v608_v41  ;;  %v610_v51 = vld [vmem:[#allocation12 + $0x258] sm:$0xff]  ;;  %v616_v53 = vld [vmem:[#allocation12 + $0x288] sm:$0xff]  ;;  %v2827_v56 = vpack.c.bf16 %v611_v50, %v607_v45 }
  0xd0   : >> { %2814 = vmatprep.subr.bf16.mxu0 %v2813_v58  ;;  %2876 = vmatpush1.bf16.msra.mxu1 %v2875_v0  ;;  %v614_v52 = vld [vmem:[#allocation12 + $0x278] sm:$0xff]  ;;  %v620_v54 = vld [vmem:[#allocation12 + $0x2a8] sm:$0xff]  ;;  %v2887_v55 = vpack.c.bf16 %v605_v48, %v601_v47  ;;  %v615_v57 = vld [vmem:[#allocation12 + $0x280] sm:$0xff] }
  0xd1   : >> { %2878 = vmatprep.subr.bf16.mxu1 %v2877_v9  ;;  %v2889_v58 = vpack.c.bf16 %v614_v52, %v610_v51  ;;  %v609_v59 = vld [vmem:[#allocation12 + $0x250] sm:$0xff]  ;;  %v2829_v61 = vpack.c.bf16 %v620_v54, %v616_v53  ;;  %v619_v62 = vld [vmem:[#allocation12 + $0x2a0] sm:$0xff]  ;;  %v618_v63 = vld [vmem:[#allocation12 + $0x298] sm:$0xff] }
  0xd2   : >> { %v613_v60 = vld [vmem:[#allocation12 + $0x270] sm:$0xff]  ;;  %v622_v0 = vld [vmem:[#allocation12 + $0x2b8] sm:$0xff]  ;;  %v628_v5 = vld [vmem:[#allocation12 + $0x2e8] sm:$0xff]  ;;  %v2831_v11 = vpack.c.bf16 %v619_v62, %v615_v57 }
  0xd3   : >> { %2816 = vmatpush1.bf16.msra.mxu0 %v2815_v1  ;;  %v624_v1 = vld [vmem:[#allocation12 + $0x2c8] sm:$0xff]  ;;  %v2891_v9 = vpack.c.bf16 %v613_v60, %v609_v59  ;;  %v623_v12 = vld [vmem:[#allocation12 + $0x2c0] sm:$0xff]  ;;  %v617_v14 = vld [vmem:[#allocation12 + $0x290] sm:$0xff] }
  0xd4   : >> { %2818 = vmatprep.subr.bf16.mxu0 %v2817_v13  ;;  %2880 = vmatpush1.bf16.msra.mxu1 %v2879_v31  ;;  %v2893_v13 = vpack.c.bf16 %v622_v0, %v618_v63  ;;  %v621_v15 = vld [vmem:[#allocation12 + $0x2b0] sm:$0xff]  ;;  %v2833_v16 = vpack.c.bf16 %v628_v5, %v624_v1  ;;  %v627_v29 = vld [vmem:[#allocation12 + $0x2e0] sm:$0xff]  ;;  %v626_v30 = vld [vmem:[#allocation12 + $0x2d8] sm:$0xff] }
  0xd5   : >> { %2882 = vmatprep.subr.bf16.mxu1 %v2881_v34  ;;  %v630_v31 = vld [vmem:[#allocation12 + $0x2f8] sm:$0xff]  ;;  %v636_v33 = vld [vmem:[#allocation12 + $0x328] sm:$0xff]  ;;  %v2895_v34 = vpack.c.bf16 %v621_v15, %v617_v14  ;;  %v2835_v35 = vpack.c.bf16 %v627_v29, %v623_v12  ;;  %v631_v36 = vld [vmem:[#allocation12 + $0x300] sm:$0xff] }
  0xd6   : >> { %v625_v38 = vld [vmem:[#allocation12 + $0x2d0] sm:$0xff]  ;;  %v635_v41 = vld [vmem:[#allocation12 + $0x320] sm:$0xff]  ;;  %v634_v42 = vld [vmem:[#allocation12 + $0x318] sm:$0xff] }
  0xd7   : >> { %2820 = vmatpush1.bf16.msra.mxu0 %v2819_v32  ;;  %v632_v32 = vld [vmem:[#allocation12 + $0x308] sm:$0xff]  ;;  %v629_v39 = vld [vmem:[#allocation12 + $0x2f0] sm:$0xff]  ;;  %v2839_v47 = vpack.c.bf16 %v635_v41, %v631_v36  ;;  %v639_v48 = vld [vmem:[#allocation12 + $0x340] sm:$0xff] }
  0xd8   : >> { %2822 = vmatprep.subr.bf16.mxu0 %v2821_v37  ;;  %2884 = vmatpush1.bf16.msra.mxu1 %v2883_v43  ;;  %v2897_v37 = vpack.c.bf16 %v630_v31, %v626_v30  ;;  %v2837_v40 = vpack.c.bf16 %v636_v33, %v632_v32  ;;  %v638_v43 = vld [vmem:[#allocation12 + $0x338] sm:$0xff]  ;;  %v644_v45 = vld [vmem:[#allocation12 + $0x368] sm:$0xff]  ;;  %v633_v50 = vld [vmem:[#allocation12 + $0x310] sm:$0xff] }
  0xd9   : >> { %2886 = vmatprep.subr.bf16.mxu1 %v2885_v46  ;;  %v2899_v46 = vpack.c.bf16 %v629_v39, %v625_v38  ;;  %v637_v51 = vld [vmem:[#allocation12 + $0x330] sm:$0xff]  ;;  %v643_v53 = vld [vmem:[#allocation12 + $0x360] sm:$0xff]  ;;  %v642_v54 = vld [vmem:[#allocation12 + $0x358] sm:$0xff] }
  0xda   : >> { %v652_v57 = vld [vmem:[#allocation12 + $0x3a8] sm:$0xff]  ;;  %v2843_v59 = vpack.c.bf16 %v643_v53, %v639_v48  ;;  %v647_v60 = vld [vmem:[#allocation12 + $0x380] sm:$0xff]  ;;  %v641_v62 = vld [vmem:[#allocation12 + $0x350] sm:$0xff] }
  0xdb   : >> { %2824 = vmatpush1.bf16.msra.mxu0 %v2823_v44  ;;  %v640_v44 = vld [vmem:[#allocation12 + $0x348] sm:$0xff]  ;;  %v645_v63 = vld [vmem:[#allocation12 + $0x370] sm:$0xff]  ;;  %v651_v1 = vld [vmem:[#allocation12 + $0x3a0] sm:$0xff] }
  0xdc   : >> { %2826 = vmatprep.subr.bf16.mxu0 %v2825_v49  ;;  %2888 = vmatpush1.bf16.msra.mxu1 %v2887_v55  ;;  %v2901_v49 = vpack.c.bf16 %v638_v43, %v634_v42  ;;  %v2841_v52 = vpack.c.bf16 %v644_v45, %v640_v44  ;;  %v646_v55 = vld [vmem:[#allocation12 + $0x378] sm:$0xff]  ;;  %v660_v12 = vld [vmem:[#allocation12 + $0x3e8] sm:$0xff]  ;;  %v2847_v14 = vpack.c.bf16 %v651_v1, %v647_v60  ;;  %v655_v15 = vld [vmem:[#allocation12 + $0x3c0] sm:$0xff] }
  0xdd   : >> { %2890 = vmatprep.subr.bf16.mxu1 %v2889_v58  ;;  %v2903_v58 = vpack.c.bf16 %v637_v51, %v633_v50  ;;  %v650_v5 = vld [vmem:[#allocation12 + $0x398] sm:$0xff]  ;;  %v649_v29 = vld [vmem:[#allocation12 + $0x390] sm:$0xff]  ;;  %v659_v32 = vld [vmem:[#allocation12 + $0x3e0] sm:$0xff] }
  0xde   : >> { %v653_v30 = vld [vmem:[#allocation12 + $0x3b0] sm:$0xff]  ;;  %v658_v33 = vld [vmem:[#allocation12 + $0x3d8] sm:$0xff]  ;;  %v828_v36 = vld [vmem:[#allocation14 + $0x28] sm:$0xff]  ;;  %v2851_v38 = vpack.c.bf16 %v659_v32, %v655_v15 }
  0xdf   : >> { %2828 = vmatpush1.bf16.msra.mxu0 %v2827_v56  ;;  %v648_v56 = vld [vmem:[#allocation12 + $0x388] sm:$0xff]  ;;  %v823_v39 = vld [vmem:[#allocation14] sm:$0xff]  ;;  %v657_v41 = vld [vmem:[#allocation12 + $0x3d0] sm:$0xff] }
  0xe0   : >> { %2830 = vmatprep.subr.bf16.mxu0 %v2829_v61  ;;  %2892 = vmatpush1.bf16.msra.mxu1 %v2891_v9  ;;  %v2905_v61 = vpack.c.bf16 %v646_v55, %v642_v54  ;;  %v2845_v0 = vpack.c.bf16 %v652_v57, %v648_v56  ;;  %v654_v9 = vld [vmem:[#allocation12 + $0x3b8] sm:$0xff]  ;;  %v661_v42 = vld [vmem:[#allocation12 + $0x3f0] sm:$0xff]  ;;  %v827_v44 = vld [vmem:[#allocation14 + $0x20] sm:$0xff] }
  0xe1   : >> { %2894 = vmatprep.subr.bf16.mxu1 %v2893_v13  ;;  %v2907_v13 = vpack.c.bf16 %v645_v63, %v641_v62  ;;  %v826_v45 = vld [vmem:[#allocation14 + $0x18] sm:$0xff]  ;;  %v836_v48 = vld [vmem:[#allocation14 + $0x68] sm:$0xff]  ;;  %v2915_v50 = vpack.c.bf16 %v661_v42, %v657_v41  ;;  %v2919_v51 = vpack.c.bf16 %v827_v44, %v823_v39  ;;  %v825_v54 = vld [vmem:[#allocation14 + $0x10] sm:$0xff] }
  0xe2   : >> { %v829_v55 = vld [vmem:[#allocation14 + $0x30] sm:$0xff]  ;;  %v835_v57 = vld [vmem:[#allocation14 + $0x60] sm:$0xff]  ;;  %v840_v60 = vld [vmem:[#allocation14 + $0x88] sm:$0xff] }
  0xe3   : >> { %2832 = vmatpush1.bf16.msra.mxu0 %v2831_v11  ;;  %v656_v11 = vld [vmem:[#allocation12 + $0x3c8] sm:$0xff]  ;;  %v2983_v62 = vpack.c.bf16 %v829_v55, %v825_v54  ;;  %v863_v55 = vld [vmem:[#allocation14 + $0x140] sm:$0xff] }
  0xe4   : >> { %2834 = vmatprep.subr.bf16.mxu0 %v2833_v16  ;;  %2896 = vmatpush1.bf16.msra.mxu1 %v2895_v34  ;;  %v2909_v16 = vpack.c.bf16 %v654_v9, %v650_v5  ;;  %v2849_v31 = vpack.c.bf16 %v660_v12, %v656_v11  ;;  %v662_v34 = vld [vmem:[#allocation12 + $0x3f8] sm:$0xff]  ;;  %v833_v5 = vld [vmem:[#allocation14 + $0x50] sm:$0xff]  ;;  %v843_v12 = vld [vmem:[#allocation14 + $0xa0] sm:$0xff] }
  0xe5   : >> { %2898 = vmatprep.subr.bf16.mxu1 %v2897_v37  ;;  %v2911_v37 = vpack.c.bf16 %v653_v30, %v649_v29  ;;  %v837_v9 = vld [vmem:[#allocation14 + $0x70] sm:$0xff]  ;;  %v848_v15 = vld [vmem:[#allocation14 + $0xc8] sm:$0xff] }
  0xe6   : >> { %v2987_v29 = vpack.c.bf16 %v837_v9, %v833_v5  ;;  %v856_v39 = vld [vmem:[#allocation14 + $0x108] sm:$0xff]  ;;  %v871_v9 = vld [vmem:[#allocation14 + $0x180] sm:$0xff] }
  0xe7   : >> { %2836 = vmatpush1.bf16.msra.mxu0 %v2835_v35  ;;  %v824_v35 = vld [vmem:[#allocation14 + $0x8] sm:$0xff] }
  0xe8   : >> { %2838 = vmatprep.subr.bf16.mxu0 %v2837_v40  ;;  %2900 = vmatpush1.bf16.msra.mxu1 %v2899_v46  ;;  %v2913_v40 = vpack.c.bf16 %v662_v34, %v658_v33  ;;  %v2917_v43 = vpack.c.bf16 %v828_v36, %v824_v35  ;;  %v830_v46 = vld [vmem:[#allocation14 + $0x38] sm:$0xff]  ;;  %v841_v33 = vld [vmem:[#allocation14 + $0x90] sm:$0xff]  ;;  %v851_v36 = vld [vmem:[#allocation14 + $0xe0] sm:$0xff] }
  0xe9   : >> { %2902 = vmatprep.subr.bf16.mxu1 %v2901_v49  ;;  %v534_v49 = vld [vmem:[%s533_s27] sm:$0xff]  ;;  %v2981_v53 = vpack.c.bf16 %v830_v46, %v826_v45 }
  0xea   : >> { %v845_v34 = vld [vmem:[#allocation14 + $0xb0] sm:$0xff] }
  0xeb   : >> { %2840 = vmatpush1.bf16.msra.mxu0 %v2839_v47  ;;  %v832_v47 = vld [vmem:[#allocation14 + $0x48] sm:$0xff]  ;;  %v2991_v41 = vpack.c.bf16 %v845_v34, %v841_v33  ;;  %v849_v45 = vld [vmem:[#allocation14 + $0xd0] sm:$0xff]  ;;  %v879_v34 = vld [vmem:[#allocation14 + $0x1c0] sm:$0xff] }
  0xec   : >> { %2842 = vmatprep.subr.bf16.mxu0 %v2841_v52  ;;  %2904 = vmatpush1.bf16.msra.mxu1 %v2903_v58  ;;  %v831_v52 = vld [vmem:[#allocation14 + $0x40] sm:$0xff]  ;;  %v2921_v56 = vpack.c.bf16 %v836_v48, %v832_v47  ;;  %v834_v58 = vld [vmem:[#allocation14 + $0x58] sm:$0xff]  ;;  %v853_v46 = vld [vmem:[#allocation14 + $0xf0] sm:$0xff] }
  0xed   : >> { %2906 = vmatprep.subr.bf16.mxu1 %v2905_v61  ;;  %v844_v61 = vld [vmem:[#allocation14 + $0xa8] sm:$0xff]  ;;  %v2923_v63 = vpack.c.bf16 %v835_v57, %v831_v52  ;;  %v859_v48 = vld [vmem:[#allocation14 + $0x120] sm:$0xff]  ;;  %v857_v57 = vld [vmem:[#allocation14 + $0x110] sm:$0xff] }
  0xee   : >> { %v2925_v11 = vpack.c.bf16 %v844_v61, %v840_v60  ;;  %v868_v52 = vld [vmem:[#allocation14 + $0x168] sm:$0xff]  ;;  %v867_v60 = vld [vmem:[#allocation14 + $0x160] sm:$0xff]  ;;  %v866_v61 = vld [vmem:[#allocation14 + $0x158] sm:$0xff] }
  0xef   : >> { %2844 = vmatpush1.bf16.msra.mxu0 %v2843_v59  ;;  %v838_v59 = vld [vmem:[#allocation14 + $0x78] sm:$0xff]  ;;  %v2939_v5 = vpack.c.bf16 %v867_v60, %v863_v55  ;;  %v900_v55 = vld [vmem:[#allocation14 + $0x268] sm:$0xff]  ;;  %v889_v60 = vld [vmem:[#allocation14 + $0x210] sm:$0xff] }
  0xf0   : >> { %2846 = vmatprep.subr.bf16.mxu0 %v2845_v0  ;;  %2908 = vmatpush1.bf16.msra.mxu1 %v2907_v13  ;;  %v839_v0 = vld [vmem:[#allocation14 + $0x80] sm:$0xff]  ;;  %v2985_v1 = vpack.c.bf16 %v838_v59, %v834_v58  ;;  %v842_v13 = vld [vmem:[#allocation14 + $0x98] sm:$0xff]  ;;  %v861_v58 = vld [vmem:[#allocation14 + $0x130] sm:$0xff] }
  0xf1   : >> { %2910 = vmatprep.subr.bf16.mxu1 %v2909_v16  ;;  %v852_v16 = vld [vmem:[#allocation14 + $0xe8] sm:$0xff]  ;;  %v2927_v30 = vpack.c.bf16 %v843_v12, %v839_v0  ;;  %v865_v12 = vld [vmem:[#allocation14 + $0x150] sm:$0xff] }
  0xf2   : >> { %v2929_v35 = vpack.c.bf16 %v852_v16, %v848_v15  ;;  %v876_v0 = vld [vmem:[#allocation14 + $0x1a8] sm:$0xff]  ;;  %v875_v15 = vld [vmem:[#allocation14 + $0x1a0] sm:$0xff]  ;;  %v874_v16 = vld [vmem:[#allocation14 + $0x198] sm:$0xff] }
  0xf3   : >> { %2848 = vmatpush1.bf16.msra.mxu0 %v2847_v14  ;;  %v846_v14 = vld [vmem:[#allocation14 + $0xb8] sm:$0xff]  ;;  %v2943_v33 = vpack.c.bf16 %v875_v15, %v871_v9  ;;  %v908_v9 = vld [vmem:[#allocation14 + $0x2a8] sm:$0xff]  ;;  %v897_v15 = vld [vmem:[#allocation14 + $0x250] sm:$0xff] }
  0xf4   : >> { %2850 = vmatprep.subr.bf16.mxu0 %v2849_v31  ;;  %2912 = vmatpush1.bf16.msra.mxu1 %v2911_v37  ;;  %v847_v31 = vld [vmem:[#allocation14 + $0xc0] sm:$0xff]  ;;  %v2989_v32 = vpack.c.bf16 %v846_v14, %v842_v13  ;;  %v850_v37 = vld [vmem:[#allocation14 + $0xd8] sm:$0xff]  ;;  %v869_v13 = vld [vmem:[#allocation14 + $0x170] sm:$0xff] }
  0xf5   : >> { %2914 = vmatprep.subr.bf16.mxu1 %v2913_v40  ;;  %v860_v40 = vld [vmem:[#allocation14 + $0x128] sm:$0xff]  ;;  %v2931_v42 = vpack.c.bf16 %v851_v36, %v847_v31  ;;  %v873_v36 = vld [vmem:[#allocation14 + $0x190] sm:$0xff] }
  0xf6   : >> { %v2933_v47 = vpack.c.bf16 %v860_v40, %v856_v39  ;;  %v884_v31 = vld [vmem:[#allocation14 + $0x1e8] sm:$0xff]  ;;  %v883_v39 = vld [vmem:[#allocation14 + $0x1e0] sm:$0xff]  ;;  %v882_v40 = vld [vmem:[#allocation14 + $0x1d8] sm:$0xff] }
  0xf7   : >> { %2852 = vmatpush1.bf16.msra.mxu0 %v2851_v38  ;;  %v854_v38 = vld [vmem:[#allocation14 + $0xf8] sm:$0xff] }
  0xf8   : >> { %2918 = vmatprep.subr.bf16.mxu0 %v2917_v43  ;;  %2916 = vmatpush1.bf16.msra.mxu1 %v2915_v50  ;;  %v855_v43 = vld [vmem:[#allocation14 + $0x100] sm:$0xff]  ;;  %v2993_v44 = vpack.c.bf16 %v854_v38, %v850_v37  ;;  %v862_v50 = vld [vmem:[#allocation14 + $0x138] sm:$0xff]  ;;  %v877_v37 = vld [vmem:[#allocation14 + $0x1b0] sm:$0xff] }
  0xf9   : >> { %2982 = vmatprep.subr.bf16.mxu1 %v2981_v53  ;;  %v2995_v53 = vpack.c.bf16 %v853_v46, %v849_v45  ;;  %v2935_v54 = vpack.c.bf16 %v859_v48, %v855_v43  ;;  %v892_v43 = vld [vmem:[#allocation14 + $0x228] sm:$0xff]  ;;  %v2947_v45 = vpack.c.bf16 %v883_v39, %v879_v34  ;;  %v887_v46 = vld [vmem:[#allocation14 + $0x200] sm:$0xff]  ;;  %v881_v48 = vld [vmem:[#allocation14 + $0x1d0] sm:$0xff] }
  0xfa   : >> { %728 = vmatmul.mubr.f32.vlgmr.msra.gmra.mrb[0].mxu0 %v534_v49  ;;  %v916_v34 = vld [vmem:[#allocation14 + $0x2e8] sm:$0xff]  ;;  %v905_v39 = vld [vmem:[#allocation14 + $0x290] sm:$0xff] }
  0xfb   : >> { %2920 = vmatpush1.bf16.msra.mxu0 %v2919_v51  ;;  %1015 = vmatprep.mubr.f32.mxu0 %v4213_v4  ;;  %v864_v51 = vld [vmem:[#allocation14 + $0x148] sm:$0xff] }
  0xfc   : >> { %2922 = vmatprep.subr.bf16.mxu0 %v2921_v56  ;;  %799 = vmatmul.mubr.f32.vlgmr.msra.gmra.mrb[0].mxu1 %v534_v49  ;;  %v858_v49 = vld [vmem:[#allocation14 + $0x118] sm:$0xff]  ;;  %v2937_v59 = vpack.c.bf16 %v868_v52, %v864_v51  ;;  %v891_v51 = vld [vmem:[#allocation14 + $0x220] sm:$0xff] }
  0xfd   : >> { %2984 = vmatpush1.bf16.msra.mxu1 %v2983_v62  ;;  %1086 = vmatprep.mubr.f32.mxu1 %v4213_v4  ;;  %v2997_v56 = vpack.c.bf16 %v862_v50, %v858_v49  ;;  %v870_v62 = vld [vmem:[#allocation14 + $0x178] sm:$0xff]  ;;  %v885_v49 = vld [vmem:[#allocation14 + $0x1f0] sm:$0xff] }
  0xfe   : >> { %2986 = vmatprep.subr.bf16.mxu1 %v2985_v1  ;;  %v2999_v1 = vpack.c.bf16 %v861_v58, %v857_v57  ;;  %v890_v52 = vld [vmem:[#allocation14 + $0x218] sm:$0xff]  ;;  %v2951_v57 = vpack.c.bf16 %v891_v51, %v887_v46  ;;  %v895_v58 = vld [vmem:[#allocation14 + $0x240] sm:$0xff]  ;;  %v924_v46 = vld [vmem:[#allocation14 + $0x328] sm:$0xff] }
  0xff   : >> { %2924 = vmatpush1.bf16.msra.mxu0 %v2923_v63  ;;  %v872_v63 = vld [vmem:[#allocation14 + $0x188] sm:$0xff]  ;;  %v913_v51 = vld [vmem:[#allocation14 + $0x2d0] sm:$0xff] }
 0x100   : >> { %2926 = vmatprep.subr.bf16.mxu0 %v2925_v11  ;;  %v3001_v11 = vpack.c.bf16 %v870_v62, %v866_v61  ;;  %v2941_v14 = vpack.c.bf16 %v876_v0, %v872_v63  ;;  %v893_v61 = vld [vmem:[#allocation14 + $0x230] sm:$0xff]  ;;  %v899_v63 = vld [vmem:[#allocation14 + $0x260] sm:$0xff]  ;;  %v898_v0 = vld [vmem:[#allocation14 + $0x258] sm:$0xff] }
 0x101   : >> { %2988 = vmatpush1.bf16.msra.mxu1 %v2987_v29  ;;  %v878_v29 = vld [vmem:[#allocation14 + $0x1b8] sm:$0xff] }
 0x102   : >> { %2990 = vmatprep.subr.bf16.mxu1 %v2989_v32  ;;  %v3003_v32 = vpack.c.bf16 %v869_v13, %v865_v12  ;;  %v2955_v12 = vpack.c.bf16 %v899_v63, %v895_v58  ;;  %v903_v13 = vld [vmem:[#allocation14 + $0x280] sm:$0xff]  ;;  %v932_v58 = vld [vmem:[#allocation14 + $0x368] sm:$0xff]  ;;  %v921_v63 = vld [vmem:[#allocation14 + $0x310] sm:$0xff] }
 0x103   : >> { %2928 = vmatpush1.bf16.msra.mxu0 %v2927_v30  ;;  %v880_v30 = vld [vmem:[#allocation14 + $0x1c8] sm:$0xff] }
 0x104   : >> { %2930 = vmatprep.subr.bf16.mxu0 %v2929_v35  ;;  %v3005_v35 = vpack.c.bf16 %v878_v29, %v874_v16  ;;  %v2945_v38 = vpack.c.bf16 %v884_v31, %v880_v30  ;;  %v901_v16 = vld [vmem:[#allocation14 + $0x270] sm:$0xff]  ;;  %v907_v30 = vld [vmem:[#allocation14 + $0x2a0] sm:$0xff]  ;;  %v906_v31 = vld [vmem:[#allocation14 + $0x298] sm:$0xff] }
 0x105   : >> { %2992 = vmatpush1.bf16.msra.mxu1 %v2991_v41  ;;  %v886_v41 = vld [vmem:[#allocation14 + $0x1f8] sm:$0xff] }
 0x106   : >> { %2994 = vmatprep.subr.bf16.mxu1 %v2993_v44  ;;  %v3007_v44 = vpack.c.bf16 %v877_v37, %v873_v36  ;;  %v2959_v36 = vpack.c.bf16 %v907_v30, %v903_v13  ;;  %v911_v37 = vld [vmem:[#allocation14 + $0x2c0] sm:$0xff]  ;;  %v940_v13 = vld [vmem:[#allocation14 + $0x3a8] sm:$0xff]  ;;  %v929_v30 = vld [vmem:[#allocation14 + $0x350] sm:$0xff] }
 0x107   : >> { %2932 = vmatpush1.bf16.msra.mxu0 %v2931_v42  ;;  %v888_v42 = vld [vmem:[#allocation14 + $0x208] sm:$0xff] }
 0x108   : >> { %2934 = vmatprep.subr.bf16.mxu0 %v2933_v47  ;;  %v3009_v47 = vpack.c.bf16 %v886_v41, %v882_v40  ;;  %v2949_v50 = vpack.c.bf16 %v892_v43, %v888_v42  ;;  %v909_v40 = vld [vmem:[#allocation14 + $0x2b0] sm:$0xff]  ;;  %v915_v42 = vld [vmem:[#allocation14 + $0x2e0] sm:$0xff]  ;;  %v914_v43 = vld [vmem:[#allocation14 + $0x2d8] sm:$0xff] }
 0x109   : >> { %2996 = vmatpush1.bf16.msra.mxu1 %v2995_v53  ;;  %v894_v53 = vld [vmem:[#allocation14 + $0x238] sm:$0xff] }
 0x10a   : >> { %2998 = vmatprep.subr.bf16.mxu1 %v2997_v56  ;;  %v3011_v56 = vpack.c.bf16 %v885_v49, %v881_v48  ;;  %v2963_v48 = vpack.c.bf16 %v915_v42, %v911_v37  ;;  %v919_v49 = vld [vmem:[#allocation14 + $0x300] sm:$0xff]  ;;  %v948_v37 = vld [vmem:[#allocation14 + $0x3e8] sm:$0xff]  ;;  %v937_v42 = vld [vmem:[#allocation14 + $0x390] sm:$0xff] }
 0x10b   : >> { %2936 = vmatpush1.bf16.msra.mxu0 %v2935_v54  ;;  %v896_v54 = vld [vmem:[#allocation14 + $0x248] sm:$0xff] }
 0x10c   : >> { %2938 = vmatprep.subr.bf16.mxu0 %v2937_v59  ;;  %v3013_v59 = vpack.c.bf16 %v894_v53, %v890_v52  ;;  %v2953_v62 = vpack.c.bf16 %v900_v55, %v896_v54  ;;  %v917_v52 = vld [vmem:[#allocation14 + $0x2f0] sm:$0xff]  ;;  %v923_v54 = vld [vmem:[#allocation14 + $0x320] sm:$0xff]  ;;  %v922_v55 = vld [vmem:[#allocation14 + $0x318] sm:$0xff] }
 0x10d   : >> { %3000 = vmatpush1.bf16.msra.mxu1 %v2999_v1  ;;  %v902_v1 = vld [vmem:[#allocation14 + $0x278] sm:$0xff] }
 0x10e   : >> { %3002 = vmatprep.subr.bf16.mxu1 %v3001_v11  ;;  %v3015_v11 = vpack.c.bf16 %v893_v61, %v889_v60  ;;  %v2967_v60 = vpack.c.bf16 %v923_v54, %v919_v49  ;;  %v927_v61 = vld [vmem:[#allocation14 + $0x340] sm:$0xff]  ;;  %v1116_v49 = vld [vmem:[#allocation15 + $0x28] sm:$0xff]  ;;  %v945_v54 = vld [vmem:[#allocation14 + $0x3d0] sm:$0xff] }
 0x10f   : >> { %2940 = vmatpush1.bf16.msra.mxu0 %v2939_v5  ;;  %v904_v5 = vld [vmem:[#allocation14 + $0x288] sm:$0xff] }
 0x110   : >> { %2942 = vmatprep.subr.bf16.mxu0 %v2941_v14  ;;  %v3017_v14 = vpack.c.bf16 %v902_v1, %v898_v0  ;;  %v2957_v29 = vpack.c.bf16 %v908_v9, %v904_v5  ;;  %v925_v0 = vld [vmem:[#allocation14 + $0x330] sm:$0xff]  ;;  %v931_v5 = vld [vmem:[#allocation14 + $0x360] sm:$0xff]  ;;  %v930_v9 = vld [vmem:[#allocation14 + $0x358] sm:$0xff] }
 0x111   : >> { %3004 = vmatpush1.bf16.msra.mxu1 %v3003_v32  ;;  %v910_v32 = vld [vmem:[#allocation14 + $0x2b8] sm:$0xff] }
 0x112   : >> { %3006 = vmatprep.subr.bf16.mxu1 %v3005_v35  ;;  %v3019_v35 = vpack.c.bf16 %v901_v16, %v897_v15  ;;  %v2971_v15 = vpack.c.bf16 %v931_v5, %v927_v61  ;;  %v935_v16 = vld [vmem:[#allocation14 + $0x380] sm:$0xff]  ;;  %v1124_v61 = vld [vmem:[#allocation15 + $0x68] sm:$0xff]  ;;  %v1113_v5 = vld [vmem:[#allocation15 + $0x10] sm:$0xff] }
 0x113   : >> { %2944 = vmatpush1.bf16.msra.mxu0 %v2943_v33  ;;  %v912_v33 = vld [vmem:[#allocation14 + $0x2c8] sm:$0xff] }
 0x114   : >> { %2946 = vmatprep.subr.bf16.mxu0 %v2945_v38  ;;  %v3021_v38 = vpack.c.bf16 %v910_v32, %v906_v31  ;;  %v2961_v41 = vpack.c.bf16 %v916_v34, %v912_v33  ;;  %v933_v31 = vld [vmem:[#allocation14 + $0x370] sm:$0xff]  ;;  %v939_v33 = vld [vmem:[#allocation14 + $0x3a0] sm:$0xff]  ;;  %v938_v34 = vld [vmem:[#allocation14 + $0x398] sm:$0xff] }
 0x115   : >> { %3008 = vmatpush1.bf16.msra.mxu1 %v3007_v44  ;;  %v918_v44 = vld [vmem:[#allocation14 + $0x2f8] sm:$0xff] }
 0x116   : >> { %3010 = vmatprep.subr.bf16.mxu1 %v3009_v47  ;;  %v3023_v47 = vpack.c.bf16 %v909_v40, %v905_v39  ;;  %v2975_v39 = vpack.c.bf16 %v939_v33, %v935_v16  ;;  %v943_v40 = vld [vmem:[#allocation14 + $0x3c0] sm:$0xff]  ;;  %v1132_v16 = vld [vmem:[#allocation15 + $0xa8] sm:$0xff]  ;;  %v1121_v33 = vld [vmem:[#allocation15 + $0x50] sm:$0xff] }
 0x117   : >> { %2948 = vmatpush1.bf16.msra.mxu0 %v2947_v45  ;;  %v920_v45 = vld [vmem:[#allocation14 + $0x308] sm:$0xff] }
 0x118   : >> { %2950 = vmatprep.subr.bf16.mxu0 %v2949_v50  ;;  %v3025_v50 = vpack.c.bf16 %v918_v44, %v914_v43  ;;  %v2965_v53 = vpack.c.bf16 %v924_v46, %v920_v45  ;;  %v941_v43 = vld [vmem:[#allocation14 + $0x3b0] sm:$0xff]  ;;  %v947_v45 = vld [vmem:[#allocation14 + $0x3e0] sm:$0xff]  ;;  %v946_v46 = vld [vmem:[#allocation14 + $0x3d8] sm:$0xff] }
 0x119   : >> { %3012 = vmatpush1.bf16.msra.mxu1 %v3011_v56  ;;  %v926_v56 = vld [vmem:[#allocation14 + $0x338] sm:$0xff] }
 0x11a   : >> { %3014 = vmatprep.subr.bf16.mxu1 %v3013_v59  ;;  %v3027_v59 = vpack.c.bf16 %v917_v52, %v913_v51  ;;  %v2979_v51 = vpack.c.bf16 %v947_v45, %v943_v40  ;;  %v1111_v52 = vld [vmem:[#allocation15] sm:$0xff]  ;;  %v1140_v40 = vld [vmem:[#allocation15 + $0xe8] sm:$0xff]  ;;  %v1129_v45 = vld [vmem:[#allocation15 + $0x90] sm:$0xff] }
 0x11b   : >> { %2952 = vmatpush1.bf16.msra.mxu0 %v2951_v57  ;;  %v928_v57 = vld [vmem:[#allocation14 + $0x348] sm:$0xff] }
 0x11c   : >> { %2954 = vmatprep.subr.bf16.mxu0 %v2953_v62  ;;  %v3029_v62 = vpack.c.bf16 %v926_v56, %v922_v55  ;;  %v2969_v1 = vpack.c.bf16 %v932_v58, %v928_v57  ;;  %v949_v55 = vld [vmem:[#allocation14 + $0x3f0] sm:$0xff]  ;;  %v1115_v57 = vld [vmem:[#allocation15 + $0x20] sm:$0xff]  ;;  %v1114_v58 = vld [vmem:[#allocation15 + $0x18] sm:$0xff] }
 0x11d   : >> { %3016 = vmatpush1.bf16.msra.mxu1 %v3015_v11  ;;  %v934_v11 = vld [vmem:[#allocation14 + $0x378] sm:$0xff] }
 0x11e   : >> { %3018 = vmatprep.subr.bf16.mxu1 %v3017_v14  ;;  %v3031_v14 = vpack.c.bf16 %v925_v0, %v921_v63  ;;  %v3047_v63 = vpack.c.bf16 %v1115_v57, %v1111_v52  ;;  %v1119_v0 = vld [vmem:[#allocation15 + $0x40] sm:$0xff] }
 0x11f   : >> { %2956 = vmatpush1.bf16.msra.mxu0 %v2955_v12  ;;  %v936_v12 = vld [vmem:[#allocation14 + $0x388] sm:$0xff] }
 0x120   : >> { %2958 = vmatprep.subr.bf16.mxu0 %v2957_v29  ;;  %v3033_v29 = vpack.c.bf16 %v934_v11, %v930_v9  ;;  %v2973_v32 = vpack.c.bf16 %v940_v13, %v936_v12  ;;  %v1117_v9 = vld [vmem:[#allocation15 + $0x30] sm:$0xff]  ;;  %v1123_v12 = vld [vmem:[#allocation15 + $0x60] sm:$0xff]  ;;  %v1122_v13 = vld [vmem:[#allocation15 + $0x58] sm:$0xff] }
 0x121   : >> { %3020 = vmatpush1.bf16.msra.mxu1 %v3019_v35  ;;  %v942_v35 = vld [vmem:[#allocation14 + $0x3b8] sm:$0xff] }
 0x122   : >> { %3022 = vmatprep.subr.bf16.mxu1 %v3021_v38  ;;  %v3035_v38 = vpack.c.bf16 %v933_v31, %v929_v30  ;;  %v3051_v30 = vpack.c.bf16 %v1123_v12, %v1119_v0  ;;  %v1127_v31 = vld [vmem:[#allocation15 + $0x80] sm:$0xff] }
 0x123   : >> { %2960 = vmatpush1.bf16.msra.mxu0 %v2959_v36  ;;  %v944_v36 = vld [vmem:[#allocation14 + $0x3c8] sm:$0xff] }
 0x124   : >> { %2962 = vmatprep.subr.bf16.mxu0 %v2961_v41  ;;  %v3037_v41 = vpack.c.bf16 %v942_v35, %v938_v34  ;;  %v2977_v44 = vpack.c.bf16 %v948_v37, %v944_v36  ;;  %v1125_v34 = vld [vmem:[#allocation15 + $0x70] sm:$0xff]  ;;  %v1131_v36 = vld [vmem:[#allocation15 + $0xa0] sm:$0xff]  ;;  %v1130_v37 = vld [vmem:[#allocation15 + $0x98] sm:$0xff] }
 0x125   : >> { %3024 = vmatpush1.bf16.msra.mxu1 %v3023_v47  ;;  %v950_v47 = vld [vmem:[#allocation14 + $0x3f8] sm:$0xff] }
 0x126   : >> { %3026 = vmatprep.subr.bf16.mxu1 %v3025_v50  ;;  %v3039_v50 = vpack.c.bf16 %v941_v43, %v937_v42  ;;  %v3055_v42 = vpack.c.bf16 %v1131_v36, %v1127_v31  ;;  %v1135_v43 = vld [vmem:[#allocation15 + $0xc0] sm:$0xff] }
 0x127   : >> { %2964 = vmatpush1.bf16.msra.mxu0 %v2963_v48  ;;  %v1112_v48 = vld [vmem:[#allocation15 + $0x8] sm:$0xff] }
 0x128   : >> { %2966 = vmatprep.subr.bf16.mxu0 %v2965_v53  ;;  %v3041_v53 = vpack.c.bf16 %v950_v47, %v946_v46  ;;  %v3045_v56 = vpack.c.bf16 %v1116_v49, %v1112_v48  ;;  %v1133_v46 = vld [vmem:[#allocation15 + $0xb0] sm:$0xff]  ;;  %v1139_v48 = vld [vmem:[#allocation15 + $0xe0] sm:$0xff]  ;;  %v1138_v49 = vld [vmem:[#allocation15 + $0xd8] sm:$0xff] }
 0x129   : >> { %3028 = vmatpush1.bf16.msra.mxu1 %v3027_v59  ;;  %v1118_v59 = vld [vmem:[#allocation15 + $0x38] sm:$0xff]  ;;  %v3119_v52 = vpack.c.bf16 %v1133_v46, %v1129_v45  ;;  %v1161_v46 = vld [vmem:[#allocation15 + $0x190] sm:$0xff] }
 0x12a   : >> { %3030 = vmatprep.subr.bf16.mxu1 %v3029_v62  ;;  %v3043_v62 = vpack.c.bf16 %v949_v55, %v945_v54  ;;  %v1137_v55 = vld [vmem:[#allocation15 + $0xd0] sm:$0xff] }
 0x12b   : >> { %2968 = vmatpush1.bf16.msra.mxu0 %v2967_v60  ;;  %v1120_v60 = vld [vmem:[#allocation15 + $0x48] sm:$0xff] }
 0x12c   : >> { %2970 = vmatprep.subr.bf16.mxu0 %v2969_v1  ;;  %v3109_v1 = vpack.c.bf16 %v1118_v59, %v1114_v58  ;;  %v3049_v11 = vpack.c.bf16 %v1124_v61, %v1120_v60  ;;  %v1147_v58 = vld [vmem:[#allocation15 + $0x120] sm:$0xff]  ;;  %v1146_v59 = vld [vmem:[#allocation15 + $0x118] sm:$0xff]  ;;  %v1152_v61 = vld [vmem:[#allocation15 + $0x148] sm:$0xff] }
 0x12d   : >> { %3032 = vmatpush1.bf16.msra.mxu1 %v3031_v14  ;;  %v1126_v14 = vld [vmem:[#allocation15 + $0x78] sm:$0xff] }
 0x12e   : >> { %3034 = vmatprep.subr.bf16.mxu1 %v3033_v29  ;;  %v3111_v29 = vpack.c.bf16 %v1117_v9, %v1113_v5  ;;  %v1150_v60 = vld [vmem:[#allocation15 + $0x138] sm:$0xff]  ;;  %v1145_v9 = vld [vmem:[#allocation15 + $0x110] sm:$0xff] }
 0x12f   : >> { %2972 = vmatpush1.bf16.msra.mxu0 %v2971_v15  ;;  %v1128_v15 = vld [vmem:[#allocation15 + $0x88] sm:$0xff]  ;;  %v3125_v5 = vpack.c.bf16 %v1150_v60, %v1146_v59  ;;  %v1179_v59 = vld [vmem:[#allocation15 + $0x220] sm:$0xff]  ;;  %v1178_v60 = vld [vmem:[#allocation15 + $0x218] sm:$0xff] }
 0x130   : >> { %2974 = vmatprep.subr.bf16.mxu0 %v2973_v32  ;;  %v3113_v32 = vpack.c.bf16 %v1126_v14, %v1122_v13  ;;  %v3053_v35 = vpack.c.bf16 %v1132_v16, %v1128_v15  ;;  %v1155_v13 = vld [vmem:[#allocation15 + $0x160] sm:$0xff]  ;;  %v1154_v14 = vld [vmem:[#allocation15 + $0x158] sm:$0xff]  ;;  %v1160_v16 = vld [vmem:[#allocation15 + $0x188] sm:$0xff] }
 0x131   : >> { %3036 = vmatpush1.bf16.msra.mxu1 %v3035_v38  ;;  %v1134_v38 = vld [vmem:[#allocation15 + $0xb8] sm:$0xff] }
 0x132   : >> { %3038 = vmatprep.subr.bf16.mxu1 %v3037_v41  ;;  %v3115_v41 = vpack.c.bf16 %v1125_v34, %v1121_v33  ;;  %v1158_v15 = vld [vmem:[#allocation15 + $0x178] sm:$0xff]  ;;  %v1153_v34 = vld [vmem:[#allocation15 + $0x150] sm:$0xff] }
 0x133   : >> { %2976 = vmatpush1.bf16.msra.mxu0 %v2975_v39  ;;  %v1136_v39 = vld [vmem:[#allocation15 + $0xc8] sm:$0xff]  ;;  %v3129_v33 = vpack.c.bf16 %v1158_v15, %v1154_v14  ;;  %v1187_v14 = vld [vmem:[#allocation15 + $0x260] sm:$0xff]  ;;  %v1186_v15 = vld [vmem:[#allocation15 + $0x258] sm:$0xff] }
 0x134   : >> { %2978 = vmatprep.subr.bf16.mxu0 %v2977_v44  ;;  %v3117_v44 = vpack.c.bf16 %v1134_v38, %v1130_v37  ;;  %v3057_v47 = vpack.c.bf16 %v1140_v40, %v1136_v39  ;;  %v1163_v37 = vld [vmem:[#allocation15 + $0x1a0] sm:$0xff]  ;;  %v1162_v38 = vld [vmem:[#allocation15 + $0x198] sm:$0xff]  ;;  %v1168_v40 = vld [vmem:[#allocation15 + $0x1c8] sm:$0xff] }
 0x135   : >> { %3040 = vmatpush1.bf16.msra.mxu1 %v3039_v50  ;;  %v1142_v50 = vld [vmem:[#allocation15 + $0xf8] sm:$0xff] }
 0x136   : >> { %3042 = vmatprep.subr.bf16.mxu1 %v3041_v53  ;;  %v3059_v53 = vpack.c.bf16 %v1139_v48, %v1135_v43  ;;  %v3121_v54 = vpack.c.bf16 %v1142_v50, %v1138_v49  ;;  %v1166_v39 = vld [vmem:[#allocation15 + $0x1b8] sm:$0xff]  ;;  %v1171_v49 = vld [vmem:[#allocation15 + $0x1e0] sm:$0xff] }
 0x137   : >> { %2980 = vmatpush1.bf16.msra.mxu0 %v2979_v51  ;;  %v1144_v51 = vld [vmem:[#allocation15 + $0x108] sm:$0xff]  ;;  %v3133_v45 = vpack.c.bf16 %v1166_v39, %v1162_v38  ;;  %v1170_v50 = vld [vmem:[#allocation15 + $0x1d8] sm:$0xff]  ;;  %v1195_v38 = vld [vmem:[#allocation15 + $0x2a0] sm:$0xff] }
 0x138   : >> { %3046 = vmatprep.subr.bf16.mxu0 %v3045_v56  ;;  %v1141_v56 = vld [vmem:[#allocation15 + $0xf0] sm:$0xff]  ;;  %v1194_v39 = vld [vmem:[#allocation15 + $0x298] sm:$0xff] }
 0x139   : >> { %3044 = vmatpush1.bf16.msra.mxu1 %v3043_v62  ;;  %v1156_v62 = vld [vmem:[#allocation15 + $0x168] sm:$0xff] }
 0x13a   : >> { %1016 = vmatmul.mubr.f32.vlgmr.msra.gmra.mrb[2].mxu0 %v4217_v3  ;;  %3110 = vmatprep.subr.bf16.mxu1 %v3109_v1  ;;  %v1151_v1 = vld [vmem:[#allocation15 + $0x140] sm:$0xff]  ;;  %v3065_v12 = vpack.c.bf16 %v1156_v62, %v1152_v61  ;;  %v1182_v61 = vld [vmem:[#allocation15 + $0x238] sm:$0xff]  ;;  %v1184_v62 = vld [vmem:[#allocation15 + $0x248] sm:$0xff] }
 0x13b   : >> { %3048 = vmatpush1.bf16.msra.mxu0 %v3047_v63  ;;  %1303 = vmatprep.mubr.f32.mxu0 %v4209_v6  ;;  %v3123_v63 = vpack.c.bf16 %v1141_v56, %v1137_v55  ;;  %v3067_v31 = vpack.c.bf16 %v1155_v13, %v1151_v1  ;;  %v1169_v56 = vld [vmem:[#allocation15 + $0x1d0] sm:$0xff] }
 0x13c   : >> { %3050 = vmatprep.subr.bf16.mxu0 %v3049_v11  ;;  %1087 = vmatmul.mubr.f32.vlgmr.msra.gmra.mrb[2].mxu1 %v4217_v3  ;;  %v1148_v3 = vld [vmem:[#allocation15 + $0x128] sm:$0xff]  ;;  %v1149_v11 = vld [vmem:[#allocation15 + $0x130] sm:$0xff] }
 0x13d   : >> { %3112 = vmatpush1.bf16.msra.mxu1 %v3111_v29  ;;  %1374 = vmatprep.mubr.f32.mxu1 %v4209_v6  ;;  %v1143_v6 = vld [vmem:[#allocation15 + $0x100] sm:$0xff]  ;;  %v3061_v57 = vpack.c.bf16 %v1148_v3, %v1144_v51  ;;  %v1164_v29 = vld [vmem:[#allocation15 + $0x1a8] sm:$0xff]  ;;  %v1174_v51 = vld [vmem:[#allocation15 + $0x1f8] sm:$0xff] }
 0x13e   : >> { %3114 = vmatprep.subr.bf16.mxu1 %v3113_v32  ;;  %v3063_v0 = vpack.c.bf16 %v1147_v58, %v1143_v6  ;;  %v1159_v32 = vld [vmem:[#allocation15 + $0x180] sm:$0xff]  ;;  %v3069_v36 = vpack.c.bf16 %v1164_v29, %v1160_v16  ;;  %v1176_v3 = vld [vmem:[#allocation15 + $0x208] sm:$0xff]  ;;  %v3137_v55 = vpack.c.bf16 %v1174_v51, %v1170_v50  ;;  %v1190_v16 = vld [vmem:[#allocation15 + $0x278] sm:$0xff] }
 0x13f   : >> { %3052 = vmatpush1.bf16.msra.mxu0 %v3051_v30  ;;  %v3127_v30 = vpack.c.bf16 %v1149_v11, %v1145_v9  ;;  %v3071_v43 = vpack.c.bf16 %v1163_v37, %v1159_v32  ;;  %v3141_v9 = vpack.c.bf16 %v1182_v61, %v1178_v60  ;;  %v1177_v11 = vld [vmem:[#allocation15 + $0x210] sm:$0xff]  ;;  %v1192_v29 = vld [vmem:[#allocation15 + $0x288] sm:$0xff]  ;;  %v1203_v50 = vld [vmem:[#allocation15 + $0x2e0] sm:$0xff] }
 0x140   : >> { %3054 = vmatprep.subr.bf16.mxu0 %v3053_v35  ;;  %v1157_v35 = vld [vmem:[#allocation15 + $0x170] sm:$0xff]  ;;  %v1202_v51 = vld [vmem:[#allocation15 + $0x2d8] sm:$0xff]  ;;  %v1211_v60 = vld [vmem:[#allocation15 + $0x320] sm:$0xff] }
 0x141   : >> { %3116 = vmatpush1.bf16.msra.mxu1 %v3115_v41  ;;  %v1172_v41 = vld [vmem:[#allocation15 + $0x1e8] sm:$0xff]  ;;  %v1210_v61 = vld [vmem:[#allocation15 + $0x318] sm:$0xff] }
 0x142   : >> { %3118 = vmatprep.subr.bf16.mxu1 %v3117_v44  ;;  %v1167_v44 = vld [vmem:[#allocation15 + $0x1c0] sm:$0xff]  ;;  %v3073_v48 = vpack.c.bf16 %v1172_v41, %v1168_v40  ;;  %v1198_v40 = vld [vmem:[#allocation15 + $0x2b8] sm:$0xff]  ;;  %v1200_v41 = vld [vmem:[#allocation15 + $0x2c8] sm:$0xff] }
 0x143   : >> { %3056 = vmatpush1.bf16.msra.mxu0 %v3055_v42  ;;  %v3131_v42 = vpack.c.bf16 %v1157_v35, %v1153_v34  ;;  %v3075_v6 = vpack.c.bf16 %v1171_v49, %v1167_v44  ;;  %v3145_v34 = vpack.c.bf16 %v1190_v16, %v1186_v15  ;;  %v1185_v35 = vld [vmem:[#allocation15 + $0x250] sm:$0xff]  ;;  %v1219_v15 = vld [vmem:[#allocation15 + $0x360] sm:$0xff]  ;;  %v1218_v16 = vld [vmem:[#allocation15 + $0x358] sm:$0xff] }
 0x144   : >> { %3058 = vmatprep.subr.bf16.mxu0 %v3057_v47  ;;  %v1165_v47 = vld [vmem:[#allocation15 + $0x1b0] sm:$0xff] }
 0x145   : >> { %3120 = vmatpush1.bf16.msra.mxu1 %v3119_v52  ;;  %v1180_v52 = vld [vmem:[#allocation15 + $0x228] sm:$0xff] }
 0x146   : >> { %3122 = vmatprep.subr.bf16.mxu1 %v3121_v54  ;;  %v1175_v54 = vld [vmem:[#allocation15 + $0x200] sm:$0xff]  ;;  %v3077_v58 = vpack.c.bf16 %v1180_v52, %v1176_v3  ;;  %v1206_v3 = vld [vmem:[#allocation15 + $0x2f8] sm:$0xff]  ;;  %v1208_v52 = vld [vmem:[#allocation15 + $0x308] sm:$0xff] }
 0x147   : >> { %3060 = vmatpush1.bf16.msra.mxu0 %v3059_v53  ;;  %v3135_v53 = vpack.c.bf16 %v1165_v47, %v1161_v46  ;;  %v3079_v1 = vpack.c.bf16 %v1179_v59, %v1175_v54  ;;  %v3149_v46 = vpack.c.bf16 %v1198_v40, %v1194_v39  ;;  %v1193_v47 = vld [vmem:[#allocation15 + $0x290] sm:$0xff]  ;;  %v1227_v39 = vld [vmem:[#allocation15 + $0x3a0] sm:$0xff]  ;;  %v1226_v40 = vld [vmem:[#allocation15 + $0x398] sm:$0xff] }
 0x148   : >> { %3062 = vmatprep.subr.bf16.mxu0 %v3061_v57  ;;  %v1173_v57 = vld [vmem:[#allocation15 + $0x1f0] sm:$0xff] }
 0x149   : >> { %3124 = vmatpush1.bf16.msra.mxu1 %v3123_v63  ;;  %v1188_v63 = vld [vmem:[#allocation15 + $0x268] sm:$0xff] }
 0x14a   : >> { %3126 = vmatprep.subr.bf16.mxu1 %v3125_v5  ;;  %v1183_v5 = vld [vmem:[#allocation15 + $0x240] sm:$0xff]  ;;  %v3081_v13 = vpack.c.bf16 %v1188_v63, %v1184_v62  ;;  %v1214_v62 = vld [vmem:[#allocation15 + $0x338] sm:$0xff]  ;;  %v1216_v63 = vld [vmem:[#allocation15 + $0x348] sm:$0xff] }
 0x14b   : >> { %3064 = vmatpush1.bf16.msra.mxu0 %v3063_v0  ;;  %v3139_v0 = vpack.c.bf16 %v1173_v57, %v1169_v56  ;;  %v3083_v32 = vpack.c.bf16 %v1187_v14, %v1183_v5  ;;  %v3153_v56 = vpack.c.bf16 %v1206_v3, %v1202_v51  ;;  %v1201_v57 = vld [vmem:[#allocation15 + $0x2d0] sm:$0xff]  ;;  %v1235_v51 = vld [vmem:[#allocation15 + $0x3e0] sm:$0xff]  ;;  %v1234_v3 = vld [vmem:[#allocation15 + $0x3d8] sm:$0xff] }
 0x14c   : >> { %3066 = vmatprep.subr.bf16.mxu0 %v3065_v12  ;;  %v1181_v12 = vld [vmem:[#allocation15 + $0x230] sm:$0xff] }
 0x14d   : >> { %3128 = vmatpush1.bf16.msra.mxu1 %v3127_v30  ;;  %v1196_v30 = vld [vmem:[#allocation15 + $0x2a8] sm:$0xff] }
 0x14e   : >> { %3130 = vmatprep.subr.bf16.mxu1 %v3129_v33  ;;  %v1191_v33 = vld [vmem:[#allocation15 + $0x280] sm:$0xff]  ;;  %v3085_v37 = vpack.c.bf16 %v1196_v30, %v1192_v29  ;;  %v1222_v29 = vld [vmem:[#allocation15 + $0x378] sm:$0xff]  ;;  %v1224_v30 = vld [vmem:[#allocation15 + $0x388] sm:$0xff] }
 0x14f   : >> { %3068 = vmatpush1.bf16.msra.mxu0 %v3067_v31  ;;  %v3143_v31 = vpack.c.bf16 %v1181_v12, %v1177_v11  ;;  %v3087_v44 = vpack.c.bf16 %v1195_v38, %v1191_v33  ;;  %v3157_v11 = vpack.c.bf16 %v1214_v62, %v1210_v61  ;;  %v1209_v12 = vld [vmem:[#allocation15 + $0x310] sm:$0xff] }
 0x150   : >> { %3070 = vmatprep.subr.bf16.mxu0 %v3069_v36  ;;  %v1189_v36 = vld [vmem:[#allocation15 + $0x270] sm:$0xff] }
 0x151   : >> { %3132 = vmatpush1.bf16.msra.mxu1 %v3131_v42  ;;  %v1204_v42 = vld [vmem:[#allocation15 + $0x2e8] sm:$0xff] }
 0x152   : >> { %3134 = vmatprep.subr.bf16.mxu1 %v3133_v45  ;;  %v1199_v45 = vld [vmem:[#allocation15 + $0x2c0] sm:$0xff]  ;;  %v3089_v49 = vpack.c.bf16 %v1204_v42, %v1200_v41  ;;  %v1230_v41 = vld [vmem:[#allocation15 + $0x3b8] sm:$0xff]  ;;  %v1232_v42 = vld [vmem:[#allocation15 + $0x3c8] sm:$0xff] }
 0x153   : >> { %3072 = vmatpush1.bf16.msra.mxu0 %v3071_v43  ;;  %v3147_v43 = vpack.c.bf16 %v1189_v36, %v1185_v35  ;;  %v3091_v54 = vpack.c.bf16 %v1203_v50, %v1199_v45  ;;  %v3161_v35 = vpack.c.bf16 %v1222_v29, %v1218_v16  ;;  %v1217_v36 = vld [vmem:[#allocation15 + $0x350] sm:$0xff]  ;;  %v1403_v29 = vld [vmem:[#allocation17 + $0x20] sm:$0xff] }
 0x154   : >> { %3074 = vmatprep.subr.bf16.mxu0 %v3073_v48  ;;  %v1197_v48 = vld [vmem:[#allocation15 + $0x2b0] sm:$0xff] }
 0x155   : >> { %3136 = vmatpush1.bf16.msra.mxu1 %v3135_v53  ;;  %v1212_v53 = vld [vmem:[#allocation15 + $0x328] sm:$0xff] }
 0x156   : >> { %3138 = vmatprep.subr.bf16.mxu1 %v3137_v55  ;;  %v1207_v55 = vld [vmem:[#allocation15 + $0x300] sm:$0xff]  ;;  %v3093_v59 = vpack.c.bf16 %v1212_v53, %v1208_v52  ;;  %v1238_v52 = vld [vmem:[#allocation15 + $0x3f8] sm:$0xff] }
 0x157   : >> { %3076 = vmatpush1.bf16.msra.mxu0 %v3075_v6  ;;  %v3151_v6 = vpack.c.bf16 %v1197_v48, %v1193_v47  ;;  %v3095_v5 = vpack.c.bf16 %v1211_v60, %v1207_v55  ;;  %v3165_v47 = vpack.c.bf16 %v1230_v41, %v1226_v40  ;;  %v1225_v48 = vld [vmem:[#allocation15 + $0x390] sm:$0xff] }
 0x158   : >> { %3078 = vmatprep.subr.bf16.mxu0 %v3077_v58  ;;  %v1205_v58 = vld [vmem:[#allocation15 + $0x2f0] sm:$0xff] }
 0x159   : >> { %3140 = vmatpush1.bf16.msra.mxu1 %v3139_v0  ;;  %v1220_v0 = vld [vmem:[#allocation15 + $0x368] sm:$0xff]  ;;  %v1233_v55 = vld [vmem:[#allocation15 + $0x3d0] sm:$0xff] }
 0x15a   : >> { %3142 = vmatprep.subr.bf16.mxu1 %v3141_v9  ;;  %v1215_v9 = vld [vmem:[#allocation15 + $0x340] sm:$0xff]  ;;  %v3097_v14 = vpack.c.bf16 %v1220_v0, %v1216_v63 }
 0x15b   : >> { %3080 = vmatpush1.bf16.msra.mxu0 %v3079_v1  ;;  %v3155_v1 = vpack.c.bf16 %v1205_v58, %v1201_v57  ;;  %v3099_v33 = vpack.c.bf16 %v1219_v15, %v1215_v9  ;;  %v1399_v9 = vld [vmem:[#allocation17] sm:$0xff] }
 0x15c   : >> { %3082 = vmatprep.subr.bf16.mxu0 %v3081_v13  ;;  %v1213_v13 = vld [vmem:[#allocation15 + $0x330] sm:$0xff] }
 0x15d   : >> { %3144 = vmatpush1.bf16.msra.mxu1 %v3143_v31  ;;  %v1228_v31 = vld [vmem:[#allocation15 + $0x3a8] sm:$0xff] }
 0x15e   : >> { %3146 = vmatprep.subr.bf16.mxu1 %v3145_v34  ;;  %v1223_v34 = vld [vmem:[#allocation15 + $0x380] sm:$0xff]  ;;  %v3101_v38 = vpack.c.bf16 %v1228_v31, %v1224_v30  ;;  %v1404_v30 = vld [vmem:[#allocation17 + $0x28] sm:$0xff] }
 0x15f   : >> { %3084 = vmatpush1.bf16.msra.mxu0 %v3083_v32  ;;  %v3159_v32 = vpack.c.bf16 %v1213_v13, %v1209_v12  ;;  %v3103_v45 = vpack.c.bf16 %v1227_v39, %v1223_v34  ;;  %v4265_v13 = vmov 0.0|0.0  }
 0x160   : >> { %3086 = vmatprep.subr.bf16.mxu0 %v3085_v37  ;;  %v1221_v37 = vld [vmem:[#allocation15 + $0x370] sm:$0xff] }
 0x161   : >> { %3148 = vmatpush1.bf16.msra.mxu1 %v3147_v43  ;;  %v1236_v43 = vld [vmem:[#allocation15 + $0x3e8] sm:$0xff] }
 0x162   : >> { %3150 = vmatprep.subr.bf16.mxu1 %v3149_v46  ;;  %v1231_v46 = vld [vmem:[#allocation15 + $0x3c0] sm:$0xff]  ;;  %v3105_v50 = vpack.c.bf16 %v1236_v43, %v1232_v42 }
 0x163   : >> { %3088 = vmatpush1.bf16.msra.mxu0 %v3087_v44  ;;  %v3163_v44 = vpack.c.bf16 %v1221_v37, %v1217_v36  ;;  %v1405_v36 = vld [vmem:[#allocation17 + $0x30] sm:$0xff]  ;;  %v1406_v37 = vld [vmem:[#allocation17 + $0x38] sm:$0xff] }
 0x164   : >> { %3090 = vmatprep.subr.bf16.mxu0 %v3089_v49  ;;  %v1229_v49 = vld [vmem:[#allocation15 + $0x3b0] sm:$0xff]  ;;  %v3183_v40 = vpack.c.bf16 %v1406_v37, %v1405_v36 }
 0x165   : >> { %3152 = vmatpush1.bf16.msra.mxu1 %v3151_v6  ;;  %v3167_v53 = vpack.c.bf16 %v1229_v49, %v1225_v48  ;;  %v3107_v6 = vpack.c.bf16 %v1235_v51, %v1231_v46  ;;  %v1409_v49 = vld [vmem:[#allocation17 + $0x50] sm:$0xff] }
 0x166   : >> { %3154 = vmatprep.subr.bf16.mxu1 %v3153_v56  ;;  %v1237_v56 = vld [vmem:[#allocation15 + $0x3f0] sm:$0xff] }
 0x167   : >> { %3092 = vmatpush1.bf16.msra.mxu0 %v3091_v54  ;;  %v3169_v54 = vpack.c.bf16 %v1238_v52, %v1234_v3  ;;  %v3171_v57 = vpack.c.bf16 %v1237_v56, %v1233_v55  ;;  %v1411_v52 = vld [vmem:[#allocation17 + $0x60] sm:$0xff]  ;;  %v1413_v55 = vld [vmem:[#allocation17 + $0x70] sm:$0xff]  ;;  %v1414_v56 = vld [vmem:[#allocation17 + $0x78] sm:$0xff] }
 0x168   : >> { %3094 = vmatprep.subr.bf16.mxu0 %v3093_v59 }
 0x169   : >> { %3156 = vmatpush1.bf16.msra.mxu1 %v3155_v1 }
 0x16a   : >> { %3158 = vmatprep.subr.bf16.mxu1 %v3157_v11  ;;  %v1400_v11 = vld [vmem:[#allocation17 + $0x8] sm:$0xff] }
 0x16b   : >> { %3096 = vmatpush1.bf16.msra.mxu0 %v3095_v5  ;;  %v3174_v12 = vpack.c.bf16 %v1400_v11, %v1399_v9 }
 0x16c   : >> { %3098 = vmatprep.subr.bf16.mxu0 %v3097_v14  ;;  %v1402_v14 = vld [vmem:[#allocation17 + $0x18] sm:$0xff] }
 0x16d   : >> { %3160 = vmatpush1.bf16.msra.mxu1 %v3159_v32  ;;  %v3180_v32 = vpack.c.bf16 %v1404_v30, %v1403_v29 }
 0x16e   : >> { %3162 = vmatprep.subr.bf16.mxu1 %v3161_v35 }
 0x16f   : >> { %3100 = vmatpush1.bf16.msra.mxu0 %v3099_v33 }
 0x170   : >> { %3102 = vmatprep.subr.bf16.mxu0 %v3101_v38 }
 0x171   : >> { %3164 = vmatpush1.bf16.msra.mxu1 %v3163_v44  ;;  %v1407_v44 = vld [vmem:[#allocation17 + $0x40] sm:$0xff] }
 0x172   : >> { %3166 = vmatprep.subr.bf16.mxu1 %v3165_v47 }
 0x173   : >> { %3104 = vmatpush1.bf16.msra.mxu0 %v3103_v45  ;;  %v1408_v45 = vld [vmem:[#allocation17 + $0x48] sm:$0xff] }
 0x174   : >> { %3106 = vmatprep.subr.bf16.mxu0 %v3105_v50  ;;  %v3186_v47 = vpack.c.bf16 %v1408_v45, %v1407_v44  ;;  %v1410_v50 = vld [vmem:[#allocation17 + $0x58] sm:$0xff] }
 0x175   : >> { %3168 = vmatpush1.bf16.msra.mxu1 %v3167_v53  ;;  %v3189_v51 = vpack.c.bf16 %v1410_v50, %v1409_v49  ;;  %v1412_v53 = vld [vmem:[#allocation17 + $0x68] sm:$0xff] }
 0x176   : >> { %3170 = vmatprep.subr.bf16.mxu1 %v3169_v54 }
 0x177   : >> { %3108 = vmatpush1.bf16.msra.mxu0 %v3107_v6  ;;  %v3192_v6 = vpack.c.bf16 %v1412_v53, %v1411_v52 }
 0x178   : >> { %3173 = vmatprep.subr.bf16.mxu0 %v4265_v13 }
 0x179   : >> { %3172 = vmatpush1.bf16.msra.mxu1 %v3171_v57  ;;  %v3195_v57 = vpack.c.bf16 %v1414_v56, %v1413_v55 }
 0x17a   : >> { %1304 = vmatmul.mubr.f32.vlgmr.msra.gmra.mrb[4].mxu0 %v4213_v4 }
 0x17b   : >> { %3175 = vmatpush3.bf16.msra.mxu0 %v3174_v12 }
 0x17c   : >> { %1375 = vmatmul.mubr.f32.vlgmr.msra.gmra.mrb[4].mxu1 %v4213_v4  ;;  %3176 = vmatprep.subr.bf16.mxu0 %v4265_v13  ;;  %v1401_v4 = vld [vmem:[#allocation17 + $0x10] sm:$0xff] }
 0x17d   : >> { %v3177_v16 = vpack.c.bf16 %v1402_v14, %v1401_v4 }
 0x17f   : >> { %3178 = vmatpush3.bf16.msra.mxu0 %v3177_v16 }
 0x180   : >> { %3179 = vmatprep.subr.bf16.mxu0 %v4265_v13 }
 0x183   : >> { %3181 = vmatpush3.bf16.msra.mxu0 %v3180_v32 }
 0x184   : >> { %3182 = vmatprep.subr.bf16.mxu0 %v4265_v13 }
 0x187   : >> { %3184 = vmatpush3.bf16.msra.mxu0 %v3183_v40 }
 0x188   : >> { %3185 = vmatprep.subr.bf16.mxu0 %v4265_v13 }
 0x18b   : >> { %3187 = vmatpush3.bf16.msra.mxu0 %v3186_v47 }
 0x18c   : >> { %3188 = vmatprep.subr.bf16.mxu0 %v4265_v13 }
 0x18f   : >> { %3190 = vmatpush3.bf16.msra.mxu0 %v3189_v51 }
 0x190   : >> { %3191 = vmatprep.subr.bf16.mxu0 %v4265_v13 }
 0x193   : >> { %3193 = vmatpush3.bf16.msra.mxu0 %v3192_v6 }
 0x194   : >> { %3194 = vmatprep.subr.bf16.mxu0 %v4265_v13 }
 0x197   : >> { %3196 = vmatpush3.bf16.msra.mxu0 %v3195_v57 }
 0x1cd   : >> { %v729_v58 = vpop.f32.mrb[0].mxu0 }
 0x1ce   : >> { %v730_v59 = vadd.f32 %v729_v58, %v4601_v17  ;;  %v731_v60 = vpop.f32.mrb[1].mxu0 }
 0x1cf   : >> { %v732_v61 = vadd.f32 %v731_v60, %v4603_v18  ;;  %v800_v63 = vpop.f32.mrb[0].mxu1  ;;  %v4267_v60 = vmov 0.0  }
 0x1d0   : >> { %v805_v62 = vmul.f32 0.5, %v730_v59  ;;  %v801_v1 = vadd.f32 %v800_v63, %v4605_v19  ;;  %v802_v5 = vpop.f32.mrb[1].mxu1  ;;  %2751 = vmatprep.mubr.msk.f32.mxu0 %vm4266_vm0, %v4267_v60 }
 0x1d1   : >> { %v809_v0 = vmul.f32 0.5, %v732_v61  ;;  %v803_v15 = vadd.f32 %v802_v5, %v4607_v20 }
 0x1d2   : >> { %3841 = vtanh.f32 %v805_v62 }
 0x1d3   : >> { %3843 = vtanh.f32 %v809_v0  ;;  %v814_v31 = vmul.f32 0.5, %v803_v15 }
 0x1d4   : >> { %3845 = vtanh.f32 %v801_v1 }
 0x1d5   : >> { %3847 = vtanh.f32 %v814_v31 }
 0x1dc   : >> { %v3842_v33 = vpop.eup %3841 }
 0x1dd   : >> { %v3844_v34 = vpop.eup %3843  ;;  %v807_v35 = vmul.f32 0.5, %v3842_v33 }
 0x1de   : >> { %v3846_v38 = vpop.eup %3845  ;;  %v811_v39 = vmul.f32 0.5, %v3844_v34 }
 0x1df   : >> { %v808_v41 = vadd.f32 0.5, %v807_v35  ;;  %v3848_v3 = vpop.eup %3847 }
 0x1e0   : >> { %v812_v42 = vadd.f32 0.5, %v811_v39  ;;  %v816_v54 = vmul.f32 0.5, %v3848_v3 }
 0x1e1   : >> { %v819_v43 = vmul.f32 %v3846_v38, %v808_v41 }
 0x1e2   : >> { %v818_v46 = vmul.f32 %v4205_v7, %v812_v42 }
 0x1e4   : >> { %v4679_v7 = vadd.f32 %v819_v43, %v818_v46  }
 0x1e6   : >> { %v4908_v48 = vmov %v4679_v7  ;;  %v817_v7 = vadd.f32 0.5, %v816_v54 }
 0x1e7   : >> { %3849 = vtanh.f32 %v4908_v48 }
 0x1f1   : >> { %v3850_v58 = vpop.eup %3849 }
 0x1f2   : >> { %v4682_v3 = vmul.f32 %v3850_v58, %v817_v7  }
 0x1f4   : >> { %v4909_v59 = vmov %v4682_v3 }
 0x20d   : >> { %v1017_v61 = vpop.f32.mrb[2].mxu0 }
 0x20e   : >> { %v1018_v62 = vadd.f32 %v1017_v61, %v4609_v21  ;;  %v1019_v63 = vpop.f32.mrb[3].mxu0 }
 0x20f   : >> { %v1020_v0 = vadd.f32 %v1019_v63, %v4611_v22  ;;  %v1088_v5 = vpop.f32.mrb[2].mxu1 }
 0x210   : >> { %v1093_v1 = vmul.f32 0.5, %v1018_v62  ;;  %v1089_v11 = vadd.f32 %v1088_v5, %v4613_v23  ;;  %v1090_v12 = vpop.f32.mrb[3].mxu1 }
 0x211   : >> { %v1097_v9 = vmul.f32 0.5, %v1020_v0  ;;  %v1091_v13 = vadd.f32 %v1090_v12, %v4615_v24 }
 0x212   : >> { %3851 = vtanh.f32 %v1093_v1 }
 0x213   : >> { %3853 = vtanh.f32 %v1097_v9  ;;  %v1102_v4 = vmul.f32 0.5, %v1091_v13 }
 0x214   : >> { %3855 = vtanh.f32 %v1089_v11 }
 0x215   : >> { %3857 = vtanh.f32 %v1102_v4 }
 0x21c   : >> { %v3852_v14 = vpop.eup %3851 }
 0x21d   : >> { %v3854_v15 = vpop.eup %3853  ;;  %v1095_v16 = vmul.f32 0.5, %v3852_v14 }
 0x21e   : >> { %v3856_v29 = vpop.eup %3855  ;;  %v1099_v30 = vmul.f32 0.5, %v3854_v15 }
 0x21f   : >> { %v1096_v31 = vadd.f32 0.5, %v1095_v16  ;;  %v3858_v36 = vpop.eup %3857 }
 0x220   : >> { %v1100_v32 = vadd.f32 0.5, %v1099_v30  ;;  %v1104_v37 = vmul.f32 0.5, %v3858_v36 }
 0x221   : >> { %v1107_v33 = vmul.f32 %v3856_v29, %v1096_v31 }
 0x222   : >> { %v1106_v34 = vmul.f32 %v4201_v8, %v1100_v32  ;;  %v1105_v38 = vadd.f32 0.5, %v1104_v37 }
 0x224   : >> { %v1108_v35 = vadd.f32 %v1107_v33, %v1106_v34  }
 0x226   : >> { %3859 = vtanh.f32 %v1108_v35 }
 0x230   : >> { %v3860_v39 = vpop.eup %3859 }
 0x231   : >> { %v1110_v40 = vmul.f32 %v3860_v39, %v1105_v38  }
 0x233   : >> { %v4914_v4 = vmov %v1110_v40 }
 0x24d   : >> { %v1305_v41 = vpop.f32.mrb[4].mxu0 }
 0x24e   : >> { %v1306_v42 = vadd.f32 %v1305_v41, %v4617_v25  ;;  %v1307_v43 = vpop.f32.mrb[5].mxu0 }
 0x24f   : >> { %v1308_v44 = vadd.f32 %v1307_v43, %v4619_v26  ;;  %v1376_v46 = vpop.f32.mrb[4].mxu1 }
 0x250   : >> { %v1381_v45 = vmul.f32 0.5, %v1306_v42  ;;  %v1377_v49 = vadd.f32 %v1376_v46, %v4621_v27  ;;  %v1378_v50 = vpop.f32.mrb[5].mxu1 }
 0x251   : >> { %v1385_v47 = vmul.f32 0.5, %v1308_v44  ;;  %v1379_v8 = vadd.f32 %v1378_v50, %v4623_v28 }
 0x252   : >> { %3861 = vtanh.f32 %v1381_v45 }
 0x253   : >> { %3863 = vtanh.f32 %v1385_v47  ;;  %v1390_v51 = vmul.f32 0.5, %v1379_v8  ;;  %v4911_v8 = vmov %v1108_v35 }
 0x254   : >> { %3865 = vtanh.f32 %v1377_v49 }
 0x255   : >> { %3867 = vtanh.f32 %v1390_v51 }
 0x25c   : >> { %v3862_v3 = vpop.eup %3861 }
 0x25d   : >> { %v3864_v52 = vpop.eup %3863  ;;  %v1383_v53 = vmul.f32 0.5, %v3862_v3  ;;  %v4915_v3 = vmov %v4909_v59 }
 0x25e   : >> { %v3866_v6 = vpop.eup %3865  ;;  %v1387_v54 = vmul.f32 0.5, %v3864_v52 }
 0x25f   : >> { %v1384_v55 = vadd.f32 0.5, %v1383_v53  ;;  %v3868_v60 = vpop.eup %3867 }
 0x260   : >> { %v1388_v56 = vadd.f32 0.5, %v1387_v54  ;;  %v1392_v61 = vmul.f32 0.5, %v3868_v60 }
 0x261   : >> { %v1395_v57 = vmul.f32 %v3866_v6, %v1384_v55 }
 0x262   : >> { %v1394_v7 = vmul.f32 %v4197_v10, %v1388_v56  ;;  %v1393_v62 = vadd.f32 0.5, %v1392_v61 }
 0x264   : >> { %v1396_v58 = vadd.f32 %v1395_v57, %v1394_v7   ;;  %v4912_v7 = vmov %v4908_v48 }
 0x266   : >> { %3869 = vtanh.f32 %v1396_v58  ;;  %v4910_v10 = vmov %v1396_v58 }
 0x270   : >> { %v3870_v63 = vpop.eup %3869 }
 0x271   : >> { %v1398_v0 = vmul.f32 %v3870_v63, %v1393_v62  }
 0x273   : >> { %2752 = vmatmul.mubr.f32.vlgmr.msra.gmra.mrb[6].mxu0 %v1398_v0  ;;  %v4913_v6 = vmov %v1398_v0 }
 0x343   : > { %523 = sbr.rel (!%p521_p6) target bundleno = 182 (0xb6), region = 138 }
 0x346   : >> { %v1481_v1 = vpop.f32.mrb[6].mxu0 }
 0x347   : >> { %v1482_v5 = vadd.f32 %v4590_v2, %v1481_v1   ;;  %v2753_v9 = vpop.f32.mrb[7].mxu0 }
 0x349   : >> { %1486 = vst [vmem:[%s1485_s19] sm:$0xff] %v1482_v5 }
 0x34a LB: >> { %v1501_v10 = vld [vmem:[#allocation12 + $0x8] sm:$0xff]  ;;  %v1500_v12 = vld [vmem:[#allocation12] sm:$0xff]  ;;  %v1503_v32 = vld [vmem:[#allocation12 + $0x18] sm:$0xff]  ;;  %1692 = vmatprep.mubr.f32.mxu0 %v4249_v59  ;;  %1763 = vmatprep.mubr.f32.mxu1 %v4249_v59  ;;  %vm4269_vm1 = vmmov 0   ;;  %s2677_s20 = sshll.u32 %s4253_s29, 3  ;;  %s1492_s29 = sadd.s32 1, %s4253_s29   ;;  %s4253_s29 = sphi %s4731_s29, %s1492_s29   ;;  %v4249_v59 = vphi %v4909_v59, %v4923_v59   ;;  %v4245_v40 = vphi %v1110_v40, %v4922_v40   ;;  %v4241_v0 = vphi %v1398_v0, %v4921_v0   ;;  %v4237_v48 = vphi %v4908_v48, %v4920_v48   ;;  %v4233_v35 = vphi %v1108_v35, %v4919_v35   ;;  %v4229_v58 = vphi %v1396_v58, %v4918_v58   ;;  %v4225_v5 = vphi %v1482_v5, %v2447_v5  }
 0x34b   : >> { %v1505_v11 = vld [vmem:[#allocation12 + $0x28] sm:$0xff]  ;;  %v1504_v4 = vld [vmem:[#allocation12 + $0x20] sm:$0xff]  ;;  %v1507_v33 = vld [vmem:[#allocation12 + $0x38] sm:$0xff]  ;;  %s2451_s17 = scalar_lea.vmem %s4584_s21, %s2677_s20 [#allocation18]  ;;  %p1489_p10 = scmp.ge.s32.totalorder %s1492_s29, 4  }
 0x34c   : >> { %v3197_v13 = vpack.c.bf16 %v1505_v11, %v1501_v10  ;;  %v1509_v14 = vld [vmem:[#allocation12 + $0x48] sm:$0xff]  ;;  %v3199_v16 = vpack.c.bf16 %v1504_v4, %v1500_v12  ;;  %v1508_v30 = vld [vmem:[#allocation12 + $0x40] sm:$0xff]  ;;  %v1502_v34 = vld [vmem:[#allocation12 + $0x10] sm:$0xff]  ;;  %v3261_v38 = vpack.c.bf16 %v1507_v33, %v1503_v32  ;;  %s2684_s30 = sshll.u32 (%p1489_p10), %s4185_s12, 9  ;;  %s4924_s15 = sld [smem:[#allocation28_spill]] (%p1489_p10) }
 0x34d   : >> { %v1513_v15 = vld [vmem:[#allocation12 + $0x68] sm:$0xff]  ;;  %v1512_v31 = vld [vmem:[#allocation12 + $0x60] sm:$0xff]  ;;  %v1506_v36 = vld [vmem:[#allocation12 + $0x30] sm:$0xff]  ;;  %s2475_s16 = sshll.u32 (%p1489_p10), %s4584_s21, 4  ;;  %s2461_s18 = scalar_lea.sflag (%p1489_p10), [#allocation11], %s4566_s6  ;;  %s4820_s16 = int_to_ptr.vmem [resolvable:$true] %s2475_s16 }
 0x34e   : >> { %v3201_v29 = vpack.c.bf16 %v1513_v15, %v1509_v14  ;;  %3198 = vmatprep.subr.bf16.mxu0 %v3197_v13  ;;  %v3203_v37 = vpack.c.bf16 %v1512_v31, %v1508_v30  ;;  %v3263_v39 = vpack.c.bf16 %v1506_v36, %v1502_v34  ;;  %v1517_v41 = vld [vmem:[#allocation12 + $0x88] sm:$0xff]  ;;  %v1516_v43 = vld [vmem:[#allocation12 + $0x80] sm:$0xff]  ;;  %v1511_v46 = vld [vmem:[#allocation12 + $0x58] sm:$0xff]  ;;  %3262 = vmatprep.subr.bf16.mxu1 %v3261_v38  ;;  %s4043_s9 = scalar_lea.vmem (%p1489_p10), %s4820_s16, 512  ;;  %s4271_s7 = smov (%p1489_p10), [#allocation18]  }
 0x34f   : >> { %3200 = vmatpush1.bf16.msra.mxu0 %v3199_v16  ;;  %v1521_v42 = vld [vmem:[#allocation12 + $0xa8] sm:$0xff]  ;;  %v1520_v45 = vld [vmem:[#allocation12 + $0xa0] sm:$0xff]  ;;  %v1515_v47 = vld [vmem:[#allocation12 + $0x78] sm:$0xff]  ;;  %p4044_p3 = scmp.ne.s32.totalorder (%p1489_p10), %s4820_s16, %s4043_s9  ;;  %s4047_s22 = sshll.u32 (%p1489_p10), %s4271_s7, 4  ;;  %s4048_s22 = int_to_ptr.vmem [resolvable:$false] %s4047_s22 }
 0x350   : >> { %3202 = vmatprep.subr.bf16.mxu0 %v3201_v29  ;;  %v3205_v44 = vpack.c.bf16 %v1521_v42, %v1517_v41  ;;  %v3265_v49 = vpack.c.bf16 %v1515_v47, %v1511_v46  ;;  %v1510_v50 = vld [vmem:[#allocation12 + $0x50] sm:$0xff]  ;;  %v1525_v51 = vld [vmem:[#allocation12 + $0xc8] sm:$0xff]  ;;  %3264 = vmatpush1.bf16.msra.mxu1 %v3263_v39  ;;  %v3207_v53 = vpack.c.bf16 %v1520_v45, %v1516_v43  ;;  %v1519_v6 = vld [vmem:[#allocation12 + $0x98] sm:$0xff]  ;;  %s4049_s12 = scalar_lea.vmem (%p1489_p10), %s4048_s22, 1024  ;;  %p4050_p0 = scmp.lt.s32.totalorder (%p1489_p10), %s4820_s16, %s4048_s22 }
 0x351   : >> { %v1514_v8 = vld [vmem:[#allocation12 + $0x70] sm:$0xff]  ;;  %v1529_v52 = vld [vmem:[#allocation12 + $0xe8] sm:$0xff]  ;;  %v1523_v54 = vld [vmem:[#allocation12 + $0xb8] sm:$0xff]  ;;  %p4045_p7 = pnand (%p1489_p10), %p4044_p3, %p4508_p5  ;;  %p4051_p4 = scmp.lt.s32.totalorder (%p1489_p10), %s4049_s12, %s4043_s9 }
 0x352   : >> { %v3267_v3 = vpack.c.bf16 %v1514_v8, %v1510_v50  ;;  %3266 = vmatprep.subr.bf16.mxu1 %v3265_v49  ;;  %v1518_v55 = vld [vmem:[#allocation12 + $0x90] sm:$0xff]  ;;  %v3209_v56 = vpack.c.bf16 %v1529_v52, %v1525_v51  ;;  %v1524_v57 = vld [vmem:[#allocation12 + $0xc0] sm:$0xff]  ;;  %v3269_v60 = vpack.c.bf16 %v1523_v54, %v1519_v6  ;;  %v1533_v62 = vld [vmem:[#allocation12 + $0x108] sm:$0xff]  ;;  %s4817_s26 = scalar_lea.hbm (%p1489_p10), %s4924_s15, %s2684_s30 }
 0x353   : >> { %3204 = vmatpush1.bf16.msra.mxu0 %v3203_v37  ;;  %v1528_v7 = vld [vmem:[#allocation12 + $0xe0] sm:$0xff]  ;;  %v1522_v61 = vld [vmem:[#allocation12 + $0xb0] sm:$0xff]  ;;  %v1537_v63 = vld [vmem:[#allocation12 + $0x128] sm:$0xff]  ;;  %p4046_p9 = pneg (%p1489_p10), %p4045_p7  ;;  %p4052_p13 = por (%p1489_p10), %p4051_p4, %p4050_p0 }
 0x354   : >> { %3206 = vmatprep.subr.bf16.mxu0 %v3205_v44  ;;  %v1527_v1 = vld [vmem:[#allocation12 + $0xd8] sm:$0xff]  ;;  %3268 = vmatpush1.bf16.msra.mxu1 %v3267_v3  ;;  %v3271_v9 = vpack.c.bf16 %v1522_v61, %v1518_v55  ;;  %v3211_v11 = vpack.c.bf16 %v1528_v7, %v1524_v57  ;;  %v1532_v12 = vld [vmem:[#allocation12 + $0x100] sm:$0xff]  ;;  %v1526_v4 = vld [vmem:[#allocation12 + $0xd0] sm:$0xff]  ;;  %v3213_v15 = vpack.c.bf16 %v1537_v63, %v1533_v62 }
 0x355   : >> { %v1531_v10 = vld [vmem:[#allocation12 + $0xf8] sm:$0xff]  ;;  %3270 = vmatprep.subr.bf16.mxu1 %v3269_v60  ;;  %v1530_v14 = vld [vmem:[#allocation12 + $0xf0] sm:$0xff]  ;;  %v1536_v16 = vld [vmem:[#allocation12 + $0x120] sm:$0xff]  ;;  %p4053_p2 = pnand (%p1489_p10), %p4052_p13, %p4046_p9 }
 0x356   : >> { %v3273_v13 = vpack.c.bf16 %v1531_v10, %v1527_v1  ;;  %v1535_v29 = vld [vmem:[#allocation12 + $0x118] sm:$0xff]  ;;  %v1541_v31 = vld [vmem:[#allocation12 + $0x148] sm:$0xff]  ;;  %v3275_v33 = vpack.c.bf16 %v1530_v14, %v1526_v4  ;;  %v3215_v34 = vpack.c.bf16 %v1536_v16, %v1532_v12  ;;  %v1540_v36 = vld [vmem:[#allocation12 + $0x140] sm:$0xff] }
 0x357   : >> { %3208 = vmatpush1.bf16.msra.mxu0 %v3207_v53  ;;  %v1539_v30 = vld [vmem:[#allocation12 + $0x138] sm:$0xff]  ;;  %v1545_v32 = vld [vmem:[#allocation12 + $0x168] sm:$0xff]  ;;  %v1534_v38 = vld [vmem:[#allocation12 + $0x110] sm:$0xff] }
 0x358   : >> { %3210 = vmatprep.subr.bf16.mxu0 %v3209_v56  ;;  %3272 = vmatpush1.bf16.msra.mxu1 %v3271_v9  ;;  %v3277_v37 = vpack.c.bf16 %v1539_v30, %v1535_v29  ;;  %v1538_v39 = vld [vmem:[#allocation12 + $0x130] sm:$0xff]  ;;  %v3217_v41 = vpack.c.bf16 %v1545_v32, %v1541_v31  ;;  %v1544_v42 = vld [vmem:[#allocation12 + $0x160] sm:$0xff]  ;;  %v1543_v43 = vld [vmem:[#allocation12 + $0x158] sm:$0xff] }
 0x359   : >> { %3274 = vmatprep.subr.bf16.mxu1 %v3273_v13  ;;  %v1547_v44 = vld [vmem:[#allocation12 + $0x178] sm:$0xff]  ;;  %v1549_v45 = vld [vmem:[#allocation12 + $0x188] sm:$0xff]  ;;  %v3279_v47 = vpack.c.bf16 %v1538_v39, %v1534_v38  ;;  %v3219_v49 = vpack.c.bf16 %v1544_v42, %v1540_v36  ;;  %v1548_v50 = vld [vmem:[#allocation12 + $0x180] sm:$0xff] }
 0x35a   : >> { %v1553_v46 = vld [vmem:[#allocation12 + $0x1a8] sm:$0xff]  ;;  %v3281_v8 = vpack.c.bf16 %v1547_v44, %v1543_v43  ;;  %v1542_v51 = vld [vmem:[#allocation12 + $0x150] sm:$0xff]  ;;  %v1552_v53 = vld [vmem:[#allocation12 + $0x1a0] sm:$0xff] }
 0x35b   : >> { %3212 = vmatpush1.bf16.msra.mxu0 %v3211_v11  ;;  %v1546_v3 = vld [vmem:[#allocation12 + $0x170] sm:$0xff]  ;;  %v3221_v52 = vpack.c.bf16 %v1553_v46, %v1549_v45  ;;  %v1551_v6 = vld [vmem:[#allocation12 + $0x198] sm:$0xff]  ;;  %v1557_v55 = vld [vmem:[#allocation12 + $0x1c8] sm:$0xff]  ;;  %v3223_v7 = vpack.c.bf16 %v1552_v53, %v1548_v50 }
 0x35c   : >> { %3214 = vmatprep.subr.bf16.mxu0 %v3213_v15  ;;  %3276 = vmatpush1.bf16.msra.mxu1 %v3275_v33  ;;  %v1555_v54 = vld [vmem:[#allocation12 + $0x1b8] sm:$0xff]  ;;  %v1561_v56 = vld [vmem:[#allocation12 + $0x1e8] sm:$0xff]  ;;  %v3283_v57 = vpack.c.bf16 %v1546_v3, %v1542_v51  ;;  %v1556_v60 = vld [vmem:[#allocation12 + $0x1c0] sm:$0xff] }
 0x35d   : >> { %3278 = vmatprep.subr.bf16.mxu1 %v3277_v37  ;;  %v3285_v61 = vpack.c.bf16 %v1555_v54, %v1551_v6  ;;  %v1550_v62 = vld [vmem:[#allocation12 + $0x190] sm:$0xff]  ;;  %v3225_v1 = vpack.c.bf16 %v1561_v56, %v1557_v55  ;;  %v1560_v9 = vld [vmem:[#allocation12 + $0x1e0] sm:$0xff]  ;;  %v1559_v10 = vld [vmem:[#allocation12 + $0x1d8] sm:$0xff] }
 0x35e   : >> { %v1554_v63 = vld [vmem:[#allocation12 + $0x1b0] sm:$0xff]  ;;  %v1563_v11 = vld [vmem:[#allocation12 + $0x1f8] sm:$0xff]  ;;  %v1565_v12 = vld [vmem:[#allocation12 + $0x208] sm:$0xff]  ;;  %v3227_v14 = vpack.c.bf16 %v1560_v9, %v1556_v60 }
 0x35f   : >> { %3216 = vmatpush1.bf16.msra.mxu0 %v3215_v34  ;;  %v1569_v13 = vld [vmem:[#allocation12 + $0x228] sm:$0xff]  ;;  %v3287_v4 = vpack.c.bf16 %v1554_v63, %v1550_v62  ;;  %v1564_v15 = vld [vmem:[#allocation12 + $0x200] sm:$0xff]  ;;  %v3289_v16 = vpack.c.bf16 %v1563_v11, %v1559_v10  ;;  %v1558_v29 = vld [vmem:[#allocation12 + $0x1d0] sm:$0xff] }
 0x360   : >> { %3218 = vmatprep.subr.bf16.mxu0 %v3217_v41  ;;  %3280 = vmatpush1.bf16.msra.mxu1 %v3279_v47  ;;  %v1562_v30 = vld [vmem:[#allocation12 + $0x1f0] sm:$0xff]  ;;  %v3229_v31 = vpack.c.bf16 %v1569_v13, %v1565_v12  ;;  %v1568_v32 = vld [vmem:[#allocation12 + $0x220] sm:$0xff]  ;;  %v1567_v33 = vld [vmem:[#allocation12 + $0x218] sm:$0xff] }
 0x361   : >> { %3282 = vmatprep.subr.bf16.mxu1 %v3281_v8  ;;  %v1571_v34 = vld [vmem:[#allocation12 + $0x238] sm:$0xff]  ;;  %v1573_v36 = vld [vmem:[#allocation12 + $0x248] sm:$0xff]  ;;  %v3291_v38 = vpack.c.bf16 %v1562_v30, %v1558_v29  ;;  %v3231_v39 = vpack.c.bf16 %v1568_v32, %v1564_v15  ;;  %v1572_v41 = vld [vmem:[#allocation12 + $0x240] sm:$0xff] }
 0x362   : >> { %v1577_v37 = vld [vmem:[#allocation12 + $0x268] sm:$0xff]  ;;  %v3293_v42 = vpack.c.bf16 %v1571_v34, %v1567_v33  ;;  %v1566_v43 = vld [vmem:[#allocation12 + $0x210] sm:$0xff]  ;;  %v1576_v46 = vld [vmem:[#allocation12 + $0x260] sm:$0xff] }
 0x363   : >> { %3220 = vmatpush1.bf16.msra.mxu0 %v3219_v49  ;;  %v1570_v44 = vld [vmem:[#allocation12 + $0x230] sm:$0xff]  ;;  %v3233_v45 = vpack.c.bf16 %v1577_v37, %v1573_v36  ;;  %v1575_v47 = vld [vmem:[#allocation12 + $0x258] sm:$0xff]  ;;  %v1581_v50 = vld [vmem:[#allocation12 + $0x288] sm:$0xff]  ;;  %v3235_v3 = vpack.c.bf16 %v1576_v46, %v1572_v41 }
 0x364   : >> { %3222 = vmatprep.subr.bf16.mxu0 %v3221_v52  ;;  %3284 = vmatpush1.bf16.msra.mxu1 %v3283_v57  ;;  %v1579_v49 = vld [vmem:[#allocation12 + $0x278] sm:$0xff]  ;;  %v1585_v8 = vld [vmem:[#allocation12 + $0x2a8] sm:$0xff]  ;;  %v3295_v51 = vpack.c.bf16 %v1570_v44, %v1566_v43  ;;  %v1580_v52 = vld [vmem:[#allocation12 + $0x280] sm:$0xff] }
 0x365   : >> { %3286 = vmatprep.subr.bf16.mxu1 %v3285_v61  ;;  %v3297_v53 = vpack.c.bf16 %v1579_v49, %v1575_v47  ;;  %v1574_v6 = vld [vmem:[#allocation12 + $0x250] sm:$0xff]  ;;  %v3237_v55 = vpack.c.bf16 %v1585_v8, %v1581_v50  ;;  %v1584_v56 = vld [vmem:[#allocation12 + $0x2a0] sm:$0xff]  ;;  %v1583_v57 = vld [vmem:[#allocation12 + $0x298] sm:$0xff] }
 0x366   : >> { %v1578_v54 = vld [vmem:[#allocation12 + $0x270] sm:$0xff]  ;;  %v1589_v60 = vld [vmem:[#allocation12 + $0x2c8] sm:$0xff]  ;;  %v3239_v63 = vpack.c.bf16 %v1584_v56, %v1580_v52  ;;  %v1592_v13 = vld [vmem:[#allocation12 + $0x2e0] sm:$0xff] }
 0x367   : >> { %3224 = vmatpush1.bf16.msra.mxu0 %v3223_v7  ;;  %v1587_v7 = vld [vmem:[#allocation12 + $0x2b8] sm:$0xff]  ;;  %v1593_v61 = vld [vmem:[#allocation12 + $0x2e8] sm:$0xff]  ;;  %v3299_v62 = vpack.c.bf16 %v1578_v54, %v1574_v6  ;;  %v1582_v10 = vld [vmem:[#allocation12 + $0x290] sm:$0xff] }
 0x368   : >> { %3226 = vmatprep.subr.bf16.mxu0 %v3225_v1  ;;  %3288 = vmatpush1.bf16.msra.mxu1 %v3287_v4  ;;  %v1588_v1 = vld [vmem:[#allocation12 + $0x2c0] sm:$0xff]  ;;  %v3301_v9 = vpack.c.bf16 %v1587_v7, %v1583_v57  ;;  %v1586_v11 = vld [vmem:[#allocation12 + $0x2b0] sm:$0xff]  ;;  %v3241_v12 = vpack.c.bf16 %v1593_v61, %v1589_v60  ;;  %v1591_v4 = vld [vmem:[#allocation12 + $0x2d8] sm:$0xff] }
 0x369   : >> { %3290 = vmatprep.subr.bf16.mxu1 %v3289_v16  ;;  %v1597_v15 = vld [vmem:[#allocation12 + $0x308] sm:$0xff]  ;;  %v3303_v29 = vpack.c.bf16 %v1586_v11, %v1582_v10  ;;  %v3243_v30 = vpack.c.bf16 %v1592_v13, %v1588_v1  ;;  %v1590_v33 = vld [vmem:[#allocation12 + $0x2d0] sm:$0xff]  ;;  %v1600_v37 = vld [vmem:[#allocation12 + $0x320] sm:$0xff] }
 0x36a   : >> { %v1601_v16 = vld [vmem:[#allocation12 + $0x328] sm:$0xff]  ;;  %v1594_v34 = vld [vmem:[#allocation12 + $0x2f0] sm:$0xff]  ;;  %v1608_v8 = vld [vmem:[#allocation12 + $0x360] sm:$0xff] }
 0x36b   : >> { %3228 = vmatpush1.bf16.msra.mxu0 %v3227_v14  ;;  %v1595_v14 = vld [vmem:[#allocation12 + $0x2f8] sm:$0xff]  ;;  %v3245_v36 = vpack.c.bf16 %v1601_v16, %v1597_v15  ;;  %v1605_v41 = vld [vmem:[#allocation12 + $0x348] sm:$0xff]  ;;  %v3307_v43 = vpack.c.bf16 %v1594_v34, %v1590_v33  ;;  %v1598_v47 = vld [vmem:[#allocation12 + $0x310] sm:$0xff] }
 0x36c   : >> { %3230 = vmatprep.subr.bf16.mxu0 %v3229_v31  ;;  %3292 = vmatpush1.bf16.msra.mxu1 %v3291_v38  ;;  %v1596_v31 = vld [vmem:[#allocation12 + $0x300] sm:$0xff]  ;;  %v3305_v32 = vpack.c.bf16 %v1595_v14, %v1591_v4  ;;  %v1599_v38 = vld [vmem:[#allocation12 + $0x318] sm:$0xff]  ;;  %v1602_v49 = vld [vmem:[#allocation12 + $0x330] sm:$0xff] }
 0x36d   : >> { %3294 = vmatprep.subr.bf16.mxu1 %v3293_v42  ;;  %v1609_v42 = vld [vmem:[#allocation12 + $0x368] sm:$0xff]  ;;  %v3247_v44 = vpack.c.bf16 %v1600_v37, %v1596_v31  ;;  %v3311_v6 = vpack.c.bf16 %v1602_v49, %v1598_v47  ;;  %v1606_v57 = vld [vmem:[#allocation12 + $0x350] sm:$0xff]  ;;  %v1616_v61 = vld [vmem:[#allocation12 + $0x3a0] sm:$0xff] }
 0x36e   : >> { %v3249_v50 = vpack.c.bf16 %v1609_v42, %v1605_v41  ;;  %v1613_v52 = vld [vmem:[#allocation12 + $0x388] sm:$0xff]  ;;  %v1610_v7 = vld [vmem:[#allocation12 + $0x370] sm:$0xff]  ;;  %v1624_v16 = vld [vmem:[#allocation12 + $0x3e0] sm:$0xff] }
 0x36f   : >> { %3232 = vmatpush1.bf16.msra.mxu0 %v3231_v39  ;;  %v1603_v39 = vld [vmem:[#allocation12 + $0x338] sm:$0xff]  ;;  %v1621_v1 = vld [vmem:[#allocation12 + $0x3c8] sm:$0xff]  ;;  %v3315_v10 = vpack.c.bf16 %v1610_v7, %v1606_v57  ;;  %v1614_v4 = vld [vmem:[#allocation12 + $0x390] sm:$0xff] }
 0x370   : >> { %3234 = vmatprep.subr.bf16.mxu0 %v3233_v45  ;;  %3296 = vmatpush1.bf16.msra.mxu1 %v3295_v51  ;;  %v1604_v45 = vld [vmem:[#allocation12 + $0x340] sm:$0xff]  ;;  %v3309_v46 = vpack.c.bf16 %v1603_v39, %v1599_v38  ;;  %v1607_v51 = vld [vmem:[#allocation12 + $0x358] sm:$0xff]  ;;  %v1618_v14 = vld [vmem:[#allocation12 + $0x3b0] sm:$0xff] }
 0x371   : >> { %3298 = vmatprep.subr.bf16.mxu1 %v3297_v53  ;;  %v1617_v53 = vld [vmem:[#allocation12 + $0x3a8] sm:$0xff]  ;;  %v3251_v54 = vpack.c.bf16 %v1608_v8, %v1604_v45  ;;  %v3319_v33 = vpack.c.bf16 %v1618_v14, %v1614_v4  ;;  %v1622_v38 = vld [vmem:[#allocation12 + $0x3d0] sm:$0xff]  ;;  %v1792_v42 = vld [vmem:[#allocation14 + $0x20] sm:$0xff] }
 0x372   : >> { %v3253_v60 = vpack.c.bf16 %v1617_v53, %v1613_v52  ;;  %v1789_v31 = vld [vmem:[#allocation14 + $0x8] sm:$0xff]  ;;  %v1626_v39 = vld [vmem:[#allocation12 + $0x3f0] sm:$0xff]  ;;  %v1800_v53 = vld [vmem:[#allocation14 + $0x60] sm:$0xff] }
 0x373   : >> { %3236 = vmatpush1.bf16.msra.mxu0 %v3235_v3  ;;  %v1611_v3 = vld [vmem:[#allocation12 + $0x378] sm:$0xff]  ;;  %v1797_v45 = vld [vmem:[#allocation14 + $0x48] sm:$0xff]  ;;  %v3323_v47 = vpack.c.bf16 %v1626_v39, %v1622_v38  ;;  %v1820_v39 = vld [vmem:[#allocation14 + $0x100] sm:$0xff] }
 0x374   : >> { %3238 = vmatprep.subr.bf16.mxu0 %v3237_v55  ;;  %3300 = vmatpush1.bf16.msra.mxu1 %v3299_v62  ;;  %v1612_v55 = vld [vmem:[#allocation12 + $0x380] sm:$0xff]  ;;  %v3313_v56 = vpack.c.bf16 %v1611_v3, %v1607_v51  ;;  %v1615_v62 = vld [vmem:[#allocation12 + $0x398] sm:$0xff]  ;;  %v1790_v51 = vld [vmem:[#allocation14 + $0x10] sm:$0xff] }
 0x375   : >> { %3302 = vmatprep.subr.bf16.mxu1 %v3301_v9  ;;  %v1625_v9 = vld [vmem:[#allocation12 + $0x3e8] sm:$0xff]  ;;  %v3255_v11 = vpack.c.bf16 %v1616_v61, %v1612_v55  ;;  %v1794_v3 = vld [vmem:[#allocation14 + $0x30] sm:$0xff] }
 0x376   : >> { %v3257_v15 = vpack.c.bf16 %v1625_v9, %v1621_v1  ;;  %v1805_v55 = vld [vmem:[#allocation14 + $0x88] sm:$0xff]  ;;  %v3391_v57 = vpack.c.bf16 %v1794_v3, %v1790_v51  ;;  %v1808_v9 = vld [vmem:[#allocation14 + $0xa0] sm:$0xff] }
 0x377   : >> { %3240 = vmatpush1.bf16.msra.mxu0 %v3239_v63  ;;  %v1619_v63 = vld [vmem:[#allocation12 + $0x3b8] sm:$0xff]  ;;  %v1828_v3 = vld [vmem:[#allocation14 + $0x140] sm:$0xff] }
 0x378   : >> { %3242 = vmatprep.subr.bf16.mxu0 %v3241_v12  ;;  %3304 = vmatpush1.bf16.msra.mxu1 %v3303_v29  ;;  %v1620_v12 = vld [vmem:[#allocation12 + $0x3c0] sm:$0xff]  ;;  %v3317_v13 = vpack.c.bf16 %v1619_v63, %v1615_v62  ;;  %v1623_v29 = vld [vmem:[#allocation12 + $0x3d8] sm:$0xff]  ;;  %v1798_v62 = vld [vmem:[#allocation14 + $0x50] sm:$0xff] }
 0x379   : >> { %3306 = vmatprep.subr.bf16.mxu1 %v3305_v32  ;;  %v1793_v32 = vld [vmem:[#allocation14 + $0x28] sm:$0xff]  ;;  %v3259_v34 = vpack.c.bf16 %v1624_v16, %v1620_v12  ;;  %v1802_v63 = vld [vmem:[#allocation14 + $0x70] sm:$0xff] }
 0x37a   : >> { %v3325_v41 = vpack.c.bf16 %v1793_v32, %v1789_v31  ;;  %v1813_v12 = vld [vmem:[#allocation14 + $0xc8] sm:$0xff]  ;;  %v3395_v4 = vpack.c.bf16 %v1802_v63, %v1798_v62  ;;  %v1816_v32 = vld [vmem:[#allocation14 + $0xe0] sm:$0xff] }
 0x37b   : >> { %3244 = vmatpush1.bf16.msra.mxu0 %v3243_v30  ;;  %v1627_v30 = vld [vmem:[#allocation12 + $0x3f8] sm:$0xff]  ;;  %v1836_v63 = vld [vmem:[#allocation14 + $0x180] sm:$0xff] }
 0x37c   : >> { %3246 = vmatprep.subr.bf16.mxu0 %v3245_v36  ;;  %3308 = vmatpush1.bf16.msra.mxu1 %v3307_v43  ;;  %v1788_v36 = vld [vmem:[#allocation14] sm:$0xff]  ;;  %v3321_v37 = vpack.c.bf16 %v1627_v30, %v1623_v29  ;;  %v1791_v43 = vld [vmem:[#allocation14 + $0x18] sm:$0xff]  ;;  %v1806_v29 = vld [vmem:[#allocation14 + $0x90] sm:$0xff] }
 0x37d   : >> { %3310 = vmatprep.subr.bf16.mxu1 %v3309_v46  ;;  %v1801_v46 = vld [vmem:[#allocation14 + $0x68] sm:$0xff]  ;;  %v3327_v49 = vpack.c.bf16 %v1792_v42, %v1788_v36  ;;  %v1810_v30 = vld [vmem:[#allocation14 + $0xb0] sm:$0xff] }
 0x37e   : >> { %v3329_v52 = vpack.c.bf16 %v1801_v46, %v1797_v45  ;;  %v1821_v36 = vld [vmem:[#allocation14 + $0x108] sm:$0xff]  ;;  %v1814_v42 = vld [vmem:[#allocation14 + $0xd0] sm:$0xff]  ;;  %v1824_v45 = vld [vmem:[#allocation14 + $0x120] sm:$0xff] }
 0x37f   : >> { %3248 = vmatpush1.bf16.msra.mxu0 %v3247_v44  ;;  %v1795_v44 = vld [vmem:[#allocation14 + $0x38] sm:$0xff]  ;;  %v3343_v51 = vpack.c.bf16 %v1824_v45, %v1820_v39  ;;  %v1857_v39 = vld [vmem:[#allocation14 + $0x228] sm:$0xff]  ;;  %v1846_v45 = vld [vmem:[#allocation14 + $0x1d0] sm:$0xff] }
 0x380   : >> { %3250 = vmatprep.subr.bf16.mxu0 %v3249_v50  ;;  %3312 = vmatpush1.bf16.msra.mxu1 %v3311_v6  ;;  %v1796_v50 = vld [vmem:[#allocation14 + $0x40] sm:$0xff]  ;;  %v3389_v8 = vpack.c.bf16 %v1795_v44, %v1791_v43  ;;  %v1799_v6 = vld [vmem:[#allocation14 + $0x58] sm:$0xff]  ;;  %v1818_v43 = vld [vmem:[#allocation14 + $0xf0] sm:$0xff] }
 0x381   : >> { %3314 = vmatprep.subr.bf16.mxu1 %v3313_v56  ;;  %v1809_v56 = vld [vmem:[#allocation14 + $0xa8] sm:$0xff]  ;;  %v3331_v7 = vpack.c.bf16 %v1800_v53, %v1796_v50  ;;  %v1823_v46 = vld [vmem:[#allocation14 + $0x118] sm:$0xff]  ;;  %v1822_v53 = vld [vmem:[#allocation14 + $0x110] sm:$0xff] }
 0x382   : >> { %v3333_v1 = vpack.c.bf16 %v1809_v56, %v1805_v55  ;;  %v1833_v50 = vld [vmem:[#allocation14 + $0x168] sm:$0xff]  ;;  %v1832_v55 = vld [vmem:[#allocation14 + $0x160] sm:$0xff]  ;;  %v1831_v56 = vld [vmem:[#allocation14 + $0x158] sm:$0xff] }
 0x383   : >> { %3252 = vmatpush1.bf16.msra.mxu0 %v3251_v54  ;;  %v1803_v54 = vld [vmem:[#allocation14 + $0x78] sm:$0xff]  ;;  %v3347_v62 = vpack.c.bf16 %v1832_v55, %v1828_v3  ;;  %v1865_v3 = vld [vmem:[#allocation14 + $0x268] sm:$0xff]  ;;  %v1854_v55 = vld [vmem:[#allocation14 + $0x210] sm:$0xff] }
 0x384   : >> { %3254 = vmatprep.subr.bf16.mxu0 %v3253_v60  ;;  %3316 = vmatpush1.bf16.msra.mxu1 %v3315_v10  ;;  %v1804_v60 = vld [vmem:[#allocation14 + $0x80] sm:$0xff]  ;;  %v3393_v61 = vpack.c.bf16 %v1803_v54, %v1799_v6  ;;  %v1807_v10 = vld [vmem:[#allocation14 + $0x98] sm:$0xff]  ;;  %v1826_v6 = vld [vmem:[#allocation14 + $0x130] sm:$0xff] }
 0x385   : >> { %3318 = vmatprep.subr.bf16.mxu1 %v3317_v13  ;;  %v1817_v13 = vld [vmem:[#allocation14 + $0xe8] sm:$0xff]  ;;  %v3335_v14 = vpack.c.bf16 %v1808_v9, %v1804_v60  ;;  %v1830_v9 = vld [vmem:[#allocation14 + $0x150] sm:$0xff] }
 0x386   : >> { %v3337_v31 = vpack.c.bf16 %v1817_v13, %v1813_v12  ;;  %v1841_v60 = vld [vmem:[#allocation14 + $0x1a8] sm:$0xff]  ;;  %v1840_v12 = vld [vmem:[#allocation14 + $0x1a0] sm:$0xff]  ;;  %v1839_v13 = vld [vmem:[#allocation14 + $0x198] sm:$0xff] }
 0x387   : >> { %3256 = vmatpush1.bf16.msra.mxu0 %v3255_v11  ;;  %v1811_v11 = vld [vmem:[#allocation14 + $0xb8] sm:$0xff] }
 0x388   : >> { %3258 = vmatprep.subr.bf16.mxu0 %v3257_v15  ;;  %3320 = vmatpush1.bf16.msra.mxu1 %v3319_v33  ;;  %v1812_v15 = vld [vmem:[#allocation14 + $0xc0] sm:$0xff]  ;;  %v3397_v16 = vpack.c.bf16 %v1811_v11, %v1807_v10  ;;  %v1815_v33 = vld [vmem:[#allocation14 + $0xd8] sm:$0xff]  ;;  %v1834_v10 = vld [vmem:[#allocation14 + $0x170] sm:$0xff] }
 0x389   : >> { %3322 = vmatprep.subr.bf16.mxu1 %v3321_v37  ;;  %v3399_v37 = vpack.c.bf16 %v1810_v30, %v1806_v29  ;;  %v3339_v38 = vpack.c.bf16 %v1816_v32, %v1812_v15  ;;  %v1849_v15 = vld [vmem:[#allocation14 + $0x1e8] sm:$0xff]  ;;  %v3351_v29 = vpack.c.bf16 %v1840_v12, %v1836_v63  ;;  %v1844_v30 = vld [vmem:[#allocation14 + $0x1c0] sm:$0xff]  ;;  %v1838_v32 = vld [vmem:[#allocation14 + $0x190] sm:$0xff] }
 0x38a   : >> { %v1873_v63 = vld [vmem:[#allocation14 + $0x2a8] sm:$0xff]  ;;  %v1862_v12 = vld [vmem:[#allocation14 + $0x250] sm:$0xff] }
 0x38b   : >> { %3260 = vmatpush1.bf16.msra.mxu0 %v3259_v34  ;;  %v1819_v34 = vld [vmem:[#allocation14 + $0xf8] sm:$0xff] }
 0x38c   : >> { %3326 = vmatprep.subr.bf16.mxu0 %v3325_v41  ;;  %3324 = vmatpush1.bf16.msra.mxu1 %v3323_v47  ;;  %v3401_v41 = vpack.c.bf16 %v1819_v34, %v1815_v33  ;;  %v1827_v47 = vld [vmem:[#allocation14 + $0x138] sm:$0xff]  ;;  %v1842_v33 = vld [vmem:[#allocation14 + $0x1b0] sm:$0xff] }
 0x38d   : >> { %3390 = vmatprep.subr.bf16.mxu1 %v3389_v8  ;;  %v3403_v8 = vpack.c.bf16 %v1818_v43, %v1814_v42  ;;  %v1852_v43 = vld [vmem:[#allocation14 + $0x200] sm:$0xff] }
 0x38e   : >> { %1693 = vmatmul.mubr.f32.vlgmr.msra.gmra.mrb[0].mxu0 %v4225_v5 }
 0x38f   : >> { %3328 = vmatpush1.bf16.msra.mxu0 %v3327_v49  ;;  %1980 = vmatprep.mubr.f32.mxu0 %v4245_v40  ;;  %v1829_v49 = vld [vmem:[#allocation14 + $0x148] sm:$0xff] }
 0x390   : >> { %3330 = vmatprep.subr.bf16.mxu0 %v3329_v52  ;;  %1764 = vmatmul.mubr.f32.vlgmr.msra.gmra.mrb[0].mxu1 %v4225_v5  ;;  %v1825_v5 = vld [vmem:[#allocation14 + $0x128] sm:$0xff]  ;;  %v3405_v52 = vpack.c.bf16 %v1827_v47, %v1823_v46  ;;  %v3345_v54 = vpack.c.bf16 %v1833_v50, %v1829_v49  ;;  %v1850_v46 = vld [vmem:[#allocation14 + $0x1f0] sm:$0xff]  ;;  %v1856_v49 = vld [vmem:[#allocation14 + $0x220] sm:$0xff] }
 0x391   : >> { %3392 = vmatpush1.bf16.msra.mxu1 %v3391_v57  ;;  %2051 = vmatprep.mubr.f32.mxu1 %v4245_v40  ;;  %v3341_v44 = vpack.c.bf16 %v1825_v5, %v1821_v36  ;;  %v1835_v57 = vld [vmem:[#allocation14 + $0x178] sm:$0xff]  ;;  %v1848_v36 = vld [vmem:[#allocation14 + $0x1e0] sm:$0xff] }
 0x392   : >> { %3394 = vmatprep.subr.bf16.mxu1 %v3393_v61  ;;  %v3407_v61 = vpack.c.bf16 %v1826_v6, %v1822_v53  ;;  %v1847_v5 = vld [vmem:[#allocation14 + $0x1d8] sm:$0xff]  ;;  %v3355_v42 = vpack.c.bf16 %v1848_v36, %v1844_v30  ;;  %v3359_v53 = vpack.c.bf16 %v1856_v49, %v1852_v43  ;;  %v1860_v6 = vld [vmem:[#allocation14 + $0x240] sm:$0xff]  ;;  %v1881_v30 = vld [vmem:[#allocation14 + $0x2e8] sm:$0xff] }
 0x393   : >> { %3332 = vmatpush1.bf16.msra.mxu0 %v3331_v7  ;;  %v1837_v7 = vld [vmem:[#allocation14 + $0x188] sm:$0xff]  ;;  %v1855_v50 = vld [vmem:[#allocation14 + $0x218] sm:$0xff]  ;;  %v1870_v36 = vld [vmem:[#allocation14 + $0x290] sm:$0xff] }
 0x394   : >> { %3334 = vmatprep.subr.bf16.mxu0 %v3333_v1  ;;  %v3409_v1 = vpack.c.bf16 %v1835_v57, %v1831_v56  ;;  %v3349_v11 = vpack.c.bf16 %v1841_v60, %v1837_v7  ;;  %v1858_v56 = vld [vmem:[#allocation14 + $0x230] sm:$0xff]  ;;  %v1864_v7 = vld [vmem:[#allocation14 + $0x260] sm:$0xff]  ;;  %v1863_v60 = vld [vmem:[#allocation14 + $0x258] sm:$0xff] }
 0x395   : >> { %3396 = vmatpush1.bf16.msra.mxu1 %v3395_v4  ;;  %v1843_v4 = vld [vmem:[#allocation14 + $0x1b8] sm:$0xff]  ;;  %v1889_v43 = vld [vmem:[#allocation14 + $0x328] sm:$0xff]  ;;  %v1878_v49 = vld [vmem:[#allocation14 + $0x2d0] sm:$0xff] }
 0x396   : >> { %3398 = vmatprep.subr.bf16.mxu1 %v3397_v16  ;;  %v3411_v16 = vpack.c.bf16 %v1834_v10, %v1830_v9  ;;  %v3363_v9 = vpack.c.bf16 %v1864_v7, %v1860_v6  ;;  %v1868_v10 = vld [vmem:[#allocation14 + $0x280] sm:$0xff]  ;;  %v1897_v6 = vld [vmem:[#allocation14 + $0x368] sm:$0xff]  ;;  %v1886_v7 = vld [vmem:[#allocation14 + $0x310] sm:$0xff] }
 0x397   : >> { %3336 = vmatpush1.bf16.msra.mxu0 %v3335_v14  ;;  %v1845_v14 = vld [vmem:[#allocation14 + $0x1c8] sm:$0xff] }
 0x398   : >> { %3338 = vmatprep.subr.bf16.mxu0 %v3337_v31  ;;  %v3413_v31 = vpack.c.bf16 %v1843_v4, %v1839_v13  ;;  %v3353_v34 = vpack.c.bf16 %v1849_v15, %v1845_v14  ;;  %v1866_v13 = vld [vmem:[#allocation14 + $0x270] sm:$0xff]  ;;  %v1872_v14 = vld [vmem:[#allocation14 + $0x2a0] sm:$0xff]  ;;  %v1871_v15 = vld [vmem:[#allocation14 + $0x298] sm:$0xff] }
 0x399   : >> { %3400 = vmatpush1.bf16.msra.mxu1 %v3399_v37  ;;  %v1851_v37 = vld [vmem:[#allocation14 + $0x1f8] sm:$0xff] }
 0x39a   : >> { %3402 = vmatprep.subr.bf16.mxu1 %v3401_v41  ;;  %v3415_v41 = vpack.c.bf16 %v1842_v33, %v1838_v32  ;;  %v3367_v32 = vpack.c.bf16 %v1872_v14, %v1868_v10  ;;  %v1876_v33 = vld [vmem:[#allocation14 + $0x2c0] sm:$0xff]  ;;  %v1905_v10 = vld [vmem:[#allocation14 + $0x3a8] sm:$0xff]  ;;  %v1894_v14 = vld [vmem:[#allocation14 + $0x350] sm:$0xff] }
 0x39b   : >> { %3340 = vmatpush1.bf16.msra.mxu0 %v3339_v38  ;;  %v1853_v38 = vld [vmem:[#allocation14 + $0x208] sm:$0xff] }
 0x39c   : >> { %3342 = vmatprep.subr.bf16.mxu0 %v3341_v44  ;;  %v3417_v44 = vpack.c.bf16 %v1851_v37, %v1847_v5  ;;  %v3357_v47 = vpack.c.bf16 %v1857_v39, %v1853_v38  ;;  %v1874_v5 = vld [vmem:[#allocation14 + $0x2b0] sm:$0xff]  ;;  %v1880_v38 = vld [vmem:[#allocation14 + $0x2e0] sm:$0xff]  ;;  %v1879_v39 = vld [vmem:[#allocation14 + $0x2d8] sm:$0xff] }
 0x39d   : >> { %3404 = vmatpush1.bf16.msra.mxu1 %v3403_v8  ;;  %v1859_v8 = vld [vmem:[#allocation14 + $0x238] sm:$0xff] }
 0x39e   : >> { %3406 = vmatprep.subr.bf16.mxu1 %v3405_v52  ;;  %v3419_v52 = vpack.c.bf16 %v1850_v46, %v1846_v45  ;;  %v3371_v45 = vpack.c.bf16 %v1880_v38, %v1876_v33  ;;  %v1884_v46 = vld [vmem:[#allocation14 + $0x300] sm:$0xff]  ;;  %v1913_v33 = vld [vmem:[#allocation14 + $0x3e8] sm:$0xff]  ;;  %v1902_v38 = vld [vmem:[#allocation14 + $0x390] sm:$0xff] }
 0x39f   : >> { %3344 = vmatpush1.bf16.msra.mxu0 %v3343_v51  ;;  %v1861_v51 = vld [vmem:[#allocation14 + $0x248] sm:$0xff] }
 0x3a0   : >> { %3346 = vmatprep.subr.bf16.mxu0 %v3345_v54  ;;  %v3421_v54 = vpack.c.bf16 %v1859_v8, %v1855_v50  ;;  %v3361_v57 = vpack.c.bf16 %v1865_v3, %v1861_v51  ;;  %v1882_v50 = vld [vmem:[#allocation14 + $0x2f0] sm:$0xff]  ;;  %v1888_v51 = vld [vmem:[#allocation14 + $0x320] sm:$0xff]  ;;  %v1887_v3 = vld [vmem:[#allocation14 + $0x318] sm:$0xff] }
 0x3a1   : >> { %3408 = vmatpush1.bf16.msra.mxu1 %v3407_v61  ;;  %v1867_v61 = vld [vmem:[#allocation14 + $0x278] sm:$0xff] }
 0x3a2   : >> { %3410 = vmatprep.subr.bf16.mxu1 %v3409_v1  ;;  %v3423_v1 = vpack.c.bf16 %v1858_v56, %v1854_v55  ;;  %v3375_v55 = vpack.c.bf16 %v1888_v51, %v1884_v46  ;;  %v1892_v56 = vld [vmem:[#allocation14 + $0x340] sm:$0xff]  ;;  %v2081_v46 = vld [vmem:[#allocation15 + $0x28] sm:$0xff]  ;;  %v1910_v51 = vld [vmem:[#allocation14 + $0x3d0] sm:$0xff] }
 0x3a3   : >> { %3348 = vmatpush1.bf16.msra.mxu0 %v3347_v62  ;;  %v1869_v62 = vld [vmem:[#allocation14 + $0x288] sm:$0xff] }
 0x3a4   : >> { %3350 = vmatprep.subr.bf16.mxu0 %v3349_v11  ;;  %v3425_v11 = vpack.c.bf16 %v1867_v61, %v1863_v60  ;;  %v3365_v4 = vpack.c.bf16 %v1873_v63, %v1869_v62  ;;  %v1890_v60 = vld [vmem:[#allocation14 + $0x330] sm:$0xff]  ;;  %v1896_v62 = vld [vmem:[#allocation14 + $0x360] sm:$0xff]  ;;  %v1895_v63 = vld [vmem:[#allocation14 + $0x358] sm:$0xff] }
 0x3a5   : >> { %3412 = vmatpush1.bf16.msra.mxu1 %v3411_v16  ;;  %v1875_v16 = vld [vmem:[#allocation14 + $0x2b8] sm:$0xff] }
 0x3a6   : >> { %3414 = vmatprep.subr.bf16.mxu1 %v3413_v31  ;;  %v3427_v31 = vpack.c.bf16 %v1866_v13, %v1862_v12  ;;  %v3379_v12 = vpack.c.bf16 %v1896_v62, %v1892_v56  ;;  %v1900_v13 = vld [vmem:[#allocation14 + $0x380] sm:$0xff]  ;;  %v2089_v56 = vld [vmem:[#allocation15 + $0x68] sm:$0xff]  ;;  %v2078_v62 = vld [vmem:[#allocation15 + $0x10] sm:$0xff] }
 0x3a7   : >> { %3352 = vmatpush1.bf16.msra.mxu0 %v3351_v29  ;;  %v1877_v29 = vld [vmem:[#allocation14 + $0x2c8] sm:$0xff] }
 0x3a8   : >> { %3354 = vmatprep.subr.bf16.mxu0 %v3353_v34  ;;  %v3429_v34 = vpack.c.bf16 %v1875_v16, %v1871_v15  ;;  %v3369_v37 = vpack.c.bf16 %v1881_v30, %v1877_v29  ;;  %v1898_v15 = vld [vmem:[#allocation14 + $0x370] sm:$0xff]  ;;  %v1904_v29 = vld [vmem:[#allocation14 + $0x3a0] sm:$0xff]  ;;  %v1903_v30 = vld [vmem:[#allocation14 + $0x398] sm:$0xff] }
 0x3a9   : >> { %3416 = vmatpush1.bf16.msra.mxu1 %v3415_v41  ;;  %v1883_v41 = vld [vmem:[#allocation14 + $0x2f8] sm:$0xff] }
 0x3aa   : >> { %3418 = vmatprep.subr.bf16.mxu1 %v3417_v44  ;;  %v3431_v44 = vpack.c.bf16 %v1874_v5, %v1870_v36  ;;  %v3383_v36 = vpack.c.bf16 %v1904_v29, %v1900_v13  ;;  %v1908_v5 = vld [vmem:[#allocation14 + $0x3c0] sm:$0xff]  ;;  %v2097_v13 = vld [vmem:[#allocation15 + $0xa8] sm:$0xff]  ;;  %v2086_v29 = vld [vmem:[#allocation15 + $0x50] sm:$0xff] }
 0x3ab   : >> { %3356 = vmatpush1.bf16.msra.mxu0 %v3355_v42  ;;  %v1885_v42 = vld [vmem:[#allocation14 + $0x308] sm:$0xff] }
 0x3ac   : >> { %3358 = vmatprep.subr.bf16.mxu0 %v3357_v47  ;;  %v3433_v47 = vpack.c.bf16 %v1883_v41, %v1879_v39  ;;  %v3373_v8 = vpack.c.bf16 %v1889_v43, %v1885_v42  ;;  %v1906_v39 = vld [vmem:[#allocation14 + $0x3b0] sm:$0xff]  ;;  %v1912_v42 = vld [vmem:[#allocation14 + $0x3e0] sm:$0xff]  ;;  %v1911_v43 = vld [vmem:[#allocation14 + $0x3d8] sm:$0xff] }
 0x3ad   : >> { %3420 = vmatpush1.bf16.msra.mxu1 %v3419_v52  ;;  %v1891_v52 = vld [vmem:[#allocation14 + $0x338] sm:$0xff] }
 0x3ae   : >> { %3422 = vmatprep.subr.bf16.mxu1 %v3421_v54  ;;  %v3435_v54 = vpack.c.bf16 %v1882_v50, %v1878_v49  ;;  %v3387_v49 = vpack.c.bf16 %v1912_v42, %v1908_v5  ;;  %v2076_v50 = vld [vmem:[#allocation15] sm:$0xff]  ;;  %v2105_v5 = vld [vmem:[#allocation15 + $0xe8] sm:$0xff]  ;;  %v2094_v42 = vld [vmem:[#allocation15 + $0x90] sm:$0xff] }
 0x3af   : >> { %3360 = vmatpush1.bf16.msra.mxu0 %v3359_v53  ;;  %v1893_v53 = vld [vmem:[#allocation14 + $0x348] sm:$0xff] }
 0x3b0   : >> { %3362 = vmatprep.subr.bf16.mxu0 %v3361_v57  ;;  %v3437_v57 = vpack.c.bf16 %v1891_v52, %v1887_v3  ;;  %v3377_v61 = vpack.c.bf16 %v1897_v6, %v1893_v53  ;;  %v1914_v3 = vld [vmem:[#allocation14 + $0x3f0] sm:$0xff]  ;;  %v2080_v53 = vld [vmem:[#allocation15 + $0x20] sm:$0xff]  ;;  %v2079_v6 = vld [vmem:[#allocation15 + $0x18] sm:$0xff] }
 0x3b1   : >> { %3424 = vmatpush1.bf16.msra.mxu1 %v3423_v1  ;;  %v1899_v1 = vld [vmem:[#allocation14 + $0x378] sm:$0xff] }
 0x3b2   : >> { %3426 = vmatprep.subr.bf16.mxu1 %v3425_v11  ;;  %v3439_v11 = vpack.c.bf16 %v1890_v60, %v1886_v7  ;;  %v3455_v7 = vpack.c.bf16 %v2080_v53, %v2076_v50  ;;  %v2084_v60 = vld [vmem:[#allocation15 + $0x40] sm:$0xff] }
 0x3b3   : >> { %3364 = vmatpush1.bf16.msra.mxu0 %v3363_v9  ;;  %v1901_v9 = vld [vmem:[#allocation14 + $0x388] sm:$0xff] }
 0x3b4   : >> { %3366 = vmatprep.subr.bf16.mxu0 %v3365_v4  ;;  %v3441_v4 = vpack.c.bf16 %v1899_v1, %v1895_v63  ;;  %v3381_v16 = vpack.c.bf16 %v1905_v10, %v1901_v9  ;;  %v2082_v63 = vld [vmem:[#allocation15 + $0x30] sm:$0xff]  ;;  %v2088_v9 = vld [vmem:[#allocation15 + $0x60] sm:$0xff]  ;;  %v2087_v10 = vld [vmem:[#allocation15 + $0x58] sm:$0xff] }
 0x3b5   : >> { %3428 = vmatpush1.bf16.msra.mxu1 %v3427_v31  ;;  %v1907_v31 = vld [vmem:[#allocation14 + $0x3b8] sm:$0xff] }
 0x3b6   : >> { %3430 = vmatprep.subr.bf16.mxu1 %v3429_v34  ;;  %v3443_v34 = vpack.c.bf16 %v1898_v15, %v1894_v14  ;;  %v3459_v14 = vpack.c.bf16 %v2088_v9, %v2084_v60  ;;  %v2092_v15 = vld [vmem:[#allocation15 + $0x80] sm:$0xff] }
 0x3b7   : >> { %3368 = vmatpush1.bf16.msra.mxu0 %v3367_v32  ;;  %v1909_v32 = vld [vmem:[#allocation14 + $0x3c8] sm:$0xff] }
 0x3b8   : >> { %3370 = vmatprep.subr.bf16.mxu0 %v3369_v37  ;;  %v3445_v37 = vpack.c.bf16 %v1907_v31, %v1903_v30  ;;  %v3385_v41 = vpack.c.bf16 %v1913_v33, %v1909_v32  ;;  %v2090_v30 = vld [vmem:[#allocation15 + $0x70] sm:$0xff]  ;;  %v2096_v32 = vld [vmem:[#allocation15 + $0xa0] sm:$0xff]  ;;  %v2095_v33 = vld [vmem:[#allocation15 + $0x98] sm:$0xff] }
 0x3b9   : >> { %3432 = vmatpush1.bf16.msra.mxu1 %v3431_v44  ;;  %v1915_v44 = vld [vmem:[#allocation14 + $0x3f8] sm:$0xff] }
 0x3ba   : >> { %3434 = vmatprep.subr.bf16.mxu1 %v3433_v47  ;;  %v3447_v47 = vpack.c.bf16 %v1906_v39, %v1902_v38  ;;  %v3463_v38 = vpack.c.bf16 %v2096_v32, %v2092_v15  ;;  %v2100_v39 = vld [vmem:[#allocation15 + $0xc0] sm:$0xff] }
 0x3bb   : >> { %3372 = vmatpush1.bf16.msra.mxu0 %v3371_v45  ;;  %v2077_v45 = vld [vmem:[#allocation15 + $0x8] sm:$0xff] }
 0x3bc   : >> { %3374 = vmatprep.subr.bf16.mxu0 %v3373_v8  ;;  %v3449_v8 = vpack.c.bf16 %v1915_v44, %v1911_v43  ;;  %v3453_v52 = vpack.c.bf16 %v2081_v46, %v2077_v45  ;;  %v2098_v43 = vld [vmem:[#allocation15 + $0xb0] sm:$0xff]  ;;  %v2104_v45 = vld [vmem:[#allocation15 + $0xe0] sm:$0xff]  ;;  %v2103_v46 = vld [vmem:[#allocation15 + $0xd8] sm:$0xff] }
 0x3bd   : >> { %3436 = vmatpush1.bf16.msra.mxu1 %v3435_v54  ;;  %v2083_v54 = vld [vmem:[#allocation15 + $0x38] sm:$0xff]  ;;  %v3527_v50 = vpack.c.bf16 %v2098_v43, %v2094_v42  ;;  %v2126_v43 = vld [vmem:[#allocation15 + $0x190] sm:$0xff] }
 0x3be   : >> { %3438 = vmatprep.subr.bf16.mxu1 %v3437_v57  ;;  %v3451_v57 = vpack.c.bf16 %v1914_v3, %v1910_v51  ;;  %v2102_v3 = vld [vmem:[#allocation15 + $0xd0] sm:$0xff] }
 0x3bf   : >> { %3376 = vmatpush1.bf16.msra.mxu0 %v3375_v55  ;;  %v2085_v55 = vld [vmem:[#allocation15 + $0x48] sm:$0xff] }
 0x3c0   : >> { %3378 = vmatprep.subr.bf16.mxu0 %v3377_v61  ;;  %v3517_v61 = vpack.c.bf16 %v2083_v54, %v2079_v6  ;;  %v3457_v1 = vpack.c.bf16 %v2089_v56, %v2085_v55  ;;  %v2112_v6 = vld [vmem:[#allocation15 + $0x120] sm:$0xff]  ;;  %v2111_v54 = vld [vmem:[#allocation15 + $0x118] sm:$0xff]  ;;  %v2117_v56 = vld [vmem:[#allocation15 + $0x148] sm:$0xff] }
 0x3c1   : >> { %3440 = vmatpush1.bf16.msra.mxu1 %v3439_v11  ;;  %v2091_v11 = vld [vmem:[#allocation15 + $0x78] sm:$0xff] }
 0x3c2   : >> { %3442 = vmatprep.subr.bf16.mxu1 %v3441_v4  ;;  %v3519_v4 = vpack.c.bf16 %v2082_v63, %v2078_v62  ;;  %v2115_v55 = vld [vmem:[#allocation15 + $0x138] sm:$0xff]  ;;  %v2110_v63 = vld [vmem:[#allocation15 + $0x110] sm:$0xff] }
 0x3c3   : >> { %3380 = vmatpush1.bf16.msra.mxu0 %v3379_v12  ;;  %v2093_v12 = vld [vmem:[#allocation15 + $0x88] sm:$0xff]  ;;  %v3533_v62 = vpack.c.bf16 %v2115_v55, %v2111_v54  ;;  %v2144_v54 = vld [vmem:[#allocation15 + $0x220] sm:$0xff]  ;;  %v2143_v55 = vld [vmem:[#allocation15 + $0x218] sm:$0xff] }
 0x3c4   : >> { %3382 = vmatprep.subr.bf16.mxu0 %v3381_v16  ;;  %v3521_v16 = vpack.c.bf16 %v2091_v11, %v2087_v10  ;;  %v3461_v31 = vpack.c.bf16 %v2097_v13, %v2093_v12  ;;  %v2120_v10 = vld [vmem:[#allocation15 + $0x160] sm:$0xff]  ;;  %v2119_v11 = vld [vmem:[#allocation15 + $0x158] sm:$0xff]  ;;  %v2125_v13 = vld [vmem:[#allocation15 + $0x188] sm:$0xff] }
 0x3c5   : >> { %3444 = vmatpush1.bf16.msra.mxu1 %v3443_v34  ;;  %v2099_v34 = vld [vmem:[#allocation15 + $0xb8] sm:$0xff] }
 0x3c6   : >> { %3446 = vmatprep.subr.bf16.mxu1 %v3445_v37  ;;  %v3523_v37 = vpack.c.bf16 %v2090_v30, %v2086_v29  ;;  %v2123_v12 = vld [vmem:[#allocation15 + $0x178] sm:$0xff]  ;;  %v2118_v30 = vld [vmem:[#allocation15 + $0x150] sm:$0xff] }
 0x3c7   : >> { %3384 = vmatpush1.bf16.msra.mxu0 %v3383_v36  ;;  %v2101_v36 = vld [vmem:[#allocation15 + $0xc8] sm:$0xff]  ;;  %v3537_v29 = vpack.c.bf16 %v2123_v12, %v2119_v11  ;;  %v2152_v11 = vld [vmem:[#allocation15 + $0x260] sm:$0xff]  ;;  %v2151_v12 = vld [vmem:[#allocation15 + $0x258] sm:$0xff] }
 0x3c8   : >> { %3386 = vmatprep.subr.bf16.mxu0 %v3385_v41  ;;  %v3525_v41 = vpack.c.bf16 %v2099_v34, %v2095_v33  ;;  %v3465_v44 = vpack.c.bf16 %v2105_v5, %v2101_v36  ;;  %v2128_v33 = vld [vmem:[#allocation15 + $0x1a0] sm:$0xff]  ;;  %v2127_v34 = vld [vmem:[#allocation15 + $0x198] sm:$0xff]  ;;  %v2133_v5 = vld [vmem:[#allocation15 + $0x1c8] sm:$0xff] }
 0x3c9   : >> { %3448 = vmatpush1.bf16.msra.mxu1 %v3447_v47  ;;  %v2107_v47 = vld [vmem:[#allocation15 + $0xf8] sm:$0xff] }
 0x3ca   : >> { %3450 = vmatprep.subr.bf16.mxu1 %v3449_v8  ;;  %v3467_v8 = vpack.c.bf16 %v2104_v45, %v2100_v39  ;;  %v3529_v51 = vpack.c.bf16 %v2107_v47, %v2103_v46  ;;  %v2131_v36 = vld [vmem:[#allocation15 + $0x1b8] sm:$0xff]  ;;  %v2136_v46 = vld [vmem:[#allocation15 + $0x1e0] sm:$0xff] }
 0x3cb   : >> { %3388 = vmatpush1.bf16.msra.mxu0 %v3387_v49  ;;  %v2109_v49 = vld [vmem:[#allocation15 + $0x108] sm:$0xff]  ;;  %v3541_v42 = vpack.c.bf16 %v2131_v36, %v2127_v34  ;;  %v2135_v47 = vld [vmem:[#allocation15 + $0x1d8] sm:$0xff]  ;;  %v2160_v34 = vld [vmem:[#allocation15 + $0x2a0] sm:$0xff] }
 0x3cc   : >> { %3454 = vmatprep.subr.bf16.mxu0 %v3453_v52  ;;  %v2106_v52 = vld [vmem:[#allocation15 + $0xf0] sm:$0xff]  ;;  %v2159_v36 = vld [vmem:[#allocation15 + $0x298] sm:$0xff] }
 0x3cd   : >> { %3452 = vmatpush1.bf16.msra.mxu1 %v3451_v57  ;;  %v2121_v57 = vld [vmem:[#allocation15 + $0x168] sm:$0xff] }
 0x3ce   : >> { %1981 = vmatmul.mubr.f32.vlgmr.msra.gmra.mrb[2].mxu0 %v4249_v59  ;;  %3518 = vmatprep.subr.bf16.mxu1 %v3517_v61  ;;  %v2116_v61 = vld [vmem:[#allocation15 + $0x140] sm:$0xff]  ;;  %v3473_v9 = vpack.c.bf16 %v2121_v57, %v2117_v56  ;;  %v2147_v56 = vld [vmem:[#allocation15 + $0x238] sm:$0xff]  ;;  %v2149_v57 = vld [vmem:[#allocation15 + $0x248] sm:$0xff] }
 0x3cf   : >> { %3456 = vmatpush1.bf16.msra.mxu0 %v3455_v7  ;;  %2268 = vmatprep.mubr.f32.mxu0 %v4241_v0  ;;  %v3531_v7 = vpack.c.bf16 %v2106_v52, %v2102_v3  ;;  %v3475_v15 = vpack.c.bf16 %v2120_v10, %v2116_v61  ;;  %v2134_v52 = vld [vmem:[#allocation15 + $0x1d0] sm:$0xff] }
 0x3d0   : >> { %3458 = vmatprep.subr.bf16.mxu0 %v3457_v1  ;;  %2052 = vmatmul.mubr.f32.vlgmr.msra.gmra.mrb[2].mxu1 %v4249_v59  ;;  %v2113_v59 = vld [vmem:[#allocation15 + $0x128] sm:$0xff]  ;;  %v2114_v1 = vld [vmem:[#allocation15 + $0x130] sm:$0xff] }
 0x3d1   : >> { %3520 = vmatpush1.bf16.msra.mxu1 %v3519_v4  ;;  %2339 = vmatprep.mubr.f32.mxu1 %v4241_v0  ;;  %v2108_v0 = vld [vmem:[#allocation15 + $0x100] sm:$0xff]  ;;  %v3469_v53 = vpack.c.bf16 %v2113_v59, %v2109_v49  ;;  %v2129_v4 = vld [vmem:[#allocation15 + $0x1a8] sm:$0xff]  ;;  %v2139_v49 = vld [vmem:[#allocation15 + $0x1f8] sm:$0xff] }
 0x3d2   : >> { %3522 = vmatprep.subr.bf16.mxu1 %v3521_v16  ;;  %v3471_v60 = vpack.c.bf16 %v2112_v6, %v2108_v0  ;;  %v2124_v16 = vld [vmem:[#allocation15 + $0x180] sm:$0xff]  ;;  %v3477_v32 = vpack.c.bf16 %v2129_v4, %v2125_v13  ;;  %v2141_v59 = vld [vmem:[#allocation15 + $0x208] sm:$0xff]  ;;  %v3545_v3 = vpack.c.bf16 %v2139_v49, %v2135_v47  ;;  %v2155_v13 = vld [vmem:[#allocation15 + $0x278] sm:$0xff] }
 0x3d3   : >> { %3460 = vmatpush1.bf16.msra.mxu0 %v3459_v14  ;;  %v3535_v14 = vpack.c.bf16 %v2114_v1, %v2110_v63  ;;  %v3479_v39 = vpack.c.bf16 %v2128_v33, %v2124_v16  ;;  %v3549_v63 = vpack.c.bf16 %v2147_v56, %v2143_v55  ;;  %v2142_v1 = vld [vmem:[#allocation15 + $0x210] sm:$0xff]  ;;  %v2157_v4 = vld [vmem:[#allocation15 + $0x288] sm:$0xff]  ;;  %v2168_v47 = vld [vmem:[#allocation15 + $0x2e0] sm:$0xff] }
 0x3d4   : >> { %3462 = vmatprep.subr.bf16.mxu0 %v3461_v31  ;;  %v2122_v31 = vld [vmem:[#allocation15 + $0x170] sm:$0xff]  ;;  %v2167_v49 = vld [vmem:[#allocation15 + $0x2d8] sm:$0xff]  ;;  %v2176_v55 = vld [vmem:[#allocation15 + $0x320] sm:$0xff] }
 0x3d5   : >> { %3524 = vmatpush1.bf16.msra.mxu1 %v3523_v37  ;;  %v2137_v37 = vld [vmem:[#allocation15 + $0x1e8] sm:$0xff]  ;;  %v2175_v56 = vld [vmem:[#allocation15 + $0x318] sm:$0xff] }
 0x3d6   : >> { %3526 = vmatprep.subr.bf16.mxu1 %v3525_v41  ;;  %v2132_v41 = vld [vmem:[#allocation15 + $0x1c0] sm:$0xff]  ;;  %v3481_v45 = vpack.c.bf16 %v2137_v37, %v2133_v5  ;;  %v2163_v5 = vld [vmem:[#allocation15 + $0x2b8] sm:$0xff]  ;;  %v2165_v37 = vld [vmem:[#allocation15 + $0x2c8] sm:$0xff] }
 0x3d7   : >> { %3464 = vmatpush1.bf16.msra.mxu0 %v3463_v38  ;;  %v3539_v38 = vpack.c.bf16 %v2122_v31, %v2118_v30  ;;  %v3483_v0 = vpack.c.bf16 %v2136_v46, %v2132_v41  ;;  %v3553_v30 = vpack.c.bf16 %v2155_v13, %v2151_v12  ;;  %v2150_v31 = vld [vmem:[#allocation15 + $0x250] sm:$0xff]  ;;  %v2184_v12 = vld [vmem:[#allocation15 + $0x360] sm:$0xff]  ;;  %v2183_v13 = vld [vmem:[#allocation15 + $0x358] sm:$0xff] }
 0x3d8   : >> { %3466 = vmatprep.subr.bf16.mxu0 %v3465_v44  ;;  %v2130_v44 = vld [vmem:[#allocation15 + $0x1b0] sm:$0xff] }
 0x3d9   : >> { %3528 = vmatpush1.bf16.msra.mxu1 %v3527_v50  ;;  %v2145_v50 = vld [vmem:[#allocation15 + $0x228] sm:$0xff] }
 0x3da   : >> { %3530 = vmatprep.subr.bf16.mxu1 %v3529_v51  ;;  %v2140_v51 = vld [vmem:[#allocation15 + $0x200] sm:$0xff]  ;;  %v3485_v6 = vpack.c.bf16 %v2145_v50, %v2141_v59  ;;  %v2171_v59 = vld [vmem:[#allocation15 + $0x2f8] sm:$0xff]  ;;  %v2173_v50 = vld [vmem:[#allocation15 + $0x308] sm:$0xff] }
 0x3db   : >> { %3468 = vmatpush1.bf16.msra.mxu0 %v3467_v8  ;;  %v3543_v8 = vpack.c.bf16 %v2130_v44, %v2126_v43  ;;  %v3487_v61 = vpack.c.bf16 %v2144_v54, %v2140_v51  ;;  %v3557_v43 = vpack.c.bf16 %v2163_v5, %v2159_v36  ;;  %v2158_v44 = vld [vmem:[#allocation15 + $0x290] sm:$0xff]  ;;  %v2192_v36 = vld [vmem:[#allocation15 + $0x3a0] sm:$0xff]  ;;  %v2191_v5 = vld [vmem:[#allocation15 + $0x398] sm:$0xff] }
 0x3dc   : >> { %3470 = vmatprep.subr.bf16.mxu0 %v3469_v53  ;;  %v2138_v53 = vld [vmem:[#allocation15 + $0x1f0] sm:$0xff] }
 0x3dd   : >> { %3532 = vmatpush1.bf16.msra.mxu1 %v3531_v7  ;;  %v2153_v7 = vld [vmem:[#allocation15 + $0x268] sm:$0xff] }
 0x3de   : >> { %3534 = vmatprep.subr.bf16.mxu1 %v3533_v62  ;;  %v2148_v62 = vld [vmem:[#allocation15 + $0x240] sm:$0xff]  ;;  %v3489_v10 = vpack.c.bf16 %v2153_v7, %v2149_v57  ;;  %v2179_v57 = vld [vmem:[#allocation15 + $0x338] sm:$0xff]  ;;  %v2181_v7 = vld [vmem:[#allocation15 + $0x348] sm:$0xff] }
 0x3df   : >> { %3472 = vmatpush1.bf16.msra.mxu0 %v3471_v60  ;;  %v3547_v60 = vpack.c.bf16 %v2138_v53, %v2134_v52  ;;  %v3491_v16 = vpack.c.bf16 %v2152_v11, %v2148_v62  ;;  %v3561_v52 = vpack.c.bf16 %v2171_v59, %v2167_v49  ;;  %v2166_v53 = vld [vmem:[#allocation15 + $0x2d0] sm:$0xff]  ;;  %v2200_v49 = vld [vmem:[#allocation15 + $0x3e0] sm:$0xff]  ;;  %v2199_v59 = vld [vmem:[#allocation15 + $0x3d8] sm:$0xff] }
 0x3e0   : >> { %3474 = vmatprep.subr.bf16.mxu0 %v3473_v9  ;;  %v2146_v9 = vld [vmem:[#allocation15 + $0x230] sm:$0xff] }
 0x3e1   : >> { %3536 = vmatpush1.bf16.msra.mxu1 %v3535_v14  ;;  %v2161_v14 = vld [vmem:[#allocation15 + $0x2a8] sm:$0xff] }
 0x3e2   : >> { %3538 = vmatprep.subr.bf16.mxu1 %v3537_v29  ;;  %v2156_v29 = vld [vmem:[#allocation15 + $0x280] sm:$0xff]  ;;  %v3493_v33 = vpack.c.bf16 %v2161_v14, %v2157_v4  ;;  %v2187_v4 = vld [vmem:[#allocation15 + $0x378] sm:$0xff]  ;;  %v2189_v14 = vld [vmem:[#allocation15 + $0x388] sm:$0xff] }
 0x3e3   : >> { %3476 = vmatpush1.bf16.msra.mxu0 %v3475_v15  ;;  %v3551_v15 = vpack.c.bf16 %v2146_v9, %v2142_v1  ;;  %v3495_v41 = vpack.c.bf16 %v2160_v34, %v2156_v29  ;;  %v3565_v1 = vpack.c.bf16 %v2179_v57, %v2175_v56  ;;  %v2174_v9 = vld [vmem:[#allocation15 + $0x310] sm:$0xff] }
 0x3e4   : >> { %3478 = vmatprep.subr.bf16.mxu0 %v3477_v32  ;;  %v2154_v32 = vld [vmem:[#allocation15 + $0x270] sm:$0xff] }
 0x3e5   : >> { %3540 = vmatpush1.bf16.msra.mxu1 %v3539_v38  ;;  %v2169_v38 = vld [vmem:[#allocation15 + $0x2e8] sm:$0xff] }
 0x3e6   : >> { %3542 = vmatprep.subr.bf16.mxu1 %v3541_v42  ;;  %v2164_v42 = vld [vmem:[#allocation15 + $0x2c0] sm:$0xff]  ;;  %v3497_v46 = vpack.c.bf16 %v2169_v38, %v2165_v37  ;;  %v2195_v37 = vld [vmem:[#allocation15 + $0x3b8] sm:$0xff]  ;;  %v2197_v38 = vld [vmem:[#allocation15 + $0x3c8] sm:$0xff] }
 0x3e7   : >> { %3480 = vmatpush1.bf16.msra.mxu0 %v3479_v39  ;;  %v3555_v39 = vpack.c.bf16 %v2154_v32, %v2150_v31  ;;  %v3499_v51 = vpack.c.bf16 %v2168_v47, %v2164_v42  ;;  %v3569_v31 = vpack.c.bf16 %v2187_v4, %v2183_v13  ;;  %v2182_v32 = vld [vmem:[#allocation15 + $0x350] sm:$0xff]  ;;  %v2368_v4 = vld [vmem:[#allocation17 + $0x20] sm:$0xff] }
 0x3e8   : >> { %3482 = vmatprep.subr.bf16.mxu0 %v3481_v45  ;;  %v2162_v45 = vld [vmem:[#allocation15 + $0x2b0] sm:$0xff] }
 0x3e9   : >> { %3544 = vmatpush1.bf16.msra.mxu1 %v3543_v8  ;;  %v2177_v8 = vld [vmem:[#allocation15 + $0x328] sm:$0xff] }
 0x3ea   : >> { %3546 = vmatprep.subr.bf16.mxu1 %v3545_v3  ;;  %v2172_v3 = vld [vmem:[#allocation15 + $0x300] sm:$0xff]  ;;  %v3501_v54 = vpack.c.bf16 %v2177_v8, %v2173_v50  ;;  %v2203_v50 = vld [vmem:[#allocation15 + $0x3f8] sm:$0xff] }
 0x3eb   : >> { %3484 = vmatpush1.bf16.msra.mxu0 %v3483_v0  ;;  %v3559_v0 = vpack.c.bf16 %v2162_v45, %v2158_v44  ;;  %v3503_v62 = vpack.c.bf16 %v2176_v55, %v2172_v3  ;;  %v3573_v44 = vpack.c.bf16 %v2195_v37, %v2191_v5  ;;  %v2190_v45 = vld [vmem:[#allocation15 + $0x390] sm:$0xff] }
 0x3ec   : >> { %3486 = vmatprep.subr.bf16.mxu0 %v3485_v6  ;;  %v2170_v6 = vld [vmem:[#allocation15 + $0x2f0] sm:$0xff] }
 0x3ed   : >> { %3548 = vmatpush1.bf16.msra.mxu1 %v3547_v60  ;;  %v2185_v60 = vld [vmem:[#allocation15 + $0x368] sm:$0xff]  ;;  %v2198_v3 = vld [vmem:[#allocation15 + $0x3d0] sm:$0xff] }
 0x3ee   : >> { %3550 = vmatprep.subr.bf16.mxu1 %v3549_v63  ;;  %v2180_v63 = vld [vmem:[#allocation15 + $0x340] sm:$0xff]  ;;  %v3505_v11 = vpack.c.bf16 %v2185_v60, %v2181_v7 }
 0x3ef   : >> { %3488 = vmatpush1.bf16.msra.mxu0 %v3487_v61  ;;  %v3563_v61 = vpack.c.bf16 %v2170_v6, %v2166_v53  ;;  %v3507_v29 = vpack.c.bf16 %v2184_v12, %v2180_v63  ;;  %v2364_v63 = vld [vmem:[#allocation17] sm:$0xff] }
 0x3f0   : >> { %3490 = vmatprep.subr.bf16.mxu0 %v3489_v10  ;;  %v2178_v10 = vld [vmem:[#allocation15 + $0x330] sm:$0xff] }
 0x3f1   : >> { %3552 = vmatpush1.bf16.msra.mxu1 %v3551_v15  ;;  %v2193_v15 = vld [vmem:[#allocation15 + $0x3a8] sm:$0xff] }
 0x3f2   : >> { %3554 = vmatprep.subr.bf16.mxu1 %v3553_v30  ;;  %v2188_v30 = vld [vmem:[#allocation15 + $0x380] sm:$0xff]  ;;  %v3509_v34 = vpack.c.bf16 %v2193_v15, %v2189_v14  ;;  %v2369_v14 = vld [vmem:[#allocation17 + $0x28] sm:$0xff] }
 0x3f3   : >> { %3492 = vmatpush1.bf16.msra.mxu0 %v3491_v16  ;;  %v3567_v16 = vpack.c.bf16 %v2178_v10, %v2174_v9  ;;  %v3511_v42 = vpack.c.bf16 %v2192_v36, %v2188_v30  ;;  %v4268_v10 = vmov 0.0|0.0  }
 0x3f4   : >> { %3494 = vmatprep.subr.bf16.mxu0 %v3493_v33  ;;  %v2186_v33 = vld [vmem:[#allocation15 + $0x370] sm:$0xff] }
 0x3f5   : >> { %3556 = vmatpush1.bf16.msra.mxu1 %v3555_v39  ;;  %v2201_v39 = vld [vmem:[#allocation15 + $0x3e8] sm:$0xff] }
 0x3f6   : >> { %3558 = vmatprep.subr.bf16.mxu1 %v3557_v43  ;;  %v2196_v43 = vld [vmem:[#allocation15 + $0x3c0] sm:$0xff]  ;;  %v3513_v47 = vpack.c.bf16 %v2201_v39, %v2197_v38 }
 0x3f7   : >> { %3496 = vmatpush1.bf16.msra.mxu0 %v3495_v41  ;;  %v3571_v41 = vpack.c.bf16 %v2186_v33, %v2182_v32  ;;  %v2370_v32 = vld [vmem:[#allocation17 + $0x30] sm:$0xff]  ;;  %v2371_v33 = vld [vmem:[#allocation17 + $0x38] sm:$0xff] }
 0x3f8   : >> { %3498 = vmatprep.subr.bf16.mxu0 %v3497_v46  ;;  %v2194_v46 = vld [vmem:[#allocation15 + $0x3b0] sm:$0xff]  ;;  %v3591_v5 = vpack.c.bf16 %v2371_v33, %v2370_v32 }
 0x3f9   : >> { %3560 = vmatpush1.bf16.msra.mxu1 %v3559_v0  ;;  %v3575_v8 = vpack.c.bf16 %v2194_v46, %v2190_v45  ;;  %v3515_v0 = vpack.c.bf16 %v2200_v49, %v2196_v43  ;;  %v2374_v46 = vld [vmem:[#allocation17 + $0x50] sm:$0xff] }
 0x3fa   : >> { %3562 = vmatprep.subr.bf16.mxu1 %v3561_v52  ;;  %v2202_v52 = vld [vmem:[#allocation15 + $0x3f0] sm:$0xff] }
 0x3fb   : >> { %3500 = vmatpush1.bf16.msra.mxu0 %v3499_v51  ;;  %v3577_v51 = vpack.c.bf16 %v2203_v50, %v2199_v59  ;;  %v3579_v53 = vpack.c.bf16 %v2202_v52, %v2198_v3  ;;  %v2376_v50 = vld [vmem:[#allocation17 + $0x60] sm:$0xff]  ;;  %v2378_v3 = vld [vmem:[#allocation17 + $0x70] sm:$0xff]  ;;  %v2379_v52 = vld [vmem:[#allocation17 + $0x78] sm:$0xff] }
 0x3fc   : >> { %3502 = vmatprep.subr.bf16.mxu0 %v3501_v54 }
 0x3fd   : >> { %3564 = vmatpush1.bf16.msra.mxu1 %v3563_v61 }
 0x3fe   : >> { %3566 = vmatprep.subr.bf16.mxu1 %v3565_v1  ;;  %v2365_v1 = vld [vmem:[#allocation17 + $0x8] sm:$0xff] }
 0x3ff   : >> { %3504 = vmatpush1.bf16.msra.mxu0 %v3503_v62  ;;  %v3582_v9 = vpack.c.bf16 %v2365_v1, %v2364_v63 }
 0x400   : >> { %3506 = vmatprep.subr.bf16.mxu0 %v3505_v11  ;;  %v2367_v11 = vld [vmem:[#allocation17 + $0x18] sm:$0xff] }
 0x401   : >> { %3568 = vmatpush1.bf16.msra.mxu1 %v3567_v16  ;;  %v3588_v16 = vpack.c.bf16 %v2369_v14, %v2368_v4 }
 0x402   : >> { %3570 = vmatprep.subr.bf16.mxu1 %v3569_v31 }
 0x403   : >> { %3508 = vmatpush1.bf16.msra.mxu0 %v3507_v29 }
 0x404   : >> { %3510 = vmatprep.subr.bf16.mxu0 %v3509_v34 }
 0x405   : >> { %3572 = vmatpush1.bf16.msra.mxu1 %v3571_v41  ;;  %v2372_v41 = vld [vmem:[#allocation17 + $0x40] sm:$0xff] }
 0x406   : >> { %3574 = vmatprep.subr.bf16.mxu1 %v3573_v44 }
 0x407   : >> { %3512 = vmatpush1.bf16.msra.mxu0 %v3511_v42  ;;  %v2373_v42 = vld [vmem:[#allocation17 + $0x48] sm:$0xff] }
 0x408   : >> { %3514 = vmatprep.subr.bf16.mxu0 %v3513_v47  ;;  %v3594_v44 = vpack.c.bf16 %v2373_v42, %v2372_v41  ;;  %v2375_v47 = vld [vmem:[#allocation17 + $0x58] sm:$0xff] }
 0x409   : >> { %3576 = vmatpush1.bf16.msra.mxu1 %v3575_v8  ;;  %v3597_v49 = vpack.c.bf16 %v2375_v47, %v2374_v46  ;;  %v2377_v8 = vld [vmem:[#allocation17 + $0x68] sm:$0xff] }
 0x40a   : >> { %3578 = vmatprep.subr.bf16.mxu1 %v3577_v51 }
 0x40b   : >> { %3516 = vmatpush1.bf16.msra.mxu0 %v3515_v0  ;;  %v3600_v0 = vpack.c.bf16 %v2377_v8, %v2376_v50 }
 0x40c   : >> { %3581 = vmatprep.subr.bf16.mxu0 %v4268_v10 }
 0x40d   : >> { %3580 = vmatpush1.bf16.msra.mxu1 %v3579_v53  ;;  %v3603_v53 = vpack.c.bf16 %v2379_v52, %v2378_v3 }
 0x40e   : >> { %2269 = vmatmul.mubr.f32.vlgmr.msra.gmra.mrb[4].mxu0 %v4245_v40 }
 0x40f   : >> { %3583 = vmatpush3.bf16.msra.mxu0 %v3582_v9 }
 0x410   : >> { %2340 = vmatmul.mubr.f32.vlgmr.msra.gmra.mrb[4].mxu1 %v4245_v40  ;;  %3584 = vmatprep.subr.bf16.mxu0 %v4268_v10  ;;  %v2366_v40 = vld [vmem:[#allocation17 + $0x10] sm:$0xff] }
 0x411   : >> { %v3585_v13 = vpack.c.bf16 %v2367_v11, %v2366_v40 }
 0x413   : >> { %3586 = vmatpush3.bf16.msra.mxu0 %v3585_v13 }
 0x414   : >> { %3587 = vmatprep.subr.bf16.mxu0 %v4268_v10 }
 0x417   : >> { %3589 = vmatpush3.bf16.msra.mxu0 %v3588_v16 }
 0x418   : >> { %3590 = vmatprep.subr.bf16.mxu0 %v4268_v10 }
 0x41b   : >> { %3592 = vmatpush3.bf16.msra.mxu0 %v3591_v5 }
 0x41c   : >> { %3593 = vmatprep.subr.bf16.mxu0 %v4268_v10 }
 0x41f   : >> { %3595 = vmatpush3.bf16.msra.mxu0 %v3594_v44 }
 0x420   : >> { %3596 = vmatprep.subr.bf16.mxu0 %v4268_v10 }
 0x423   : >> { %3598 = vmatpush3.bf16.msra.mxu0 %v3597_v49 }
 0x424   : >> { %3599 = vmatprep.subr.bf16.mxu0 %v4268_v10 }
 0x427   : >> { %3601 = vmatpush3.bf16.msra.mxu0 %v3600_v0 }
 0x428   : >> { %3602 = vmatprep.subr.bf16.mxu0 %v4268_v10 }
 0x42b   : >> { %3604 = vmatpush3.bf16.msra.mxu0 %v3603_v53 }
 0x461   : >> { %v1694_v6 = vpop.f32.mrb[0].mxu0 }
 0x462   : >> { %v1695_v54 = vadd.f32 %v1694_v6, %v4601_v17  ;;  %v1696_v55 = vpop.f32.mrb[1].mxu0 }
 0x463   : >> { %v1697_v56 = vadd.f32 %v1696_v55, %v4603_v18  ;;  %v1765_v7 = vpop.f32.mrb[0].mxu1  ;;  %v4270_v55 = vmov 0.0  }
 0x464   : >> { %v1770_v57 = vmul.f32 0.5, %v1695_v54  ;;  %v1766_v61 = vadd.f32 %v1765_v7, %v4605_v19  ;;  %v1767_v62 = vpop.f32.mrb[1].mxu1  ;;  %2786 = vmatprep.mubr.msk.f32.mxu0 %vm4269_vm1, %v4270_v55 }
 0x465   : >> { %v1774_v60 = vmul.f32 0.5, %v1697_v56  ;;  %v1768_v12 = vadd.f32 %v1767_v62, %v4607_v20 }
 0x466   : >> { %3871 = vtanh.f32 %v1770_v57 }
 0x467   : >> { %3873 = vtanh.f32 %v1774_v60  ;;  %v1779_v15 = vmul.f32 0.5, %v1768_v12 }
 0x468   : >> { %3875 = vtanh.f32 %v1766_v61 }
 0x469   : >> { %3877 = vtanh.f32 %v1779_v15 }
 0x470   : >> { %v3872_v29 = vpop.eup %3871 }
 0x471   : >> { %v3874_v30 = vpop.eup %3873  ;;  %v1772_v31 = vmul.f32 0.5, %v3872_v29 }
 0x472   : >> { %v3876_v34 = vpop.eup %3875  ;;  %v1776_v36 = vmul.f32 0.5, %v3874_v30 }
 0x473   : >> { %v1773_v37 = vadd.f32 0.5, %v1772_v31  ;;  %v3878_v59 = vpop.eup %3877 }
 0x474   : >> { %v1777_v38 = vadd.f32 0.5, %v1776_v36  ;;  %v1781_v51 = vmul.f32 0.5, %v3878_v59 }
 0x475   : >> { %v1784_v39 = vmul.f32 %v3876_v34, %v1773_v37 }
 0x476   : >> { %v1783_v43 = vmul.f32 %v4237_v48, %v1777_v38 }
 0x478   : >> { %v4774_v48 = vadd.f32 %v1784_v39, %v1783_v43  }
 0x47a   : >> { %v4916_v45 = vmov %v4774_v48  ;;  %v1782_v48 = vadd.f32 0.5, %v1781_v51 }
 0x47b   : >> { %3879 = vtanh.f32 %v4916_v45  ;;  %2456 = vst [vmem:[#allocation5] sm:$0xff] (%p1489_p10), %v4916_v45 }
 0x485   : >> { %v3880_v6 = vpop.eup %3879 }
 0x486   : >> { %v4777_v59 = vmul.f32 %v3880_v6, %v1782_v48  }
 0x488   : >> { %v4917_v54 = vmov %v4777_v59 }
 0x489   : > { %2453 = vst [vmem:[#allocation2] sm:$0xff] (%p1489_p10), %v4917_v54 }
 0x4a1   : >> { %v1982_v56 = vpop.f32.mrb[2].mxu0 }
 0x4a2   : >> { %v1983_v57 = vadd.f32 %v1982_v56, %v4609_v21  ;;  %v1984_v7 = vpop.f32.mrb[3].mxu0 }
 0x4a3   : >> { %v1985_v60 = vadd.f32 %v1984_v7, %v4611_v22  ;;  %v2053_v62 = vpop.f32.mrb[2].mxu1 }
 0x4a4   : >> { %v2058_v61 = vmul.f32 0.5, %v1983_v57  ;;  %v2054_v1 = vadd.f32 %v2053_v62, %v4613_v23  ;;  %v2055_v9 = vpop.f32.mrb[3].mxu1 }
 0x4a5   : >> { %v2062_v63 = vmul.f32 0.5, %v1985_v60  ;;  %v2056_v10 = vadd.f32 %v2055_v9, %v4615_v24 }
 0x4a6   : >> { %3881 = vtanh.f32 %v2058_v61 }
 0x4a7   : >> { %3883 = vtanh.f32 %v2062_v63  ;;  %v2067_v40 = vmul.f32 0.5, %v2056_v10 }
 0x4a8   : >> { %3885 = vtanh.f32 %v2054_v1 }
 0x4a9   : >> { %3887 = vtanh.f32 %v2067_v40 }
 0x4b0   : >> { %v3882_v11 = vpop.eup %3881 }
 0x4b1   : >> { %v3884_v12 = vpop.eup %3883  ;;  %v2060_v13 = vmul.f32 0.5, %v3882_v11 }
 0x4b2   : >> { %v3886_v4 = vpop.eup %3885  ;;  %v2064_v14 = vmul.f32 0.5, %v3884_v12 }
 0x4b3   : >> { %v2061_v15 = vadd.f32 0.5, %v2060_v13  ;;  %v3888_v32 = vpop.eup %3887 }
 0x4b4   : >> { %v2065_v16 = vadd.f32 0.5, %v2064_v14  ;;  %v2069_v33 = vmul.f32 0.5, %v3888_v32 }
 0x4b5   : >> { %v2072_v29 = vmul.f32 %v3886_v4, %v2061_v15 }
 0x4b6   : >> { %v2071_v30 = vmul.f32 %v4233_v35, %v2065_v16  ;;  %v2070_v34 = vadd.f32 0.5, %v2069_v33 }
 0x4b8   : >> { %v2073_v31 = vadd.f32 %v2072_v29, %v2071_v30  }
 0x4ba   : >> { %3889 = vtanh.f32 %v2073_v31  ;;  %2457 = vst [vmem:[#allocation6] sm:$0xff] (%p1489_p10), %v2073_v31 }
 0x4c4   : >> { %v3890_v36 = vpop.eup %3889 }
 0x4c5   : >> { %v2075_v37 = vmul.f32 %v3890_v36, %v2070_v34  }
 0x4c7   : >> { %v4922_v40 = vmov %v2075_v37  ;;  %2454 = vst [vmem:[#allocation3] sm:$0xff] (%p1489_p10), %v2075_v37 }
 0x4e1   : >> { %v2270_v5 = vpop.f32.mrb[4].mxu0 }
 0x4e2   : >> { %v2271_v38 = vadd.f32 %v2270_v5, %v4617_v25  ;;  %v2272_v39 = vpop.f32.mrb[5].mxu0 }
 0x4e3   : >> { %v2273_v41 = vadd.f32 %v2272_v39, %v4619_v26  ;;  %v2341_v43 = vpop.f32.mrb[4].mxu1 }
 0x4e4   : >> { %v2346_v42 = vmul.f32 0.5, %v2271_v38  ;;  %v2342_v46 = vadd.f32 %v2341_v43, %v4621_v27  ;;  %v2343_v47 = vpop.f32.mrb[5].mxu1 }
 0x4e5   : >> { %v2350_v44 = vmul.f32 0.5, %v2273_v41  ;;  %v2344_v35 = vadd.f32 %v2343_v47, %v4623_v28 }
 0x4e6   : >> { %3891 = vtanh.f32 %v2346_v42 }
 0x4e7   : >> { %3893 = vtanh.f32 %v2350_v44  ;;  %v2355_v49 = vmul.f32 0.5, %v2344_v35  ;;  %v4919_v35 = vmov %v2073_v31 }
 0x4e8   : >> { %3895 = vtanh.f32 %v2342_v46 }
 0x4e9   : >> { %3897 = vtanh.f32 %v2355_v49 }
 0x4f0   : >> { %v3892_v59 = vpop.eup %3891 }
 0x4f1   : >> { %v3894_v50 = vpop.eup %3893  ;;  %v2348_v8 = vmul.f32 0.5, %v3892_v59  ;;  %v4923_v59 = vmov %v4917_v54 }
 0x4f2   : >> { %v3896_v0 = vpop.eup %3895  ;;  %v2352_v51 = vmul.f32 0.5, %v3894_v50 }
 0x4f3   : >> { %v2349_v3 = vadd.f32 0.5, %v2348_v8  ;;  %v3898_v55 = vpop.eup %3897 }
 0x4f4   : >> { %v2353_v52 = vadd.f32 0.5, %v2352_v51  ;;  %v2357_v56 = vmul.f32 0.5, %v3898_v55 }
 0x4f5   : >> { %v2360_v53 = vmul.f32 %v3896_v0, %v2349_v3 }
 0x4f6   : >> { %v2359_v48 = vmul.f32 %v4229_v58, %v2353_v52  ;;  %v2358_v57 = vadd.f32 0.5, %v2357_v56 }
 0x4f8   : >> { %v2361_v6 = vadd.f32 %v2360_v53, %v2359_v48   ;;  %v4920_v48 = vmov %v4916_v45 }
 0x4fa   : >> { %3899 = vtanh.f32 %v2361_v6  ;;  %v4918_v58 = vmov %v2361_v6  ;;  %2458 = vst [vmem:[#allocation7] sm:$0xff] (%p1489_p10), %v2361_v6 }
 0x504   : >> { %v3900_v7 = vpop.eup %3899 }
 0x505   : >> { %v2363_v60 = vmul.f32 %v3900_v7, %v2358_v57  }
 0x507   : >> { %2787 = vmatmul.mubr.f32.vlgmr.msra.gmra.mrb[6].mxu0 %v2363_v60  ;;  %v4921_v0 = vmov %v2363_v60  ;;  %2455 = vst [vmem:[#allocation4] sm:$0xff] (%p1489_p10), %v2363_v60 }
 0x5d7   : > { %1491 = sbr.rel (!%p1489_p10) target bundleno = 842 (0x34a), region = 149 }
 0x5da   : >> { %v2446_v61 = vpop.f32.mrb[6].mxu0 }
 0x5db   : >> { %v2447_v5 = vadd.f32 %v4590_v2, %v2446_v61   ;;  %v2788_v62 = vpop.f32.mrb[7].mxu0 }
 0x5dd   : >> { %2452 = vst [vmem:[%s2451_s17] sm:$0xff] %v2447_v5 }
 0x5de   : > { %4056 = shalt.err (!%p4053_p2)
}
 0x5df   : > { %s4057_s21 = scalar_lea.hbm %s4817_s26, 512  ;;  %s4061_s29 = scalar_lea.hbm %s4924_s15, 1024 }
 0x5e0   : > { %p4058_p12 = scmp.ne.s32.totalorder %s4817_s26, %s4057_s21  ;;  %p4062_p8 = scmp.lt.u32.totalorder %s4817_s26, %s4924_s15 }
 0x5e1   : > { %p4063_p6 = scmp.lt.u32.totalorder %s4061_s29, %s4057_s21  ;;  %p4065_p3 = scmp.lt.u32.totalorder %s4057_s21, %s4817_s26 }
 0x5e2   : > { %p4059_p1 = pnand %p4058_p12, %p4508_p5 }
 0x5e3   : > { %p4064_p10 = por %p4063_p6, %p4062_p8 }
 0x5e4   : > { %p4060_p11 = pneg %p4059_p1 }
 0x5e5   : > { %p4066_p7 = por %p4065_p3, %p4064_p10 }
 0x5e7   : > { %p4067_p9 = pnand %p4066_p7, %p4060_p11 }
 0x5e9   : > { %4070 = shalt.err (!%p4067_p9)
}
 0x5ea   : > { %s4272_s30 = smov 128   ;;  %s4273_s23 = smov 8  }
 0x5eb   : > { %3623 = dma.vmem_to_hbm [thread:$0]  (%p4508_p5), %s4820_s16, 512, %s4817_s26, %s2461_s18, %s4272_s30, %s4272_s30, %s4273_s23  }
 0x5ec PF: > { %s4925_s28 = sld [smem:[#allocation23_spill]]  ;;  %s4926_s9 = sld [smem:[#allocation24_spill]] }
 0x5ed   : > { %p4928_p4 = scmp.ge.s32.totalorder %s4193_s14, 2 }
 0x5f2   : > { %s2490_s7 = sand.u32 1, %s4925_s28   ;;  %p4927_p0 = scmp.ne.s32.totalorder %s4926_s9, 0 }
 0x5f3   : > { %s2491_s22 = scalar_lea.sflag [#allocation11], %s2490_s7 }
 0x5f4   : > { %p3643_p13 = pnand %p4928_p4, %p4927_p0 }
 0x5f6   : > { %4168 = dma.done.wait (!%p3643_p13), %s2491_s22, 512  }
 0x5f7   : > { %4170 = vsyncadd (!%p3643_p13), %s2491_s22, 4294966784  ;;  %s27_s14 = sadd.s32 1, %s4193_s14   ;;  %s4929_s30 = smov %s4177_s10 }
 0x5f8   : > { %p24_p2 = scmp.ge.s32.totalorder %s27_s14, 4   ;;  %s4930_s10 = smov %s4181_s11 }
 0x5f9   : > { %s4931_s11 = smov %s4517_s25  ;;  %s4932_s12 = smov %s4189_s13 }
 0x5fa   : > { %s4933_s13 = smov %s4935_s5  ;;  %26 = sbr.rel (!%p24_p2) target bundleno = 13 (0xd), region = 160 }
 0x601   :  { %2496 = vsyncpa [#allocation10], 1 }
 0x602   :  { %2498 = vsyncpa [#allocation10 + $0x1], 1 }
 0x603   :  { %2499 = vsyncpa [#allocation13], 1 }
 0x604   :  { %2500 = vsyncpa [#allocation16], 1 }
 0x605   :  { %2501 = vsyncpa [#allocation11], 1 }
 0x606   :  { %2503 = vsyncpa [#allocation11 + $0x1], 1 }

</bundles_post_ra>
